<compile_context>
chip_gen: v5e
topology: v5e:2x2
jax: 0.10.0
libtpu: 0.0.40
codegen_flags: <defaults>
</compile_context>

<pallas_src>
import numpy as np
import jax
import jax.numpy as jnp
from jax.experimental import pallas as pl
from jax.experimental.pallas import tpu as pltpu


def _round_up(x, m):
    return ((x + m - 1) // m) * m


def _pool_selectors(w, out_cols):
    """0/1 (w, out_cols) matrices implementing MaxPool2d((1,2)) as MXU matmuls."""
    assert w % 2 == 0, "MaxPool2d((1,2)) requires an even feature width"
    half = w // 2
    assert out_cols >= half
    e = np.zeros((w, out_cols), np.float32)
    o = np.zeros((w, out_cols), np.float32)
    e[np.arange(0, w, 2), np.arange(half)] = 1.0
    o[np.arange(1, w, 2), np.arange(half)] = 1.0
    return jnp.asarray(e), jnp.asarray(o)


def _make_fused_forward(T, D, h1, h2, out_dim, P):
    """Builds the single fused pallas_call implementing the whole forward pass."""
    assert D % 4 == 0 and out_dim == D // 4
    assert P >= out_dim and P % 128 == 0

    HALO_S = 8          # sublane-aligned top halo (interior store alignment)
    HALO_L = 128        # lane-aligned left halo  (interior store alignment)
    D2 = D // 2         # width after the first pool

    L0 = HALO_L + _round_up(D + 1, 128)      # conv1 / conv2 stage buffers
    L1 = HALO_L + _round_up(D2 + 1, 128)     # conv3 / conv4 stage buffers
    S = HALO_S + _round_up(T + 1, 8)         # sublanes of every padded buffer

    def conv3x3_relu(src, c_in, w, w_ref, b_ref, c_out):
        """3x3 'same' conv + bias + ReLU on padded scratch `src` (c_in, S, L).

        Interior lives at [HALO_S:HALO_S+T, HALO_L:HALO_L+w]; the halo strips
        are zeroed.  Loop order (ci, kh, kw) outer / co inner: each tap is
        loaded once and accumulated into c_out accumulators (VPU MACs).
        """
        accs = [jnp.zeros((T, w), jnp.float32) for _ in range(c_out)]
        for ci in range(c_in):
            for kh in range(3):
                for kw in range(3):
                    tap = src[ci,
                              HALO_S + kh - 1: HALO_S + kh - 1 + T,
                              HALO_L + kw - 1: HALO_L + kw - 1 + w]
                    for co in range(c_out):
                        wv = w_ref[((co * c_in + ci) * 3 + kh) * 3 + kw]
                        accs[co] = accs[co] + wv * tap
        return [jnp.maximum(a + b_ref[co], 0.0) for co, a in enumerate(accs)]

    def kernel(x_ref,
               w1_ref, b1_ref, w2_ref, b2_ref, w3_ref, b3_ref, w4_ref, b4_ref,
               pe1_ref, po1_ref, pe2_ref, po2_ref, wd_ref, bd_ref,
               o_ref,
               pad0, pad1, pad2, pad3, z_ref):

        # ---- Zero ONLY the halo strips (interiors are fully overwritten). ----
        def zero_halo(pad, n_ch, w, L):
            for c in range(n_ch):
                pad[c, 0:HALO_S, :] = jnp.zeros((HALO_S, L), jnp.float32)
                pad[c, HALO_S + T:S, :] = jnp.zeros((S - HALO_S - T, L), jnp.float32)
                pad[c, HALO_S:HALO_S + T, 0:HALO_L] = jnp.zeros((T, HALO_L), jnp.float32)
                pad[c, HALO_S:HALO_S + T, HALO_L + w:L] = (
                    jnp.zeros((T, L - HALO_L - w), jnp.float32))

        zero_halo(pad0, 1, D, L0)
        zero_halo(pad1, h1, D, L0)
        zero_halo(pad2, h1, D2, L1)
        zero_halo(pad3, h2, D2, L1)

        # In-kernel padding of the (T, D) input (aligned interior store).
        pad0[0, HALO_S:HALO_S + T, HALO_L:HALO_L + D] = x_ref[...]

        # conv1 + ReLU
        a1 = conv3x3_relu(pad0, 1, D, w1_ref, b1_ref, h1)
        for c in range(h1):
            pad1[c, HALO_S:HALO_S + T, HALO_L:HALO_L + D] = a1[c]

        # conv2 + ReLU, MaxPool(1,2) fused as TWO channel-batched MXU matmuls.
        a2 = conv3x3_relu(pad1, h1, D, w2_ref, b2_ref, h1)
        a2cat = jnp.concatenate(a2, axis=0)                       # (h1*T, D)
        p1 = jnp.maximum(
            jnp.dot(a2cat, pe1_ref[...], preferred_element_type=jnp.float32),
            jnp.dot(a2cat, po1_ref[...], preferred_element_type=jnp.float32))
        for c in range(h1):
            pad2[c, HALO_S:HALO_S + T, HALO_L:HALO_L + D2] = p1[c * T:(c + 1) * T, :]

        # conv3 + ReLU
        a3 = conv3x3_relu(pad2, h1, D2, w3_ref, b3_ref, h2)
        for c in range(h2):
            pad3[c, HALO_S:HALO_S + T, HALO_L:HALO_L + D2] = a3[c]

        # conv4 + ReLU + fused MaxPool(1,2) (channel-batched, lane-padded to P).
        a4 = conv3x3_relu(pad3, h2, D2, w4_ref, b4_ref, h2)
        a4cat = jnp.concatenate(a4, axis=0)                       # (h2*T, D2)
        z_ref[...] = jnp.maximum(
            jnp.dot(a4cat, pe2_ref[...], preferred_element_type=jnp.float32),
            jnp.dot(a4cat, po2_ref[...], preferred_element_type=jnp.float32))

        # Flatten + Linear, re-associated and selector-free:
        #   y[r] = bd + sum_k Z[r*h2+k] @ W_k
        # Row group k is gathered with a strided sublane read of the z scratch.
        acc = jnp.zeros((T, P), jnp.float32)
        for k in range(h2):
            zk = z_ref[pl.ds(k, T, stride=h2), :].astype(jnp.bfloat16)   # (T, P)
            acc = acc + jnp.dot(zk, wd_ref[k], preferred_element_type=jnp.float32)
        o_ref[...] = acc + bd_ref[...]          # lane-dense (T, P) store

    vmem = pl.BlockSpec(memory_space=pltpu.MemorySpace.VMEM)
    smem = pl.BlockSpec(memory_space=pltpu.MemorySpace.SMEM)
    in_specs = [vmem] + [smem] * 8 + [vmem] * 6

    # Explicit scoped-VMEM budget (v5e defaults to 16 MiB); clamped to be safe
    # on v7x's 64 MiB physical VMEM.
    scratch_bytes = 4 * (S * L0 * (1 + h1) + S * L1 * (h1 + h2) + h2 * T * P)
    io_bytes = 4 * (T * D + T * P + 2 * D * D2 + 2 * D2 * P + P) + 2 * h2 * P * P
    vmem_limit = int(min(max(2 * (scratch_bytes + io_bytes), 32 << 20), 64 << 20))

    return pl.pallas_call(
        kernel,
        out_shape=jax.ShapeDtypeStruct((T, P), jnp.float32),
        in_specs=in_specs,
        out_specs=vmem,
        scratch_shapes=[
            pltpu.VMEM((1, S, L0), jnp.float32),    # padded input
            pltpu.VMEM((h1, S, L0), jnp.float32),   # padded conv1 output
            pltpu.VMEM((h1, S, L1), jnp.float32),   # padded pool1 output
            pltpu.VMEM((h2, S, L1), jnp.float32),   # padded conv3 output
            pltpu.VMEM((h2 * T, P), jnp.float32),   # pooled conv4 (flatten source)
        ],
        compiler_params=pltpu.CompilerParams(vmem_limit_bytes=vmem_limit),
    )


class CNNClassifierPallas:
    def __init__(self, input_dim, key):
        assert input_dim % 64 == 0 and input_dim >= 64
        self.input_dim = input_dim
        self.hidden_dim_1 = h1 = input_dim // 64
        self.hidden_dim_2 = h2 = h1 * 2
        self.out_dim = out_dim = input_dim // 4
        self.P = P = _round_up(out_dim, 128)     # lane-dense output width

        ks = jax.random.split(key, 10)
        scale = 0.05

        def conv_params(k1, k2, cin, cout):
            w = scale * jax.random.normal(k1, (cout, cin, 3, 3), jnp.float32)
            b = scale * jax.random.normal(k2, (cout,), jnp.float32)
            return w, b

        # Raw parameters (kept for the pure-JAX reference).
        self.w1, self.b1 = conv_params(ks[0], ks[1], 1, h1)
        self.w2, self.b2 = conv_params(ks[2], ks[3], h1, h1)
        self.w3, self.b3 = conv_params(ks[4], ks[5], h1, h2)
        self.w4, self.b4 = conv_params(ks[6], ks[7], h2, h2)
        self.wd = scale * jax.random.normal(ks[8], (out_dim, h2 * out_dim), jnp.float32)
        self.bd = scale * jax.random.normal(ks[9], (out_dim,), jnp.float32)

        # ---- One-time parameter preprocessing (hoisted out of forward) ----
        self.w1_flat = self.w1.reshape(-1)
        self.w2_flat = self.w2.reshape(-1)
        self.w3_flat = self.w3.reshape(-1)
        self.w4_flat = self.w4.reshape(-1)

        # dense.weight.T split into h2 blocks, zero-padded to (P, P), bf16 for MXU.
        wdT = np.asarray(self.wd).T.reshape(h2, out_dim, out_dim)
        blocks = np.zeros((h2, P, P), np.float32)
        blocks[:, :out_dim, :out_dim] = wdT
        self.wd_blocks = jnp.asarray(blocks).astype(jnp.bfloat16)

        bd_pad = np.zeros((1, P), np.float32)
        bd_pad[0, :out_dim] = np.asarray(self.bd)
        self.bd_pad = jnp.asarray(bd_pad)

        # 0/1 selector matrices implementing MaxPool2d((1,2)) as MXU matmuls.
        self.pe1, self.po1 = _pool_selectors(input_dim, input_dim // 2)
        self.pe2, self.po2 = _pool_selectors(input_dim // 2, P)   # lane-padded

        self._fwd_cache = {}

    def _get_fwd(self, t):
        if t not in self._fwd_cache:
            self._fwd_cache[t] = _make_fused_forward(
                t, self.input_dim, self.hidden_dim_1, self.hidden_dim_2,
                self.out_dim, self.P)
        return self._fwd_cache[t]

    def forward(self, feature):
        """feature: (T, input_dim)  ->  (1, T, out_dim)  (matches PyTorch)."""
        t = feature.shape[0]
        fwd = self._get_fwd(t)
        out = fwd(feature.astype(jnp.float32),
                  self.w1_flat, self.b1, self.w2_flat, self.b2,
                  self.w3_flat, self.b3, self.w4_flat, self.b4,
                  self.pe1, self.po1, self.pe2, self.po2,
                  self.wd_blocks, self.bd_pad)
        return out[:, :self.out_dim][None, :, :]


# ----------------------------------------------------------------------------
# Pure-JAX reference (float32) for correctness checking — mirrors PyTorch:
# transpose(0,1) only swaps the size-1 batch dim, so the flatten is the plain
# row-major reshape of the (h2, T, out_dim) buffer.
# ----------------------------------------------------------------------------
def reference_forward(model, feature):
    def conv(x, w, b):
        y = jax.lax.conv_general_dilated(
            x[None], w, window_strides=(1, 1), padding=((1, 1), (1, 1)),
            dimension_numbers=("NCHW", "OIHW", "NCHW"))[0]
        return jnp.maximum(y + b[:, None, None], 0.0)

    def pool(x):
        return jnp.maximum(x[..., 0::2], x[..., 1::2])

    t = feature.shape[0]
    x = feature[None].astype(jnp.float32)
    x = conv(x, model.w1, model.b1)
    x = conv(x, model.w2, model.b2)
    x = pool(x)
    x = conv(x, model.w3, model.b3)
    x = conv(x, model.w4, model.b4)
    x = pool(x)
    x2d = x.reshape(t, model.hidden_dim_2 * model.out_dim)
    out = x2d @ model.wd.T + model.bd
    return out[None]


if __name__ == "__main__":
    key = jax.random.PRNGKey(0)

    # Two configs: the original small one, plus one with T not a multiple of 8
    # (and T % h2 != 0) to exercise the general flatten / strided-gather path.
    configs = [(128, 8),    # h1=2, h2=4, out_dim=32
               (192, 10)]   # h1=3, h2=6, out_dim=48

    for idx, (input_dim, T) in enumerate(configs):
        k_param, k_x = jax.random.split(jax.random.fold_in(key, idx))
        model = CNNClassifierPallas(input_dim, k_param)
        feature = jax.random.normal(k_x, (T, input_dim), jnp.float32)

        out = jax.block_until_ready(model.forward(feature))
        assert out.shape == (1, T, input_dim // 4), out.shape

        ref = reference_forward(model, feature)
        # bf16 is only used for the final dense contraction (f32 accumulate);
        # tolerances comfortably cover it.
        np.testing.assert_allclose(np.asarray(out), np.asarray(ref),
                                   rtol=2e-2, atol=3e-3)

    print("KERNEL_OK")
</pallas_src>

<mosaic_0001>
module attributes {stable_mosaic.version = 11 : i64} {
  func.func @kernel(%arg0: memref<8x128xf32, #tpu.memory_space<vmem>>, %arg1: memref<18xf32, #tpu.memory_space<smem>>, %arg2: memref<2xf32, #tpu.memory_space<smem>>, %arg3: memref<36xf32, #tpu.memory_space<smem>>, %arg4: memref<2xf32, #tpu.memory_space<smem>>, %arg5: memref<72xf32, #tpu.memory_space<smem>>, %arg6: memref<4xf32, #tpu.memory_space<smem>>, %arg7: memref<144xf32, #tpu.memory_space<smem>>, %arg8: memref<4xf32, #tpu.memory_space<smem>>, %arg9: memref<128x64xf32, #tpu.memory_space<vmem>>, %arg10: memref<128x64xf32, #tpu.memory_space<vmem>>, %arg11: memref<64x128xf32, #tpu.memory_space<vmem>>, %arg12: memref<64x128xf32, #tpu.memory_space<vmem>>, %arg13: memref<4x128x128xbf16, #tpu.memory_space<vmem>>, %arg14: memref<1x128xf32, #tpu.memory_space<vmem>>, %arg15: memref<8x128xf32, #tpu.memory_space<vmem>>, %arg16: memref<1x24x384xf32, #tpu.memory_space<vmem>>, %arg17: memref<2x24x384xf32, #tpu.memory_space<vmem>>, %arg18: memref<2x24x256xf32, #tpu.memory_space<vmem>>, %arg19: memref<4x24x256xf32, #tpu.memory_space<vmem>>, %arg20: memref<32x128xf32, #tpu.memory_space<vmem>>) attributes {dimension_semantics = [], scalar_prefetch = 0 : i64, scratch_operands = 5 : i64, tpu.core_type = #tpu.core_type<tc>} {
    %cst = arith.constant 0.000000e+00 : f32
    %0 = vector.broadcast %cst : f32 to vector<8x384xf32>
    %c0 = arith.constant 0 : index
    %c0_0 = arith.constant 0 : index
    %c0_1 = arith.constant 0 : index
    %1 = vector.load %arg16[%c0, %c0_0, %c0_1] : memref<1x24x384xf32, #tpu.memory_space<vmem>>, vector<1x8x384xf32>
    %2 = vector.shape_cast %1 : vector<1x8x384xf32> to vector<8x384xf32>
    %3 = vector.shape_cast %0 : vector<8x384xf32> to vector<1x8x384xf32>
    tpu.vector_store %arg16[%c0, %c0_0, %c0_1], %3 {strides = array<i32>} : memref<1x24x384xf32, #tpu.memory_space<vmem>>, vector<1x8x384xf32>,
    %cst_2 = arith.constant 0.000000e+00 : f32
    %4 = vector.broadcast %cst_2 : f32 to vector<8x384xf32>
    %c0_3 = arith.constant 0 : index
    %c16 = arith.constant 16 : index
    %c0_4 = arith.constant 0 : index
    %5 = vector.load %arg16[%c0_3, %c16, %c0_4] : memref<1x24x384xf32, #tpu.memory_space<vmem>>, vector<1x8x384xf32>
    %6 = vector.shape_cast %5 : vector<1x8x384xf32> to vector<8x384xf32>
    %7 = vector.shape_cast %4 : vector<8x384xf32> to vector<1x8x384xf32>
    tpu.vector_store %arg16[%c0_3, %c16, %c0_4], %7 {strides = array<i32>} : memref<1x24x384xf32, #tpu.memory_space<vmem>>, vector<1x8x384xf32>,
    %cst_5 = arith.constant 0.000000e+00 : f32
    %8 = vector.broadcast %cst_5 : f32 to vector<8x128xf32>
    %c0_6 = arith.constant 0 : index
    %c8 = arith.constant 8 : index
    %c0_7 = arith.constant 0 : index
    %9 = vector.load %arg16[%c0_6, %c8, %c0_7] : memref<1x24x384xf32, #tpu.memory_space<vmem>>, vector<1x8x128xf32>
    %10 = vector.shape_cast %9 : vector<1x8x128xf32> to vector<8x128xf32>
    %11 = vector.shape_cast %8 : vector<8x128xf32> to vector<1x8x128xf32>
    tpu.vector_store %arg16[%c0_6, %c8, %c0_7], %11 {strides = array<i32>} : memref<1x24x384xf32, #tpu.memory_space<vmem>>, vector<1x8x128xf32>,
    %cst_8 = arith.constant 0.000000e+00 : f32
    %12 = vector.broadcast %cst_8 : f32 to vector<8x128xf32>
    %c0_9 = arith.constant 0 : index
    %c8_10 = arith.constant 8 : index
    %c256 = arith.constant 256 : index
    %13 = vector.load %arg16[%c0_9, %c8_10, %c256] : memref<1x24x384xf32, #tpu.memory_space<vmem>>, vector<1x8x128xf32>
    %14 = vector.shape_cast %13 : vector<1x8x128xf32> to vector<8x128xf32>
    %15 = vector.shape_cast %12 : vector<8x128xf32> to vector<1x8x128xf32>
    tpu.vector_store %arg16[%c0_9, %c8_10, %c256], %15 {strides = array<i32>} : memref<1x24x384xf32, #tpu.memory_space<vmem>>, vector<1x8x128xf32>,
    %cst_11 = arith.constant 0.000000e+00 : f32
    %16 = vector.broadcast %cst_11 : f32 to vector<8x384xf32>
    %c0_12 = arith.constant 0 : index
    %c0_13 = arith.constant 0 : index
    %c0_14 = arith.constant 0 : index
    %17 = vector.load %arg17[%c0_12, %c0_13, %c0_14] : memref<2x24x384xf32, #tpu.memory_space<vmem>>, vector<1x8x384xf32>
    %18 = vector.shape_cast %17 : vector<1x8x384xf32> to vector<8x384xf32>
    %19 = vector.shape_cast %16 : vector<8x384xf32> to vector<1x8x384xf32>
    tpu.vector_store %arg17[%c0_12, %c0_13, %c0_14], %19 {strides = array<i32>} : memref<2x24x384xf32, #tpu.memory_space<vmem>>, vector<1x8x384xf32>,
    %cst_15 = arith.constant 0.000000e+00 : f32
    %20 = vector.broadcast %cst_15 : f32 to vector<8x384xf32>
    %c0_16 = arith.constant 0 : index
    %c16_17 = arith.constant 16 : index
    %c0_18 = arith.constant 0 : index
    %21 = vector.load %arg17[%c0_16, %c16_17, %c0_18] : memref<2x24x384xf32, #tpu.memory_space<vmem>>, vector<1x8x384xf32>
    %22 = vector.shape_cast %21 : vector<1x8x384xf32> to vector<8x384xf32>
    %23 = vector.shape_cast %20 : vector<8x384xf32> to vector<1x8x384xf32>
    tpu.vector_store %arg17[%c0_16, %c16_17, %c0_18], %23 {strides = array<i32>} : memref<2x24x384xf32, #tpu.memory_space<vmem>>, vector<1x8x384xf32>,
    %cst_19 = arith.constant 0.000000e+00 : f32
    %24 = vector.broadcast %cst_19 : f32 to vector<8x128xf32>
    %c0_20 = arith.constant 0 : index
    %c8_21 = arith.constant 8 : index
    %c0_22 = arith.constant 0 : index
    %25 = vector.load %arg17[%c0_20, %c8_21, %c0_22] : memref<2x24x384xf32, #tpu.memory_space<vmem>>, vector<1x8x128xf32>
    %26 = vector.shape_cast %25 : vector<1x8x128xf32> to vector<8x128xf32>
    %27 = vector.shape_cast %24 : vector<8x128xf32> to vector<1x8x128xf32>
    tpu.vector_store %arg17[%c0_20, %c8_21, %c0_22], %27 {strides = array<i32>} : memref<2x24x384xf32, #tpu.memory_space<vmem>>, vector<1x8x128xf32>,
    %cst_23 = arith.constant 0.000000e+00 : f32
    %28 = vector.broadcast %cst_23 : f32 to vector<8x128xf32>
    %c0_24 = arith.constant 0 : index
    %c8_25 = arith.constant 8 : index
    %c256_26 = arith.constant 256 : index
    %29 = vector.load %arg17[%c0_24, %c8_25, %c256_26] : memref<2x24x384xf32, #tpu.memory_space<vmem>>, vector<1x8x128xf32>
    %30 = vector.shape_cast %29 : vector<1x8x128xf32> to vector<8x128xf32>
    %31 = vector.shape_cast %28 : vector<8x128xf32> to vector<1x8x128xf32>
    tpu.vector_store %arg17[%c0_24, %c8_25, %c256_26], %31 {strides = array<i32>} : memref<2x24x384xf32, #tpu.memory_space<vmem>>, vector<1x8x128xf32>,
    %cst_27 = arith.constant 0.000000e+00 : f32
    %32 = vector.broadcast %cst_27 : f32 to vector<8x384xf32>
    %c1 = arith.constant 1 : index
    %c0_28 = arith.constant 0 : index
    %c0_29 = arith.constant 0 : index
    %33 = vector.load %arg17[%c1, %c0_28, %c0_29] : memref<2x24x384xf32, #tpu.memory_space<vmem>>, vector<1x8x384xf32>
    %34 = vector.shape_cast %33 : vector<1x8x384xf32> to vector<8x384xf32>
    %35 = vector.shape_cast %32 : vector<8x384xf32> to vector<1x8x384xf32>
    tpu.vector_store %arg17[%c1, %c0_28, %c0_29], %35 {strides = array<i32>} : memref<2x24x384xf32, #tpu.memory_space<vmem>>, vector<1x8x384xf32>,
    %cst_30 = arith.constant 0.000000e+00 : f32
    %36 = vector.broadcast %cst_30 : f32 to vector<8x384xf32>
    %c1_31 = arith.constant 1 : index
    %c16_32 = arith.constant 16 : index
    %c0_33 = arith.constant 0 : index
    %37 = vector.load %arg17[%c1_31, %c16_32, %c0_33] : memref<2x24x384xf32, #tpu.memory_space<vmem>>, vector<1x8x384xf32>
    %38 = vector.shape_cast %37 : vector<1x8x384xf32> to vector<8x384xf32>
    %39 = vector.shape_cast %36 : vector<8x384xf32> to vector<1x8x384xf32>
    tpu.vector_store %arg17[%c1_31, %c16_32, %c0_33], %39 {strides = array<i32>} : memref<2x24x384xf32, #tpu.memory_space<vmem>>, vector<1x8x384xf32>,
    %cst_34 = arith.constant 0.000000e+00 : f32
    %40 = vector.broadcast %cst_34 : f32 to vector<8x128xf32>
    %c1_35 = arith.constant 1 : index
    %c8_36 = arith.constant 8 : index
    %c0_37 = arith.constant 0 : index
    %41 = vector.load %arg17[%c1_35, %c8_36, %c0_37] : memref<2x24x384xf32, #tpu.memory_space<vmem>>, vector<1x8x128xf32>
    %42 = vector.shape_cast %41 : vector<1x8x128xf32> to vector<8x128xf32>
    %43 = vector.shape_cast %40 : vector<8x128xf32> to vector<1x8x128xf32>
    tpu.vector_store %arg17[%c1_35, %c8_36, %c0_37], %43 {strides = array<i32>} : memref<2x24x384xf32, #tpu.memory_space<vmem>>, vector<1x8x128xf32>,
    %cst_38 = arith.constant 0.000000e+00 : f32
    %44 = vector.broadcast %cst_38 : f32 to vector<8x128xf32>
    %c1_39 = arith.constant 1 : index
    %c8_40 = arith.constant 8 : index
    %c256_41 = arith.constant 256 : index
    %45 = vector.load %arg17[%c1_39, %c8_40, %c256_41] : memref<2x24x384xf32, #tpu.memory_space<vmem>>, vector<1x8x128xf32>
    %46 = vector.shape_cast %45 : vector<1x8x128xf32> to vector<8x128xf32>
    %47 = vector.shape_cast %44 : vector<8x128xf32> to vector<1x8x128xf32>
    tpu.vector_store %arg17[%c1_39, %c8_40, %c256_41], %47 {strides = array<i32>} : memref<2x24x384xf32, #tpu.memory_space<vmem>>, vector<1x8x128xf32>,
    %cst_42 = arith.constant 0.000000e+00 : f32
    %48 = vector.broadcast %cst_42 : f32 to vector<8x256xf32>
    %c0_43 = arith.constant 0 : index
    %c0_44 = arith.constant 0 : index
    %c0_45 = arith.constant 0 : index
    %49 = vector.load %arg18[%c0_43, %c0_44, %c0_45] : memref<2x24x256xf32, #tpu.memory_space<vmem>>, vector<1x8x256xf32>
    %50 = vector.shape_cast %49 : vector<1x8x256xf32> to vector<8x256xf32>
    %51 = vector.shape_cast %48 : vector<8x256xf32> to vector<1x8x256xf32>
    tpu.vector_store %arg18[%c0_43, %c0_44, %c0_45], %51 {strides = array<i32>} : memref<2x24x256xf32, #tpu.memory_space<vmem>>, vector<1x8x256xf32>,
    %cst_46 = arith.constant 0.000000e+00 : f32
    %52 = vector.broadcast %cst_46 : f32 to vector<8x256xf32>
    %c0_47 = arith.constant 0 : index
    %c16_48 = arith.constant 16 : index
    %c0_49 = arith.constant 0 : index
    %53 = vector.load %arg18[%c0_47, %c16_48, %c0_49] : memref<2x24x256xf32, #tpu.memory_space<vmem>>, vector<1x8x256xf32>
    %54 = vector.shape_cast %53 : vector<1x8x256xf32> to vector<8x256xf32>
    %55 = vector.shape_cast %52 : vector<8x256xf32> to vector<1x8x256xf32>
    tpu.vector_store %arg18[%c0_47, %c16_48, %c0_49], %55 {strides = array<i32>} : memref<2x24x256xf32, #tpu.memory_space<vmem>>, vector<1x8x256xf32>,
    %cst_50 = arith.constant 0.000000e+00 : f32
    %56 = vector.broadcast %cst_50 : f32 to vector<8x128xf32>
    %c0_51 = arith.constant 0 : index
    %c8_52 = arith.constant 8 : index
    %c0_53 = arith.constant 0 : index
    %57 = vector.load %arg18[%c0_51, %c8_52, %c0_53] : memref<2x24x256xf32, #tpu.memory_space<vmem>>, vector<1x8x128xf32>
    %58 = vector.shape_cast %57 : vector<1x8x128xf32> to vector<8x128xf32>
    %59 = vector.shape_cast %56 : vector<8x128xf32> to vector<1x8x128xf32>
    tpu.vector_store %arg18[%c0_51, %c8_52, %c0_53], %59 {strides = array<i32>} : memref<2x24x256xf32, #tpu.memory_space<vmem>>, vector<1x8x128xf32>,
    %cst_54 = arith.constant 0.000000e+00 : f32
    %60 = vector.broadcast %cst_54 : f32 to vector<8x64xf32>
    %c0_55 = arith.constant 0 : index
    %c8_56 = arith.constant 8 : index
    %c192 = arith.constant 192 : index
    %61 = vector.load %arg18[%c0_55, %c8_56, %c192] : memref<2x24x256xf32, #tpu.memory_space<vmem>>, vector<1x8x64xf32>
    %62 = vector.shape_cast %61 : vector<1x8x64xf32> to vector<8x64xf32>
    %63 = vector.shape_cast %60 : vector<8x64xf32> to vector<1x8x64xf32>
    tpu.vector_store %arg18[%c0_55, %c8_56, %c192], %63 {strides = array<i32>} : memref<2x24x256xf32, #tpu.memory_space<vmem>>, vector<1x8x64xf32>,
    %cst_57 = arith.constant 0.000000e+00 : f32
    %64 = vector.broadcast %cst_57 : f32 to vector<8x256xf32>
    %c1_58 = arith.constant 1 : index
    %c0_59 = arith.constant 0 : index
    %c0_60 = arith.constant 0 : index
    %65 = vector.load %arg18[%c1_58, %c0_59, %c0_60] : memref<2x24x256xf32, #tpu.memory_space<vmem>>, vector<1x8x256xf32>
    %66 = vector.shape_cast %65 : vector<1x8x256xf32> to vector<8x256xf32>
    %67 = vector.shape_cast %64 : vector<8x256xf32> to vector<1x8x256xf32>
    tpu.vector_store %arg18[%c1_58, %c0_59, %c0_60], %67 {strides = array<i32>} : memref<2x24x256xf32, #tpu.memory_space<vmem>>, vector<1x8x256xf32>,
    %cst_61 = arith.constant 0.000000e+00 : f32
    %68 = vector.broadcast %cst_61 : f32 to vector<8x256xf32>
    %c1_62 = arith.constant 1 : index
    %c16_63 = arith.constant 16 : index
    %c0_64 = arith.constant 0 : index
    %69 = vector.load %arg18[%c1_62, %c16_63, %c0_64] : memref<2x24x256xf32, #tpu.memory_space<vmem>>, vector<1x8x256xf32>
    %70 = vector.shape_cast %69 : vector<1x8x256xf32> to vector<8x256xf32>
    %71 = vector.shape_cast %68 : vector<8x256xf32> to vector<1x8x256xf32>
    tpu.vector_store %arg18[%c1_62, %c16_63, %c0_64], %71 {strides = array<i32>} : memref<2x24x256xf32, #tpu.memory_space<vmem>>, vector<1x8x256xf32>,
    %cst_65 = arith.constant 0.000000e+00 : f32
    %72 = vector.broadcast %cst_65 : f32 to vector<8x128xf32>
    %c1_66 = arith.constant 1 : index
    %c8_67 = arith.constant 8 : index
    %c0_68 = arith.constant 0 : index
    %73 = vector.load %arg18[%c1_66, %c8_67, %c0_68] : memref<2x24x256xf32, #tpu.memory_space<vmem>>, vector<1x8x128xf32>
    %74 = vector.shape_cast %73 : vector<1x8x128xf32> to vector<8x128xf32>
    %75 = vector.shape_cast %72 : vector<8x128xf32> to vector<1x8x128xf32>
    tpu.vector_store %arg18[%c1_66, %c8_67, %c0_68], %75 {strides = array<i32>} : memref<2x24x256xf32, #tpu.memory_space<vmem>>, vector<1x8x128xf32>,
    %cst_69 = arith.constant 0.000000e+00 : f32
    %76 = vector.broadcast %cst_69 : f32 to vector<8x64xf32>
    %c1_70 = arith.constant 1 : index
    %c8_71 = arith.constant 8 : index
    %c192_72 = arith.constant 192 : index
    %77 = vector.load %arg18[%c1_70, %c8_71, %c192_72] : memref<2x24x256xf32, #tpu.memory_space<vmem>>, vector<1x8x64xf32>
    %78 = vector.shape_cast %77 : vector<1x8x64xf32> to vector<8x64xf32>
    %79 = vector.shape_cast %76 : vector<8x64xf32> to vector<1x8x64xf32>
    tpu.vector_store %arg18[%c1_70, %c8_71, %c192_72], %79 {strides = array<i32>} : memref<2x24x256xf32, #tpu.memory_space<vmem>>, vector<1x8x64xf32>,
    %cst_73 = arith.constant 0.000000e+00 : f32
    %80 = vector.broadcast %cst_73 : f32 to vector<8x256xf32>
    %c0_74 = arith.constant 0 : index
    %c0_75 = arith.constant 0 : index
    %c0_76 = arith.constant 0 : index
    %81 = vector.load %arg19[%c0_74, %c0_75, %c0_76] : memref<4x24x256xf32, #tpu.memory_space<vmem>>, vector<1x8x256xf32>
    %82 = vector.shape_cast %81 : vector<1x8x256xf32> to vector<8x256xf32>
    %83 = vector.shape_cast %80 : vector<8x256xf32> to vector<1x8x256xf32>
    tpu.vector_store %arg19[%c0_74, %c0_75, %c0_76], %83 {strides = array<i32>} : memref<4x24x256xf32, #tpu.memory_space<vmem>>, vector<1x8x256xf32>,
    %cst_77 = arith.constant 0.000000e+00 : f32
    %84 = vector.broadcast %cst_77 : f32 to vector<8x256xf32>
    %c0_78 = arith.constant 0 : index
    %c16_79 = arith.constant 16 : index
    %c0_80 = arith.constant 0 : index
    %85 = vector.load %arg19[%c0_78, %c16_79, %c0_80] : memref<4x24x256xf32, #tpu.memory_space<vmem>>, vector<1x8x256xf32>
    %86 = vector.shape_cast %85 : vector<1x8x256xf32> to vector<8x256xf32>
    %87 = vector.shape_cast %84 : vector<8x256xf32> to vector<1x8x256xf32>
    tpu.vector_store %arg19[%c0_78, %c16_79, %c0_80], %87 {strides = array<i32>} : memref<4x24x256xf32, #tpu.memory_space<vmem>>, vector<1x8x256xf32>,
    %cst_81 = arith.constant 0.000000e+00 : f32
    %88 = vector.broadcast %cst_81 : f32 to vector<8x128xf32>
    %c0_82 = arith.constant 0 : index
    %c8_83 = arith.constant 8 : index
    %c0_84 = arith.constant 0 : index
    %89 = vector.load %arg19[%c0_82, %c8_83, %c0_84] : memref<4x24x256xf32, #tpu.memory_space<vmem>>, vector<1x8x128xf32>
    %90 = vector.shape_cast %89 : vector<1x8x128xf32> to vector<8x128xf32>
    %91 = vector.shape_cast %88 : vector<8x128xf32> to vector<1x8x128xf32>
    tpu.vector_store %arg19[%c0_82, %c8_83, %c0_84], %91 {strides = array<i32>} : memref<4x24x256xf32, #tpu.memory_space<vmem>>, vector<1x8x128xf32>,
    %cst_85 = arith.constant 0.000000e+00 : f32
    %92 = vector.broadcast %cst_85 : f32 to vector<8x64xf32>
    %c0_86 = arith.constant 0 : index
    %c8_87 = arith.constant 8 : index
    %c192_88 = arith.constant 192 : index
    %93 = vector.load %arg19[%c0_86, %c8_87, %c192_88] : memref<4x24x256xf32, #tpu.memory_space<vmem>>, vector<1x8x64xf32>
    %94 = vector.shape_cast %93 : vector<1x8x64xf32> to vector<8x64xf32>
    %95 = vector.shape_cast %92 : vector<8x64xf32> to vector<1x8x64xf32>
    tpu.vector_store %arg19[%c0_86, %c8_87, %c192_88], %95 {strides = array<i32>} : memref<4x24x256xf32, #tpu.memory_space<vmem>>, vector<1x8x64xf32>,
    %cst_89 = arith.constant 0.000000e+00 : f32
    %96 = vector.broadcast %cst_89 : f32 to vector<8x256xf32>
    %c1_90 = arith.constant 1 : index
    %c0_91 = arith.constant 0 : index
    %c0_92 = arith.constant 0 : index
    %97 = vector.load %arg19[%c1_90, %c0_91, %c0_92] : memref<4x24x256xf32, #tpu.memory_space<vmem>>, vector<1x8x256xf32>
    %98 = vector.shape_cast %97 : vector<1x8x256xf32> to vector<8x256xf32>
    %99 = vector.shape_cast %96 : vector<8x256xf32> to vector<1x8x256xf32>
    tpu.vector_store %arg19[%c1_90, %c0_91, %c0_92], %99 {strides = array<i32>} : memref<4x24x256xf32, #tpu.memory_space<vmem>>, vector<1x8x256xf32>,
    %cst_93 = arith.constant 0.000000e+00 : f32
    %100 = vector.broadcast %cst_93 : f32 to vector<8x256xf32>
    %c1_94 = arith.constant 1 : index
    %c16_95 = arith.constant 16 : index
    %c0_96 = arith.constant 0 : index
    %101 = vector.load %arg19[%c1_94, %c16_95, %c0_96] : memref<4x24x256xf32, #tpu.memory_space<vmem>>, vector<1x8x256xf32>
    %102 = vector.shape_cast %101 : vector<1x8x256xf32> to vector<8x256xf32>
    %103 = vector.shape_cast %100 : vector<8x256xf32> to vector<1x8x256xf32>
    tpu.vector_store %arg19[%c1_94, %c16_95, %c0_96], %103 {strides = array<i32>} : memref<4x24x256xf32, #tpu.memory_space<vmem>>, vector<1x8x256xf32>,
    %cst_97 = arith.constant 0.000000e+00 : f32
    %104 = vector.broadcast %cst_97 : f32 to vector<8x128xf32>
    %c1_98 = arith.constant 1 : index
    %c8_99 = arith.constant 8 : index
    %c0_100 = arith.constant 0 : index
    %105 = vector.load %arg19[%c1_98, %c8_99, %c0_100] : memref<4x24x256xf32, #tpu.memory_space<vmem>>, vector<1x8x128xf32>
    %106 = vector.shape_cast %105 : vector<1x8x128xf32> to vector<8x128xf32>
    %107 = vector.shape_cast %104 : vector<8x128xf32> to vector<1x8x128xf32>
    tpu.vector_store %arg19[%c1_98, %c8_99, %c0_100], %107 {strides = array<i32>} : memref<4x24x256xf32, #tpu.memory_space<vmem>>, vector<1x8x128xf32>,
    %cst_101 = arith.constant 0.000000e+00 : f32
    %108 = vector.broadcast %cst_101 : f32 to vector<8x64xf32>
    %c1_102 = arith.constant 1 : index
    %c8_103 = arith.constant 8 : index
    %c192_104 = arith.constant 192 : index
    %109 = vector.load %arg19[%c1_102, %c8_103, %c192_104] : memref<4x24x256xf32, #tpu.memory_space<vmem>>, vector<1x8x64xf32>
    %110 = vector.shape_cast %109 : vector<1x8x64xf32> to vector<8x64xf32>
    %111 = vector.shape_cast %108 : vector<8x64xf32> to vector<1x8x64xf32>
    tpu.vector_store %arg19[%c1_102, %c8_103, %c192_104], %111 {strides = array<i32>} : memref<4x24x256xf32, #tpu.memory_space<vmem>>, vector<1x8x64xf32>,
    %cst_105 = arith.constant 0.000000e+00 : f32
    %112 = vector.broadcast %cst_105 : f32 to vector<8x256xf32>
    %c2 = arith.constant 2 : index
    %c0_106 = arith.constant 0 : index
    %c0_107 = arith.constant 0 : index
    %113 = vector.load %arg19[%c2, %c0_106, %c0_107] : memref<4x24x256xf32, #tpu.memory_space<vmem>>, vector<1x8x256xf32>
    %114 = vector.shape_cast %113 : vector<1x8x256xf32> to vector<8x256xf32>
    %115 = vector.shape_cast %112 : vector<8x256xf32> to vector<1x8x256xf32>
    tpu.vector_store %arg19[%c2, %c0_106, %c0_107], %115 {strides = array<i32>} : memref<4x24x256xf32, #tpu.memory_space<vmem>>, vector<1x8x256xf32>,
    %cst_108 = arith.constant 0.000000e+00 : f32
    %116 = vector.broadcast %cst_108 : f32 to vector<8x256xf32>
    %c2_109 = arith.constant 2 : index
    %c16_110 = arith.constant 16 : index
    %c0_111 = arith.constant 0 : index
    %117 = vector.load %arg19[%c2_109, %c16_110, %c0_111] : memref<4x24x256xf32, #tpu.memory_space<vmem>>, vector<1x8x256xf32>
    %118 = vector.shape_cast %117 : vector<1x8x256xf32> to vector<8x256xf32>
    %119 = vector.shape_cast %116 : vector<8x256xf32> to vector<1x8x256xf32>
    tpu.vector_store %arg19[%c2_109, %c16_110, %c0_111], %119 {strides = array<i32>} : memref<4x24x256xf32, #tpu.memory_space<vmem>>, vector<1x8x256xf32>,
    %cst_112 = arith.constant 0.000000e+00 : f32
    %120 = vector.broadcast %cst_112 : f32 to vector<8x128xf32>
    %c2_113 = arith.constant 2 : index
    %c8_114 = arith.constant 8 : index
    %c0_115 = arith.constant 0 : index
    %121 = vector.load %arg19[%c2_113, %c8_114, %c0_115] : memref<4x24x256xf32, #tpu.memory_space<vmem>>, vector<1x8x128xf32>
    %122 = vector.shape_cast %121 : vector<1x8x128xf32> to vector<8x128xf32>
    %123 = vector.shape_cast %120 : vector<8x128xf32> to vector<1x8x128xf32>
    tpu.vector_store %arg19[%c2_113, %c8_114, %c0_115], %123 {strides = array<i32>} : memref<4x24x256xf32, #tpu.memory_space<vmem>>, vector<1x8x128xf32>,
    %cst_116 = arith.constant 0.000000e+00 : f32
    %124 = vector.broadcast %cst_116 : f32 to vector<8x64xf32>
    %c2_117 = arith.constant 2 : index
    %c8_118 = arith.constant 8 : index
    %c192_119 = arith.constant 192 : index
    %125 = vector.load %arg19[%c2_117, %c8_118, %c192_119] : memref<4x24x256xf32, #tpu.memory_space<vmem>>, vector<1x8x64xf32>
    %126 = vector.shape_cast %125 : vector<1x8x64xf32> to vector<8x64xf32>
    %127 = vector.shape_cast %124 : vector<8x64xf32> to vector<1x8x64xf32>
    tpu.vector_store %arg19[%c2_117, %c8_118, %c192_119], %127 {strides = array<i32>} : memref<4x24x256xf32, #tpu.memory_space<vmem>>, vector<1x8x64xf32>,
    %cst_120 = arith.constant 0.000000e+00 : f32
    %128 = vector.broadcast %cst_120 : f32 to vector<8x256xf32>
    %c3 = arith.constant 3 : index
    %c0_121 = arith.constant 0 : index
    %c0_122 = arith.constant 0 : index
    %129 = vector.load %arg19[%c3, %c0_121, %c0_122] : memref<4x24x256xf32, #tpu.memory_space<vmem>>, vector<1x8x256xf32>
    %130 = vector.shape_cast %129 : vector<1x8x256xf32> to vector<8x256xf32>
    %131 = vector.shape_cast %128 : vector<8x256xf32> to vector<1x8x256xf32>
    tpu.vector_store %arg19[%c3, %c0_121, %c0_122], %131 {strides = array<i32>} : memref<4x24x256xf32, #tpu.memory_space<vmem>>, vector<1x8x256xf32>,
    %cst_123 = arith.constant 0.000000e+00 : f32
    %132 = vector.broadcast %cst_123 : f32 to vector<8x256xf32>
    %c3_124 = arith.constant 3 : index
    %c16_125 = arith.constant 16 : index
    %c0_126 = arith.constant 0 : index
    %133 = vector.load %arg19[%c3_124, %c16_125, %c0_126] : memref<4x24x256xf32, #tpu.memory_space<vmem>>, vector<1x8x256xf32>
    %134 = vector.shape_cast %133 : vector<1x8x256xf32> to vector<8x256xf32>
    %135 = vector.shape_cast %132 : vector<8x256xf32> to vector<1x8x256xf32>
    tpu.vector_store %arg19[%c3_124, %c16_125, %c0_126], %135 {strides = array<i32>} : memref<4x24x256xf32, #tpu.memory_space<vmem>>, vector<1x8x256xf32>,
    %cst_127 = arith.constant 0.000000e+00 : f32
    %136 = vector.broadcast %cst_127 : f32 to vector<8x128xf32>
    %c3_128 = arith.constant 3 : index
    %c8_129 = arith.constant 8 : index
    %c0_130 = arith.constant 0 : index
    %137 = vector.load %arg19[%c3_128, %c8_129, %c0_130] : memref<4x24x256xf32, #tpu.memory_space<vmem>>, vector<1x8x128xf32>
    %138 = vector.shape_cast %137 : vector<1x8x128xf32> to vector<8x128xf32>
    %139 = vector.shape_cast %136 : vector<8x128xf32> to vector<1x8x128xf32>
    tpu.vector_store %arg19[%c3_128, %c8_129, %c0_130], %139 {strides = array<i32>} : memref<4x24x256xf32, #tpu.memory_space<vmem>>, vector<1x8x128xf32>,
    %cst_131 = arith.constant 0.000000e+00 : f32
    %140 = vector.broadcast %cst_131 : f32 to vector<8x64xf32>
    %c3_132 = arith.constant 3 : index
    %c8_133 = arith.constant 8 : index
    %c192_134 = arith.constant 192 : index
    %141 = vector.load %arg19[%c3_132, %c8_133, %c192_134] : memref<4x24x256xf32, #tpu.memory_space<vmem>>, vector<1x8x64xf32>
    %142 = vector.shape_cast %141 : vector<1x8x64xf32> to vector<8x64xf32>
    %143 = vector.shape_cast %140 : vector<8x64xf32> to vector<1x8x64xf32>
    tpu.vector_store %arg19[%c3_132, %c8_133, %c192_134], %143 {strides = array<i32>} : memref<4x24x256xf32, #tpu.memory_space<vmem>>, vector<1x8x64xf32>,
    %c0_135 = arith.constant 0 : index
    %c0_136 = arith.constant 0 : index
    %144 = vector.load %arg0[%c0_135, %c0_136] : memref<8x128xf32, #tpu.memory_space<vmem>>, vector<8x128xf32>
    %c0_137 = arith.constant 0 : index
    %c8_138 = arith.constant 8 : index
    %c128 = arith.constant 128 : index
    %145 = vector.load %arg16[%c0_137, %c8_138, %c128] : memref<1x24x384xf32, #tpu.memory_space<vmem>>, vector<1x8x128xf32>
    %146 = vector.shape_cast %145 : vector<1x8x128xf32> to vector<8x128xf32>
    %147 = vector.shape_cast %144 : vector<8x128xf32> to vector<1x8x128xf32>
    tpu.vector_store %arg16[%c0_137, %c8_138, %c128], %147 {strides = array<i32>} : memref<1x24x384xf32, #tpu.memory_space<vmem>>, vector<1x8x128xf32>,
    %cst_139 = arith.constant 0.000000e+00 : f32
    %148 = vector.broadcast %cst_139 : f32 to vector<8x128xf32>
    %cst_140 = arith.constant 0.000000e+00 : f32
    %149 = vector.broadcast %cst_140 : f32 to vector<8x128xf32>
    %c0_141 = arith.constant 0 : index
    %c7 = arith.constant 7 : index
    %c127 = arith.constant 127 : index
    %150 = vector.load %arg16[%c0_141, %c7, %c127] : memref<1x24x384xf32, #tpu.memory_space<vmem>>, vector<1x8x128xf32>
    %151 = vector.shape_cast %150 : vector<1x8x128xf32> to vector<8x128xf32>
    %c0_142 = arith.constant 0 : index
    %152 = memref.load %arg1[%c0_142] : memref<18xf32, #tpu.memory_space<smem>>
    %153 = vector.broadcast %152 : f32 to vector<8x128xf32>
    %154 = arith.mulf %153, %151 : vector<8x128xf32>
    %155 = arith.addf %148, %154 : vector<8x128xf32>
    %c9 = arith.constant 9 : index
    %156 = memref.load %arg1[%c9] : memref<18xf32, #tpu.memory_space<smem>>
    %157 = vector.broadcast %156 : f32 to vector<8x128xf32>
    %158 = arith.mulf %157, %151 : vector<8x128xf32>
    %159 = arith.addf %149, %158 : vector<8x128xf32>
    %c0_143 = arith.constant 0 : index
    %c7_144 = arith.constant 7 : index
    %c128_145 = arith.constant 128 : index
    %160 = vector.load %arg16[%c0_143, %c7_144, %c128_145] : memref<1x24x384xf32, #tpu.memory_space<vmem>>, vector<1x8x128xf32>
    %161 = vector.shape_cast %160 : vector<1x8x128xf32> to vector<8x128xf32>
    %c1_146 = arith.constant 1 : index
    %162 = memref.load %arg1[%c1_146] : memref<18xf32, #tpu.memory_space<smem>>
    %163 = vector.broadcast %162 : f32 to vector<8x128xf32>
    %164 = arith.mulf %163, %161 : vector<8x128xf32>
    %165 = arith.addf %155, %164 : vector<8x128xf32>
    %c10 = arith.constant 10 : index
    %166 = memref.load %arg1[%c10] : memref<18xf32, #tpu.memory_space<smem>>
    %167 = vector.broadcast %166 : f32 to vector<8x128xf32>
    %168 = arith.mulf %167, %161 : vector<8x128xf32>
    %169 = arith.addf %159, %168 : vector<8x128xf32>
    %c0_147 = arith.constant 0 : index
    %c7_148 = arith.constant 7 : index
    %c129 = arith.constant 129 : index
    %170 = vector.load %arg16[%c0_147, %c7_148, %c129] : memref<1x24x384xf32, #tpu.memory_space<vmem>>, vector<1x8x128xf32>
    %171 = vector.shape_cast %170 : vector<1x8x128xf32> to vector<8x128xf32>
    %c2_149 = arith.constant 2 : index
    %172 = memref.load %arg1[%c2_149] : memref<18xf32, #tpu.memory_space<smem>>
    %173 = vector.broadcast %172 : f32 to vector<8x128xf32>
    %174 = arith.mulf %173, %171 : vector<8x128xf32>
    %175 = arith.addf %165, %174 : vector<8x128xf32>
    %c11 = arith.constant 11 : index
    %176 = memref.load %arg1[%c11] : memref<18xf32, #tpu.memory_space<smem>>
    %177 = vector.broadcast %176 : f32 to vector<8x128xf32>
    %178 = arith.mulf %177, %171 : vector<8x128xf32>
    %179 = arith.addf %169, %178 : vector<8x128xf32>
    %c0_150 = arith.constant 0 : index
    %c8_151 = arith.constant 8 : index
    %c127_152 = arith.constant 127 : index
    %180 = vector.load %arg16[%c0_150, %c8_151, %c127_152] : memref<1x24x384xf32, #tpu.memory_space<vmem>>, vector<1x8x128xf32>
    %181 = vector.shape_cast %180 : vector<1x8x128xf32> to vector<8x128xf32>
    %c3_153 = arith.constant 3 : index
    %182 = memref.load %arg1[%c3_153] : memref<18xf32, #tpu.memory_space<smem>>
    %183 = vector.broadcast %182 : f32 to vector<8x128xf32>
    %184 = arith.mulf %183, %181 : vector<8x128xf32>
    %185 = arith.addf %175, %184 : vector<8x128xf32>
    %c12 = arith.constant 12 : index
    %186 = memref.load %arg1[%c12] : memref<18xf32, #tpu.memory_space<smem>>
    %187 = vector.broadcast %186 : f32 to vector<8x128xf32>
    %188 = arith.mulf %187, %181 : vector<8x128xf32>
    %189 = arith.addf %179, %188 : vector<8x128xf32>
    %c0_154 = arith.constant 0 : index
    %c8_155 = arith.constant 8 : index
    %c128_156 = arith.constant 128 : index
    %190 = vector.load %arg16[%c0_154, %c8_155, %c128_156] : memref<1x24x384xf32, #tpu.memory_space<vmem>>, vector<1x8x128xf32>
    %191 = vector.shape_cast %190 : vector<1x8x128xf32> to vector<8x128xf32>
    %c4 = arith.constant 4 : index
    %192 = memref.load %arg1[%c4] : memref<18xf32, #tpu.memory_space<smem>>
    %193 = vector.broadcast %192 : f32 to vector<8x128xf32>
    %194 = arith.mulf %193, %191 : vector<8x128xf32>
    %195 = arith.addf %185, %194 : vector<8x128xf32>
    %c13 = arith.constant 13 : index
    %196 = memref.load %arg1[%c13] : memref<18xf32, #tpu.memory_space<smem>>
    %197 = vector.broadcast %196 : f32 to vector<8x128xf32>
    %198 = arith.mulf %197, %191 : vector<8x128xf32>
    %199 = arith.addf %189, %198 : vector<8x128xf32>
    %c0_157 = arith.constant 0 : index
    %c8_158 = arith.constant 8 : index
    %c129_159 = arith.constant 129 : index
    %200 = vector.load %arg16[%c0_157, %c8_158, %c129_159] : memref<1x24x384xf32, #tpu.memory_space<vmem>>, vector<1x8x128xf32>
    %201 = vector.shape_cast %200 : vector<1x8x128xf32> to vector<8x128xf32>
    %c5 = arith.constant 5 : index
    %202 = memref.load %arg1[%c5] : memref<18xf32, #tpu.memory_space<smem>>
    %203 = vector.broadcast %202 : f32 to vector<8x128xf32>
    %204 = arith.mulf %203, %201 : vector<8x128xf32>
    %205 = arith.addf %195, %204 : vector<8x128xf32>
    %c14 = arith.constant 14 : index
    %206 = memref.load %arg1[%c14] : memref<18xf32, #tpu.memory_space<smem>>
    %207 = vector.broadcast %206 : f32 to vector<8x128xf32>
    %208 = arith.mulf %207, %201 : vector<8x128xf32>
    %209 = arith.addf %199, %208 : vector<8x128xf32>
    %c0_160 = arith.constant 0 : index
    %c9_161 = arith.constant 9 : index
    %c127_162 = arith.constant 127 : index
    %210 = vector.load %arg16[%c0_160, %c9_161, %c127_162] : memref<1x24x384xf32, #tpu.memory_space<vmem>>, vector<1x8x128xf32>
    %211 = vector.shape_cast %210 : vector<1x8x128xf32> to vector<8x128xf32>
    %c6 = arith.constant 6 : index
    %212 = memref.load %arg1[%c6] : memref<18xf32, #tpu.memory_space<smem>>
    %213 = vector.broadcast %212 : f32 to vector<8x128xf32>
    %214 = arith.mulf %213, %211 : vector<8x128xf32>
    %215 = arith.addf %205, %214 : vector<8x128xf32>
    %c15 = arith.constant 15 : index
    %216 = memref.load %arg1[%c15] : memref<18xf32, #tpu.memory_space<smem>>
    %217 = vector.broadcast %216 : f32 to vector<8x128xf32>
    %218 = arith.mulf %217, %211 : vector<8x128xf32>
    %219 = arith.addf %209, %218 : vector<8x128xf32>
    %c0_163 = arith.constant 0 : index
    %c9_164 = arith.constant 9 : index
    %c128_165 = arith.constant 128 : index
    %220 = vector.load %arg16[%c0_163, %c9_164, %c128_165] : memref<1x24x384xf32, #tpu.memory_space<vmem>>, vector<1x8x128xf32>
    %221 = vector.shape_cast %220 : vector<1x8x128xf32> to vector<8x128xf32>
    %c7_166 = arith.constant 7 : index
    %222 = memref.load %arg1[%c7_166] : memref<18xf32, #tpu.memory_space<smem>>
    %223 = vector.broadcast %222 : f32 to vector<8x128xf32>
    %224 = arith.mulf %223, %221 : vector<8x128xf32>
    %225 = arith.addf %215, %224 : vector<8x128xf32>
    %c16_167 = arith.constant 16 : index
    %226 = memref.load %arg1[%c16_167] : memref<18xf32, #tpu.memory_space<smem>>
    %227 = vector.broadcast %226 : f32 to vector<8x128xf32>
    %228 = arith.mulf %227, %221 : vector<8x128xf32>
    %229 = arith.addf %219, %228 : vector<8x128xf32>
    %c0_168 = arith.constant 0 : index
    %c9_169 = arith.constant 9 : index
    %c129_170 = arith.constant 129 : index
    %230 = vector.load %arg16[%c0_168, %c9_169, %c129_170] : memref<1x24x384xf32, #tpu.memory_space<vmem>>, vector<1x8x128xf32>
    %231 = vector.shape_cast %230 : vector<1x8x128xf32> to vector<8x128xf32>
    %c8_171 = arith.constant 8 : index
    %232 = memref.load %arg1[%c8_171] : memref<18xf32, #tpu.memory_space<smem>>
    %233 = vector.broadcast %232 : f32 to vector<8x128xf32>
    %234 = arith.mulf %233, %231 : vector<8x128xf32>
    %235 = arith.addf %225, %234 : vector<8x128xf32>
    %c17 = arith.constant 17 : index
    %236 = memref.load %arg1[%c17] : memref<18xf32, #tpu.memory_space<smem>>
    %237 = vector.broadcast %236 : f32 to vector<8x128xf32>
    %238 = arith.mulf %237, %231 : vector<8x128xf32>
    %239 = arith.addf %229, %238 : vector<8x128xf32>
    %c0_172 = arith.constant 0 : index
    %240 = memref.load %arg2[%c0_172] : memref<2xf32, #tpu.memory_space<smem>>
    %241 = vector.broadcast %240 : f32 to vector<8x128xf32>
    %242 = arith.addf %235, %241 : vector<8x128xf32>
    %cst_173 = arith.constant 0.000000e+00 : f32
    %243 = vector.broadcast %cst_173 : f32 to vector<8x128xf32>
    %244 = arith.maximumf %242, %243 : vector<8x128xf32>
    %c1_174 = arith.constant 1 : index
    %245 = memref.load %arg2[%c1_174] : memref<2xf32, #tpu.memory_space<smem>>
    %246 = vector.broadcast %245 : f32 to vector<8x128xf32>
    %247 = arith.addf %239, %246 : vector<8x128xf32>
    %cst_175 = arith.constant 0.000000e+00 : f32
    %248 = vector.broadcast %cst_175 : f32 to vector<8x128xf32>
    %249 = arith.maximumf %247, %248 : vector<8x128xf32>
    %c0_176 = arith.constant 0 : index
    %c8_177 = arith.constant 8 : index
    %c128_178 = arith.constant 128 : index
    %250 = vector.load %arg17[%c0_176, %c8_177, %c128_178] : memref<2x24x384xf32, #tpu.memory_space<vmem>>, vector<1x8x128xf32>
    %251 = vector.shape_cast %250 : vector<1x8x128xf32> to vector<8x128xf32>
    %252 = vector.shape_cast %244 : vector<8x128xf32> to vector<1x8x128xf32>
    tpu.vector_store %arg17[%c0_176, %c8_177, %c128_178], %252 {strides = array<i32>} : memref<2x24x384xf32, #tpu.memory_space<vmem>>, vector<1x8x128xf32>,
    %c1_179 = arith.constant 1 : index
    %c8_180 = arith.constant 8 : index
    %c128_181 = arith.constant 128 : index
    %253 = vector.load %arg17[%c1_179, %c8_180, %c128_181] : memref<2x24x384xf32, #tpu.memory_space<vmem>>, vector<1x8x128xf32>
    %254 = vector.shape_cast %253 : vector<1x8x128xf32> to vector<8x128xf32>
    %255 = vector.shape_cast %249 : vector<8x128xf32> to vector<1x8x128xf32>
    tpu.vector_store %arg17[%c1_179, %c8_180, %c128_181], %255 {strides = array<i32>} : memref<2x24x384xf32, #tpu.memory_space<vmem>>, vector<1x8x128xf32>,
    %cst_182 = arith.constant 0.000000e+00 : f32
    %256 = vector.broadcast %cst_182 : f32 to vector<8x128xf32>
    %cst_183 = arith.constant 0.000000e+00 : f32
    %257 = vector.broadcast %cst_183 : f32 to vector<8x128xf32>
    %c0_184 = arith.constant 0 : index
    %c7_185 = arith.constant 7 : index
    %c127_186 = arith.constant 127 : index
    %258 = vector.load %arg17[%c0_184, %c7_185, %c127_186] : memref<2x24x384xf32, #tpu.memory_space<vmem>>, vector<1x8x128xf32>
    %259 = vector.shape_cast %258 : vector<1x8x128xf32> to vector<8x128xf32>
    %c0_187 = arith.constant 0 : index
    %260 = memref.load %arg3[%c0_187] : memref<36xf32, #tpu.memory_space<smem>>
    %261 = vector.broadcast %260 : f32 to vector<8x128xf32>
    %262 = arith.mulf %261, %259 : vector<8x128xf32>
    %263 = arith.addf %256, %262 : vector<8x128xf32>
    %c18 = arith.constant 18 : index
    %264 = memref.load %arg3[%c18] : memref<36xf32, #tpu.memory_space<smem>>
    %265 = vector.broadcast %264 : f32 to vector<8x128xf32>
    %266 = arith.mulf %265, %259 : vector<8x128xf32>
    %267 = arith.addf %257, %266 : vector<8x128xf32>
    %c0_188 = arith.constant 0 : index
    %c7_189 = arith.constant 7 : index
    %c128_190 = arith.constant 128 : index
    %268 = vector.load %arg17[%c0_188, %c7_189, %c128_190] : memref<2x24x384xf32, #tpu.memory_space<vmem>>, vector<1x8x128xf32>
    %269 = vector.shape_cast %268 : vector<1x8x128xf32> to vector<8x128xf32>
    %c1_191 = arith.constant 1 : index
    %270 = memref.load %arg3[%c1_191] : memref<36xf32, #tpu.memory_space<smem>>
    %271 = vector.broadcast %270 : f32 to vector<8x128xf32>
    %272 = arith.mulf %271, %269 : vector<8x128xf32>
    %273 = arith.addf %263, %272 : vector<8x128xf32>
    %c19 = arith.constant 19 : index
    %274 = memref.load %arg3[%c19] : memref<36xf32, #tpu.memory_space<smem>>
    %275 = vector.broadcast %274 : f32 to vector<8x128xf32>
    %276 = arith.mulf %275, %269 : vector<8x128xf32>
    %277 = arith.addf %267, %276 : vector<8x128xf32>
    %c0_192 = arith.constant 0 : index
    %c7_193 = arith.constant 7 : index
    %c129_194 = arith.constant 129 : index
    %278 = vector.load %arg17[%c0_192, %c7_193, %c129_194] : memref<2x24x384xf32, #tpu.memory_space<vmem>>, vector<1x8x128xf32>
    %279 = vector.shape_cast %278 : vector<1x8x128xf32> to vector<8x128xf32>
    %c2_195 = arith.constant 2 : index
    %280 = memref.load %arg3[%c2_195] : memref<36xf32, #tpu.memory_space<smem>>
    %281 = vector.broadcast %280 : f32 to vector<8x128xf32>
    %282 = arith.mulf %281, %279 : vector<8x128xf32>
    %283 = arith.addf %273, %282 : vector<8x128xf32>
    %c20 = arith.constant 20 : index
    %284 = memref.load %arg3[%c20] : memref<36xf32, #tpu.memory_space<smem>>
    %285 = vector.broadcast %284 : f32 to vector<8x128xf32>
    %286 = arith.mulf %285, %279 : vector<8x128xf32>
    %287 = arith.addf %277, %286 : vector<8x128xf32>
    %c0_196 = arith.constant 0 : index
    %c8_197 = arith.constant 8 : index
    %c127_198 = arith.constant 127 : index
    %288 = vector.load %arg17[%c0_196, %c8_197, %c127_198] : memref<2x24x384xf32, #tpu.memory_space<vmem>>, vector<1x8x128xf32>
    %289 = vector.shape_cast %288 : vector<1x8x128xf32> to vector<8x128xf32>
    %c3_199 = arith.constant 3 : index
    %290 = memref.load %arg3[%c3_199] : memref<36xf32, #tpu.memory_space<smem>>
    %291 = vector.broadcast %290 : f32 to vector<8x128xf32>
    %292 = arith.mulf %291, %289 : vector<8x128xf32>
    %293 = arith.addf %283, %292 : vector<8x128xf32>
    %c21 = arith.constant 21 : index
    %294 = memref.load %arg3[%c21] : memref<36xf32, #tpu.memory_space<smem>>
    %295 = vector.broadcast %294 : f32 to vector<8x128xf32>
    %296 = arith.mulf %295, %289 : vector<8x128xf32>
    %297 = arith.addf %287, %296 : vector<8x128xf32>
    %c0_200 = arith.constant 0 : index
    %c8_201 = arith.constant 8 : index
    %c128_202 = arith.constant 128 : index
    %298 = vector.load %arg17[%c0_200, %c8_201, %c128_202] : memref<2x24x384xf32, #tpu.memory_space<vmem>>, vector<1x8x128xf32>
    %299 = vector.shape_cast %298 : vector<1x8x128xf32> to vector<8x128xf32>
    %c4_203 = arith.constant 4 : index
    %300 = memref.load %arg3[%c4_203] : memref<36xf32, #tpu.memory_space<smem>>
    %301 = vector.broadcast %300 : f32 to vector<8x128xf32>
    %302 = arith.mulf %301, %299 : vector<8x128xf32>
    %303 = arith.addf %293, %302 : vector<8x128xf32>
    %c22 = arith.constant 22 : index
    %304 = memref.load %arg3[%c22] : memref<36xf32, #tpu.memory_space<smem>>
    %305 = vector.broadcast %304 : f32 to vector<8x128xf32>
    %306 = arith.mulf %305, %299 : vector<8x128xf32>
    %307 = arith.addf %297, %306 : vector<8x128xf32>
    %c0_204 = arith.constant 0 : index
    %c8_205 = arith.constant 8 : index
    %c129_206 = arith.constant 129 : index
    %308 = vector.load %arg17[%c0_204, %c8_205, %c129_206] : memref<2x24x384xf32, #tpu.memory_space<vmem>>, vector<1x8x128xf32>
    %309 = vector.shape_cast %308 : vector<1x8x128xf32> to vector<8x128xf32>
    %c5_207 = arith.constant 5 : index
    %310 = memref.load %arg3[%c5_207] : memref<36xf32, #tpu.memory_space<smem>>
    %311 = vector.broadcast %310 : f32 to vector<8x128xf32>
    %312 = arith.mulf %311, %309 : vector<8x128xf32>
    %313 = arith.addf %303, %312 : vector<8x128xf32>
    %c23 = arith.constant 23 : index
    %314 = memref.load %arg3[%c23] : memref<36xf32, #tpu.memory_space<smem>>
    %315 = vector.broadcast %314 : f32 to vector<8x128xf32>
    %316 = arith.mulf %315, %309 : vector<8x128xf32>
    %317 = arith.addf %307, %316 : vector<8x128xf32>
    %c0_208 = arith.constant 0 : index
    %c9_209 = arith.constant 9 : index
    %c127_210 = arith.constant 127 : index
    %318 = vector.load %arg17[%c0_208, %c9_209, %c127_210] : memref<2x24x384xf32, #tpu.memory_space<vmem>>, vector<1x8x128xf32>
    %319 = vector.shape_cast %318 : vector<1x8x128xf32> to vector<8x128xf32>
    %c6_211 = arith.constant 6 : index
    %320 = memref.load %arg3[%c6_211] : memref<36xf32, #tpu.memory_space<smem>>
    %321 = vector.broadcast %320 : f32 to vector<8x128xf32>
    %322 = arith.mulf %321, %319 : vector<8x128xf32>
    %323 = arith.addf %313, %322 : vector<8x128xf32>
    %c24 = arith.constant 24 : index
    %324 = memref.load %arg3[%c24] : memref<36xf32, #tpu.memory_space<smem>>
    %325 = vector.broadcast %324 : f32 to vector<8x128xf32>
    %326 = arith.mulf %325, %319 : vector<8x128xf32>
    %327 = arith.addf %317, %326 : vector<8x128xf32>
    %c0_212 = arith.constant 0 : index
    %c9_213 = arith.constant 9 : index
    %c128_214 = arith.constant 128 : index
    %328 = vector.load %arg17[%c0_212, %c9_213, %c128_214] : memref<2x24x384xf32, #tpu.memory_space<vmem>>, vector<1x8x128xf32>
    %329 = vector.shape_cast %328 : vector<1x8x128xf32> to vector<8x128xf32>
    %c7_215 = arith.constant 7 : index
    %330 = memref.load %arg3[%c7_215] : memref<36xf32, #tpu.memory_space<smem>>
    %331 = vector.broadcast %330 : f32 to vector<8x128xf32>
    %332 = arith.mulf %331, %329 : vector<8x128xf32>
    %333 = arith.addf %323, %332 : vector<8x128xf32>
    %c25 = arith.constant 25 : index
    %334 = memref.load %arg3[%c25] : memref<36xf32, #tpu.memory_space<smem>>
    %335 = vector.broadcast %334 : f32 to vector<8x128xf32>
    %336 = arith.mulf %335, %329 : vector<8x128xf32>
    %337 = arith.addf %327, %336 : vector<8x128xf32>
    %c0_216 = arith.constant 0 : index
    %c9_217 = arith.constant 9 : index
    %c129_218 = arith.constant 129 : index
    %338 = vector.load %arg17[%c0_216, %c9_217, %c129_218] : memref<2x24x384xf32, #tpu.memory_space<vmem>>, vector<1x8x128xf32>
    %339 = vector.shape_cast %338 : vector<1x8x128xf32> to vector<8x128xf32>
    %c8_219 = arith.constant 8 : index
    %340 = memref.load %arg3[%c8_219] : memref<36xf32, #tpu.memory_space<smem>>
    %341 = vector.broadcast %340 : f32 to vector<8x128xf32>
    %342 = arith.mulf %341, %339 : vector<8x128xf32>
    %343 = arith.addf %333, %342 : vector<8x128xf32>
    %c26 = arith.constant 26 : index
    %344 = memref.load %arg3[%c26] : memref<36xf32, #tpu.memory_space<smem>>
    %345 = vector.broadcast %344 : f32 to vector<8x128xf32>
    %346 = arith.mulf %345, %339 : vector<8x128xf32>
    %347 = arith.addf %337, %346 : vector<8x128xf32>
    %c1_220 = arith.constant 1 : index
    %c7_221 = arith.constant 7 : index
    %c127_222 = arith.constant 127 : index
    %348 = vector.load %arg17[%c1_220, %c7_221, %c127_222] : memref<2x24x384xf32, #tpu.memory_space<vmem>>, vector<1x8x128xf32>
    %349 = vector.shape_cast %348 : vector<1x8x128xf32> to vector<8x128xf32>
    %c9_223 = arith.constant 9 : index
    %350 = memref.load %arg3[%c9_223] : memref<36xf32, #tpu.memory_space<smem>>
    %351 = vector.broadcast %350 : f32 to vector<8x128xf32>
    %352 = arith.mulf %351, %349 : vector<8x128xf32>
    %353 = arith.addf %343, %352 : vector<8x128xf32>
    %c27 = arith.constant 27 : index
    %354 = memref.load %arg3[%c27] : memref<36xf32, #tpu.memory_space<smem>>
    %355 = vector.broadcast %354 : f32 to vector<8x128xf32>
    %356 = arith.mulf %355, %349 : vector<8x128xf32>
    %357 = arith.addf %347, %356 : vector<8x128xf32>
    %c1_224 = arith.constant 1 : index
    %c7_225 = arith.constant 7 : index
    %c128_226 = arith.constant 128 : index
    %358 = vector.load %arg17[%c1_224, %c7_225, %c128_226] : memref<2x24x384xf32, #tpu.memory_space<vmem>>, vector<1x8x128xf32>
    %359 = vector.shape_cast %358 : vector<1x8x128xf32> to vector<8x128xf32>
    %c10_227 = arith.constant 10 : index
    %360 = memref.load %arg3[%c10_227] : memref<36xf32, #tpu.memory_space<smem>>
    %361 = vector.broadcast %360 : f32 to vector<8x128xf32>
    %362 = arith.mulf %361, %359 : vector<8x128xf32>
    %363 = arith.addf %353, %362 : vector<8x128xf32>
    %c28 = arith.constant 28 : index
    %364 = memref.load %arg3[%c28] : memref<36xf32, #tpu.memory_space<smem>>
    %365 = vector.broadcast %364 : f32 to vector<8x128xf32>
    %366 = arith.mulf %365, %359 : vector<8x128xf32>
    %367 = arith.addf %357, %366 : vector<8x128xf32>
    %c1_228 = arith.constant 1 : index
    %c7_229 = arith.constant 7 : index
    %c129_230 = arith.constant 129 : index
    %368 = vector.load %arg17[%c1_228, %c7_229, %c129_230] : memref<2x24x384xf32, #tpu.memory_space<vmem>>, vector<1x8x128xf32>
    %369 = vector.shape_cast %368 : vector<1x8x128xf32> to vector<8x128xf32>
    %c11_231 = arith.constant 11 : index
    %370 = memref.load %arg3[%c11_231] : memref<36xf32, #tpu.memory_space<smem>>
    %371 = vector.broadcast %370 : f32 to vector<8x128xf32>
    %372 = arith.mulf %371, %369 : vector<8x128xf32>
    %373 = arith.addf %363, %372 : vector<8x128xf32>
    %c29 = arith.constant 29 : index
    %374 = memref.load %arg3[%c29] : memref<36xf32, #tpu.memory_space<smem>>
    %375 = vector.broadcast %374 : f32 to vector<8x128xf32>
    %376 = arith.mulf %375, %369 : vector<8x128xf32>
    %377 = arith.addf %367, %376 : vector<8x128xf32>
    %c1_232 = arith.constant 1 : index
    %c8_233 = arith.constant 8 : index
    %c127_234 = arith.constant 127 : index
    %378 = vector.load %arg17[%c1_232, %c8_233, %c127_234] : memref<2x24x384xf32, #tpu.memory_space<vmem>>, vector<1x8x128xf32>
    %379 = vector.shape_cast %378 : vector<1x8x128xf32> to vector<8x128xf32>
    %c12_235 = arith.constant 12 : index
    %380 = memref.load %arg3[%c12_235] : memref<36xf32, #tpu.memory_space<smem>>
    %381 = vector.broadcast %380 : f32 to vector<8x128xf32>
    %382 = arith.mulf %381, %379 : vector<8x128xf32>
    %383 = arith.addf %373, %382 : vector<8x128xf32>
    %c30 = arith.constant 30 : index
    %384 = memref.load %arg3[%c30] : memref<36xf32, #tpu.memory_space<smem>>
    %385 = vector.broadcast %384 : f32 to vector<8x128xf32>
    %386 = arith.mulf %385, %379 : vector<8x128xf32>
    %387 = arith.addf %377, %386 : vector<8x128xf32>
    %c1_236 = arith.constant 1 : index
    %c8_237 = arith.constant 8 : index
    %c128_238 = arith.constant 128 : index
    %388 = vector.load %arg17[%c1_236, %c8_237, %c128_238] : memref<2x24x384xf32, #tpu.memory_space<vmem>>, vector<1x8x128xf32>
    %389 = vector.shape_cast %388 : vector<1x8x128xf32> to vector<8x128xf32>
    %c13_239 = arith.constant 13 : index
    %390 = memref.load %arg3[%c13_239] : memref<36xf32, #tpu.memory_space<smem>>
    %391 = vector.broadcast %390 : f32 to vector<8x128xf32>
    %392 = arith.mulf %391, %389 : vector<8x128xf32>
    %393 = arith.addf %383, %392 : vector<8x128xf32>
    %c31 = arith.constant 31 : index
    %394 = memref.load %arg3[%c31] : memref<36xf32, #tpu.memory_space<smem>>
    %395 = vector.broadcast %394 : f32 to vector<8x128xf32>
    %396 = arith.mulf %395, %389 : vector<8x128xf32>
    %397 = arith.addf %387, %396 : vector<8x128xf32>
    %c1_240 = arith.constant 1 : index
    %c8_241 = arith.constant 8 : index
    %c129_242 = arith.constant 129 : index
    %398 = vector.load %arg17[%c1_240, %c8_241, %c129_242] : memref<2x24x384xf32, #tpu.memory_space<vmem>>, vector<1x8x128xf32>
    %399 = vector.shape_cast %398 : vector<1x8x128xf32> to vector<8x128xf32>
    %c14_243 = arith.constant 14 : index
    %400 = memref.load %arg3[%c14_243] : memref<36xf32, #tpu.memory_space<smem>>
    %401 = vector.broadcast %400 : f32 to vector<8x128xf32>
    %402 = arith.mulf %401, %399 : vector<8x128xf32>
    %403 = arith.addf %393, %402 : vector<8x128xf32>
    %c32 = arith.constant 32 : index
    %404 = memref.load %arg3[%c32] : memref<36xf32, #tpu.memory_space<smem>>
    %405 = vector.broadcast %404 : f32 to vector<8x128xf32>
    %406 = arith.mulf %405, %399 : vector<8x128xf32>
    %407 = arith.addf %397, %406 : vector<8x128xf32>
    %c1_244 = arith.constant 1 : index
    %c9_245 = arith.constant 9 : index
    %c127_246 = arith.constant 127 : index
    %408 = vector.load %arg17[%c1_244, %c9_245, %c127_246] : memref<2x24x384xf32, #tpu.memory_space<vmem>>, vector<1x8x128xf32>
    %409 = vector.shape_cast %408 : vector<1x8x128xf32> to vector<8x128xf32>
    %c15_247 = arith.constant 15 : index
    %410 = memref.load %arg3[%c15_247] : memref<36xf32, #tpu.memory_space<smem>>
    %411 = vector.broadcast %410 : f32 to vector<8x128xf32>
    %412 = arith.mulf %411, %409 : vector<8x128xf32>
    %413 = arith.addf %403, %412 : vector<8x128xf32>
    %c33 = arith.constant 33 : index
    %414 = memref.load %arg3[%c33] : memref<36xf32, #tpu.memory_space<smem>>
    %415 = vector.broadcast %414 : f32 to vector<8x128xf32>
    %416 = arith.mulf %415, %409 : vector<8x128xf32>
    %417 = arith.addf %407, %416 : vector<8x128xf32>
    %c1_248 = arith.constant 1 : index
    %c9_249 = arith.constant 9 : index
    %c128_250 = arith.constant 128 : index
    %418 = vector.load %arg17[%c1_248, %c9_249, %c128_250] : memref<2x24x384xf32, #tpu.memory_space<vmem>>, vector<1x8x128xf32>
    %419 = vector.shape_cast %418 : vector<1x8x128xf32> to vector<8x128xf32>
    %c16_251 = arith.constant 16 : index
    %420 = memref.load %arg3[%c16_251] : memref<36xf32, #tpu.memory_space<smem>>
    %421 = vector.broadcast %420 : f32 to vector<8x128xf32>
    %422 = arith.mulf %421, %419 : vector<8x128xf32>
    %423 = arith.addf %413, %422 : vector<8x128xf32>
    %c34 = arith.constant 34 : index
    %424 = memref.load %arg3[%c34] : memref<36xf32, #tpu.memory_space<smem>>
    %425 = vector.broadcast %424 : f32 to vector<8x128xf32>
    %426 = arith.mulf %425, %419 : vector<8x128xf32>
    %427 = arith.addf %417, %426 : vector<8x128xf32>
    %c1_252 = arith.constant 1 : index
    %c9_253 = arith.constant 9 : index
    %c129_254 = arith.constant 129 : index
    %428 = vector.load %arg17[%c1_252, %c9_253, %c129_254] : memref<2x24x384xf32, #tpu.memory_space<vmem>>, vector<1x8x128xf32>
    %429 = vector.shape_cast %428 : vector<1x8x128xf32> to vector<8x128xf32>
    %c17_255 = arith.constant 17 : index
    %430 = memref.load %arg3[%c17_255] : memref<36xf32, #tpu.memory_space<smem>>
    %431 = vector.broadcast %430 : f32 to vector<8x128xf32>
    %432 = arith.mulf %431, %429 : vector<8x128xf32>
    %433 = arith.addf %423, %432 : vector<8x128xf32>
    %c35 = arith.constant 35 : index
    %434 = memref.load %arg3[%c35] : memref<36xf32, #tpu.memory_space<smem>>
    %435 = vector.broadcast %434 : f32 to vector<8x128xf32>
    %436 = arith.mulf %435, %429 : vector<8x128xf32>
    %437 = arith.addf %427, %436 : vector<8x128xf32>
    %c0_256 = arith.constant 0 : index
    %438 = memref.load %arg4[%c0_256] : memref<2xf32, #tpu.memory_space<smem>>
    %439 = vector.broadcast %438 : f32 to vector<8x128xf32>
    %440 = arith.addf %433, %439 : vector<8x128xf32>
    %cst_257 = arith.constant 0.000000e+00 : f32
    %441 = vector.broadcast %cst_257 : f32 to vector<8x128xf32>
    %442 = arith.maximumf %440, %441 : vector<8x128xf32>
    %c1_258 = arith.constant 1 : index
    %443 = memref.load %arg4[%c1_258] : memref<2xf32, #tpu.memory_space<smem>>
    %444 = vector.broadcast %443 : f32 to vector<8x128xf32>
    %445 = arith.addf %437, %444 : vector<8x128xf32>
    %cst_259 = arith.constant 0.000000e+00 : f32
    %446 = vector.broadcast %cst_259 : f32 to vector<8x128xf32>
    %447 = arith.maximumf %445, %446 : vector<8x128xf32>
    %448 = tpu.concatenate %442, %447 in 0 : vector<8x128xf32>, vector<8x128xf32> -> vector<16x128xf32>
    %c0_260 = arith.constant 0 : index
    %c0_261 = arith.constant 0 : index
    %449 = vector.load %arg9[%c0_260, %c0_261] : memref<128x64xf32, #tpu.memory_space<vmem>>, vector<128x64xf32>
    %cst_262 = arith.constant dense<0.000000e+00> : vector<16x64xf32>
    %450 = tpu.matmul %448, %449, %cst_262 {dimension_numbers = #tpu.dot_dimension_numbers<[1], [0], [0], [1], [0, 0, 1, 1], [], []>} : vector<16x128xf32>, vector<128x64xf32>, vector<16x64xf32> -> vector<16x64xf32>
    %c0_263 = arith.constant 0 : index
    %c0_264 = arith.constant 0 : index
    %451 = vector.load %arg10[%c0_263, %c0_264] : memref<128x64xf32, #tpu.memory_space<vmem>>, vector<128x64xf32>
    %cst_265 = arith.constant dense<0.000000e+00> : vector<16x64xf32>
    %452 = tpu.matmul %448, %451, %cst_265 {dimension_numbers = #tpu.dot_dimension_numbers<[1], [0], [0], [1], [0, 0, 1, 1], [], []>} : vector<16x128xf32>, vector<128x64xf32>, vector<16x64xf32> -> vector<16x64xf32>
    %453 = arith.maximumf %450, %452 : vector<16x64xf32>
    %454 = vector.extract_strided_slice %453 {offsets = [0, 0], sizes = [8, 64], strides = [1, 1]} : vector<16x64xf32> to vector<8x64xf32>
    %c0_266 = arith.constant 0 : index
    %c8_267 = arith.constant 8 : index
    %c128_268 = arith.constant 128 : index
    %455 = vector.load %arg18[%c0_266, %c8_267, %c128_268] : memref<2x24x256xf32, #tpu.memory_space<vmem>>, vector<1x8x64xf32>
    %456 = vector.shape_cast %455 : vector<1x8x64xf32> to vector<8x64xf32>
    %457 = vector.shape_cast %454 : vector<8x64xf32> to vector<1x8x64xf32>
    tpu.vector_store %arg18[%c0_266, %c8_267, %c128_268], %457 {strides = array<i32>} : memref<2x24x256xf32, #tpu.memory_space<vmem>>, vector<1x8x64xf32>,
    %458 = vector.extract_strided_slice %453 {offsets = [8, 0], sizes = [8, 64], strides = [1, 1]} : vector<16x64xf32> to vector<8x64xf32>
    %c1_269 = arith.constant 1 : index
    %c8_270 = arith.constant 8 : index
    %c128_271 = arith.constant 128 : index
    %459 = vector.load %arg18[%c1_269, %c8_270, %c128_271] : memref<2x24x256xf32, #tpu.memory_space<vmem>>, vector<1x8x64xf32>
    %460 = vector.shape_cast %459 : vector<1x8x64xf32> to vector<8x64xf32>
    %461 = vector.shape_cast %458 : vector<8x64xf32> to vector<1x8x64xf32>
    tpu.vector_store %arg18[%c1_269, %c8_270, %c128_271], %461 {strides = array<i32>} : memref<2x24x256xf32, #tpu.memory_space<vmem>>, vector<1x8x64xf32>,
    %cst_272 = arith.constant 0.000000e+00 : f32
    %462 = vector.broadcast %cst_272 : f32 to vector<8x64xf32>
    %cst_273 = arith.constant 0.000000e+00 : f32
    %463 = vector.broadcast %cst_273 : f32 to vector<8x64xf32>
    %cst_274 = arith.constant 0.000000e+00 : f32
    %464 = vector.broadcast %cst_274 : f32 to vector<8x64xf32>
    %cst_275 = arith.constant 0.000000e+00 : f32
    %465 = vector.broadcast %cst_275 : f32 to vector<8x64xf32>
    %c0_276 = arith.constant 0 : index
    %c7_277 = arith.constant 7 : index
    %c127_278 = arith.constant 127 : index
    %466 = vector.load %arg18[%c0_276, %c7_277, %c127_278] : memref<2x24x256xf32, #tpu.memory_space<vmem>>, vector<1x8x64xf32>
    %467 = vector.shape_cast %466 : vector<1x8x64xf32> to vector<8x64xf32>
    %c0_279 = arith.constant 0 : index
    %468 = memref.load %arg5[%c0_279] : memref<72xf32, #tpu.memory_space<smem>>
    %469 = vector.broadcast %468 : f32 to vector<8x64xf32>
    %470 = arith.mulf %469, %467 : vector<8x64xf32>
    %471 = arith.addf %462, %470 : vector<8x64xf32>
    %c18_280 = arith.constant 18 : index
    %472 = memref.load %arg5[%c18_280] : memref<72xf32, #tpu.memory_space<smem>>
    %473 = vector.broadcast %472 : f32 to vector<8x64xf32>
    %474 = arith.mulf %473, %467 : vector<8x64xf32>
    %475 = arith.addf %463, %474 : vector<8x64xf32>
    %c36 = arith.constant 36 : index
    %476 = memref.load %arg5[%c36] : memref<72xf32, #tpu.memory_space<smem>>
    %477 = vector.broadcast %476 : f32 to vector<8x64xf32>
    %478 = arith.mulf %477, %467 : vector<8x64xf32>
    %479 = arith.addf %464, %478 : vector<8x64xf32>
    %c54 = arith.constant 54 : index
    %480 = memref.load %arg5[%c54] : memref<72xf32, #tpu.memory_space<smem>>
    %481 = vector.broadcast %480 : f32 to vector<8x64xf32>
    %482 = arith.mulf %481, %467 : vector<8x64xf32>
    %483 = arith.addf %465, %482 : vector<8x64xf32>
    %c0_281 = arith.constant 0 : index
    %c7_282 = arith.constant 7 : index
    %c128_283 = arith.constant 128 : index
    %484 = vector.load %arg18[%c0_281, %c7_282, %c128_283] : memref<2x24x256xf32, #tpu.memory_space<vmem>>, vector<1x8x64xf32>
    %485 = vector.shape_cast %484 : vector<1x8x64xf32> to vector<8x64xf32>
    %c1_284 = arith.constant 1 : index
    %486 = memref.load %arg5[%c1_284] : memref<72xf32, #tpu.memory_space<smem>>
    %487 = vector.broadcast %486 : f32 to vector<8x64xf32>
    %488 = arith.mulf %487, %485 : vector<8x64xf32>
    %489 = arith.addf %471, %488 : vector<8x64xf32>
    %c19_285 = arith.constant 19 : index
    %490 = memref.load %arg5[%c19_285] : memref<72xf32, #tpu.memory_space<smem>>
    %491 = vector.broadcast %490 : f32 to vector<8x64xf32>
    %492 = arith.mulf %491, %485 : vector<8x64xf32>
    %493 = arith.addf %475, %492 : vector<8x64xf32>
    %c37 = arith.constant 37 : index
    %494 = memref.load %arg5[%c37] : memref<72xf32, #tpu.memory_space<smem>>
    %495 = vector.broadcast %494 : f32 to vector<8x64xf32>
    %496 = arith.mulf %495, %485 : vector<8x64xf32>
    %497 = arith.addf %479, %496 : vector<8x64xf32>
    %c55 = arith.constant 55 : index
    %498 = memref.load %arg5[%c55] : memref<72xf32, #tpu.memory_space<smem>>
    %499 = vector.broadcast %498 : f32 to vector<8x64xf32>
    %500 = arith.mulf %499, %485 : vector<8x64xf32>
    %501 = arith.addf %483, %500 : vector<8x64xf32>
    %c0_286 = arith.constant 0 : index
    %c7_287 = arith.constant 7 : index
    %c129_288 = arith.constant 129 : index
    %502 = vector.load %arg18[%c0_286, %c7_287, %c129_288] : memref<2x24x256xf32, #tpu.memory_space<vmem>>, vector<1x8x64xf32>
    %503 = vector.shape_cast %502 : vector<1x8x64xf32> to vector<8x64xf32>
    %c2_289 = arith.constant 2 : index
    %504 = memref.load %arg5[%c2_289] : memref<72xf32, #tpu.memory_space<smem>>
    %505 = vector.broadcast %504 : f32 to vector<8x64xf32>
    %506 = arith.mulf %505, %503 : vector<8x64xf32>
    %507 = arith.addf %489, %506 : vector<8x64xf32>
    %c20_290 = arith.constant 20 : index
    %508 = memref.load %arg5[%c20_290] : memref<72xf32, #tpu.memory_space<smem>>
    %509 = vector.broadcast %508 : f32 to vector<8x64xf32>
    %510 = arith.mulf %509, %503 : vector<8x64xf32>
    %511 = arith.addf %493, %510 : vector<8x64xf32>
    %c38 = arith.constant 38 : index
    %512 = memref.load %arg5[%c38] : memref<72xf32, #tpu.memory_space<smem>>
    %513 = vector.broadcast %512 : f32 to vector<8x64xf32>
    %514 = arith.mulf %513, %503 : vector<8x64xf32>
    %515 = arith.addf %497, %514 : vector<8x64xf32>
    %c56 = arith.constant 56 : index
    %516 = memref.load %arg5[%c56] : memref<72xf32, #tpu.memory_space<smem>>
    %517 = vector.broadcast %516 : f32 to vector<8x64xf32>
    %518 = arith.mulf %517, %503 : vector<8x64xf32>
    %519 = arith.addf %501, %518 : vector<8x64xf32>
    %c0_291 = arith.constant 0 : index
    %c8_292 = arith.constant 8 : index
    %c127_293 = arith.constant 127 : index
    %520 = vector.load %arg18[%c0_291, %c8_292, %c127_293] : memref<2x24x256xf32, #tpu.memory_space<vmem>>, vector<1x8x64xf32>
    %521 = vector.shape_cast %520 : vector<1x8x64xf32> to vector<8x64xf32>
    %c3_294 = arith.constant 3 : index
    %522 = memref.load %arg5[%c3_294] : memref<72xf32, #tpu.memory_space<smem>>
    %523 = vector.broadcast %522 : f32 to vector<8x64xf32>
    %524 = arith.mulf %523, %521 : vector<8x64xf32>
    %525 = arith.addf %507, %524 : vector<8x64xf32>
    %c21_295 = arith.constant 21 : index
    %526 = memref.load %arg5[%c21_295] : memref<72xf32, #tpu.memory_space<smem>>
    %527 = vector.broadcast %526 : f32 to vector<8x64xf32>
    %528 = arith.mulf %527, %521 : vector<8x64xf32>
    %529 = arith.addf %511, %528 : vector<8x64xf32>
    %c39 = arith.constant 39 : index
    %530 = memref.load %arg5[%c39] : memref<72xf32, #tpu.memory_space<smem>>
    %531 = vector.broadcast %530 : f32 to vector<8x64xf32>
    %532 = arith.mulf %531, %521 : vector<8x64xf32>
    %533 = arith.addf %515, %532 : vector<8x64xf32>
    %c57 = arith.constant 57 : index
    %534 = memref.load %arg5[%c57] : memref<72xf32, #tpu.memory_space<smem>>
    %535 = vector.broadcast %534 : f32 to vector<8x64xf32>
    %536 = arith.mulf %535, %521 : vector<8x64xf32>
    %537 = arith.addf %519, %536 : vector<8x64xf32>
    %c0_296 = arith.constant 0 : index
    %c8_297 = arith.constant 8 : index
    %c128_298 = arith.constant 128 : index
    %538 = vector.load %arg18[%c0_296, %c8_297, %c128_298] : memref<2x24x256xf32, #tpu.memory_space<vmem>>, vector<1x8x64xf32>
    %539 = vector.shape_cast %538 : vector<1x8x64xf32> to vector<8x64xf32>
    %c4_299 = arith.constant 4 : index
    %540 = memref.load %arg5[%c4_299] : memref<72xf32, #tpu.memory_space<smem>>
    %541 = vector.broadcast %540 : f32 to vector<8x64xf32>
    %542 = arith.mulf %541, %539 : vector<8x64xf32>
    %543 = arith.addf %525, %542 : vector<8x64xf32>
    %c22_300 = arith.constant 22 : index
    %544 = memref.load %arg5[%c22_300] : memref<72xf32, #tpu.memory_space<smem>>
    %545 = vector.broadcast %544 : f32 to vector<8x64xf32>
    %546 = arith.mulf %545, %539 : vector<8x64xf32>
    %547 = arith.addf %529, %546 : vector<8x64xf32>
    %c40 = arith.constant 40 : index
    %548 = memref.load %arg5[%c40] : memref<72xf32, #tpu.memory_space<smem>>
    %549 = vector.broadcast %548 : f32 to vector<8x64xf32>
    %550 = arith.mulf %549, %539 : vector<8x64xf32>
    %551 = arith.addf %533, %550 : vector<8x64xf32>
    %c58 = arith.constant 58 : index
    %552 = memref.load %arg5[%c58] : memref<72xf32, #tpu.memory_space<smem>>
    %553 = vector.broadcast %552 : f32 to vector<8x64xf32>
    %554 = arith.mulf %553, %539 : vector<8x64xf32>
    %555 = arith.addf %537, %554 : vector<8x64xf32>
    %c0_301 = arith.constant 0 : index
    %c8_302 = arith.constant 8 : index
    %c129_303 = arith.constant 129 : index
    %556 = vector.load %arg18[%c0_301, %c8_302, %c129_303] : memref<2x24x256xf32, #tpu.memory_space<vmem>>, vector<1x8x64xf32>
    %557 = vector.shape_cast %556 : vector<1x8x64xf32> to vector<8x64xf32>
    %c5_304 = arith.constant 5 : index
    %558 = memref.load %arg5[%c5_304] : memref<72xf32, #tpu.memory_space<smem>>
    %559 = vector.broadcast %558 : f32 to vector<8x64xf32>
    %560 = arith.mulf %559, %557 : vector<8x64xf32>
    %561 = arith.addf %543, %560 : vector<8x64xf32>
    %c23_305 = arith.constant 23 : index
    %562 = memref.load %arg5[%c23_305] : memref<72xf32, #tpu.memory_space<smem>>
    %563 = vector.broadcast %562 : f32 to vector<8x64xf32>
    %564 = arith.mulf %563, %557 : vector<8x64xf32>
    %565 = arith.addf %547, %564 : vector<8x64xf32>
    %c41 = arith.constant 41 : index
    %566 = memref.load %arg5[%c41] : memref<72xf32, #tpu.memory_space<smem>>
    %567 = vector.broadcast %566 : f32 to vector<8x64xf32>
    %568 = arith.mulf %567, %557 : vector<8x64xf32>
    %569 = arith.addf %551, %568 : vector<8x64xf32>
    %c59 = arith.constant 59 : index
    %570 = memref.load %arg5[%c59] : memref<72xf32, #tpu.memory_space<smem>>
    %571 = vector.broadcast %570 : f32 to vector<8x64xf32>
    %572 = arith.mulf %571, %557 : vector<8x64xf32>
    %573 = arith.addf %555, %572 : vector<8x64xf32>
    %c0_306 = arith.constant 0 : index
    %c9_307 = arith.constant 9 : index
    %c127_308 = arith.constant 127 : index
    %574 = vector.load %arg18[%c0_306, %c9_307, %c127_308] : memref<2x24x256xf32, #tpu.memory_space<vmem>>, vector<1x8x64xf32>
    %575 = vector.shape_cast %574 : vector<1x8x64xf32> to vector<8x64xf32>
    %c6_309 = arith.constant 6 : index
    %576 = memref.load %arg5[%c6_309] : memref<72xf32, #tpu.memory_space<smem>>
    %577 = vector.broadcast %576 : f32 to vector<8x64xf32>
    %578 = arith.mulf %577, %575 : vector<8x64xf32>
    %579 = arith.addf %561, %578 : vector<8x64xf32>
    %c24_310 = arith.constant 24 : index
    %580 = memref.load %arg5[%c24_310] : memref<72xf32, #tpu.memory_space<smem>>
    %581 = vector.broadcast %580 : f32 to vector<8x64xf32>
    %582 = arith.mulf %581, %575 : vector<8x64xf32>
    %583 = arith.addf %565, %582 : vector<8x64xf32>
    %c42 = arith.constant 42 : index
    %584 = memref.load %arg5[%c42] : memref<72xf32, #tpu.memory_space<smem>>
    %585 = vector.broadcast %584 : f32 to vector<8x64xf32>
    %586 = arith.mulf %585, %575 : vector<8x64xf32>
    %587 = arith.addf %569, %586 : vector<8x64xf32>
    %c60 = arith.constant 60 : index
    %588 = memref.load %arg5[%c60] : memref<72xf32, #tpu.memory_space<smem>>
    %589 = vector.broadcast %588 : f32 to vector<8x64xf32>
    %590 = arith.mulf %589, %575 : vector<8x64xf32>
    %591 = arith.addf %573, %590 : vector<8x64xf32>
    %c0_311 = arith.constant 0 : index
    %c9_312 = arith.constant 9 : index
    %c128_313 = arith.constant 128 : index
    %592 = vector.load %arg18[%c0_311, %c9_312, %c128_313] : memref<2x24x256xf32, #tpu.memory_space<vmem>>, vector<1x8x64xf32>
    %593 = vector.shape_cast %592 : vector<1x8x64xf32> to vector<8x64xf32>
    %c7_314 = arith.constant 7 : index
    %594 = memref.load %arg5[%c7_314] : memref<72xf32, #tpu.memory_space<smem>>
    %595 = vector.broadcast %594 : f32 to vector<8x64xf32>
    %596 = arith.mulf %595, %593 : vector<8x64xf32>
    %597 = arith.addf %579, %596 : vector<8x64xf32>
    %c25_315 = arith.constant 25 : index
    %598 = memref.load %arg5[%c25_315] : memref<72xf32, #tpu.memory_space<smem>>
    %599 = vector.broadcast %598 : f32 to vector<8x64xf32>
    %600 = arith.mulf %599, %593 : vector<8x64xf32>
    %601 = arith.addf %583, %600 : vector<8x64xf32>
    %c43 = arith.constant 43 : index
    %602 = memref.load %arg5[%c43] : memref<72xf32, #tpu.memory_space<smem>>
    %603 = vector.broadcast %602 : f32 to vector<8x64xf32>
    %604 = arith.mulf %603, %593 : vector<8x64xf32>
    %605 = arith.addf %587, %604 : vector<8x64xf32>
    %c61 = arith.constant 61 : index
    %606 = memref.load %arg5[%c61] : memref<72xf32, #tpu.memory_space<smem>>
    %607 = vector.broadcast %606 : f32 to vector<8x64xf32>
    %608 = arith.mulf %607, %593 : vector<8x64xf32>
    %609 = arith.addf %591, %608 : vector<8x64xf32>
    %c0_316 = arith.constant 0 : index
    %c9_317 = arith.constant 9 : index
    %c129_318 = arith.constant 129 : index
    %610 = vector.load %arg18[%c0_316, %c9_317, %c129_318] : memref<2x24x256xf32, #tpu.memory_space<vmem>>, vector<1x8x64xf32>
    %611 = vector.shape_cast %610 : vector<1x8x64xf32> to vector<8x64xf32>
    %c8_319 = arith.constant 8 : index
    %612 = memref.load %arg5[%c8_319] : memref<72xf32, #tpu.memory_space<smem>>
    %613 = vector.broadcast %612 : f32 to vector<8x64xf32>
    %614 = arith.mulf %613, %611 : vector<8x64xf32>
    %615 = arith.addf %597, %614 : vector<8x64xf32>
    %c26_320 = arith.constant 26 : index
    %616 = memref.load %arg5[%c26_320] : memref<72xf32, #tpu.memory_space<smem>>
    %617 = vector.broadcast %616 : f32 to vector<8x64xf32>
    %618 = arith.mulf %617, %611 : vector<8x64xf32>
    %619 = arith.addf %601, %618 : vector<8x64xf32>
    %c44 = arith.constant 44 : index
    %620 = memref.load %arg5[%c44] : memref<72xf32, #tpu.memory_space<smem>>
    %621 = vector.broadcast %620 : f32 to vector<8x64xf32>
    %622 = arith.mulf %621, %611 : vector<8x64xf32>
    %623 = arith.addf %605, %622 : vector<8x64xf32>
    %c62 = arith.constant 62 : index
    %624 = memref.load %arg5[%c62] : memref<72xf32, #tpu.memory_space<smem>>
    %625 = vector.broadcast %624 : f32 to vector<8x64xf32>
    %626 = arith.mulf %625, %611 : vector<8x64xf32>
    %627 = arith.addf %609, %626 : vector<8x64xf32>
    %c1_321 = arith.constant 1 : index
    %c7_322 = arith.constant 7 : index
    %c127_323 = arith.constant 127 : index
    %628 = vector.load %arg18[%c1_321, %c7_322, %c127_323] : memref<2x24x256xf32, #tpu.memory_space<vmem>>, vector<1x8x64xf32>
    %629 = vector.shape_cast %628 : vector<1x8x64xf32> to vector<8x64xf32>
    %c9_324 = arith.constant 9 : index
    %630 = memref.load %arg5[%c9_324] : memref<72xf32, #tpu.memory_space<smem>>
    %631 = vector.broadcast %630 : f32 to vector<8x64xf32>
    %632 = arith.mulf %631, %629 : vector<8x64xf32>
    %633 = arith.addf %615, %632 : vector<8x64xf32>
    %c27_325 = arith.constant 27 : index
    %634 = memref.load %arg5[%c27_325] : memref<72xf32, #tpu.memory_space<smem>>
    %635 = vector.broadcast %634 : f32 to vector<8x64xf32>
    %636 = arith.mulf %635, %629 : vector<8x64xf32>
    %637 = arith.addf %619, %636 : vector<8x64xf32>
    %c45 = arith.constant 45 : index
    %638 = memref.load %arg5[%c45] : memref<72xf32, #tpu.memory_space<smem>>
    %639 = vector.broadcast %638 : f32 to vector<8x64xf32>
    %640 = arith.mulf %639, %629 : vector<8x64xf32>
    %641 = arith.addf %623, %640 : vector<8x64xf32>
    %c63 = arith.constant 63 : index
    %642 = memref.load %arg5[%c63] : memref<72xf32, #tpu.memory_space<smem>>
    %643 = vector.broadcast %642 : f32 to vector<8x64xf32>
    %644 = arith.mulf %643, %629 : vector<8x64xf32>
    %645 = arith.addf %627, %644 : vector<8x64xf32>
    %c1_326 = arith.constant 1 : index
    %c7_327 = arith.constant 7 : index
    %c128_328 = arith.constant 128 : index
    %646 = vector.load %arg18[%c1_326, %c7_327, %c128_328] : memref<2x24x256xf32, #tpu.memory_space<vmem>>, vector<1x8x64xf32>
    %647 = vector.shape_cast %646 : vector<1x8x64xf32> to vector<8x64xf32>
    %c10_329 = arith.constant 10 : index
    %648 = memref.load %arg5[%c10_329] : memref<72xf32, #tpu.memory_space<smem>>
    %649 = vector.broadcast %648 : f32 to vector<8x64xf32>
    %650 = arith.mulf %649, %647 : vector<8x64xf32>
    %651 = arith.addf %633, %650 : vector<8x64xf32>
    %c28_330 = arith.constant 28 : index
    %652 = memref.load %arg5[%c28_330] : memref<72xf32, #tpu.memory_space<smem>>
    %653 = vector.broadcast %652 : f32 to vector<8x64xf32>
    %654 = arith.mulf %653, %647 : vector<8x64xf32>
    %655 = arith.addf %637, %654 : vector<8x64xf32>
    %c46 = arith.constant 46 : index
    %656 = memref.load %arg5[%c46] : memref<72xf32, #tpu.memory_space<smem>>
    %657 = vector.broadcast %656 : f32 to vector<8x64xf32>
    %658 = arith.mulf %657, %647 : vector<8x64xf32>
    %659 = arith.addf %641, %658 : vector<8x64xf32>
    %c64 = arith.constant 64 : index
    %660 = memref.load %arg5[%c64] : memref<72xf32, #tpu.memory_space<smem>>
    %661 = vector.broadcast %660 : f32 to vector<8x64xf32>
    %662 = arith.mulf %661, %647 : vector<8x64xf32>
    %663 = arith.addf %645, %662 : vector<8x64xf32>
    %c1_331 = arith.constant 1 : index
    %c7_332 = arith.constant 7 : index
    %c129_333 = arith.constant 129 : index
    %664 = vector.load %arg18[%c1_331, %c7_332, %c129_333] : memref<2x24x256xf32, #tpu.memory_space<vmem>>, vector<1x8x64xf32>
    %665 = vector.shape_cast %664 : vector<1x8x64xf32> to vector<8x64xf32>
    %c11_334 = arith.constant 11 : index
    %666 = memref.load %arg5[%c11_334] : memref<72xf32, #tpu.memory_space<smem>>
    %667 = vector.broadcast %666 : f32 to vector<8x64xf32>
    %668 = arith.mulf %667, %665 : vector<8x64xf32>
    %669 = arith.addf %651, %668 : vector<8x64xf32>
    %c29_335 = arith.constant 29 : index
    %670 = memref.load %arg5[%c29_335] : memref<72xf32, #tpu.memory_space<smem>>
    %671 = vector.broadcast %670 : f32 to vector<8x64xf32>
    %672 = arith.mulf %671, %665 : vector<8x64xf32>
    %673 = arith.addf %655, %672 : vector<8x64xf32>
    %c47 = arith.constant 47 : index
    %674 = memref.load %arg5[%c47] : memref<72xf32, #tpu.memory_space<smem>>
    %675 = vector.broadcast %674 : f32 to vector<8x64xf32>
    %676 = arith.mulf %675, %665 : vector<8x64xf32>
    %677 = arith.addf %659, %676 : vector<8x64xf32>
    %c65 = arith.constant 65 : index
    %678 = memref.load %arg5[%c65] : memref<72xf32, #tpu.memory_space<smem>>
    %679 = vector.broadcast %678 : f32 to vector<8x64xf32>
    %680 = arith.mulf %679, %665 : vector<8x64xf32>
    %681 = arith.addf %663, %680 : vector<8x64xf32>
    %c1_336 = arith.constant 1 : index
    %c8_337 = arith.constant 8 : index
    %c127_338 = arith.constant 127 : index
    %682 = vector.load %arg18[%c1_336, %c8_337, %c127_338] : memref<2x24x256xf32, #tpu.memory_space<vmem>>, vector<1x8x64xf32>
    %683 = vector.shape_cast %682 : vector<1x8x64xf32> to vector<8x64xf32>
    %c12_339 = arith.constant 12 : index
    %684 = memref.load %arg5[%c12_339] : memref<72xf32, #tpu.memory_space<smem>>
    %685 = vector.broadcast %684 : f32 to vector<8x64xf32>
    %686 = arith.mulf %685, %683 : vector<8x64xf32>
    %687 = arith.addf %669, %686 : vector<8x64xf32>
    %c30_340 = arith.constant 30 : index
    %688 = memref.load %arg5[%c30_340] : memref<72xf32, #tpu.memory_space<smem>>
    %689 = vector.broadcast %688 : f32 to vector<8x64xf32>
    %690 = arith.mulf %689, %683 : vector<8x64xf32>
    %691 = arith.addf %673, %690 : vector<8x64xf32>
    %c48 = arith.constant 48 : index
    %692 = memref.load %arg5[%c48] : memref<72xf32, #tpu.memory_space<smem>>
    %693 = vector.broadcast %692 : f32 to vector<8x64xf32>
    %694 = arith.mulf %693, %683 : vector<8x64xf32>
    %695 = arith.addf %677, %694 : vector<8x64xf32>
    %c66 = arith.constant 66 : index
    %696 = memref.load %arg5[%c66] : memref<72xf32, #tpu.memory_space<smem>>
    %697 = vector.broadcast %696 : f32 to vector<8x64xf32>
    %698 = arith.mulf %697, %683 : vector<8x64xf32>
    %699 = arith.addf %681, %698 : vector<8x64xf32>
    %c1_341 = arith.constant 1 : index
    %c8_342 = arith.constant 8 : index
    %c128_343 = arith.constant 128 : index
    %700 = vector.load %arg18[%c1_341, %c8_342, %c128_343] : memref<2x24x256xf32, #tpu.memory_space<vmem>>, vector<1x8x64xf32>
    %701 = vector.shape_cast %700 : vector<1x8x64xf32> to vector<8x64xf32>
    %c13_344 = arith.constant 13 : index
    %702 = memref.load %arg5[%c13_344] : memref<72xf32, #tpu.memory_space<smem>>
    %703 = vector.broadcast %702 : f32 to vector<8x64xf32>
    %704 = arith.mulf %703, %701 : vector<8x64xf32>
    %705 = arith.addf %687, %704 : vector<8x64xf32>
    %c31_345 = arith.constant 31 : index
    %706 = memref.load %arg5[%c31_345] : memref<72xf32, #tpu.memory_space<smem>>
    %707 = vector.broadcast %706 : f32 to vector<8x64xf32>
    %708 = arith.mulf %707, %701 : vector<8x64xf32>
    %709 = arith.addf %691, %708 : vector<8x64xf32>
    %c49 = arith.constant 49 : index
    %710 = memref.load %arg5[%c49] : memref<72xf32, #tpu.memory_space<smem>>
    %711 = vector.broadcast %710 : f32 to vector<8x64xf32>
    %712 = arith.mulf %711, %701 : vector<8x64xf32>
    %713 = arith.addf %695, %712 : vector<8x64xf32>
    %c67 = arith.constant 67 : index
    %714 = memref.load %arg5[%c67] : memref<72xf32, #tpu.memory_space<smem>>
    %715 = vector.broadcast %714 : f32 to vector<8x64xf32>
    %716 = arith.mulf %715, %701 : vector<8x64xf32>
    %717 = arith.addf %699, %716 : vector<8x64xf32>
    %c1_346 = arith.constant 1 : index
    %c8_347 = arith.constant 8 : index
    %c129_348 = arith.constant 129 : index
    %718 = vector.load %arg18[%c1_346, %c8_347, %c129_348] : memref<2x24x256xf32, #tpu.memory_space<vmem>>, vector<1x8x64xf32>
    %719 = vector.shape_cast %718 : vector<1x8x64xf32> to vector<8x64xf32>
    %c14_349 = arith.constant 14 : index
    %720 = memref.load %arg5[%c14_349] : memref<72xf32, #tpu.memory_space<smem>>
    %721 = vector.broadcast %720 : f32 to vector<8x64xf32>
    %722 = arith.mulf %721, %719 : vector<8x64xf32>
    %723 = arith.addf %705, %722 : vector<8x64xf32>
    %c32_350 = arith.constant 32 : index
    %724 = memref.load %arg5[%c32_350] : memref<72xf32, #tpu.memory_space<smem>>
    %725 = vector.broadcast %724 : f32 to vector<8x64xf32>
    %726 = arith.mulf %725, %719 : vector<8x64xf32>
    %727 = arith.addf %709, %726 : vector<8x64xf32>
    %c50 = arith.constant 50 : index
    %728 = memref.load %arg5[%c50] : memref<72xf32, #tpu.memory_space<smem>>
    %729 = vector.broadcast %728 : f32 to vector<8x64xf32>
    %730 = arith.mulf %729, %719 : vector<8x64xf32>
    %731 = arith.addf %713, %730 : vector<8x64xf32>
    %c68 = arith.constant 68 : index
    %732 = memref.load %arg5[%c68] : memref<72xf32, #tpu.memory_space<smem>>
    %733 = vector.broadcast %732 : f32 to vector<8x64xf32>
    %734 = arith.mulf %733, %719 : vector<8x64xf32>
    %735 = arith.addf %717, %734 : vector<8x64xf32>
    %c1_351 = arith.constant 1 : index
    %c9_352 = arith.constant 9 : index
    %c127_353 = arith.constant 127 : index
    %736 = vector.load %arg18[%c1_351, %c9_352, %c127_353] : memref<2x24x256xf32, #tpu.memory_space<vmem>>, vector<1x8x64xf32>
    %737 = vector.shape_cast %736 : vector<1x8x64xf32> to vector<8x64xf32>
    %c15_354 = arith.constant 15 : index
    %738 = memref.load %arg5[%c15_354] : memref<72xf32, #tpu.memory_space<smem>>
    %739 = vector.broadcast %738 : f32 to vector<8x64xf32>
    %740 = arith.mulf %739, %737 : vector<8x64xf32>
    %741 = arith.addf %723, %740 : vector<8x64xf32>
    %c33_355 = arith.constant 33 : index
    %742 = memref.load %arg5[%c33_355] : memref<72xf32, #tpu.memory_space<smem>>
    %743 = vector.broadcast %742 : f32 to vector<8x64xf32>
    %744 = arith.mulf %743, %737 : vector<8x64xf32>
    %745 = arith.addf %727, %744 : vector<8x64xf32>
    %c51 = arith.constant 51 : index
    %746 = memref.load %arg5[%c51] : memref<72xf32, #tpu.memory_space<smem>>
    %747 = vector.broadcast %746 : f32 to vector<8x64xf32>
    %748 = arith.mulf %747, %737 : vector<8x64xf32>
    %749 = arith.addf %731, %748 : vector<8x64xf32>
    %c69 = arith.constant 69 : index
    %750 = memref.load %arg5[%c69] : memref<72xf32, #tpu.memory_space<smem>>
    %751 = vector.broadcast %750 : f32 to vector<8x64xf32>
    %752 = arith.mulf %751, %737 : vector<8x64xf32>
    %753 = arith.addf %735, %752 : vector<8x64xf32>
    %c1_356 = arith.constant 1 : index
    %c9_357 = arith.constant 9 : index
    %c128_358 = arith.constant 128 : index
    %754 = vector.load %arg18[%c1_356, %c9_357, %c128_358] : memref<2x24x256xf32, #tpu.memory_space<vmem>>, vector<1x8x64xf32>
    %755 = vector.shape_cast %754 : vector<1x8x64xf32> to vector<8x64xf32>
    %c16_359 = arith.constant 16 : index
    %756 = memref.load %arg5[%c16_359] : memref<72xf32, #tpu.memory_space<smem>>
    %757 = vector.broadcast %756 : f32 to vector<8x64xf32>
    %758 = arith.mulf %757, %755 : vector<8x64xf32>
    %759 = arith.addf %741, %758 : vector<8x64xf32>
    %c34_360 = arith.constant 34 : index
    %760 = memref.load %arg5[%c34_360] : memref<72xf32, #tpu.memory_space<smem>>
    %761 = vector.broadcast %760 : f32 to vector<8x64xf32>
    %762 = arith.mulf %761, %755 : vector<8x64xf32>
    %763 = arith.addf %745, %762 : vector<8x64xf32>
    %c52 = arith.constant 52 : index
    %764 = memref.load %arg5[%c52] : memref<72xf32, #tpu.memory_space<smem>>
    %765 = vector.broadcast %764 : f32 to vector<8x64xf32>
    %766 = arith.mulf %765, %755 : vector<8x64xf32>
    %767 = arith.addf %749, %766 : vector<8x64xf32>
    %c70 = arith.constant 70 : index
    %768 = memref.load %arg5[%c70] : memref<72xf32, #tpu.memory_space<smem>>
    %769 = vector.broadcast %768 : f32 to vector<8x64xf32>
    %770 = arith.mulf %769, %755 : vector<8x64xf32>
    %771 = arith.addf %753, %770 : vector<8x64xf32>
    %c1_361 = arith.constant 1 : index
    %c9_362 = arith.constant 9 : index
    %c129_363 = arith.constant 129 : index
    %772 = vector.load %arg18[%c1_361, %c9_362, %c129_363] : memref<2x24x256xf32, #tpu.memory_space<vmem>>, vector<1x8x64xf32>
    %773 = vector.shape_cast %772 : vector<1x8x64xf32> to vector<8x64xf32>
    %c17_364 = arith.constant 17 : index
    %774 = memref.load %arg5[%c17_364] : memref<72xf32, #tpu.memory_space<smem>>
    %775 = vector.broadcast %774 : f32 to vector<8x64xf32>
    %776 = arith.mulf %775, %773 : vector<8x64xf32>
    %777 = arith.addf %759, %776 : vector<8x64xf32>
    %c35_365 = arith.constant 35 : index
    %778 = memref.load %arg5[%c35_365] : memref<72xf32, #tpu.memory_space<smem>>
    %779 = vector.broadcast %778 : f32 to vector<8x64xf32>
    %780 = arith.mulf %779, %773 : vector<8x64xf32>
    %781 = arith.addf %763, %780 : vector<8x64xf32>
    %c53 = arith.constant 53 : index
    %782 = memref.load %arg5[%c53] : memref<72xf32, #tpu.memory_space<smem>>
    %783 = vector.broadcast %782 : f32 to vector<8x64xf32>
    %784 = arith.mulf %783, %773 : vector<8x64xf32>
    %785 = arith.addf %767, %784 : vector<8x64xf32>
    %c71 = arith.constant 71 : index
    %786 = memref.load %arg5[%c71] : memref<72xf32, #tpu.memory_space<smem>>
    %787 = vector.broadcast %786 : f32 to vector<8x64xf32>
    %788 = arith.mulf %787, %773 : vector<8x64xf32>
    %789 = arith.addf %771, %788 : vector<8x64xf32>
    %c0_366 = arith.constant 0 : index
    %790 = memref.load %arg6[%c0_366] : memref<4xf32, #tpu.memory_space<smem>>
    %791 = vector.broadcast %790 : f32 to vector<8x64xf32>
    %792 = arith.addf %777, %791 : vector<8x64xf32>
    %cst_367 = arith.constant 0.000000e+00 : f32
    %793 = vector.broadcast %cst_367 : f32 to vector<8x64xf32>
    %794 = arith.maximumf %792, %793 : vector<8x64xf32>
    %c1_368 = arith.constant 1 : index
    %795 = memref.load %arg6[%c1_368] : memref<4xf32, #tpu.memory_space<smem>>
    %796 = vector.broadcast %795 : f32 to vector<8x64xf32>
    %797 = arith.addf %781, %796 : vector<8x64xf32>
    %cst_369 = arith.constant 0.000000e+00 : f32
    %798 = vector.broadcast %cst_369 : f32 to vector<8x64xf32>
    %799 = arith.maximumf %797, %798 : vector<8x64xf32>
    %c2_370 = arith.constant 2 : index
    %800 = memref.load %arg6[%c2_370] : memref<4xf32, #tpu.memory_space<smem>>
    %801 = vector.broadcast %800 : f32 to vector<8x64xf32>
    %802 = arith.addf %785, %801 : vector<8x64xf32>
    %cst_371 = arith.constant 0.000000e+00 : f32
    %803 = vector.broadcast %cst_371 : f32 to vector<8x64xf32>
    %804 = arith.maximumf %802, %803 : vector<8x64xf32>
    %c3_372 = arith.constant 3 : index
    %805 = memref.load %arg6[%c3_372] : memref<4xf32, #tpu.memory_space<smem>>
    %806 = vector.broadcast %805 : f32 to vector<8x64xf32>
    %807 = arith.addf %789, %806 : vector<8x64xf32>
    %cst_373 = arith.constant 0.000000e+00 : f32
    %808 = vector.broadcast %cst_373 : f32 to vector<8x64xf32>
    %809 = arith.maximumf %807, %808 : vector<8x64xf32>
    %c0_374 = arith.constant 0 : index
    %c8_375 = arith.constant 8 : index
    %c128_376 = arith.constant 128 : index
    %810 = vector.load %arg19[%c0_374, %c8_375, %c128_376] : memref<4x24x256xf32, #tpu.memory_space<vmem>>, vector<1x8x64xf32>
    %811 = vector.shape_cast %810 : vector<1x8x64xf32> to vector<8x64xf32>
    %812 = vector.shape_cast %794 : vector<8x64xf32> to vector<1x8x64xf32>
    tpu.vector_store %arg19[%c0_374, %c8_375, %c128_376], %812 {strides = array<i32>} : memref<4x24x256xf32, #tpu.memory_space<vmem>>, vector<1x8x64xf32>,
    %c1_377 = arith.constant 1 : index
    %c8_378 = arith.constant 8 : index
    %c128_379 = arith.constant 128 : index
    %813 = vector.load %arg19[%c1_377, %c8_378, %c128_379] : memref<4x24x256xf32, #tpu.memory_space<vmem>>, vector<1x8x64xf32>
    %814 = vector.shape_cast %813 : vector<1x8x64xf32> to vector<8x64xf32>
    %815 = vector.shape_cast %799 : vector<8x64xf32> to vector<1x8x64xf32>
    tpu.vector_store %arg19[%c1_377, %c8_378, %c128_379], %815 {strides = array<i32>} : memref<4x24x256xf32, #tpu.memory_space<vmem>>, vector<1x8x64xf32>,
    %c2_380 = arith.constant 2 : index
    %c8_381 = arith.constant 8 : index
    %c128_382 = arith.constant 128 : index
    %816 = vector.load %arg19[%c2_380, %c8_381, %c128_382] : memref<4x24x256xf32, #tpu.memory_space<vmem>>, vector<1x8x64xf32>
    %817 = vector.shape_cast %816 : vector<1x8x64xf32> to vector<8x64xf32>
    %818 = vector.shape_cast %804 : vector<8x64xf32> to vector<1x8x64xf32>
    tpu.vector_store %arg19[%c2_380, %c8_381, %c128_382], %818 {strides = array<i32>} : memref<4x24x256xf32, #tpu.memory_space<vmem>>, vector<1x8x64xf32>,
    %c3_383 = arith.constant 3 : index
    %c8_384 = arith.constant 8 : index
    %c128_385 = arith.constant 128 : index
    %819 = vector.load %arg19[%c3_383, %c8_384, %c128_385] : memref<4x24x256xf32, #tpu.memory_space<vmem>>, vector<1x8x64xf32>
    %820 = vector.shape_cast %819 : vector<1x8x64xf32> to vector<8x64xf32>
    %821 = vector.shape_cast %809 : vector<8x64xf32> to vector<1x8x64xf32>
    tpu.vector_store %arg19[%c3_383, %c8_384, %c128_385], %821 {strides = array<i32>} : memref<4x24x256xf32, #tpu.memory_space<vmem>>, vector<1x8x64xf32>,
    %cst_386 = arith.constant 0.000000e+00 : f32
    %822 = vector.broadcast %cst_386 : f32 to vector<8x64xf32>
    %cst_387 = arith.constant 0.000000e+00 : f32
    %823 = vector.broadcast %cst_387 : f32 to vector<8x64xf32>
    %cst_388 = arith.constant 0.000000e+00 : f32
    %824 = vector.broadcast %cst_388 : f32 to vector<8x64xf32>
    %cst_389 = arith.constant 0.000000e+00 : f32
    %825 = vector.broadcast %cst_389 : f32 to vector<8x64xf32>
    %c0_390 = arith.constant 0 : index
    %c7_391 = arith.constant 7 : index
    %c127_392 = arith.constant 127 : index
    %826 = vector.load %arg19[%c0_390, %c7_391, %c127_392] : memref<4x24x256xf32, #tpu.memory_space<vmem>>, vector<1x8x64xf32>
    %827 = vector.shape_cast %826 : vector<1x8x64xf32> to vector<8x64xf32>
    %c0_393 = arith.constant 0 : index
    %828 = memref.load %arg7[%c0_393] : memref<144xf32, #tpu.memory_space<smem>>
    %829 = vector.broadcast %828 : f32 to vector<8x64xf32>
    %830 = arith.mulf %829, %827 : vector<8x64xf32>
    %831 = arith.addf %822, %830 : vector<8x64xf32>
    %c36_394 = arith.constant 36 : index
    %832 = memref.load %arg7[%c36_394] : memref<144xf32, #tpu.memory_space<smem>>
    %833 = vector.broadcast %832 : f32 to vector<8x64xf32>
    %834 = arith.mulf %833, %827 : vector<8x64xf32>
    %835 = arith.addf %823, %834 : vector<8x64xf32>
    %c72 = arith.constant 72 : index
    %836 = memref.load %arg7[%c72] : memref<144xf32, #tpu.memory_space<smem>>
    %837 = vector.broadcast %836 : f32 to vector<8x64xf32>
    %838 = arith.mulf %837, %827 : vector<8x64xf32>
    %839 = arith.addf %824, %838 : vector<8x64xf32>
    %c108 = arith.constant 108 : index
    %840 = memref.load %arg7[%c108] : memref<144xf32, #tpu.memory_space<smem>>
    %841 = vector.broadcast %840 : f32 to vector<8x64xf32>
    %842 = arith.mulf %841, %827 : vector<8x64xf32>
    %843 = arith.addf %825, %842 : vector<8x64xf32>
    %c0_395 = arith.constant 0 : index
    %c7_396 = arith.constant 7 : index
    %c128_397 = arith.constant 128 : index
    %844 = vector.load %arg19[%c0_395, %c7_396, %c128_397] : memref<4x24x256xf32, #tpu.memory_space<vmem>>, vector<1x8x64xf32>
    %845 = vector.shape_cast %844 : vector<1x8x64xf32> to vector<8x64xf32>
    %c1_398 = arith.constant 1 : index
    %846 = memref.load %arg7[%c1_398] : memref<144xf32, #tpu.memory_space<smem>>
    %847 = vector.broadcast %846 : f32 to vector<8x64xf32>
    %848 = arith.mulf %847, %845 : vector<8x64xf32>
    %849 = arith.addf %831, %848 : vector<8x64xf32>
    %c37_399 = arith.constant 37 : index
    %850 = memref.load %arg7[%c37_399] : memref<144xf32, #tpu.memory_space<smem>>
    %851 = vector.broadcast %850 : f32 to vector<8x64xf32>
    %852 = arith.mulf %851, %845 : vector<8x64xf32>
    %853 = arith.addf %835, %852 : vector<8x64xf32>
    %c73 = arith.constant 73 : index
    %854 = memref.load %arg7[%c73] : memref<144xf32, #tpu.memory_space<smem>>
    %855 = vector.broadcast %854 : f32 to vector<8x64xf32>
    %856 = arith.mulf %855, %845 : vector<8x64xf32>
    %857 = arith.addf %839, %856 : vector<8x64xf32>
    %c109 = arith.constant 109 : index
    %858 = memref.load %arg7[%c109] : memref<144xf32, #tpu.memory_space<smem>>
    %859 = vector.broadcast %858 : f32 to vector<8x64xf32>
    %860 = arith.mulf %859, %845 : vector<8x64xf32>
    %861 = arith.addf %843, %860 : vector<8x64xf32>
    %c0_400 = arith.constant 0 : index
    %c7_401 = arith.constant 7 : index
    %c129_402 = arith.constant 129 : index
    %862 = vector.load %arg19[%c0_400, %c7_401, %c129_402] : memref<4x24x256xf32, #tpu.memory_space<vmem>>, vector<1x8x64xf32>
    %863 = vector.shape_cast %862 : vector<1x8x64xf32> to vector<8x64xf32>
    %c2_403 = arith.constant 2 : index
    %864 = memref.load %arg7[%c2_403] : memref<144xf32, #tpu.memory_space<smem>>
    %865 = vector.broadcast %864 : f32 to vector<8x64xf32>
    %866 = arith.mulf %865, %863 : vector<8x64xf32>
    %867 = arith.addf %849, %866 : vector<8x64xf32>
    %c38_404 = arith.constant 38 : index
    %868 = memref.load %arg7[%c38_404] : memref<144xf32, #tpu.memory_space<smem>>
    %869 = vector.broadcast %868 : f32 to vector<8x64xf32>
    %870 = arith.mulf %869, %863 : vector<8x64xf32>
    %871 = arith.addf %853, %870 : vector<8x64xf32>
    %c74 = arith.constant 74 : index
    %872 = memref.load %arg7[%c74] : memref<144xf32, #tpu.memory_space<smem>>
    %873 = vector.broadcast %872 : f32 to vector<8x64xf32>
    %874 = arith.mulf %873, %863 : vector<8x64xf32>
    %875 = arith.addf %857, %874 : vector<8x64xf32>
    %c110 = arith.constant 110 : index
    %876 = memref.load %arg7[%c110] : memref<144xf32, #tpu.memory_space<smem>>
    %877 = vector.broadcast %876 : f32 to vector<8x64xf32>
    %878 = arith.mulf %877, %863 : vector<8x64xf32>
    %879 = arith.addf %861, %878 : vector<8x64xf32>
    %c0_405 = arith.constant 0 : index
    %c8_406 = arith.constant 8 : index
    %c127_407 = arith.constant 127 : index
    %880 = vector.load %arg19[%c0_405, %c8_406, %c127_407] : memref<4x24x256xf32, #tpu.memory_space<vmem>>, vector<1x8x64xf32>
    %881 = vector.shape_cast %880 : vector<1x8x64xf32> to vector<8x64xf32>
    %c3_408 = arith.constant 3 : index
    %882 = memref.load %arg7[%c3_408] : memref<144xf32, #tpu.memory_space<smem>>
    %883 = vector.broadcast %882 : f32 to vector<8x64xf32>
    %884 = arith.mulf %883, %881 : vector<8x64xf32>
    %885 = arith.addf %867, %884 : vector<8x64xf32>
    %c39_409 = arith.constant 39 : index
    %886 = memref.load %arg7[%c39_409] : memref<144xf32, #tpu.memory_space<smem>>
    %887 = vector.broadcast %886 : f32 to vector<8x64xf32>
    %888 = arith.mulf %887, %881 : vector<8x64xf32>
    %889 = arith.addf %871, %888 : vector<8x64xf32>
    %c75 = arith.constant 75 : index
    %890 = memref.load %arg7[%c75] : memref<144xf32, #tpu.memory_space<smem>>
    %891 = vector.broadcast %890 : f32 to vector<8x64xf32>
    %892 = arith.mulf %891, %881 : vector<8x64xf32>
    %893 = arith.addf %875, %892 : vector<8x64xf32>
    %c111 = arith.constant 111 : index
    %894 = memref.load %arg7[%c111] : memref<144xf32, #tpu.memory_space<smem>>
    %895 = vector.broadcast %894 : f32 to vector<8x64xf32>
    %896 = arith.mulf %895, %881 : vector<8x64xf32>
    %897 = arith.addf %879, %896 : vector<8x64xf32>
    %c0_410 = arith.constant 0 : index
    %c8_411 = arith.constant 8 : index
    %c128_412 = arith.constant 128 : index
    %898 = vector.load %arg19[%c0_410, %c8_411, %c128_412] : memref<4x24x256xf32, #tpu.memory_space<vmem>>, vector<1x8x64xf32>
    %899 = vector.shape_cast %898 : vector<1x8x64xf32> to vector<8x64xf32>
    %c4_413 = arith.constant 4 : index
    %900 = memref.load %arg7[%c4_413] : memref<144xf32, #tpu.memory_space<smem>>
    %901 = vector.broadcast %900 : f32 to vector<8x64xf32>
    %902 = arith.mulf %901, %899 : vector<8x64xf32>
    %903 = arith.addf %885, %902 : vector<8x64xf32>
    %c40_414 = arith.constant 40 : index
    %904 = memref.load %arg7[%c40_414] : memref<144xf32, #tpu.memory_space<smem>>
    %905 = vector.broadcast %904 : f32 to vector<8x64xf32>
    %906 = arith.mulf %905, %899 : vector<8x64xf32>
    %907 = arith.addf %889, %906 : vector<8x64xf32>
    %c76 = arith.constant 76 : index
    %908 = memref.load %arg7[%c76] : memref<144xf32, #tpu.memory_space<smem>>
    %909 = vector.broadcast %908 : f32 to vector<8x64xf32>
    %910 = arith.mulf %909, %899 : vector<8x64xf32>
    %911 = arith.addf %893, %910 : vector<8x64xf32>
    %c112 = arith.constant 112 : index
    %912 = memref.load %arg7[%c112] : memref<144xf32, #tpu.memory_space<smem>>
    %913 = vector.broadcast %912 : f32 to vector<8x64xf32>
    %914 = arith.mulf %913, %899 : vector<8x64xf32>
    %915 = arith.addf %897, %914 : vector<8x64xf32>
    %c0_415 = arith.constant 0 : index
    %c8_416 = arith.constant 8 : index
    %c129_417 = arith.constant 129 : index
    %916 = vector.load %arg19[%c0_415, %c8_416, %c129_417] : memref<4x24x256xf32, #tpu.memory_space<vmem>>, vector<1x8x64xf32>
    %917 = vector.shape_cast %916 : vector<1x8x64xf32> to vector<8x64xf32>
    %c5_418 = arith.constant 5 : index
    %918 = memref.load %arg7[%c5_418] : memref<144xf32, #tpu.memory_space<smem>>
    %919 = vector.broadcast %918 : f32 to vector<8x64xf32>
    %920 = arith.mulf %919, %917 : vector<8x64xf32>
    %921 = arith.addf %903, %920 : vector<8x64xf32>
    %c41_419 = arith.constant 41 : index
    %922 = memref.load %arg7[%c41_419] : memref<144xf32, #tpu.memory_space<smem>>
    %923 = vector.broadcast %922 : f32 to vector<8x64xf32>
    %924 = arith.mulf %923, %917 : vector<8x64xf32>
    %925 = arith.addf %907, %924 : vector<8x64xf32>
    %c77 = arith.constant 77 : index
    %926 = memref.load %arg7[%c77] : memref<144xf32, #tpu.memory_space<smem>>
    %927 = vector.broadcast %926 : f32 to vector<8x64xf32>
    %928 = arith.mulf %927, %917 : vector<8x64xf32>
    %929 = arith.addf %911, %928 : vector<8x64xf32>
    %c113 = arith.constant 113 : index
    %930 = memref.load %arg7[%c113] : memref<144xf32, #tpu.memory_space<smem>>
    %931 = vector.broadcast %930 : f32 to vector<8x64xf32>
    %932 = arith.mulf %931, %917 : vector<8x64xf32>
    %933 = arith.addf %915, %932 : vector<8x64xf32>
    %c0_420 = arith.constant 0 : index
    %c9_421 = arith.constant 9 : index
    %c127_422 = arith.constant 127 : index
    %934 = vector.load %arg19[%c0_420, %c9_421, %c127_422] : memref<4x24x256xf32, #tpu.memory_space<vmem>>, vector<1x8x64xf32>
    %935 = vector.shape_cast %934 : vector<1x8x64xf32> to vector<8x64xf32>
    %c6_423 = arith.constant 6 : index
    %936 = memref.load %arg7[%c6_423] : memref<144xf32, #tpu.memory_space<smem>>
    %937 = vector.broadcast %936 : f32 to vector<8x64xf32>
    %938 = arith.mulf %937, %935 : vector<8x64xf32>
    %939 = arith.addf %921, %938 : vector<8x64xf32>
    %c42_424 = arith.constant 42 : index
    %940 = memref.load %arg7[%c42_424] : memref<144xf32, #tpu.memory_space<smem>>
    %941 = vector.broadcast %940 : f32 to vector<8x64xf32>
    %942 = arith.mulf %941, %935 : vector<8x64xf32>
    %943 = arith.addf %925, %942 : vector<8x64xf32>
    %c78 = arith.constant 78 : index
    %944 = memref.load %arg7[%c78] : memref<144xf32, #tpu.memory_space<smem>>
    %945 = vector.broadcast %944 : f32 to vector<8x64xf32>
    %946 = arith.mulf %945, %935 : vector<8x64xf32>
    %947 = arith.addf %929, %946 : vector<8x64xf32>
    %c114 = arith.constant 114 : index
    %948 = memref.load %arg7[%c114] : memref<144xf32, #tpu.memory_space<smem>>
    %949 = vector.broadcast %948 : f32 to vector<8x64xf32>
    %950 = arith.mulf %949, %935 : vector<8x64xf32>
    %951 = arith.addf %933, %950 : vector<8x64xf32>
    %c0_425 = arith.constant 0 : index
    %c9_426 = arith.constant 9 : index
    %c128_427 = arith.constant 128 : index
    %952 = vector.load %arg19[%c0_425, %c9_426, %c128_427] : memref<4x24x256xf32, #tpu.memory_space<vmem>>, vector<1x8x64xf32>
    %953 = vector.shape_cast %952 : vector<1x8x64xf32> to vector<8x64xf32>
    %c7_428 = arith.constant 7 : index
    %954 = memref.load %arg7[%c7_428] : memref<144xf32, #tpu.memory_space<smem>>
    %955 = vector.broadcast %954 : f32 to vector<8x64xf32>
    %956 = arith.mulf %955, %953 : vector<8x64xf32>
    %957 = arith.addf %939, %956 : vector<8x64xf32>
    %c43_429 = arith.constant 43 : index
    %958 = memref.load %arg7[%c43_429] : memref<144xf32, #tpu.memory_space<smem>>
    %959 = vector.broadcast %958 : f32 to vector<8x64xf32>
    %960 = arith.mulf %959, %953 : vector<8x64xf32>
    %961 = arith.addf %943, %960 : vector<8x64xf32>
    %c79 = arith.constant 79 : index
    %962 = memref.load %arg7[%c79] : memref<144xf32, #tpu.memory_space<smem>>
    %963 = vector.broadcast %962 : f32 to vector<8x64xf32>
    %964 = arith.mulf %963, %953 : vector<8x64xf32>
    %965 = arith.addf %947, %964 : vector<8x64xf32>
    %c115 = arith.constant 115 : index
    %966 = memref.load %arg7[%c115] : memref<144xf32, #tpu.memory_space<smem>>
    %967 = vector.broadcast %966 : f32 to vector<8x64xf32>
    %968 = arith.mulf %967, %953 : vector<8x64xf32>
    %969 = arith.addf %951, %968 : vector<8x64xf32>
    %c0_430 = arith.constant 0 : index
    %c9_431 = arith.constant 9 : index
    %c129_432 = arith.constant 129 : index
    %970 = vector.load %arg19[%c0_430, %c9_431, %c129_432] : memref<4x24x256xf32, #tpu.memory_space<vmem>>, vector<1x8x64xf32>
    %971 = vector.shape_cast %970 : vector<1x8x64xf32> to vector<8x64xf32>
    %c8_433 = arith.constant 8 : index
    %972 = memref.load %arg7[%c8_433] : memref<144xf32, #tpu.memory_space<smem>>
    %973 = vector.broadcast %972 : f32 to vector<8x64xf32>
    %974 = arith.mulf %973, %971 : vector<8x64xf32>
    %975 = arith.addf %957, %974 : vector<8x64xf32>
    %c44_434 = arith.constant 44 : index
    %976 = memref.load %arg7[%c44_434] : memref<144xf32, #tpu.memory_space<smem>>
    %977 = vector.broadcast %976 : f32 to vector<8x64xf32>
    %978 = arith.mulf %977, %971 : vector<8x64xf32>
    %979 = arith.addf %961, %978 : vector<8x64xf32>
    %c80 = arith.constant 80 : index
    %980 = memref.load %arg7[%c80] : memref<144xf32, #tpu.memory_space<smem>>
    %981 = vector.broadcast %980 : f32 to vector<8x64xf32>
    %982 = arith.mulf %981, %971 : vector<8x64xf32>
    %983 = arith.addf %965, %982 : vector<8x64xf32>
    %c116 = arith.constant 116 : index
    %984 = memref.load %arg7[%c116] : memref<144xf32, #tpu.memory_space<smem>>
    %985 = vector.broadcast %984 : f32 to vector<8x64xf32>
    %986 = arith.mulf %985, %971 : vector<8x64xf32>
    %987 = arith.addf %969, %986 : vector<8x64xf32>
    %c1_435 = arith.constant 1 : index
    %c7_436 = arith.constant 7 : index
    %c127_437 = arith.constant 127 : index
    %988 = vector.load %arg19[%c1_435, %c7_436, %c127_437] : memref<4x24x256xf32, #tpu.memory_space<vmem>>, vector<1x8x64xf32>
    %989 = vector.shape_cast %988 : vector<1x8x64xf32> to vector<8x64xf32>
    %c9_438 = arith.constant 9 : index
    %990 = memref.load %arg7[%c9_438] : memref<144xf32, #tpu.memory_space<smem>>
    %991 = vector.broadcast %990 : f32 to vector<8x64xf32>
    %992 = arith.mulf %991, %989 : vector<8x64xf32>
    %993 = arith.addf %975, %992 : vector<8x64xf32>
    %c45_439 = arith.constant 45 : index
    %994 = memref.load %arg7[%c45_439] : memref<144xf32, #tpu.memory_space<smem>>
    %995 = vector.broadcast %994 : f32 to vector<8x64xf32>
    %996 = arith.mulf %995, %989 : vector<8x64xf32>
    %997 = arith.addf %979, %996 : vector<8x64xf32>
    %c81 = arith.constant 81 : index
    %998 = memref.load %arg7[%c81] : memref<144xf32, #tpu.memory_space<smem>>
    %999 = vector.broadcast %998 : f32 to vector<8x64xf32>
    %1000 = arith.mulf %999, %989 : vector<8x64xf32>
    %1001 = arith.addf %983, %1000 : vector<8x64xf32>
    %c117 = arith.constant 117 : index
    %1002 = memref.load %arg7[%c117] : memref<144xf32, #tpu.memory_space<smem>>
    %1003 = vector.broadcast %1002 : f32 to vector<8x64xf32>
    %1004 = arith.mulf %1003, %989 : vector<8x64xf32>
    %1005 = arith.addf %987, %1004 : vector<8x64xf32>
    %c1_440 = arith.constant 1 : index
    %c7_441 = arith.constant 7 : index
    %c128_442 = arith.constant 128 : index
    %1006 = vector.load %arg19[%c1_440, %c7_441, %c128_442] : memref<4x24x256xf32, #tpu.memory_space<vmem>>, vector<1x8x64xf32>
    %1007 = vector.shape_cast %1006 : vector<1x8x64xf32> to vector<8x64xf32>
    %c10_443 = arith.constant 10 : index
    %1008 = memref.load %arg7[%c10_443] : memref<144xf32, #tpu.memory_space<smem>>
    %1009 = vector.broadcast %1008 : f32 to vector<8x64xf32>
    %1010 = arith.mulf %1009, %1007 : vector<8x64xf32>
    %1011 = arith.addf %993, %1010 : vector<8x64xf32>
    %c46_444 = arith.constant 46 : index
    %1012 = memref.load %arg7[%c46_444] : memref<144xf32, #tpu.memory_space<smem>>
    %1013 = vector.broadcast %1012 : f32 to vector<8x64xf32>
    %1014 = arith.mulf %1013, %1007 : vector<8x64xf32>
    %1015 = arith.addf %997, %1014 : vector<8x64xf32>
    %c82 = arith.constant 82 : index
    %1016 = memref.load %arg7[%c82] : memref<144xf32, #tpu.memory_space<smem>>
    %1017 = vector.broadcast %1016 : f32 to vector<8x64xf32>
    %1018 = arith.mulf %1017, %1007 : vector<8x64xf32>
    %1019 = arith.addf %1001, %1018 : vector<8x64xf32>
    %c118 = arith.constant 118 : index
    %1020 = memref.load %arg7[%c118] : memref<144xf32, #tpu.memory_space<smem>>
    %1021 = vector.broadcast %1020 : f32 to vector<8x64xf32>
    %1022 = arith.mulf %1021, %1007 : vector<8x64xf32>
    %1023 = arith.addf %1005, %1022 : vector<8x64xf32>
    %c1_445 = arith.constant 1 : index
    %c7_446 = arith.constant 7 : index
    %c129_447 = arith.constant 129 : index
    %1024 = vector.load %arg19[%c1_445, %c7_446, %c129_447] : memref<4x24x256xf32, #tpu.memory_space<vmem>>, vector<1x8x64xf32>
    %1025 = vector.shape_cast %1024 : vector<1x8x64xf32> to vector<8x64xf32>
    %c11_448 = arith.constant 11 : index
    %1026 = memref.load %arg7[%c11_448] : memref<144xf32, #tpu.memory_space<smem>>
    %1027 = vector.broadcast %1026 : f32 to vector<8x64xf32>
    %1028 = arith.mulf %1027, %1025 : vector<8x64xf32>
    %1029 = arith.addf %1011, %1028 : vector<8x64xf32>
    %c47_449 = arith.constant 47 : index
    %1030 = memref.load %arg7[%c47_449] : memref<144xf32, #tpu.memory_space<smem>>
    %1031 = vector.broadcast %1030 : f32 to vector<8x64xf32>
    %1032 = arith.mulf %1031, %1025 : vector<8x64xf32>
    %1033 = arith.addf %1015, %1032 : vector<8x64xf32>
    %c83 = arith.constant 83 : index
    %1034 = memref.load %arg7[%c83] : memref<144xf32, #tpu.memory_space<smem>>
    %1035 = vector.broadcast %1034 : f32 to vector<8x64xf32>
    %1036 = arith.mulf %1035, %1025 : vector<8x64xf32>
    %1037 = arith.addf %1019, %1036 : vector<8x64xf32>
    %c119 = arith.constant 119 : index
    %1038 = memref.load %arg7[%c119] : memref<144xf32, #tpu.memory_space<smem>>
    %1039 = vector.broadcast %1038 : f32 to vector<8x64xf32>
    %1040 = arith.mulf %1039, %1025 : vector<8x64xf32>
    %1041 = arith.addf %1023, %1040 : vector<8x64xf32>
    %c1_450 = arith.constant 1 : index
    %c8_451 = arith.constant 8 : index
    %c127_452 = arith.constant 127 : index
    %1042 = vector.load %arg19[%c1_450, %c8_451, %c127_452] : memref<4x24x256xf32, #tpu.memory_space<vmem>>, vector<1x8x64xf32>
    %1043 = vector.shape_cast %1042 : vector<1x8x64xf32> to vector<8x64xf32>
    %c12_453 = arith.constant 12 : index
    %1044 = memref.load %arg7[%c12_453] : memref<144xf32, #tpu.memory_space<smem>>
    %1045 = vector.broadcast %1044 : f32 to vector<8x64xf32>
    %1046 = arith.mulf %1045, %1043 : vector<8x64xf32>
    %1047 = arith.addf %1029, %1046 : vector<8x64xf32>
    %c48_454 = arith.constant 48 : index
    %1048 = memref.load %arg7[%c48_454] : memref<144xf32, #tpu.memory_space<smem>>
    %1049 = vector.broadcast %1048 : f32 to vector<8x64xf32>
    %1050 = arith.mulf %1049, %1043 : vector<8x64xf32>
    %1051 = arith.addf %1033, %1050 : vector<8x64xf32>
    %c84 = arith.constant 84 : index
    %1052 = memref.load %arg7[%c84] : memref<144xf32, #tpu.memory_space<smem>>
    %1053 = vector.broadcast %1052 : f32 to vector<8x64xf32>
    %1054 = arith.mulf %1053, %1043 : vector<8x64xf32>
    %1055 = arith.addf %1037, %1054 : vector<8x64xf32>
    %c120 = arith.constant 120 : index
    %1056 = memref.load %arg7[%c120] : memref<144xf32, #tpu.memory_space<smem>>
    %1057 = vector.broadcast %1056 : f32 to vector<8x64xf32>
    %1058 = arith.mulf %1057, %1043 : vector<8x64xf32>
    %1059 = arith.addf %1041, %1058 : vector<8x64xf32>
    %c1_455 = arith.constant 1 : index
    %c8_456 = arith.constant 8 : index
    %c128_457 = arith.constant 128 : index
    %1060 = vector.load %arg19[%c1_455, %c8_456, %c128_457] : memref<4x24x256xf32, #tpu.memory_space<vmem>>, vector<1x8x64xf32>
    %1061 = vector.shape_cast %1060 : vector<1x8x64xf32> to vector<8x64xf32>
    %c13_458 = arith.constant 13 : index
    %1062 = memref.load %arg7[%c13_458] : memref<144xf32, #tpu.memory_space<smem>>
    %1063 = vector.broadcast %1062 : f32 to vector<8x64xf32>
    %1064 = arith.mulf %1063, %1061 : vector<8x64xf32>
    %1065 = arith.addf %1047, %1064 : vector<8x64xf32>
    %c49_459 = arith.constant 49 : index
    %1066 = memref.load %arg7[%c49_459] : memref<144xf32, #tpu.memory_space<smem>>
    %1067 = vector.broadcast %1066 : f32 to vector<8x64xf32>
    %1068 = arith.mulf %1067, %1061 : vector<8x64xf32>
    %1069 = arith.addf %1051, %1068 : vector<8x64xf32>
    %c85 = arith.constant 85 : index
    %1070 = memref.load %arg7[%c85] : memref<144xf32, #tpu.memory_space<smem>>
    %1071 = vector.broadcast %1070 : f32 to vector<8x64xf32>
    %1072 = arith.mulf %1071, %1061 : vector<8x64xf32>
    %1073 = arith.addf %1055, %1072 : vector<8x64xf32>
    %c121 = arith.constant 121 : index
    %1074 = memref.load %arg7[%c121] : memref<144xf32, #tpu.memory_space<smem>>
    %1075 = vector.broadcast %1074 : f32 to vector<8x64xf32>
    %1076 = arith.mulf %1075, %1061 : vector<8x64xf32>
    %1077 = arith.addf %1059, %1076 : vector<8x64xf32>
    %c1_460 = arith.constant 1 : index
    %c8_461 = arith.constant 8 : index
    %c129_462 = arith.constant 129 : index
    %1078 = vector.load %arg19[%c1_460, %c8_461, %c129_462] : memref<4x24x256xf32, #tpu.memory_space<vmem>>, vector<1x8x64xf32>
    %1079 = vector.shape_cast %1078 : vector<1x8x64xf32> to vector<8x64xf32>
    %c14_463 = arith.constant 14 : index
    %1080 = memref.load %arg7[%c14_463] : memref<144xf32, #tpu.memory_space<smem>>
    %1081 = vector.broadcast %1080 : f32 to vector<8x64xf32>
    %1082 = arith.mulf %1081, %1079 : vector<8x64xf32>
    %1083 = arith.addf %1065, %1082 : vector<8x64xf32>
    %c50_464 = arith.constant 50 : index
    %1084 = memref.load %arg7[%c50_464] : memref<144xf32, #tpu.memory_space<smem>>
    %1085 = vector.broadcast %1084 : f32 to vector<8x64xf32>
    %1086 = arith.mulf %1085, %1079 : vector<8x64xf32>
    %1087 = arith.addf %1069, %1086 : vector<8x64xf32>
    %c86 = arith.constant 86 : index
    %1088 = memref.load %arg7[%c86] : memref<144xf32, #tpu.memory_space<smem>>
    %1089 = vector.broadcast %1088 : f32 to vector<8x64xf32>
    %1090 = arith.mulf %1089, %1079 : vector<8x64xf32>
    %1091 = arith.addf %1073, %1090 : vector<8x64xf32>
    %c122 = arith.constant 122 : index
    %1092 = memref.load %arg7[%c122] : memref<144xf32, #tpu.memory_space<smem>>
    %1093 = vector.broadcast %1092 : f32 to vector<8x64xf32>
    %1094 = arith.mulf %1093, %1079 : vector<8x64xf32>
    %1095 = arith.addf %1077, %1094 : vector<8x64xf32>
    %c1_465 = arith.constant 1 : index
    %c9_466 = arith.constant 9 : index
    %c127_467 = arith.constant 127 : index
    %1096 = vector.load %arg19[%c1_465, %c9_466, %c127_467] : memref<4x24x256xf32, #tpu.memory_space<vmem>>, vector<1x8x64xf32>
    %1097 = vector.shape_cast %1096 : vector<1x8x64xf32> to vector<8x64xf32>
    %c15_468 = arith.constant 15 : index
    %1098 = memref.load %arg7[%c15_468] : memref<144xf32, #tpu.memory_space<smem>>
    %1099 = vector.broadcast %1098 : f32 to vector<8x64xf32>
    %1100 = arith.mulf %1099, %1097 : vector<8x64xf32>
    %1101 = arith.addf %1083, %1100 : vector<8x64xf32>
    %c51_469 = arith.constant 51 : index
    %1102 = memref.load %arg7[%c51_469] : memref<144xf32, #tpu.memory_space<smem>>
    %1103 = vector.broadcast %1102 : f32 to vector<8x64xf32>
    %1104 = arith.mulf %1103, %1097 : vector<8x64xf32>
    %1105 = arith.addf %1087, %1104 : vector<8x64xf32>
    %c87 = arith.constant 87 : index
    %1106 = memref.load %arg7[%c87] : memref<144xf32, #tpu.memory_space<smem>>
    %1107 = vector.broadcast %1106 : f32 to vector<8x64xf32>
    %1108 = arith.mulf %1107, %1097 : vector<8x64xf32>
    %1109 = arith.addf %1091, %1108 : vector<8x64xf32>
    %c123 = arith.constant 123 : index
    %1110 = memref.load %arg7[%c123] : memref<144xf32, #tpu.memory_space<smem>>
    %1111 = vector.broadcast %1110 : f32 to vector<8x64xf32>
    %1112 = arith.mulf %1111, %1097 : vector<8x64xf32>
    %1113 = arith.addf %1095, %1112 : vector<8x64xf32>
    %c1_470 = arith.constant 1 : index
    %c9_471 = arith.constant 9 : index
    %c128_472 = arith.constant 128 : index
    %1114 = vector.load %arg19[%c1_470, %c9_471, %c128_472] : memref<4x24x256xf32, #tpu.memory_space<vmem>>, vector<1x8x64xf32>
    %1115 = vector.shape_cast %1114 : vector<1x8x64xf32> to vector<8x64xf32>
    %c16_473 = arith.constant 16 : index
    %1116 = memref.load %arg7[%c16_473] : memref<144xf32, #tpu.memory_space<smem>>
    %1117 = vector.broadcast %1116 : f32 to vector<8x64xf32>
    %1118 = arith.mulf %1117, %1115 : vector<8x64xf32>
    %1119 = arith.addf %1101, %1118 : vector<8x64xf32>
    %c52_474 = arith.constant 52 : index
    %1120 = memref.load %arg7[%c52_474] : memref<144xf32, #tpu.memory_space<smem>>
    %1121 = vector.broadcast %1120 : f32 to vector<8x64xf32>
    %1122 = arith.mulf %1121, %1115 : vector<8x64xf32>
    %1123 = arith.addf %1105, %1122 : vector<8x64xf32>
    %c88 = arith.constant 88 : index
    %1124 = memref.load %arg7[%c88] : memref<144xf32, #tpu.memory_space<smem>>
    %1125 = vector.broadcast %1124 : f32 to vector<8x64xf32>
    %1126 = arith.mulf %1125, %1115 : vector<8x64xf32>
    %1127 = arith.addf %1109, %1126 : vector<8x64xf32>
    %c124 = arith.constant 124 : index
    %1128 = memref.load %arg7[%c124] : memref<144xf32, #tpu.memory_space<smem>>
    %1129 = vector.broadcast %1128 : f32 to vector<8x64xf32>
    %1130 = arith.mulf %1129, %1115 : vector<8x64xf32>
    %1131 = arith.addf %1113, %1130 : vector<8x64xf32>
    %c1_475 = arith.constant 1 : index
    %c9_476 = arith.constant 9 : index
    %c129_477 = arith.constant 129 : index
    %1132 = vector.load %arg19[%c1_475, %c9_476, %c129_477] : memref<4x24x256xf32, #tpu.memory_space<vmem>>, vector<1x8x64xf32>
    %1133 = vector.shape_cast %1132 : vector<1x8x64xf32> to vector<8x64xf32>
    %c17_478 = arith.constant 17 : index
    %1134 = memref.load %arg7[%c17_478] : memref<144xf32, #tpu.memory_space<smem>>
    %1135 = vector.broadcast %1134 : f32 to vector<8x64xf32>
    %1136 = arith.mulf %1135, %1133 : vector<8x64xf32>
    %1137 = arith.addf %1119, %1136 : vector<8x64xf32>
    %c53_479 = arith.constant 53 : index
    %1138 = memref.load %arg7[%c53_479] : memref<144xf32, #tpu.memory_space<smem>>
    %1139 = vector.broadcast %1138 : f32 to vector<8x64xf32>
    %1140 = arith.mulf %1139, %1133 : vector<8x64xf32>
    %1141 = arith.addf %1123, %1140 : vector<8x64xf32>
    %c89 = arith.constant 89 : index
    %1142 = memref.load %arg7[%c89] : memref<144xf32, #tpu.memory_space<smem>>
    %1143 = vector.broadcast %1142 : f32 to vector<8x64xf32>
    %1144 = arith.mulf %1143, %1133 : vector<8x64xf32>
    %1145 = arith.addf %1127, %1144 : vector<8x64xf32>
    %c125 = arith.constant 125 : index
    %1146 = memref.load %arg7[%c125] : memref<144xf32, #tpu.memory_space<smem>>
    %1147 = vector.broadcast %1146 : f32 to vector<8x64xf32>
    %1148 = arith.mulf %1147, %1133 : vector<8x64xf32>
    %1149 = arith.addf %1131, %1148 : vector<8x64xf32>
    %c2_480 = arith.constant 2 : index
    %c7_481 = arith.constant 7 : index
    %c127_482 = arith.constant 127 : index
    %1150 = vector.load %arg19[%c2_480, %c7_481, %c127_482] : memref<4x24x256xf32, #tpu.memory_space<vmem>>, vector<1x8x64xf32>
    %1151 = vector.shape_cast %1150 : vector<1x8x64xf32> to vector<8x64xf32>
    %c18_483 = arith.constant 18 : index
    %1152 = memref.load %arg7[%c18_483] : memref<144xf32, #tpu.memory_space<smem>>
    %1153 = vector.broadcast %1152 : f32 to vector<8x64xf32>
    %1154 = arith.mulf %1153, %1151 : vector<8x64xf32>
    %1155 = arith.addf %1137, %1154 : vector<8x64xf32>
    %c54_484 = arith.constant 54 : index
    %1156 = memref.load %arg7[%c54_484] : memref<144xf32, #tpu.memory_space<smem>>
    %1157 = vector.broadcast %1156 : f32 to vector<8x64xf32>
    %1158 = arith.mulf %1157, %1151 : vector<8x64xf32>
    %1159 = arith.addf %1141, %1158 : vector<8x64xf32>
    %c90 = arith.constant 90 : index
    %1160 = memref.load %arg7[%c90] : memref<144xf32, #tpu.memory_space<smem>>
    %1161 = vector.broadcast %1160 : f32 to vector<8x64xf32>
    %1162 = arith.mulf %1161, %1151 : vector<8x64xf32>
    %1163 = arith.addf %1145, %1162 : vector<8x64xf32>
    %c126 = arith.constant 126 : index
    %1164 = memref.load %arg7[%c126] : memref<144xf32, #tpu.memory_space<smem>>
    %1165 = vector.broadcast %1164 : f32 to vector<8x64xf32>
    %1166 = arith.mulf %1165, %1151 : vector<8x64xf32>
    %1167 = arith.addf %1149, %1166 : vector<8x64xf32>
    %c2_485 = arith.constant 2 : index
    %c7_486 = arith.constant 7 : index
    %c128_487 = arith.constant 128 : index
    %1168 = vector.load %arg19[%c2_485, %c7_486, %c128_487] : memref<4x24x256xf32, #tpu.memory_space<vmem>>, vector<1x8x64xf32>
    %1169 = vector.shape_cast %1168 : vector<1x8x64xf32> to vector<8x64xf32>
    %c19_488 = arith.constant 19 : index
    %1170 = memref.load %arg7[%c19_488] : memref<144xf32, #tpu.memory_space<smem>>
    %1171 = vector.broadcast %1170 : f32 to vector<8x64xf32>
    %1172 = arith.mulf %1171, %1169 : vector<8x64xf32>
    %1173 = arith.addf %1155, %1172 : vector<8x64xf32>
    %c55_489 = arith.constant 55 : index
    %1174 = memref.load %arg7[%c55_489] : memref<144xf32, #tpu.memory_space<smem>>
    %1175 = vector.broadcast %1174 : f32 to vector<8x64xf32>
    %1176 = arith.mulf %1175, %1169 : vector<8x64xf32>
    %1177 = arith.addf %1159, %1176 : vector<8x64xf32>
    %c91 = arith.constant 91 : index
    %1178 = memref.load %arg7[%c91] : memref<144xf32, #tpu.memory_space<smem>>
    %1179 = vector.broadcast %1178 : f32 to vector<8x64xf32>
    %1180 = arith.mulf %1179, %1169 : vector<8x64xf32>
    %1181 = arith.addf %1163, %1180 : vector<8x64xf32>
    %c127_490 = arith.constant 127 : index
    %1182 = memref.load %arg7[%c127_490] : memref<144xf32, #tpu.memory_space<smem>>
    %1183 = vector.broadcast %1182 : f32 to vector<8x64xf32>
    %1184 = arith.mulf %1183, %1169 : vector<8x64xf32>
    %1185 = arith.addf %1167, %1184 : vector<8x64xf32>
    %c2_491 = arith.constant 2 : index
    %c7_492 = arith.constant 7 : index
    %c129_493 = arith.constant 129 : index
    %1186 = vector.load %arg19[%c2_491, %c7_492, %c129_493] : memref<4x24x256xf32, #tpu.memory_space<vmem>>, vector<1x8x64xf32>
    %1187 = vector.shape_cast %1186 : vector<1x8x64xf32> to vector<8x64xf32>
    %c20_494 = arith.constant 20 : index
    %1188 = memref.load %arg7[%c20_494] : memref<144xf32, #tpu.memory_space<smem>>
    %1189 = vector.broadcast %1188 : f32 to vector<8x64xf32>
    %1190 = arith.mulf %1189, %1187 : vector<8x64xf32>
    %1191 = arith.addf %1173, %1190 : vector<8x64xf32>
    %c56_495 = arith.constant 56 : index
    %1192 = memref.load %arg7[%c56_495] : memref<144xf32, #tpu.memory_space<smem>>
    %1193 = vector.broadcast %1192 : f32 to vector<8x64xf32>
    %1194 = arith.mulf %1193, %1187 : vector<8x64xf32>
    %1195 = arith.addf %1177, %1194 : vector<8x64xf32>
    %c92 = arith.constant 92 : index
    %1196 = memref.load %arg7[%c92] : memref<144xf32, #tpu.memory_space<smem>>
    %1197 = vector.broadcast %1196 : f32 to vector<8x64xf32>
    %1198 = arith.mulf %1197, %1187 : vector<8x64xf32>
    %1199 = arith.addf %1181, %1198 : vector<8x64xf32>
    %c128_496 = arith.constant 128 : index
    %1200 = memref.load %arg7[%c128_496] : memref<144xf32, #tpu.memory_space<smem>>
    %1201 = vector.broadcast %1200 : f32 to vector<8x64xf32>
    %1202 = arith.mulf %1201, %1187 : vector<8x64xf32>
    %1203 = arith.addf %1185, %1202 : vector<8x64xf32>
    %c2_497 = arith.constant 2 : index
    %c8_498 = arith.constant 8 : index
    %c127_499 = arith.constant 127 : index
    %1204 = vector.load %arg19[%c2_497, %c8_498, %c127_499] : memref<4x24x256xf32, #tpu.memory_space<vmem>>, vector<1x8x64xf32>
    %1205 = vector.shape_cast %1204 : vector<1x8x64xf32> to vector<8x64xf32>
    %c21_500 = arith.constant 21 : index
    %1206 = memref.load %arg7[%c21_500] : memref<144xf32, #tpu.memory_space<smem>>
    %1207 = vector.broadcast %1206 : f32 to vector<8x64xf32>
    %1208 = arith.mulf %1207, %1205 : vector<8x64xf32>
    %1209 = arith.addf %1191, %1208 : vector<8x64xf32>
    %c57_501 = arith.constant 57 : index
    %1210 = memref.load %arg7[%c57_501] : memref<144xf32, #tpu.memory_space<smem>>
    %1211 = vector.broadcast %1210 : f32 to vector<8x64xf32>
    %1212 = arith.mulf %1211, %1205 : vector<8x64xf32>
    %1213 = arith.addf %1195, %1212 : vector<8x64xf32>
    %c93 = arith.constant 93 : index
    %1214 = memref.load %arg7[%c93] : memref<144xf32, #tpu.memory_space<smem>>
    %1215 = vector.broadcast %1214 : f32 to vector<8x64xf32>
    %1216 = arith.mulf %1215, %1205 : vector<8x64xf32>
    %1217 = arith.addf %1199, %1216 : vector<8x64xf32>
    %c129_502 = arith.constant 129 : index
    %1218 = memref.load %arg7[%c129_502] : memref<144xf32, #tpu.memory_space<smem>>
    %1219 = vector.broadcast %1218 : f32 to vector<8x64xf32>
    %1220 = arith.mulf %1219, %1205 : vector<8x64xf32>
    %1221 = arith.addf %1203, %1220 : vector<8x64xf32>
    %c2_503 = arith.constant 2 : index
    %c8_504 = arith.constant 8 : index
    %c128_505 = arith.constant 128 : index
    %1222 = vector.load %arg19[%c2_503, %c8_504, %c128_505] : memref<4x24x256xf32, #tpu.memory_space<vmem>>, vector<1x8x64xf32>
    %1223 = vector.shape_cast %1222 : vector<1x8x64xf32> to vector<8x64xf32>
    %c22_506 = arith.constant 22 : index
    %1224 = memref.load %arg7[%c22_506] : memref<144xf32, #tpu.memory_space<smem>>
    %1225 = vector.broadcast %1224 : f32 to vector<8x64xf32>
    %1226 = arith.mulf %1225, %1223 : vector<8x64xf32>
    %1227 = arith.addf %1209, %1226 : vector<8x64xf32>
    %c58_507 = arith.constant 58 : index
    %1228 = memref.load %arg7[%c58_507] : memref<144xf32, #tpu.memory_space<smem>>
    %1229 = vector.broadcast %1228 : f32 to vector<8x64xf32>
    %1230 = arith.mulf %1229, %1223 : vector<8x64xf32>
    %1231 = arith.addf %1213, %1230 : vector<8x64xf32>
    %c94 = arith.constant 94 : index
    %1232 = memref.load %arg7[%c94] : memref<144xf32, #tpu.memory_space<smem>>
    %1233 = vector.broadcast %1232 : f32 to vector<8x64xf32>
    %1234 = arith.mulf %1233, %1223 : vector<8x64xf32>
    %1235 = arith.addf %1217, %1234 : vector<8x64xf32>
    %c130 = arith.constant 130 : index
    %1236 = memref.load %arg7[%c130] : memref<144xf32, #tpu.memory_space<smem>>
    %1237 = vector.broadcast %1236 : f32 to vector<8x64xf32>
    %1238 = arith.mulf %1237, %1223 : vector<8x64xf32>
    %1239 = arith.addf %1221, %1238 : vector<8x64xf32>
    %c2_508 = arith.constant 2 : index
    %c8_509 = arith.constant 8 : index
    %c129_510 = arith.constant 129 : index
    %1240 = vector.load %arg19[%c2_508, %c8_509, %c129_510] : memref<4x24x256xf32, #tpu.memory_space<vmem>>, vector<1x8x64xf32>
    %1241 = vector.shape_cast %1240 : vector<1x8x64xf32> to vector<8x64xf32>
    %c23_511 = arith.constant 23 : index
    %1242 = memref.load %arg7[%c23_511] : memref<144xf32, #tpu.memory_space<smem>>
    %1243 = vector.broadcast %1242 : f32 to vector<8x64xf32>
    %1244 = arith.mulf %1243, %1241 : vector<8x64xf32>
    %1245 = arith.addf %1227, %1244 : vector<8x64xf32>
    %c59_512 = arith.constant 59 : index
    %1246 = memref.load %arg7[%c59_512] : memref<144xf32, #tpu.memory_space<smem>>
    %1247 = vector.broadcast %1246 : f32 to vector<8x64xf32>
    %1248 = arith.mulf %1247, %1241 : vector<8x64xf32>
    %1249 = arith.addf %1231, %1248 : vector<8x64xf32>
    %c95 = arith.constant 95 : index
    %1250 = memref.load %arg7[%c95] : memref<144xf32, #tpu.memory_space<smem>>
    %1251 = vector.broadcast %1250 : f32 to vector<8x64xf32>
    %1252 = arith.mulf %1251, %1241 : vector<8x64xf32>
    %1253 = arith.addf %1235, %1252 : vector<8x64xf32>
    %c131 = arith.constant 131 : index
    %1254 = memref.load %arg7[%c131] : memref<144xf32, #tpu.memory_space<smem>>
    %1255 = vector.broadcast %1254 : f32 to vector<8x64xf32>
    %1256 = arith.mulf %1255, %1241 : vector<8x64xf32>
    %1257 = arith.addf %1239, %1256 : vector<8x64xf32>
    %c2_513 = arith.constant 2 : index
    %c9_514 = arith.constant 9 : index
    %c127_515 = arith.constant 127 : index
    %1258 = vector.load %arg19[%c2_513, %c9_514, %c127_515] : memref<4x24x256xf32, #tpu.memory_space<vmem>>, vector<1x8x64xf32>
    %1259 = vector.shape_cast %1258 : vector<1x8x64xf32> to vector<8x64xf32>
    %c24_516 = arith.constant 24 : index
    %1260 = memref.load %arg7[%c24_516] : memref<144xf32, #tpu.memory_space<smem>>
    %1261 = vector.broadcast %1260 : f32 to vector<8x64xf32>
    %1262 = arith.mulf %1261, %1259 : vector<8x64xf32>
    %1263 = arith.addf %1245, %1262 : vector<8x64xf32>
    %c60_517 = arith.constant 60 : index
    %1264 = memref.load %arg7[%c60_517] : memref<144xf32, #tpu.memory_space<smem>>
    %1265 = vector.broadcast %1264 : f32 to vector<8x64xf32>
    %1266 = arith.mulf %1265, %1259 : vector<8x64xf32>
    %1267 = arith.addf %1249, %1266 : vector<8x64xf32>
    %c96 = arith.constant 96 : index
    %1268 = memref.load %arg7[%c96] : memref<144xf32, #tpu.memory_space<smem>>
    %1269 = vector.broadcast %1268 : f32 to vector<8x64xf32>
    %1270 = arith.mulf %1269, %1259 : vector<8x64xf32>
    %1271 = arith.addf %1253, %1270 : vector<8x64xf32>
    %c132 = arith.constant 132 : index
    %1272 = memref.load %arg7[%c132] : memref<144xf32, #tpu.memory_space<smem>>
    %1273 = vector.broadcast %1272 : f32 to vector<8x64xf32>
    %1274 = arith.mulf %1273, %1259 : vector<8x64xf32>
    %1275 = arith.addf %1257, %1274 : vector<8x64xf32>
    %c2_518 = arith.constant 2 : index
    %c9_519 = arith.constant 9 : index
    %c128_520 = arith.constant 128 : index
    %1276 = vector.load %arg19[%c2_518, %c9_519, %c128_520] : memref<4x24x256xf32, #tpu.memory_space<vmem>>, vector<1x8x64xf32>
    %1277 = vector.shape_cast %1276 : vector<1x8x64xf32> to vector<8x64xf32>
    %c25_521 = arith.constant 25 : index
    %1278 = memref.load %arg7[%c25_521] : memref<144xf32, #tpu.memory_space<smem>>
    %1279 = vector.broadcast %1278 : f32 to vector<8x64xf32>
    %1280 = arith.mulf %1279, %1277 : vector<8x64xf32>
    %1281 = arith.addf %1263, %1280 : vector<8x64xf32>
    %c61_522 = arith.constant 61 : index
    %1282 = memref.load %arg7[%c61_522] : memref<144xf32, #tpu.memory_space<smem>>
    %1283 = vector.broadcast %1282 : f32 to vector<8x64xf32>
    %1284 = arith.mulf %1283, %1277 : vector<8x64xf32>
    %1285 = arith.addf %1267, %1284 : vector<8x64xf32>
    %c97 = arith.constant 97 : index
    %1286 = memref.load %arg7[%c97] : memref<144xf32, #tpu.memory_space<smem>>
    %1287 = vector.broadcast %1286 : f32 to vector<8x64xf32>
    %1288 = arith.mulf %1287, %1277 : vector<8x64xf32>
    %1289 = arith.addf %1271, %1288 : vector<8x64xf32>
    %c133 = arith.constant 133 : index
    %1290 = memref.load %arg7[%c133] : memref<144xf32, #tpu.memory_space<smem>>
    %1291 = vector.broadcast %1290 : f32 to vector<8x64xf32>
    %1292 = arith.mulf %1291, %1277 : vector<8x64xf32>
    %1293 = arith.addf %1275, %1292 : vector<8x64xf32>
    %c2_523 = arith.constant 2 : index
    %c9_524 = arith.constant 9 : index
    %c129_525 = arith.constant 129 : index
    %1294 = vector.load %arg19[%c2_523, %c9_524, %c129_525] : memref<4x24x256xf32, #tpu.memory_space<vmem>>, vector<1x8x64xf32>
    %1295 = vector.shape_cast %1294 : vector<1x8x64xf32> to vector<8x64xf32>
    %c26_526 = arith.constant 26 : index
    %1296 = memref.load %arg7[%c26_526] : memref<144xf32, #tpu.memory_space<smem>>
    %1297 = vector.broadcast %1296 : f32 to vector<8x64xf32>
    %1298 = arith.mulf %1297, %1295 : vector<8x64xf32>
    %1299 = arith.addf %1281, %1298 : vector<8x64xf32>
    %c62_527 = arith.constant 62 : index
    %1300 = memref.load %arg7[%c62_527] : memref<144xf32, #tpu.memory_space<smem>>
    %1301 = vector.broadcast %1300 : f32 to vector<8x64xf32>
    %1302 = arith.mulf %1301, %1295 : vector<8x64xf32>
    %1303 = arith.addf %1285, %1302 : vector<8x64xf32>
    %c98 = arith.constant 98 : index
    %1304 = memref.load %arg7[%c98] : memref<144xf32, #tpu.memory_space<smem>>
    %1305 = vector.broadcast %1304 : f32 to vector<8x64xf32>
    %1306 = arith.mulf %1305, %1295 : vector<8x64xf32>
    %1307 = arith.addf %1289, %1306 : vector<8x64xf32>
    %c134 = arith.constant 134 : index
    %1308 = memref.load %arg7[%c134] : memref<144xf32, #tpu.memory_space<smem>>
    %1309 = vector.broadcast %1308 : f32 to vector<8x64xf32>
    %1310 = arith.mulf %1309, %1295 : vector<8x64xf32>
    %1311 = arith.addf %1293, %1310 : vector<8x64xf32>
    %c3_528 = arith.constant 3 : index
    %c7_529 = arith.constant 7 : index
    %c127_530 = arith.constant 127 : index
    %1312 = vector.load %arg19[%c3_528, %c7_529, %c127_530] : memref<4x24x256xf32, #tpu.memory_space<vmem>>, vector<1x8x64xf32>
    %1313 = vector.shape_cast %1312 : vector<1x8x64xf32> to vector<8x64xf32>
    %c27_531 = arith.constant 27 : index
    %1314 = memref.load %arg7[%c27_531] : memref<144xf32, #tpu.memory_space<smem>>
    %1315 = vector.broadcast %1314 : f32 to vector<8x64xf32>
    %1316 = arith.mulf %1315, %1313 : vector<8x64xf32>
    %1317 = arith.addf %1299, %1316 : vector<8x64xf32>
    %c63_532 = arith.constant 63 : index
    %1318 = memref.load %arg7[%c63_532] : memref<144xf32, #tpu.memory_space<smem>>
    %1319 = vector.broadcast %1318 : f32 to vector<8x64xf32>
    %1320 = arith.mulf %1319, %1313 : vector<8x64xf32>
    %1321 = arith.addf %1303, %1320 : vector<8x64xf32>
    %c99 = arith.constant 99 : index
    %1322 = memref.load %arg7[%c99] : memref<144xf32, #tpu.memory_space<smem>>
    %1323 = vector.broadcast %1322 : f32 to vector<8x64xf32>
    %1324 = arith.mulf %1323, %1313 : vector<8x64xf32>
    %1325 = arith.addf %1307, %1324 : vector<8x64xf32>
    %c135 = arith.constant 135 : index
    %1326 = memref.load %arg7[%c135] : memref<144xf32, #tpu.memory_space<smem>>
    %1327 = vector.broadcast %1326 : f32 to vector<8x64xf32>
    %1328 = arith.mulf %1327, %1313 : vector<8x64xf32>
    %1329 = arith.addf %1311, %1328 : vector<8x64xf32>
    %c3_533 = arith.constant 3 : index
    %c7_534 = arith.constant 7 : index
    %c128_535 = arith.constant 128 : index
    %1330 = vector.load %arg19[%c3_533, %c7_534, %c128_535] : memref<4x24x256xf32, #tpu.memory_space<vmem>>, vector<1x8x64xf32>
    %1331 = vector.shape_cast %1330 : vector<1x8x64xf32> to vector<8x64xf32>
    %c28_536 = arith.constant 28 : index
    %1332 = memref.load %arg7[%c28_536] : memref<144xf32, #tpu.memory_space<smem>>
    %1333 = vector.broadcast %1332 : f32 to vector<8x64xf32>
    %1334 = arith.mulf %1333, %1331 : vector<8x64xf32>
    %1335 = arith.addf %1317, %1334 : vector<8x64xf32>
    %c64_537 = arith.constant 64 : index
    %1336 = memref.load %arg7[%c64_537] : memref<144xf32, #tpu.memory_space<smem>>
    %1337 = vector.broadcast %1336 : f32 to vector<8x64xf32>
    %1338 = arith.mulf %1337, %1331 : vector<8x64xf32>
    %1339 = arith.addf %1321, %1338 : vector<8x64xf32>
    %c100 = arith.constant 100 : index
    %1340 = memref.load %arg7[%c100] : memref<144xf32, #tpu.memory_space<smem>>
    %1341 = vector.broadcast %1340 : f32 to vector<8x64xf32>
    %1342 = arith.mulf %1341, %1331 : vector<8x64xf32>
    %1343 = arith.addf %1325, %1342 : vector<8x64xf32>
    %c136 = arith.constant 136 : index
    %1344 = memref.load %arg7[%c136] : memref<144xf32, #tpu.memory_space<smem>>
    %1345 = vector.broadcast %1344 : f32 to vector<8x64xf32>
    %1346 = arith.mulf %1345, %1331 : vector<8x64xf32>
    %1347 = arith.addf %1329, %1346 : vector<8x64xf32>
    %c3_538 = arith.constant 3 : index
    %c7_539 = arith.constant 7 : index
    %c129_540 = arith.constant 129 : index
    %1348 = vector.load %arg19[%c3_538, %c7_539, %c129_540] : memref<4x24x256xf32, #tpu.memory_space<vmem>>, vector<1x8x64xf32>
    %1349 = vector.shape_cast %1348 : vector<1x8x64xf32> to vector<8x64xf32>
    %c29_541 = arith.constant 29 : index
    %1350 = memref.load %arg7[%c29_541] : memref<144xf32, #tpu.memory_space<smem>>
    %1351 = vector.broadcast %1350 : f32 to vector<8x64xf32>
    %1352 = arith.mulf %1351, %1349 : vector<8x64xf32>
    %1353 = arith.addf %1335, %1352 : vector<8x64xf32>
    %c65_542 = arith.constant 65 : index
    %1354 = memref.load %arg7[%c65_542] : memref<144xf32, #tpu.memory_space<smem>>
    %1355 = vector.broadcast %1354 : f32 to vector<8x64xf32>
    %1356 = arith.mulf %1355, %1349 : vector<8x64xf32>
    %1357 = arith.addf %1339, %1356 : vector<8x64xf32>
    %c101 = arith.constant 101 : index
    %1358 = memref.load %arg7[%c101] : memref<144xf32, #tpu.memory_space<smem>>
    %1359 = vector.broadcast %1358 : f32 to vector<8x64xf32>
    %1360 = arith.mulf %1359, %1349 : vector<8x64xf32>
    %1361 = arith.addf %1343, %1360 : vector<8x64xf32>
    %c137 = arith.constant 137 : index
    %1362 = memref.load %arg7[%c137] : memref<144xf32, #tpu.memory_space<smem>>
    %1363 = vector.broadcast %1362 : f32 to vector<8x64xf32>
    %1364 = arith.mulf %1363, %1349 : vector<8x64xf32>
    %1365 = arith.addf %1347, %1364 : vector<8x64xf32>
    %c3_543 = arith.constant 3 : index
    %c8_544 = arith.constant 8 : index
    %c127_545 = arith.constant 127 : index
    %1366 = vector.load %arg19[%c3_543, %c8_544, %c127_545] : memref<4x24x256xf32, #tpu.memory_space<vmem>>, vector<1x8x64xf32>
    %1367 = vector.shape_cast %1366 : vector<1x8x64xf32> to vector<8x64xf32>
    %c30_546 = arith.constant 30 : index
    %1368 = memref.load %arg7[%c30_546] : memref<144xf32, #tpu.memory_space<smem>>
    %1369 = vector.broadcast %1368 : f32 to vector<8x64xf32>
    %1370 = arith.mulf %1369, %1367 : vector<8x64xf32>
    %1371 = arith.addf %1353, %1370 : vector<8x64xf32>
    %c66_547 = arith.constant 66 : index
    %1372 = memref.load %arg7[%c66_547] : memref<144xf32, #tpu.memory_space<smem>>
    %1373 = vector.broadcast %1372 : f32 to vector<8x64xf32>
    %1374 = arith.mulf %1373, %1367 : vector<8x64xf32>
    %1375 = arith.addf %1357, %1374 : vector<8x64xf32>
    %c102 = arith.constant 102 : index
    %1376 = memref.load %arg7[%c102] : memref<144xf32, #tpu.memory_space<smem>>
    %1377 = vector.broadcast %1376 : f32 to vector<8x64xf32>
    %1378 = arith.mulf %1377, %1367 : vector<8x64xf32>
    %1379 = arith.addf %1361, %1378 : vector<8x64xf32>
    %c138 = arith.constant 138 : index
    %1380 = memref.load %arg7[%c138] : memref<144xf32, #tpu.memory_space<smem>>
    %1381 = vector.broadcast %1380 : f32 to vector<8x64xf32>
    %1382 = arith.mulf %1381, %1367 : vector<8x64xf32>
    %1383 = arith.addf %1365, %1382 : vector<8x64xf32>
    %c3_548 = arith.constant 3 : index
    %c8_549 = arith.constant 8 : index
    %c128_550 = arith.constant 128 : index
    %1384 = vector.load %arg19[%c3_548, %c8_549, %c128_550] : memref<4x24x256xf32, #tpu.memory_space<vmem>>, vector<1x8x64xf32>
    %1385 = vector.shape_cast %1384 : vector<1x8x64xf32> to vector<8x64xf32>
    %c31_551 = arith.constant 31 : index
    %1386 = memref.load %arg7[%c31_551] : memref<144xf32, #tpu.memory_space<smem>>
    %1387 = vector.broadcast %1386 : f32 to vector<8x64xf32>
    %1388 = arith.mulf %1387, %1385 : vector<8x64xf32>
    %1389 = arith.addf %1371, %1388 : vector<8x64xf32>
    %c67_552 = arith.constant 67 : index
    %1390 = memref.load %arg7[%c67_552] : memref<144xf32, #tpu.memory_space<smem>>
    %1391 = vector.broadcast %1390 : f32 to vector<8x64xf32>
    %1392 = arith.mulf %1391, %1385 : vector<8x64xf32>
    %1393 = arith.addf %1375, %1392 : vector<8x64xf32>
    %c103 = arith.constant 103 : index
    %1394 = memref.load %arg7[%c103] : memref<144xf32, #tpu.memory_space<smem>>
    %1395 = vector.broadcast %1394 : f32 to vector<8x64xf32>
    %1396 = arith.mulf %1395, %1385 : vector<8x64xf32>
    %1397 = arith.addf %1379, %1396 : vector<8x64xf32>
    %c139 = arith.constant 139 : index
    %1398 = memref.load %arg7[%c139] : memref<144xf32, #tpu.memory_space<smem>>
    %1399 = vector.broadcast %1398 : f32 to vector<8x64xf32>
    %1400 = arith.mulf %1399, %1385 : vector<8x64xf32>
    %1401 = arith.addf %1383, %1400 : vector<8x64xf32>
    %c3_553 = arith.constant 3 : index
    %c8_554 = arith.constant 8 : index
    %c129_555 = arith.constant 129 : index
    %1402 = vector.load %arg19[%c3_553, %c8_554, %c129_555] : memref<4x24x256xf32, #tpu.memory_space<vmem>>, vector<1x8x64xf32>
    %1403 = vector.shape_cast %1402 : vector<1x8x64xf32> to vector<8x64xf32>
    %c32_556 = arith.constant 32 : index
    %1404 = memref.load %arg7[%c32_556] : memref<144xf32, #tpu.memory_space<smem>>
    %1405 = vector.broadcast %1404 : f32 to vector<8x64xf32>
    %1406 = arith.mulf %1405, %1403 : vector<8x64xf32>
    %1407 = arith.addf %1389, %1406 : vector<8x64xf32>
    %c68_557 = arith.constant 68 : index
    %1408 = memref.load %arg7[%c68_557] : memref<144xf32, #tpu.memory_space<smem>>
    %1409 = vector.broadcast %1408 : f32 to vector<8x64xf32>
    %1410 = arith.mulf %1409, %1403 : vector<8x64xf32>
    %1411 = arith.addf %1393, %1410 : vector<8x64xf32>
    %c104 = arith.constant 104 : index
    %1412 = memref.load %arg7[%c104] : memref<144xf32, #tpu.memory_space<smem>>
    %1413 = vector.broadcast %1412 : f32 to vector<8x64xf32>
    %1414 = arith.mulf %1413, %1403 : vector<8x64xf32>
    %1415 = arith.addf %1397, %1414 : vector<8x64xf32>
    %c140 = arith.constant 140 : index
    %1416 = memref.load %arg7[%c140] : memref<144xf32, #tpu.memory_space<smem>>
    %1417 = vector.broadcast %1416 : f32 to vector<8x64xf32>
    %1418 = arith.mulf %1417, %1403 : vector<8x64xf32>
    %1419 = arith.addf %1401, %1418 : vector<8x64xf32>
    %c3_558 = arith.constant 3 : index
    %c9_559 = arith.constant 9 : index
    %c127_560 = arith.constant 127 : index
    %1420 = vector.load %arg19[%c3_558, %c9_559, %c127_560] : memref<4x24x256xf32, #tpu.memory_space<vmem>>, vector<1x8x64xf32>
    %1421 = vector.shape_cast %1420 : vector<1x8x64xf32> to vector<8x64xf32>
    %c33_561 = arith.constant 33 : index
    %1422 = memref.load %arg7[%c33_561] : memref<144xf32, #tpu.memory_space<smem>>
    %1423 = vector.broadcast %1422 : f32 to vector<8x64xf32>
    %1424 = arith.mulf %1423, %1421 : vector<8x64xf32>
    %1425 = arith.addf %1407, %1424 : vector<8x64xf32>
    %c69_562 = arith.constant 69 : index
    %1426 = memref.load %arg7[%c69_562] : memref<144xf32, #tpu.memory_space<smem>>
    %1427 = vector.broadcast %1426 : f32 to vector<8x64xf32>
    %1428 = arith.mulf %1427, %1421 : vector<8x64xf32>
    %1429 = arith.addf %1411, %1428 : vector<8x64xf32>
    %c105 = arith.constant 105 : index
    %1430 = memref.load %arg7[%c105] : memref<144xf32, #tpu.memory_space<smem>>
    %1431 = vector.broadcast %1430 : f32 to vector<8x64xf32>
    %1432 = arith.mulf %1431, %1421 : vector<8x64xf32>
    %1433 = arith.addf %1415, %1432 : vector<8x64xf32>
    %c141 = arith.constant 141 : index
    %1434 = memref.load %arg7[%c141] : memref<144xf32, #tpu.memory_space<smem>>
    %1435 = vector.broadcast %1434 : f32 to vector<8x64xf32>
    %1436 = arith.mulf %1435, %1421 : vector<8x64xf32>
    %1437 = arith.addf %1419, %1436 : vector<8x64xf32>
    %c3_563 = arith.constant 3 : index
    %c9_564 = arith.constant 9 : index
    %c128_565 = arith.constant 128 : index
    %1438 = vector.load %arg19[%c3_563, %c9_564, %c128_565] : memref<4x24x256xf32, #tpu.memory_space<vmem>>, vector<1x8x64xf32>
    %1439 = vector.shape_cast %1438 : vector<1x8x64xf32> to vector<8x64xf32>
    %c34_566 = arith.constant 34 : index
    %1440 = memref.load %arg7[%c34_566] : memref<144xf32, #tpu.memory_space<smem>>
    %1441 = vector.broadcast %1440 : f32 to vector<8x64xf32>
    %1442 = arith.mulf %1441, %1439 : vector<8x64xf32>
    %1443 = arith.addf %1425, %1442 : vector<8x64xf32>
    %c70_567 = arith.constant 70 : index
    %1444 = memref.load %arg7[%c70_567] : memref<144xf32, #tpu.memory_space<smem>>
    %1445 = vector.broadcast %1444 : f32 to vector<8x64xf32>
    %1446 = arith.mulf %1445, %1439 : vector<8x64xf32>
    %1447 = arith.addf %1429, %1446 : vector<8x64xf32>
    %c106 = arith.constant 106 : index
    %1448 = memref.load %arg7[%c106] : memref<144xf32, #tpu.memory_space<smem>>
    %1449 = vector.broadcast %1448 : f32 to vector<8x64xf32>
    %1450 = arith.mulf %1449, %1439 : vector<8x64xf32>
    %1451 = arith.addf %1433, %1450 : vector<8x64xf32>
    %c142 = arith.constant 142 : index
    %1452 = memref.load %arg7[%c142] : memref<144xf32, #tpu.memory_space<smem>>
    %1453 = vector.broadcast %1452 : f32 to vector<8x64xf32>
    %1454 = arith.mulf %1453, %1439 : vector<8x64xf32>
    %1455 = arith.addf %1437, %1454 : vector<8x64xf32>
    %c3_568 = arith.constant 3 : index
    %c9_569 = arith.constant 9 : index
    %c129_570 = arith.constant 129 : index
    %1456 = vector.load %arg19[%c3_568, %c9_569, %c129_570] : memref<4x24x256xf32, #tpu.memory_space<vmem>>, vector<1x8x64xf32>
    %1457 = vector.shape_cast %1456 : vector<1x8x64xf32> to vector<8x64xf32>
    %c35_571 = arith.constant 35 : index
    %1458 = memref.load %arg7[%c35_571] : memref<144xf32, #tpu.memory_space<smem>>
    %1459 = vector.broadcast %1458 : f32 to vector<8x64xf32>
    %1460 = arith.mulf %1459, %1457 : vector<8x64xf32>
    %1461 = arith.addf %1443, %1460 : vector<8x64xf32>
    %c71_572 = arith.constant 71 : index
    %1462 = memref.load %arg7[%c71_572] : memref<144xf32, #tpu.memory_space<smem>>
    %1463 = vector.broadcast %1462 : f32 to vector<8x64xf32>
    %1464 = arith.mulf %1463, %1457 : vector<8x64xf32>
    %1465 = arith.addf %1447, %1464 : vector<8x64xf32>
    %c107 = arith.constant 107 : index
    %1466 = memref.load %arg7[%c107] : memref<144xf32, #tpu.memory_space<smem>>
    %1467 = vector.broadcast %1466 : f32 to vector<8x64xf32>
    %1468 = arith.mulf %1467, %1457 : vector<8x64xf32>
    %1469 = arith.addf %1451, %1468 : vector<8x64xf32>
    %c143 = arith.constant 143 : index
    %1470 = memref.load %arg7[%c143] : memref<144xf32, #tpu.memory_space<smem>>
    %1471 = vector.broadcast %1470 : f32 to vector<8x64xf32>
    %1472 = arith.mulf %1471, %1457 : vector<8x64xf32>
    %1473 = arith.addf %1455, %1472 : vector<8x64xf32>
    %c0_573 = arith.constant 0 : index
    %1474 = memref.load %arg8[%c0_573] : memref<4xf32, #tpu.memory_space<smem>>
    %1475 = vector.broadcast %1474 : f32 to vector<8x64xf32>
    %1476 = arith.addf %1461, %1475 : vector<8x64xf32>
    %cst_574 = arith.constant 0.000000e+00 : f32
    %1477 = vector.broadcast %cst_574 : f32 to vector<8x64xf32>
    %1478 = arith.maximumf %1476, %1477 : vector<8x64xf32>
    %c1_575 = arith.constant 1 : index
    %1479 = memref.load %arg8[%c1_575] : memref<4xf32, #tpu.memory_space<smem>>
    %1480 = vector.broadcast %1479 : f32 to vector<8x64xf32>
    %1481 = arith.addf %1465, %1480 : vector<8x64xf32>
    %cst_576 = arith.constant 0.000000e+00 : f32
    %1482 = vector.broadcast %cst_576 : f32 to vector<8x64xf32>
    %1483 = arith.maximumf %1481, %1482 : vector<8x64xf32>
    %c2_577 = arith.constant 2 : index
    %1484 = memref.load %arg8[%c2_577] : memref<4xf32, #tpu.memory_space<smem>>
    %1485 = vector.broadcast %1484 : f32 to vector<8x64xf32>
    %1486 = arith.addf %1469, %1485 : vector<8x64xf32>
    %cst_578 = arith.constant 0.000000e+00 : f32
    %1487 = vector.broadcast %cst_578 : f32 to vector<8x64xf32>
    %1488 = arith.maximumf %1486, %1487 : vector<8x64xf32>
    %c3_579 = arith.constant 3 : index
    %1489 = memref.load %arg8[%c3_579] : memref<4xf32, #tpu.memory_space<smem>>
    %1490 = vector.broadcast %1489 : f32 to vector<8x64xf32>
    %1491 = arith.addf %1473, %1490 : vector<8x64xf32>
    %cst_580 = arith.constant 0.000000e+00 : f32
    %1492 = vector.broadcast %cst_580 : f32 to vector<8x64xf32>
    %1493 = arith.maximumf %1491, %1492 : vector<8x64xf32>
    %1494 = tpu.concatenate %1478, %1483, %1488, %1493 in 0 : vector<8x64xf32>, vector<8x64xf32>, vector<8x64xf32>, vector<8x64xf32> -> vector<32x64xf32>
    %c0_581 = arith.constant 0 : index
    %c0_582 = arith.constant 0 : index
    %1495 = vector.load %arg11[%c0_581, %c0_582] : memref<64x128xf32, #tpu.memory_space<vmem>>, vector<64x128xf32>
    %cst_583 = arith.constant dense<0.000000e+00> : vector<32x128xf32>
    %1496 = tpu.matmul %1494, %1495, %cst_583 {dimension_numbers = #tpu.dot_dimension_numbers<[1], [0], [0], [1], [0, 0, 1, 1], [], []>} : vector<32x64xf32>, vector<64x128xf32>, vector<32x128xf32> -> vector<32x128xf32>
    %c0_584 = arith.constant 0 : index
    %c0_585 = arith.constant 0 : index
    %1497 = vector.load %arg12[%c0_584, %c0_585] : memref<64x128xf32, #tpu.memory_space<vmem>>, vector<64x128xf32>
    %cst_586 = arith.constant dense<0.000000e+00> : vector<32x128xf32>
    %1498 = tpu.matmul %1494, %1497, %cst_586 {dimension_numbers = #tpu.dot_dimension_numbers<[1], [0], [0], [1], [0, 0, 1, 1], [], []>} : vector<32x64xf32>, vector<64x128xf32>, vector<32x128xf32> -> vector<32x128xf32>
    %1499 = arith.maximumf %1496, %1498 : vector<32x128xf32>
    %c0_587 = arith.constant 0 : index
    %c0_588 = arith.constant 0 : index
    %1500 = vector.load %arg20[%c0_587, %c0_588] : memref<32x128xf32, #tpu.memory_space<vmem>>, vector<32x128xf32>
    tpu.vector_store %arg20[%c0_587, %c0_588], %1499 {strides = array<i32>} : memref<32x128xf32, #tpu.memory_space<vmem>>, vector<32x128xf32>,
    %cst_589 = arith.constant 0.000000e+00 : f32
    %1501 = vector.broadcast %cst_589 : f32 to vector<8x128xf32>
    %c0_590 = arith.constant 0 : index
    %c0_591 = arith.constant 0 : index
    %1502 = tpu.strided_load %arg20[%c0_590, %c0_591] {strides = array<i32: 4, 1>} : memref<32x128xf32, #tpu.memory_space<vmem>>, vector<8x128xf32>
    %1503 = arith.truncf %1502 : vector<8x128xf32> to vector<8x128xbf16>
    %c0_592 = arith.constant 0 : index
    %c0_593 = arith.constant 0 : index
    %c0_594 = arith.constant 0 : index
    %1504 = vector.load %arg13[%c0_592, %c0_593, %c0_594] : memref<4x128x128xbf16, #tpu.memory_space<vmem>>, vector<1x128x128xbf16>
    %1505 = vector.shape_cast %1504 : vector<1x128x128xbf16> to vector<128x128xbf16>
    %cst_595 = arith.constant dense<0.000000e+00> : vector<8x128xf32>
    %1506 = tpu.matmul %1503, %1505, %cst_595 {dimension_numbers = #tpu.dot_dimension_numbers<[1], [0], [0], [1], [0, 0, 1, 1], [], []>} : vector<8x128xbf16>, vector<128x128xbf16>, vector<8x128xf32> -> vector<8x128xf32>
    %1507 = arith.addf %1501, %1506 : vector<8x128xf32>
    %c1_596 = arith.constant 1 : index
    %c0_597 = arith.constant 0 : index
    %1508 = tpu.strided_load %arg20[%c1_596, %c0_597] {strides = array<i32: 4, 1>} : memref<32x128xf32, #tpu.memory_space<vmem>>, vector<8x128xf32>
    %1509 = arith.truncf %1508 : vector<8x128xf32> to vector<8x128xbf16>
    %c1_598 = arith.constant 1 : index
    %c0_599 = arith.constant 0 : index
    %c0_600 = arith.constant 0 : index
    %1510 = vector.load %arg13[%c1_598, %c0_599, %c0_600] : memref<4x128x128xbf16, #tpu.memory_space<vmem>>, vector<1x128x128xbf16>
    %1511 = vector.shape_cast %1510 : vector<1x128x128xbf16> to vector<128x128xbf16>
    %cst_601 = arith.constant dense<0.000000e+00> : vector<8x128xf32>
    %1512 = tpu.matmul %1509, %1511, %cst_601 {dimension_numbers = #tpu.dot_dimension_numbers<[1], [0], [0], [1], [0, 0, 1, 1], [], []>} : vector<8x128xbf16>, vector<128x128xbf16>, vector<8x128xf32> -> vector<8x128xf32>
    %1513 = arith.addf %1507, %1512 : vector<8x128xf32>
    %c2_602 = arith.constant 2 : index
    %c0_603 = arith.constant 0 : index
    %1514 = tpu.strided_load %arg20[%c2_602, %c0_603] {strides = array<i32: 4, 1>} : memref<32x128xf32, #tpu.memory_space<vmem>>, vector<8x128xf32>
    %1515 = arith.truncf %1514 : vector<8x128xf32> to vector<8x128xbf16>
    %c2_604 = arith.constant 2 : index
    %c0_605 = arith.constant 0 : index
    %c0_606 = arith.constant 0 : index
    %1516 = vector.load %arg13[%c2_604, %c0_605, %c0_606] : memref<4x128x128xbf16, #tpu.memory_space<vmem>>, vector<1x128x128xbf16>
    %1517 = vector.shape_cast %1516 : vector<1x128x128xbf16> to vector<128x128xbf16>
    %cst_607 = arith.constant dense<0.000000e+00> : vector<8x128xf32>
    %1518 = tpu.matmul %1515, %1517, %cst_607 {dimension_numbers = #tpu.dot_dimension_numbers<[1], [0], [0], [1], [0, 0, 1, 1], [], []>} : vector<8x128xbf16>, vector<128x128xbf16>, vector<8x128xf32> -> vector<8x128xf32>
    %1519 = arith.addf %1513, %1518 : vector<8x128xf32>
    %c3_608 = arith.constant 3 : index
    %c0_609 = arith.constant 0 : index
    %1520 = tpu.strided_load %arg20[%c3_608, %c0_609] {strides = array<i32: 4, 1>} : memref<32x128xf32, #tpu.memory_space<vmem>>, vector<8x128xf32>
    %1521 = arith.truncf %1520 : vector<8x128xf32> to vector<8x128xbf16>
    %c3_610 = arith.constant 3 : index
    %c0_611 = arith.constant 0 : index
    %c0_612 = arith.constant 0 : index
    %1522 = vector.load %arg13[%c3_610, %c0_611, %c0_612] : memref<4x128x128xbf16, #tpu.memory_space<vmem>>, vector<1x128x128xbf16>
    %1523 = vector.shape_cast %1522 : vector<1x128x128xbf16> to vector<128x128xbf16>
    %cst_613 = arith.constant dense<0.000000e+00> : vector<8x128xf32>
    %1524 = tpu.matmul %1521, %1523, %cst_613 {dimension_numbers = #tpu.dot_dimension_numbers<[1], [0], [0], [1], [0, 0, 1, 1], [], []>} : vector<8x128xbf16>, vector<128x128xbf16>, vector<8x128xf32> -> vector<8x128xf32>
    %1525 = arith.addf %1519, %1524 : vector<8x128xf32>
    %c0_614 = arith.constant 0 : index
    %c0_615 = arith.constant 0 : index
    %1526 = vector.load %arg14[%c0_614, %c0_615] : memref<1x128xf32, #tpu.memory_space<vmem>>, vector<1x128xf32>
    %1527 = vector.broadcast %1526 : vector<1x128xf32> to vector<8x128xf32>
    %1528 = arith.addf %1525, %1527 : vector<8x128xf32>
    %c0_616 = arith.constant 0 : index
    %c0_617 = arith.constant 0 : index
    %1529 = vector.load %arg15[%c0_616, %c0_617] : memref<8x128xf32, #tpu.memory_space<vmem>>, vector<8x128xf32>
    tpu.vector_store %arg15[%c0_616, %c0_617], %1528 {strides = array<i32>} : memref<8x128xf32, #tpu.memory_space<vmem>>, vector<8x128xf32>,
    return
  }
}

</mosaic_0001>

<bundles_post_ra>
// kernel: tpu_custom_call.1
= control target key start
LH: loop header
LB: loop body
LE: loop exit
PB: predicated region body
PF: predicated region fallthrough
CT: control target
= control target key end

     0   :  { %s11916_s0 = inlined_call_operand.hbm [shape: f32[8,128], index: 0, kind: input, shape index: {}]   ;;  %s11917_s1 = inlined_call_operand.hbm [shape: f32[18], index: 1, kind: input, shape index: {}]   ;;  %s11918_s2 = inlined_call_operand.hbm [shape: f32[2], index: 2, kind: input, shape index: {}]   ;;  %s11919_s3 = inlined_call_operand.hbm [shape: f32[36], index: 3, kind: input, shape index: {}]   ;;  %s11920_s4 = inlined_call_operand.hbm [shape: f32[2], index: 4, kind: input, shape index: {}]   ;;  %s11921_s5 = inlined_call_operand.vmem [shape: f32[72], index: 5, kind: input, shape index: {}]   ;;  %s11922_s6 = inlined_call_operand.vmem [shape: f32[4], index: 6, kind: input, shape index: {}]   ;;  %s11923_s7 = inlined_call_operand.vmem [shape: f32[144], index: 7, kind: input, shape index: {}]   ;;  %s11924_s8 = inlined_call_operand.hbm [shape: f32[4], index: 8, kind: input, shape index: {}]   ;;  %s11925_s9 = inlined_call_operand.vmem [shape: f32[128,64], index: 9, kind: input, shape index: {}]   ;;  %s11926_s10 = inlined_call_operand.vmem [shape: f32[128,64], index: 10, kind: input, shape index: {}]   ;;  %s11927_s11 = inlined_call_operand.vmem [shape: f32[64,128], index: 11, kind: input, shape index: {}]   ;;  %s11928_s12 = inlined_call_operand.hbm [shape: f32[64,128], index: 12, kind: input, shape index: {}]   ;;  %s11929_s13 = inlined_call_operand.vmem [shape: bf16[4,128,128], index: 13, kind: input, shape index: {}]   ;;  %s11930_s14 = inlined_call_operand.vmem [shape: f32[1,128], index: 14, kind: input, shape index: {}]   ;;  %s11931_s15 = inlined_call_operand.hbm [shape: f32[8,128], index: 15, kind: output, shape index: {}]  }
   0x1   :  { %12380 = sst [smem:[#allocation183_spill]] %s11927_s11 }
   0x2   :  { %12381 = sst [smem:[#allocation184_spill]] %s11929_s13 }
   0x3   :  { %12382 = sst [smem:[#allocation185_spill]] %s11930_s14 }
   0x4   :  { %12383 = sst [smem:[#allocation186_spill]] %s11931_s15 }
   0x5   :  { %20 = vsyncpa [#allocation8], 0 }
   0x6   :  { %21 = vsyncpa [#allocation10], 0 }
   0x7   :  { %22 = vsyncpa [#allocation14], 0 }
   0x8   :  { %23 = vsyncpa [#allocation17], 0 }
   0x9   :  { %24 = vsyncpa [#allocation11], 0 }
   0xa   :  { %25 = vsyncpa [#allocation20], 0 }
   0xb   :  { %26 = vsyncpa [#allocation24], 0  ;;  %s53_s20 = sshll.u32 %s11918_s2, 4  ;;  %s54_s20 = int_to_ptr.hbm [resolvable:$true] %s53_s20 }
   0xc   :  { %27 = vsyncpa [#allocation9], 0  ;;  %s71_s23 = sshll.u32 %s11920_s4, 4  ;;  %s6404_s24 = smov [#allocation13]   ;;  %s72_s23 = int_to_ptr.hbm [resolvable:$true] %s71_s23 }
   0xd   :  { %56 = dma.hbm_to_smem %s54_s20, 16, %s6404_s24, [#allocation14]  }
   0xe   :  { %s6405_s25 = smov [#allocation16]   ;;  %s89_s28 = sshll.u32 %s11922_s6, 4  ;;  %s90_s28 = int_to_ptr.vmem [resolvable:$true] %s89_s28 }
   0xf   :  { %74 = dma.hbm_to_smem %s72_s23, 16, %s6405_s25, [#allocation17]  }
  0x10   :  { %s33_s2 = sshll.u32 %s11916_s0, 4  ;;  %s6406_s16 = smov [#allocation19]   ;;  %s34_s2 = int_to_ptr.hbm [resolvable:$true] %s33_s2 }
  0x11   :  { %92 = dma.vmem_to_smem %s90_s28, 16, %s6406_s16, [#allocation20]  }
  0x12   :  { %s6407_s17 = smov [#allocation7]   ;;  %s44_s20 = sshll.u32 %s11917_s1, 4  ;;  %s45_s20 = int_to_ptr.hbm [resolvable:$true] %s44_s20 }
  0x13   :  { %s35_s18 = sshll.u32 %s6407_s17, 4  ;;  %s62_s6 = sshll.u32 %s11919_s3, 4  ;;  %s36_s18 = int_to_ptr.vmem [resolvable:$true] %s35_s18  ;;  %s63_s6 = int_to_ptr.hbm [resolvable:$true] %s62_s6 }
  0x14   :  { %38 = dma.hbm_to_vmem [thread:$0]  %s34_s2, 128, %s36_s18, [#allocation8]  }
  0x15   :  { %s6408_s23 = smov [#allocation12]   ;;  %s6409_s0 = smov [#allocation15]  }
  0x16   :  { %47 = dma.hbm_to_smem %s45_s20, 16, %s6408_s23, [#allocation10]  }
  0x17   :  { %65 = dma.hbm_to_smem %s63_s6, 16, %s6409_s0, [#allocation14]  }
  0x18   :  { %s80_s26 = sshll.u32 %s11921_s5, 4  ;;  %s98_s1 = sshll.u32 %s11923_s7, 4  ;;  %s81_s26 = int_to_ptr.vmem [resolvable:$true] %s80_s26  ;;  %s99_s1 = int_to_ptr.vmem [resolvable:$true] %s98_s1 }
  0x19   :  { %s6410_s29 = smov [#allocation18]   ;;  %s6411_s30 = smov [#allocation21]  }
  0x1a   :  { %83 = dma.vmem_to_smem %s81_s26, 16, %s6410_s29, [#allocation11]  }
  0x1b   :  { %101 = dma.vmem_to_smem %s99_s1, 32, %s6411_s30, [#allocation20]  }
  0x1c   :  { %s107_s16 = sshll.u32 %s11924_s8, 4  ;;  %s121_s4 = sshll.u32 %s11928_s12, 4  ;;  %s108_s16 = int_to_ptr.hbm [resolvable:$true] %s107_s16  ;;  %s122_s4 = int_to_ptr.hbm [resolvable:$true] %s121_s4 }
  0x1d   :  { %s6412_s5 = smov [#allocation22]   ;;  %s6413_s19 = smov [#allocation23]  }
  0x1e   :  { %110 = dma.hbm_to_smem %s108_s16, 16, %s6412_s5, [#allocation17]  }
  0x1f   :  { %s123_s20 = sshll.u32 %s6413_s19, 4  ;;  %s6414_s7 = smov 128   ;;  %s124_s20 = int_to_ptr.vmem [resolvable:$true] %s123_s20 }
  0x20   :  { %s6415_s21 = smov 8  }
  0x21   :  { %129 = dma.hbm_to_vmem [thread:$0]  %s122_s4, 1024, %s124_s20, [#allocation24], %s6414_s7, %s6414_s7, %s6415_s21  }
  0x22   :  { %6386 = dma.done.wait [#allocation8], 128  }
  0x23   :  { %6387 = vsyncadd [#allocation8], 4294967168 }
  0x24   :  { %6388 = dma.done.wait [#allocation10], 16  }
  0x25   :  { %6389 = vsyncadd [#allocation10], 4294967280 }
  0x26   :  { %6390 = dma.done.wait [#allocation14], 32  }
  0x27   :  { %6391 = vsyncadd [#allocation14], 4294967264 }
  0x28   :  { %6392 = dma.done.wait [#allocation17], 16  }
  0x29   :  { %6393 = vsyncadd [#allocation17], 4294967280 }
  0x2a   :  { %6394 = dma.done.wait [#allocation11], 16  }
  0x2b   :  { %6395 = vsyncadd [#allocation11], 4294967280 }
  0x2c   :  { %6396 = dma.done.wait [#allocation20], 48  }
  0x2d   :  { %6397 = vsyncadd [#allocation20], 4294967248 }
  0x2e   :  { %6398 = dma.done.wait [#allocation17], 16  }
  0x2f   :  { %6399 = vsyncadd [#allocation17], 4294967280 }
  0x30   :  { %6400 = dma.done.wait [#allocation24], 1024  }
  0x31   :  { %6401 = vsyncadd [#allocation24], 4294966272 }
  0x32   :  { %174 = sfence }
  0x33   :  { %v6531_v0 = vld [vmem:[#allocation7] sm:$0xff]  ;;  %s6533_s8 = sld [smem:[#allocation12 + $0xa]]  ;;  %v6416_v1 = vmov 0.0   ;;  %s11969_s6 = smov 127   ;;  %vm468_vm0 = vcmask 1045504   ;;  %vm321_vm1 = vcmask 1031168  }
  0x34   :  { %176 = vst [vmem:[#allocation2] sm:$0xff] %v6416_v1  ;;  %s6536_s12 = sld [smem:[#allocation12 + $0x1]]  ;;  %s11967_s23 = smov 126   ;;  %vm641_vm2 = vcmask 1040384   ;;  %vm652_vm3 = vcmask 7168   ;;  %vm205_vm4 = vcmask 1048064  }
  0x35   :  { %242 = vst [vmem:[#allocation2 + $0x8] sm:$0xff] %v6531_v0  ;;  %s5674_s22 = sld [smem:[#allocation12 + $0x2]]  ;;  %s12410_s13 = smov 127   ;;  %vm1549_vm5 = vcmask 523264  }
  0x36   :  { %175 = vst [vmem:[#allocation2 + $0x18] sm:$0xff] %v6416_v1  ;;  %s5675_s0 = sld [smem:[#allocation12 + $0xb]] }
  0x37   :  { %177 = vst [vmem:[#allocation2 + $0x30] sm:$0xff] %v6416_v1  ;;  %s5679_s24 = sld [smem:[#allocation12 + $0xd]] }
  0x38   :  { %178 = vst [vmem:[#allocation2 + $0x10] sm:$0xff] %v6416_v1  ;;  %s5678_s25 = sld [smem:[#allocation12 + $0x4]] }
  0x39   :  { %v284_v2 = vstv %s6533_s8  ;;  %179 = vst [vmem:[#allocation2 + $0x38] sm:$0xff] %v6416_v1  ;;  %s6578_s26 = sld [smem:[#allocation12 + $0x5]] }
  0x3a   :  { %180 = vst [vmem:[#allocation2 + $0x40] sm:$0xff] %v6416_v1  ;;  %v268_v3 = vstv %s6536_s12  ;;  %s6590_s27 = sld [smem:[#allocation12 + $0xe]] }
  0x3b   :  { %v6546_v4 = vld [vmem:[#allocation2] sm:$0x80]  ;;  %181 = vst [vmem:[#allocation2 + $0x20] sm:$0xff] %v6416_v1  ;;  %v304_v6 = vstv %s5674_s22  ;;  %s5684_s28 = sld [smem:[#allocation12 + $0x7]] }
  0x3c   :  { %v299_v5 = vld [vmem:[#allocation2] sm:$0x80]  ;;  %v285_v7 = vmul.f32 %v284_v2, %v6546_v4  ;;  %182 = vst [vmem:[#allocation2 + $0x28] sm:$0xff] %v6416_v1  ;;  %v269_v8 = vmul.f32 %v268_v3, %v6546_v4  ;;  %v6556_v10 = vld [vmem:[#allocation2 + $0x8] sm:$0x7f]  ;;  %v333_v17 = vstv %s5675_s0  ;;  %s6609_s1 = sld [smem:[#allocation12 + $0x10]] }
  0x3d   :  { %v305_v9 = vmul.f32 %v304_v6, %v299_v5  ;;  %183 = vst [vmem:[#allocation3 + $0x48] sm:$0xff] %v6416_v1  ;;  %v286_v12 = vmul.f32 %v284_v2, %v6556_v10  ;;  %v270_v13 = vmul.f32 %v268_v3, %v6556_v10  ;;  %v301_v16 = vld [vmem:[#allocation2 + $0x8] sm:$0x7f]  ;;  %v334_v20 = vmul.f32 %v333_v17, %v299_v5  ;;  %s5686_s29 = sld [smem:[#allocation12 + $0x8]] }
  0x3e   :  { %289 = vrot.lane.b32.xlu1 %v285_v7, %s11969_s6  ;;  %184 = vst [vmem:[#allocation3 + $0x88] sm:$0xff] %v6416_v1  ;;  %273 = vrot.lane.b32.xlu0 %v269_v8, %s11969_s6  ;;  %v300_v11 = vld [vmem:[#allocation2 + $0x30] sm:$0x80]  ;;  %v307_v19 = vmul.f32 %v304_v6, %v301_v16  ;;  %v336_v21 = vmul.f32 %v333_v17, %v301_v16  ;;  %v403_v24 = vstv %s5679_s24  ;;  %v391_v25 = vstv %s5678_s25  ;;  %v6619_v37 = vld [vmem:[#allocation2 + $0x8] sm:$0xfe]  ;;  %s5687_s30 = sld [smem:[#allocation12 + $0x11]] }
  0x3f   :  { %185 = vst [vmem:[#allocation3 + $0x10] sm:$0xff] %v6416_v1  ;;  %313 = vrot.lane.b32.xlu2 %v305_v9, %s11967_s23  ;;  %v306_v14 = vmul.f32 %v304_v6, %v300_v11  ;;  %v335_v22 = vmul.f32 %v333_v17, %v300_v11  ;;  %v417_v26 = vstv %s6578_s26  ;;  %v404_v27 = vmul.f32 %v403_v24, %v6531_v0  ;;  %v545_v52 = vld [vmem:[#allocation2 + $0x8] sm:$0xfe]  ;;  %s6659_s3 = sld [smem:[#allocation15 + $0x13]] }
  0x40   :  { %186 = vst [vmem:[#allocation3] sm:$0xff] %v6416_v1  ;;  %v392_v28 = vmul.f32 %v391_v25, %v6531_v0  ;;  %v418_v29 = vmul.f32 %v417_v26, %v6531_v0  ;;  %v436_v33 = vstv %s6590_s27  ;;  %v419_v35 = vmul.f32 0.0, %v417_v26  ;;  %v6621_v38 = vld [vmem:[#allocation2 + $0x38] sm:$0x1]  ;;  %s6661_s2 = sld [smem:[#allocation15 + $0x1]]  ;;  %s11962_s27 = smov 1  }
  0x41   :  { %187 = vst [vmem:[#allocation3 + $0x50] sm:$0xff] %v6416_v1  ;;  %v406_v30 = vrot.slane %v404_v27, 1  ;;  %v437_v34 = vmul.f32 %v436_v33, %v6531_v0  ;;  %v438_v36 = vmul.f32 0.0, %v436_v33  ;;  %v508_v39 = vstv %s5684_s28  ;;  %v548_v58 = vld [vmem:[#allocation2 + $0x40] sm:$0x1]  ;;  %s5692_s16 = sld [smem:[#allocation15 + $0x2]] }
  0x42   :  { %188 = vst [vmem:[#allocation3 + $0x18] sm:$0xff] %v6416_v1  ;;  %v394_v31 = vrot.slane %v392_v28, 1  ;;  %v422_v32 = vrot.slane %v418_v29, 1  ;;  %v423_v41 = vrot.slane %v419_v35, 1  ;;  %v509_v43 = vmul.f32 %v508_v39, %v6619_v37  ;;  %v547_v59 = vld [vmem:[#allocation2 + $0x38] sm:$0x1] }
  0x43   :  { %189 = vst [vmem:[#allocation3 + $0x60] sm:$0xff] %v6416_v1  ;;  %v302_v15 = vld [vmem:[#allocation2 + $0x28] sm:$0x7f]  ;;  %v441_v40 = vrot.slane %v437_v34, 1  ;;  %v442_v42 = vrot.slane %v438_v36, 1  ;;  %v510_v44 = vmul.f32 %v508_v39, %v6621_v38  ;;  %v527_v45 = vstv %s6609_s1  ;;  %s5693_s17 = sld [smem:[#allocation15 + $0x14]] }
  0x44   :  { %190 = vst [vmem:[#allocation3 + $0x28] sm:$0xff] %v6416_v1  ;;  %v308_v18 = vmul.f32 %v304_v6, %v302_v15  ;;  %v337_v23 = vmul.f32 %v333_v17, %v302_v15  ;;  %v513_v46 = vrot.slane %v509_v43, 2  ;;  %v528_v48 = vmul.f32 %v527_v45, %v6619_v37  ;;  %v546_v54 = vld [vmem:[#allocation2 + $0x28] sm:$0xfe]  ;;  %s6691_s18 = sld [smem:[#allocation15 + $0x17]] }
  0x45   :  { %192 = vst [vmem:[#allocation3 + $0x38] sm:$0xff] %v6416_v1  ;;  %v514_v47 = vrot.slane %v510_v44, 2  ;;  %v529_v50 = vmul.f32 %v527_v45, %v6621_v38  ;;  %v550_v53 = vstv %s5686_s29  ;;  %v584_v2 = vstv %s5687_s30  ;;  %v729_v29 = vld [vmem:[#allocation3 + $0x88] sm:$0x80]  ;;  %s6693_s4 = sld [smem:[#allocation15 + $0x5]] }
  0x46   :  { %193 = vst [vmem:[#allocation3 + $0x70] sm:$0xff] %v6416_v1  ;;  %291 = vrot.lane.b32.xlu1 %v286_v12, %s11969_s6  ;;  %275 = vrot.lane.b32.xlu0 %v270_v13, %s11969_s6  ;;  %v532_v51 = vrot.slane %v528_v48, 2  ;;  %v551_v55 = vmul.f32 %v550_v53, %v545_v52  ;;  %v552_v57 = vmul.f32 %v550_v53, %v546_v54  ;;  %s5704_s5 = sld [smem:[#allocation15 + $0x8]] }
  0x47   :  { %194 = vst [vmem:[#allocation3 + $0x30] sm:$0xff] %v6416_v1  ;;  %315 = vrot.lane.b32.xlu2 %v306_v14, %s11967_s23  ;;  %v515_v49 = vsel %vm468_vm0, %v513_v46, %v514_v47  ;;  %v533_v56 = vrot.slane %v529_v50, 2  ;;  %v554_v63 = vmul.f32 %v550_v53, %v548_v58  ;;  %v585_v6 = vmul.f32 %v584_v2, %v545_v52  ;;  %s5705_s19 = sld [smem:[#allocation15 + $0x1a]] }
  0x48   :  { %195 = vst [vmem:[#allocation3 + $0x68] sm:$0xff] %v6416_v1  ;;  %v559_v60 = vrot.slane %v551_v55, 2  ;;  %v560_v62 = vrot.slane %v552_v57, 2  ;;  %v587_v11 = vmul.f32 %v584_v2, %v547_v59  ;;  %v588_v12 = vmul.f32 %v584_v2, %v548_v58  ;;  %s247_s20 = sld [smem:[#allocation12]] }
  0x49   :  { %196 = vst [vmem:[#allocation3 + $0x80] sm:$0xff] %v6416_v1  ;;  %v534_v61 = vsel %vm468_vm0, %v532_v51, %v533_v56  ;;  %v563_v3 = vrot.slane %v554_v63, 2  ;;  %v593_v9 = vrot.slane %v585_v6, 2  ;;  %v586_v13 = vmul.f32 %v584_v2, %v546_v54  ;;  %s6729_s7 = sld [smem:[#allocation12 + $0x3]]  ;;  %v243_v63 = vld [vmem:[#allocation2 + $0x18] sm:$0x80] }
  0x4a   :  { %197 = vst [vmem:[#allocation3 + $0x58] sm:$0xff] %v6416_v1  ;;  %v595_v14 = vrot.slane %v587_v11, 2  ;;  %v597_v15 = vrot.slane %v588_v12, 2  ;;  %v6668_v24 = vstv %s5692_s16  ;;  %v6677_v28 = vstv %s5693_s17  ;;  %s5671_s21 = sld [smem:[#allocation12 + $0x9]] }
  0x4b   :  { %198 = vst [vmem:[#allocation3 + $0x78] sm:$0xff] %v6416_v1  ;;  %v564_v7 = vsel %vm468_vm0, %v560_v62, %v563_v3  ;;  %v594_v16 = vrot.slane %v586_v13, 2  ;;  %v865_v43 = vstv %s6691_s18  ;;  %v846_v45 = vstv %s6693_s4  ;;  %s6732_s8 = sld [smem:[#allocation15 + $0xa]] }
  0x4c   :  { %199 = vst [vmem:[#allocation3 + $0x8] sm:$0xff] %v6416_v1  ;;  %v596_v17 = vsel %vm468_vm0, %v593_v9, %v595_v14  ;;  %v867_v44 = vmul.f32 0.0, %v865_v43  ;;  %v848_v48 = vmul.f32 0.0, %v846_v45  ;;  %v735_v50 = vmul.f32 %v6668_v24, %v729_v29  ;;  %s6734_s12 = sld [smem:[#allocation12 + $0xc]] }
  0x4d   :  { %200 = vst [vmem:[#allocation4] sm:$0xff] %v6416_v1  ;;  %v6719_v54 = vstv %s5704_s5  ;;  %v6722_v56 = vstv %s5705_s19  ;;  %s5682_s22 = sld [smem:[#allocation12 + $0x6]]  ;;  %v6745_v11 = vld [vmem:[#allocation3 + $0x70] sm:$0x80] }
  0x4e   :  { %201 = vst [vmem:[#allocation4 + $0x8] sm:$0xff] %v6416_v1  ;;  %319 = vrot.lane.b32.xlu1 %v308_v18, %s11967_s23  ;;  %317 = vrot.lane.b32.xlu0 %v307_v19, %s11967_s23  ;;  %v598_v18 = vsel %vm468_vm0, %v594_v16, %v597_v15  ;;  %v674_v19 = vld [vmem:[#allocation3 + $0x88] sm:$0x80]  ;;  %s5683_s0 = sld [smem:[#allocation12 + $0xf]] }
  0x4f   :  { %202 = vst [vmem:[#allocation4 + $0x20] sm:$0xff] %v6416_v1  ;;  %342 = vrot.lane.b32.xlu2 %v334_v20, %s11967_s23  ;;  %v714_v20 = vstv %s6659_s3  ;;  %s6805_s24 = sld [smem:[#allocation13]] }
  0x50   :  { %203 = vst [vmem:[#allocation4 + $0x28] sm:$0xff] %v6416_v1  ;;  %v258_v12 = vstv %s5671_s21  ;;  %s6826_s25 = sld [smem:[#allocation13 + $0x1]] }
  0x51   :  { %204 = vst [vmem:[#allocation4 + $0x10] sm:$0xff] %v6416_v1  ;;  %s6845_s26 = sld [smem:[#allocation15 + $0x1d]] }
  0x52   :  { %208 = vst [vmem:[#allocation4 + $0x30] sm:$0xff] %v6416_v1  ;;  %s6854_s28 = sld [smem:[#allocation15 + $0xe]] }
  0x53   :  { %209 = vst [vmem:[#allocation4 + $0x38] sm:$0xff] %v6416_v1  ;;  %s6856_s1 = sld [smem:[#allocation15 + $0x1c]] }
  0x54   :  { %210 = vst [vmem:[#allocation4 + $0x50] sm:$0xff] %v6416_v1  ;;  %s5710_s29 = sld [smem:[#allocation15 + $0xb]] }
  0x55   :  { %211 = vst [vmem:[#allocation4 + $0x58] sm:$0xff] %v6416_v1  ;;  %s5722_s30 = sld [smem:[#allocation15 + $0x11]] }
  0x56   :  { %212 = vst [vmem:[#allocation4 + $0x40] sm:$0xff] %v6416_v1  ;;  %346 = vrot.lane.b32.xlu1 %v336_v21, %s11967_s23  ;;  %344 = vrot.lane.b32.xlu0 %v335_v22, %s11967_s23  ;;  %v715_v21 = vmul.f32 %v714_v20, %v674_v19  ;;  %v698_v22 = vstv %s6661_s2  ;;  %s5723_s16 = sld [smem:[#allocation15 + $0x23]] }
  0x57   :  { %214 = vst [vmem:[#allocation5] sm:$0xff] %v6416_v1  ;;  %348 = vrot.lane.b32.xlu2 %v337_v23, %s11967_s23  ;;  %v730_v23 = vld [vmem:[#allocation3 + $0x10] sm:$0x80]  ;;  %v699_v25 = vmul.f32 %v698_v22, %v674_v19  ;;  %s6891_s17 = sld [smem:[#allocation18 + $0x25]] }
  0x58   :  { %215 = vst [vmem:[#allocation5 + $0x8] sm:$0xff] %v6416_v1  ;;  %v736_v26 = vmul.f32 %v6668_v24, %v730_v23  ;;  %s6896_s5 = sld [smem:[#allocation15 + $0x20]] }
  0x59   :  { %216 = vst [vmem:[#allocation5 + $0x20] sm:$0xff] %v6416_v1  ;;  %s6914_s19 = sld [smem:[#allocation18 + $0x1]] }
  0x5a   :  { %217 = vst [vmem:[#allocation5 + $0x28] sm:$0xff] %v6416_v1  ;;  %s6925_s21 = sld [smem:[#allocation18 + $0x14]] }
  0x5b   :  { %218 = vst [vmem:[#allocation5 + $0x10] sm:$0xff] %v6416_v1  ;;  %s5696_s3 = sld [smem:[#allocation15 + $0x4]] }
  0x5c   :  { %221 = vst [vmem:[#allocation5 + $0x30] sm:$0xff] %v6416_v1  ;;  %s5697_s2 = sld [smem:[#allocation15 + $0x16]] }
  0x5d   :  { %222 = vst [vmem:[#allocation5 + $0x38] sm:$0xff] %v6416_v1  ;;  %s5720_s4 = sld [smem:[#allocation15 + $0x10]] }
  0x5e   :  { %223 = vst [vmem:[#allocation5 + $0x50] sm:$0xff] %v6416_v1  ;;  %407 = vrot.lane.b32.xlu1 %v406_v30, %s11969_s6  ;;  %395 = vrot.lane.b32.xlu0 %v394_v31, %s11969_s6  ;;  %v764_v30 = vmul.f32 %v6677_v28, %v730_v23  ;;  %v763_v31 = vmul.f32 %v6677_v28, %v729_v29  ;;  %v459_v29 = vstv %s5682_s22  ;;  %s6937_s22 = sld [smem:[#allocation18 + $0x26]] }
  0x5f   :  { %224 = vst [vmem:[#allocation5 + $0x58] sm:$0xff] %v6416_v1  ;;  %424 = vrot.lane.b32.xlu2 %v422_v32, %s11967_s23  ;;  %v259_v23 = vmul.f32 %v258_v12, %v243_v63  ;;  %s7169_s18 = sld [smem:[#allocation15 + $0x22]] }
  0x60   :  { %225 = vst [vmem:[#allocation5 + $0x40] sm:$0xff] %v6416_v1  ;;  %s7368_s15 = sld [smem:[#allocation21 + $0x6e]] }
  0x61   :  { %228 = vst [vmem:[#allocation5 + $0x60] sm:$0xff] %v6416_v1  ;;  %s7370_s14 = sld [smem:[#allocation15 + $0x1e]] }
  0x62   :  { %229 = vst [vmem:[#allocation5 + $0x68] sm:$0xff] %v6416_v1  ;;  %s7375_s11 = sld [smem:[#allocation21 + $0x2f]] }
  0x63   :  { %230 = vst [vmem:[#allocation5 + $0x80] sm:$0xff] %v6416_v1 }
  0x64   :  { %231 = vst [vmem:[#allocation5 + $0x88] sm:$0xff] %v6416_v1 }
  0x65   :  { %232 = vst [vmem:[#allocation5 + $0x70] sm:$0xff] %v6416_v1 }
  0x66   :  { %235 = vst [vmem:[#allocation5 + $0x90] sm:$0xff] %v6416_v1  ;;  %443 = vrot.lane.b32.xlu1 %v441_v40, %s11967_s23  ;;  %426 = vrot.lane.b32.xlu0 %v423_v41, %s11967_s23  ;;  %v732_v40 = vld [vmem:[#allocation3 + $0x28] sm:$0x7f]  ;;  %12409 = sst [smem:[#allocation59_spill]] %s7368_s15 }
  0x67   :  { %236 = vst [vmem:[#allocation5 + $0x98] sm:$0xff] %v6416_v1  ;;  %445 = vrot.lane.b32.xlu2 %v442_v42, %s11967_s23  ;;  %v766_v41 = vmul.f32 %v6677_v28, %v732_v40  ;;  %v738_v13 = vmul.f32 %v6668_v24, %v732_v40 }
  0x68   :  { %237 = vst [vmem:[#allocation5 + $0xb0] sm:$0xff] %v6416_v1  ;;  %12411 = sst [smem:[#allocation60_spill]] %s7375_s11 }
  0x69   :  { %238 = vst [vmem:[#allocation5 + $0xb8] sm:$0xff] %v6416_v1 }
  0x6a   :  { %239 = vst [vmem:[#allocation5 + $0xa0] sm:$0xff] %v6416_v1  ;;  %v553_v1 = vmul.f32 %v550_v53, %v547_v59  ;;  %v974_v53 = vld [vmem:[#allocation3 + $0x28] sm:$0xfe] }
  0x6b   :  { %v980_v55 = vmul.f32 %v6719_v54, %v974_v53  ;;  %v1014_v59 = vmul.f32 %v6722_v56, %v974_v53 }
  0x6c   :  { %v561_v5 = vrot.slane %v553_v1, 2  ;;  %v248_v1 = vstv %s247_s20  ;;  %s6919_s20 = sld [smem:[#allocation18 + $0x37]] }
  0x6d   :  { %v250_v15 = vmul.f32 %v248_v1, %v6546_v4 }
  0x6e   :  { %518 = vrot.lane.b32.xlu1 %v515_v49, %s11969_s6  ;;  %516 = vrot.lane.b32.xlu0 %v513_v46, %s11969_s6  ;;  %v562_v8 = vsel %vm468_vm0, %v559_v60, %v561_v5  ;;  %v871_v49 = vrot.slane %v867_v44, 1 }
  0x6f   :  { %535 = vrot.lane.b32.xlu2 %v532_v51, %s11969_s6  ;;  %v852_v51 = vrot.slane %v848_v48, 1 }
  0x76   :  { %565 = vrot.lane.b32.xlu1 %v559_v60, %s11967_s23  ;;  %537 = vrot.lane.b32.xlu0 %v534_v61, %s11969_s6  ;;  %v988_v60 = vrot.slane %v980_v55, 2  ;;  %v1022_v61 = vrot.slane %v1014_v59, 2 }
  0x77   :  { %567 = vrot.lane.b32.xlu2 %v560_v62, %s11967_s23  ;;  %v976_v62 = vld [vmem:[#allocation3 + $0x18] sm:$0x1] }
  0x78   :  { %v1016_v2 = vmul.f32 %v6722_v56, %v976_v62 }
  0x7e   :  { %571 = vrot.lane.b32.xlu1 %v564_v7, %s11967_s23  ;;  %569 = vrot.lane.b32.xlu0 %v562_v8, %s11967_s23  ;;  %v1025_v7 = vrot.slane %v1016_v2, 2  ;;  %v249_v8 = vmul.f32 %v248_v1, %v243_v63 }
  0x7f   :  { %599 = vrot.lane.b32.xlu2 %v593_v9, %s11967_s23  ;;  %v363_v9 = vstv %s6729_s7  ;;  %s6922_s7 = sld [smem:[#allocation18 + $0x13]] }
  0x80   :  { %v1026_v14 = vsel %vm468_vm0, %v1022_v61, %v1025_v7 }
  0x86   :  { %603 = vrot.lane.b32.xlu1 %v596_v17, %s11967_s23  ;;  %601 = vrot.lane.b32.xlu0 %v594_v16, %s11967_s23  ;;  %v1070_v16 = vstv %s6732_s8  ;;  %v377_v17 = vstv %s6734_s12  ;;  %s6929_s12 = sld [smem:[#allocation18 + $0x2]] }
  0x87   :  { %605 = vrot.lane.b32.xlu2 %v598_v18, %s11967_s23  ;;  %v364_v18 = vmul.f32 0.0, %v363_v9  ;;  %s7128_s8 = sld [smem:[#allocation15 + $0x7]] }
  0x89   :  { %v368_v53 = vrot.slane %v364_v18, 1  ;;  %v6781_v18 = vmul.f32 %v377_v17, %v6531_v0 }
  0x8e   :  { %719 = vrot.lane.b32.xlu0 %v715_v21, %s11969_s6  ;;  %703 = vrot.lane.b32.xlu1 %v699_v25, %s11969_s6  ;;  %v1071_v21 = vmul.f32 %v1070_v16, %v6745_v11  ;;  %v245_v25 = vld [vmem:[#allocation2 + $0x20] sm:$0x7f] }
  0x8f   :  { %743 = vrot.lane.b32.xlu2 %v735_v50, %s11967_s23  ;;  %v251_v59 = vmul.f32 %v248_v1, %v245_v25 }
  0x96   :  { %745 = vrot.lane.b32.xlu0 %v736_v26, %s11967_s23  ;;  %773 = vrot.lane.b32.xlu1 %v764_v30, %s11967_s23  ;;  %v982_v26 = vmul.f32 %v6719_v54, %v976_v62  ;;  %v454_v30 = vld [vmem:[#allocation2 + $0x20] sm:$0xfe] }
  0x97   :  { %749 = vrot.lane.b32.xlu2 %v738_v13, %s11967_s23 }
  0x98   :  { %v991_v50 = vrot.slane %v982_v26, 2 }
  0x99   :  { %v6675_v27 = vpop.permute.xlu2 %313 }
  0x9a   :  { %v992_v2 = vsel %vm468_vm0, %v988_v60, %v991_v50 }
  0x9e   :  { %771 = vrot.lane.b32.xlu0 %v763_v31, %s11967_s23  ;;  %855 = vrot.lane.b32.xlu1 %v852_v51, %s11967_s23  ;;  %v6760_v31 = vmul.f32 0.0, %v377_v17  ;;  %v261_v17 = vmul.f32 %v258_v12, %v245_v25 }
  0x9f   :  { %999 = vrot.lane.b32.xlu2 %v992_v2, %s11967_s23 }
  0xa0   :  { %v382_v13 = vrot.slane %v6760_v31, 1 }
  0xa1   :  { %v6683_v32 = vpop.permute.xlu2 %315 }
  0xa2   :  { %v322_v51 = vsel %vm321_vm1, %v6675_v27, %v6683_v32 }
  0xa6   :  { %777 = vrot.lane.b32.xlu0 %v766_v41, %s11967_s23  ;;  %1029 = vrot.lane.b32.xlu1 %v1022_v61, %s11967_s23  ;;  %v365_v41 = vmul.f32 %v363_v9, %v6531_v0 }
  0xa8   :  { %v369_v9 = vrot.slane %v365_v41, 1  ;;  %v484_v41 = vstv %s5683_s0  ;;  %s6956_s0 = sld [smem:[#allocation18 + $0xa]] }
  0xa9   :  { %v6689_v35 = vpop.permute.xlu2 %342 }
  0xae   :  { %874 = vrot.lane.b32.xlu0 %v871_v49, %s11967_s23  ;;  %1075 = vrot.lane.b32.xlu1 %v1071_v21, %s11969_s6  ;;  %v456_v49 = vld [vmem:[#allocation2 + $0x10] sm:$0x1] }
  0xaf   :  { %v462_v63 = vmul.f32 %v459_v29, %v456_v49 }
  0xb0   :  { %v6685_v33 = vpop.permute.xlu1 %289  ;;  %v6687_v34 = vpop.permute.xlu0 %273 }
  0xb1   :  { %v6700_v42 = vpop.permute.xlu2 %348  ;;  %v279_v19 = vadd.f32 %v6687_v34, %v249_v8  ;;  %v280_v40 = vadd.f32 %v6687_v34, %v250_v15  ;;  %v295_v61 = vadd.f32 %v6685_v33, %v259_v23  ;;  %v460_v34 = vmul.f32 %v459_v29, %v454_v30 }
  0xb2   :  { %v252_v8 = vmul.f32 %v248_v1, %v6556_v10  ;;  %v471_v23 = vrot.slane %v462_v63, 2  ;;  %v6800_v63 = vmul.f32 %v484_v41, %v454_v30 }
  0xb3   :  { %v328_v55 = vadd.f32 %v6675_v27, %v279_v19  ;;  %v329_v7 = vadd.f32 %v322_v51, %v280_v40  ;;  %v260_v27 = vmul.f32 %v258_v12, %v6546_v4  ;;  %v356_v15 = vadd.f32 %v6689_v35, %v295_v61 }
  0xb4   :  { %v469_v19 = vrot.slane %v460_v34, 2  ;;  %v461_v40 = vmul.f32 %v459_v29, %v6619_v37  ;;  %v262_v51 = vmul.f32 %v258_v12, %v6556_v10 }
  0xb5   :  { %v373_v4 = vadd.f32 %v369_v9, %v329_v7  ;;  %v386_v61 = vadd.f32 %v382_v13, %v356_v15  ;;  %v296_v10 = vadd.f32 %v6685_v33, %v260_v27  ;;  %v486_v27 = vmul.f32 %v484_v41, %v6619_v37 }
  0xb6   :  { %995 = vrot.lane.b32.xlu0 %v988_v60, %s11967_s23  ;;  %v470_v2 = vrot.slane %v461_v40, 2  ;;  %v472_v7 = vsel %vm468_vm0, %v469_v19, %v471_v23 }
  0xb8   :  { %v6695_v36 = vpop.permute.xlu1 %291  ;;  %v6697_v39 = vpop.permute.xlu0 %275 }
  0xb9   :  { %v6716_v52 = vpop.permute.xlu2 %424  ;;  %v281_v32 = vadd.f32 %v6697_v39, %v251_v59  ;;  %v282_v26 = vadd.f32 %v6697_v39, %v252_v8  ;;  %v463_v59 = vmul.f32 %v459_v29, %v6621_v38 }
  0xbb   :  { %v473_v33 = vrot.slane %v463_v59, 2 }
  0xbe   :  { %1033 = vrot.lane.b32.xlu0 %v1026_v14, %s11967_s23  ;;  %v372_v14 = vadd.f32 %v368_v53, %v328_v55 }
  0xc0   :  { %v6707_v46 = vpop.permute.xlu1 %319  ;;  %v6709_v47 = vpop.permute.xlu0 %317 }
  0xc1   :  { %v6738_v3 = vpop.permute.xlu2 %445  ;;  %v323_v60 = vsel %vm321_vm1, %v6709_v47, %v6707_v46  ;;  %v330_v1 = vadd.f32 %v6709_v47, %v281_v32  ;;  %v383_v47 = vrot.slane %v6781_v18, 1 }
  0xc2   :  { %v331_v55 = vadd.f32 %v323_v60, %v282_v26  ;;  %v493_v60 = vrot.slane %v6800_v63, 2 }
  0xc3   :  { %v374_v34 = vadd.f32 %v368_v53, %v330_v1  ;;  %v487_v53 = vmul.f32 %v484_v41, %v456_v49 }
  0xc4   :  { %v375_v32 = vadd.f32 %v369_v9, %v331_v55 }
  0xc8   :  { %v6724_v57 = vpop.permute.xlu1 %346  ;;  %v6726_v58 = vpop.permute.xlu0 %344 }
  0xc9   :  { %v6771_v62 = vpop.permute.xlu2 %535  ;;  %v350_v29 = vsel %vm321_vm1, %v6689_v35, %v6726_v58  ;;  %v351_v15 = vsel %vm321_vm1, %v6724_v57, %v6700_v42  ;;  %v298_v58 = vadd.f32 %v6695_v36, %v262_v51 }
  0xca   :  { %v357_v1 = vadd.f32 %v350_v29, %v296_v10 }
  0xcc   :  { %v387_v59 = vadd.f32 %v383_v47, %v357_v1 }
  0xd0   :  { %v6740_v5 = vpop.permute.xlu1 %407  ;;  %v6742_v6 = vpop.permute.xlu0 %395 }
  0xd1   :  { %v398_v21 = vadd.f32 %v6742_v6, %v372_v14  ;;  %v399_v39 = vadd.f32 %v6742_v6, %v373_v4  ;;  %v568_v12 = vpop.permute.xlu2 %567  ;;  %v400_v8 = vadd.f32 %v6742_v6, %v374_v34  ;;  %v410_v30 = vadd.f32 %v6740_v5, %v386_v61 }
  0xd2   :  { %v297_v14 = vadd.f32 %v6695_v36, %v261_v17  ;;  %v401_v49 = vadd.f32 %v6742_v6, %v375_v32  ;;  %v359_v4 = vadd.f32 %v351_v15, %v298_v58  ;;  %v474_v36 = vsel %vm468_vm0, %v470_v2, %v473_v33 }
  0xd3   :  { %v431_v25 = vadd.f32 %v6716_v52, %v398_v21  ;;  %v433_v26 = vadd.f32 %v6716_v52, %v400_v8  ;;  %v495_v34 = vrot.slane %v487_v53, 2  ;;  %v628_v58 = vstv %s6826_s25  ;;  %s5703_s25 = sld [smem:[#allocation15 + $0x19]] }
  0xd4   :  { %v358_v37 = vadd.f32 %v6724_v57, %v297_v14  ;;  %v494_v57 = vrot.slane %v486_v27, 2 }
  0xd5   :  { %v479_v35 = vadd.f32 %v469_v19, %v431_v25  ;;  %v488_v19 = vmul.f32 %v484_v41, %v6621_v38  ;;  %v389_v38 = vadd.f32 %v383_v47, %v359_v4  ;;  %v411_v41 = vadd.f32 %v6740_v5, %v387_v59 }
  0xd6   :  { %v496_v33 = vsel %vm468_vm0, %v493_v60, %v495_v34 }
  0xd7   :  { %v497_v10 = vrot.slane %v488_v19, 2 }
  0xd8   :  { %v6764_v44 = vpop.permute.xlu1 %443  ;;  %v427_v48 = vpop.permute.xlu0 %426 }
  0xd9   :  { %v428_v46 = vsel %vm321_vm1, %v6716_v52, %v427_v48  ;;  %v450_v18 = vadd.f32 %v6764_v44, %v410_v30  ;;  %v388_v52 = vadd.f32 %v382_v13, %v358_v37  ;;  %v600_v25 = vpop.permute.xlu2 %599  ;;  %v413_v13 = vadd.f32 %v6740_v5, %v389_v38 }
  0xda   :  { %v432_v48 = vadd.f32 %v428_v46, %v399_v39  ;;  %v434_v17 = vadd.f32 %v428_v46, %v401_v49  ;;  %v618_v39 = vstv %s6805_s24  ;;  %v447_v46 = vsel %vm321_vm1, %v6764_v44, %v6738_v3  ;;  %s6963_s24 = sld [smem:[#allocation18 + $0x38]] }
  0xdb   :  { %v503_v51 = vadd.f32 %v493_v60, %v450_v18  ;;  %v451_v29 = vadd.f32 %v447_v46, %v411_v41  ;;  %v453_v32 = vadd.f32 %v447_v46, %v413_v13 }
  0xdc   :  { %v480_v21 = vadd.f32 %v470_v2, %v432_v48  ;;  %v482_v63 = vadd.f32 %v474_v36, %v434_v17 }
  0xdd   :  { %v541_v2 = vadd.f32 %v6771_v62, %v503_v51 }
  0xdf   :  { %v613_v15 = vadd.f32 %v600_v25, %v541_v2 }
  0xe0   :  { %v6790_v50 = vpop.permute.xlu1 %518  ;;  %v517_v0 = vpop.permute.xlu0 %516 }
  0xe1   :  { %v522_v40 = vadd.f32 %v517_v0, %v479_v35  ;;  %v523_v55 = vadd.f32 %v517_v0, %v480_v21  ;;  %v481_v0 = vadd.f32 %v472_v7, %v433_v26  ;;  %v525_v3 = vadd.f32 %v6790_v50, %v482_v63 }
  0xe3   :  { %v524_v48 = vadd.f32 %v6790_v50, %v481_v0  ;;  %v504_v50 = vadd.f32 %v494_v57, %v451_v29 }
  0xe5   :  { %v542_v36 = vadd.f32 %v6771_v62, %v504_v50 }
  0xe8   :  { %v566_v9 = vpop.permute.xlu1 %565  ;;  %v538_v23 = vpop.permute.xlu0 %537 }
  0xe9   :  { %v573_v42 = vsel %vm321_vm1, %v566_v9, %v568_v12  ;;  %v579_v6 = vadd.f32 %v566_v9, %v522_v40  ;;  %v412_v12 = vadd.f32 %v6740_v5, %v388_v52  ;;  %v498_v5 = vsel %vm468_vm0, %v494_v57, %v497_v10  ;;  %v1102_v10 = vld [vmem:[#allocation3 + $0x30] sm:$0x80] }
  0xea   :  { %v580_v61 = vadd.f32 %v573_v42, %v523_v55  ;;  %v506_v37 = vadd.f32 %v498_v5, %v453_v32  ;;  %v629_v40 = vadd.f32 %v628_v58, %v613_v15  ;;  %v6874_v32 = vstv %s5710_s29  ;;  %v1346_v15 = vld [vmem:[#allocation3 + $0x8] sm:$0xfe]  ;;  %s5701_s29 = sld [smem:[#allocation15 + $0x18]] }
  0xeb   :  { %v619_v31 = vadd.f32 %v618_v39, %v579_v6  ;;  %v452_v30 = vadd.f32 %v6764_v44, %v412_v12  ;;  %v606_v44 = vpop.permute.xlu2 %605  ;;  %v6859_v12 = vstv %s6845_s26  ;;  %v6879_v5 = vstv %s5722_s30  ;;  %s5700_s26 = sld [smem:[#allocation15 + $0x6]] }
  0xec   :  { %v620_v7 = vadd.f32 %v618_v39, %v580_v61  ;;  %v544_v17 = vadd.f32 %v538_v23, %v506_v37  ;;  %v633_v0 = vmax.f32 %v629_v40, 0.0  ;;  %v1108_v50 = vmul.f32 %v6874_v32, %v1102_v10  ;;  %s5718_s30 = sld [smem:[#allocation15 + $0xf]] }
  0xed   :  { %v623_v18 = vmax.f32 %v619_v31, 0.0  ;;  %v505_v21 = vadd.f32 %v496_v33, %v452_v30  ;;  %v1136_v31 = vmul.f32 %v6859_v12, %v1102_v10  ;;  %v1101_v33 = vld [vmem:[#allocation3 + $0x70] sm:$0x80] }
  0xee   :  { %v624_v49 = vmax.f32 %v620_v7, 0.0  ;;  %v660_v2 = vrot.slane %v633_v0, 7  ;;  %v11939_v0 = vstv %s6922_s7 }
  0xef   :  { %v543_v60 = vadd.f32 %v538_v23, %v505_v21  ;;  %v642_v42 = vrot.slane %v623_v18, 7  ;;  %v1348_v18 = vld [vmem:[#allocation3 + $0x58] sm:$0x1]  ;;  %v1104_v21 = vld [vmem:[#allocation3 + $0x8] sm:$0x7f] }
  0xf0   :  { %v572_v47 = vpop.permute.xlu1 %571  ;;  %v570_v8 = vpop.permute.xlu0 %569  ;;  %v645_v51 = vrot.slane %v624_v49, 7  ;;  %v1110_v37 = vmul.f32 %v6874_v32, %v1104_v21 }
  0xf1   :  { %v574_v53 = vsel %vm321_vm1, %v570_v8, %v572_v47  ;;  %v581_v14 = vadd.f32 %v570_v8, %v524_v48  ;;  %v1218_v47 = vstv %s6854_s28  ;;  %v1086_v8 = vstv %s6856_s1  ;;  %s5714_s28 = sld [smem:[#allocation15 + $0xd]] }
  0xf2   :  { %v582_v27 = vadd.f32 %v574_v53, %v525_v3  ;;  %v1220_v30 = vmul.f32 0.0, %v1218_v47  ;;  %v1087_v53 = vmul.f32 %v1086_v8, %v6745_v11  ;;  %s5715_s1 = sld [smem:[#allocation15 + $0x1f]] }
  0xf3   :  { %v621_v35 = vadd.f32 %v618_v39, %v581_v14 }
  0xf4   :  { %v622_v1 = vadd.f32 %v618_v39, %v582_v27  ;;  %v1224_v14 = vrot.slane %v1220_v30, 1  ;;  %v1107_v27 = vmul.f32 %v6874_v32, %v1101_v33  ;;  %v11932_v30 = vstv %s6956_s0 }
  0xf5   :  { %v625_v9 = vmax.f32 %v621_v35, 0.0  ;;  %v1352_v35 = vmul.f32 %v6879_v5, %v1346_v15 }
  0xf6   :  { %v626_v26 = vmax.f32 %v622_v1, 0.0 }
  0xf7   :  { %v643_v4 = vrot.slane %v625_v9, 7  ;;  %v1360_v11 = vrot.slane %v1352_v35, 2  ;;  %v6886_v9 = vstv %s5723_s16  ;;  %s5719_s16 = sld [smem:[#allocation15 + $0x21]] }
  0xf8   :  { %v604_v55 = vpop.permute.xlu1 %603  ;;  %v602_v19 = vpop.permute.xlu0 %601  ;;  %v646_v6 = vrot.slane %v626_v26, 7  ;;  %v1135_v26 = vmul.f32 %v6859_v12, %v1101_v33 }
  0xf9   :  { %v608_v59 = vsel %vm321_vm1, %v604_v55, %v606_v44  ;;  %v615_v39 = vadd.f32 %v604_v55, %v543_v60  ;;  %v607_v61 = vsel %vm321_vm1, %v600_v25, %v602_v19  ;;  %v644_v57 = vsel %vm641_vm2, %v642_v42, %v643_v4  ;;  %v1553_v42 = vld [vmem:[#allocation4 + $0x8] sm:$0x80] }
  0xfa   :  { %v616_v52 = vadd.f32 %v608_v59, %v544_v17  ;;  %v614_v46 = vadd.f32 %v607_v61, %v542_v36  ;;  %648 = vrot.lane.b32.xlu0 %v644_v57, %s11962_s27  ;;  %v647_v23 = vsel %vm641_vm2, %v645_v51, %v646_v6  ;;  %v1386_v44 = vmul.f32 %v6886_v9, %v1346_v15  ;;  %v6983_v15 = vpop.permute.xlu2 %743 }
  0xfb   :  { %v631_v34 = vadd.f32 %v628_v58, %v615_v39  ;;  %650 = vrot.lane.b32.xlu1 %v647_v23, %s11962_s27  ;;  %v11940_v60 = vstv %s6891_s17  ;;  %v1138_v4 = vmul.f32 %v6859_v12, %v1104_v21  ;;  %v1237_v55 = vstv %s6896_s5  ;;  %s7213_s5 = sld [smem:[#allocation18 + $0x2e]] }
  0xfc   :  { %v632_v62 = vadd.f32 %v628_v58, %v616_v52  ;;  %v630_v38 = vadd.f32 %v628_v58, %v614_v46  ;;  %v1354_v58 = vmul.f32 %v6879_v5, %v1348_v18  ;;  %v1394_v40 = vrot.slane %v1386_v44, 2 }
  0xfd   :  { %v635_v41 = vmax.f32 %v631_v34, 0.0  ;;  %v1630_v17 = vmul.f32 %v11940_v60, %v1553_v42  ;;  %v1239_v19 = vmul.f32 0.0, %v1237_v55  ;;  %v1388_v6 = vmul.f32 %v6886_v9, %v1348_v18 }
  0xfe   :  { %v634_v63 = vmax.f32 %v630_v38, 0.0  ;;  %v636_v25 = vmax.f32 %v632_v62, 0.0  ;;  %v1363_v1 = vrot.slane %v1354_v58, 2  ;;  %v11938_v57 = vstv %s6914_s19 }
  0xff   :  { %v661_v48 = vrot.slane %v635_v41, 7  ;;  %v1243_v36 = vrot.slane %v1239_v19, 1  ;;  %v1397_v59 = vrot.slane %v1388_v6, 2  ;;  %v1598_v52 = vmul.f32 %v11938_v57, %v1553_v42 }
 0x100   :  { %v663_v13 = vrot.slane %v634_v63, 7  ;;  %v664_v29 = vrot.slane %v636_v25, 7  ;;  %v1364_v49 = vsel %vm468_vm0, %v1360_v11, %v1363_v1  ;;  %v6910_v51 = vpop.permute.xlu0 %719  ;;  %v11935_v23 = vstv %s6919_s20  ;;  %v6939_v62 = vpop.permute.xlu1 %703 }
 0x101   :  { %v662_v3 = vsel %vm641_vm2, %v660_v2, %v661_v48  ;;  %v1398_v39 = vsel %vm468_vm0, %v1394_v40, %v1397_v59  ;;  %v11937_v34 = vstv %s6925_s21  ;;  %v1614_v38 = vmul.f32 %v11939_v0, %v1553_v42 }
 0x102   :  { %666 = vrot.lane.b32.xlu2 %v662_v3, %s11962_s27  ;;  %v665_v7 = vsel %vm641_vm2, %v663_v13, %v664_v29  ;;  %v1678_v41 = vmul.f32 %v11937_v34, %v1553_v42  ;;  %v1646_v63 = vmul.f32 %v11935_v23, %v1553_v42  ;;  %v11936_v25 = vstv %s6929_s12  ;;  %v6987_v35 = vpop.permute.xlu2 %749 }
 0x103   :  { %668 = vrot.lane.b32.xlu0 %v665_v7, %s11962_s27  ;;  %1145 = vrot.lane.b32.xlu1 %v1136_v31, %s11967_s23  ;;  %v1662_v10 = vmul.f32 %v11936_v25, %v1553_v42  ;;  %v11933_v48 = vstv %s6937_s22  ;;  %v6970_v7 = vld [vmem:[#allocation4 + $0x38] sm:$0x80]  ;;  %s7333_s27 = sld [smem:[#allocation21 + $0x2]] }
 0x104   :  { %v1694_v13 = vmul.f32 %v11933_v48, %v1553_v42 }
 0x108   :  { %v6917_v61 = vpop.permute.xlu0 %745  ;;  %v6958_v31 = vpop.permute.xlu1 %773 }
 0x109   :  { %12406 = sst [smem:[#allocation56_spill]] %s7333_s27 }
 0x10a   :  { %1115 = vrot.lane.b32.xlu2 %v1107_v27, %s11967_s23  ;;  %v6993_v1 = vpop.permute.xlu2 %999 }
 0x10b   :  { %1091 = vrot.lane.b32.xlu0 %v1087_v53, %s11969_s6  ;;  %1227 = vrot.lane.b32.xlu1 %v1224_v14, %s11967_s23  ;;  %v11934_v53 = vstv %s6963_s24  ;;  %v2176_v14 = vmul.f32 %v11932_v30, %v6970_v7  ;;  %12384 = vst [vmem:[#allocation35_spill] sm:$0xff] %v6993_v1 }
 0x10c   :  { %v1710_v33 = vmul.f32 %v11934_v53, %v1553_v42 }
 0x110   :  { %v6932_v46 = vpop.permute.xlu0 %771  ;;  %v6968_v3 = vpop.permute.xlu1 %855 }
 0x112   :  { %1121 = vrot.lane.b32.xlu2 %v1110_v37, %s11967_s23 }
 0x113   :  { %1117 = vrot.lane.b32.xlu0 %v1108_v50, %s11967_s23  ;;  %1371 = vrot.lane.b32.xlu1 %v1364_v49, %s11967_s23 }
 0x118   :  { %v6953_v2 = vpop.permute.xlu0 %777  ;;  %v6985_v18 = vpop.permute.xlu1 %1029 }
 0x11a   :  { %1367 = vrot.lane.b32.xlu2 %v1360_v11, %s11967_s23 }
 0x11b   :  { %1143 = vrot.lane.b32.xlu0 %v1135_v26, %s11967_s23  ;;  %1401 = vrot.lane.b32.xlu1 %v1394_v40, %s11967_s23  ;;  %v7002_v26 = vld [vmem:[#allocation3 + $0x50] sm:$0x1]  ;;  %v955_v40 = vstv %s5703_s25  ;;  %s7219_s25 = sld [smem:[#allocation18 + $0x1c]] }
 0x11c   :  { %v957_v42 = vmul.f32 %v955_v40, %v7002_v26 }
 0x120   :  { %v6966_v29 = vpop.permute.xlu0 %874  ;;  %v6991_v11 = vpop.permute.xlu1 %1075 }
 0x122   :  { %1618 = vrot.lane.b32.xlu2 %v1614_v38, %s11969_s6  ;;  %v7021_v38 = vstv %s5700_s26  ;;  %s7231_s26 = sld [smem:[#allocation18 + $0xb]] }
 0x123   :  { %1149 = vrot.lane.b32.xlu0 %v1138_v4, %s11967_s23  ;;  %1634 = vrot.lane.b32.xlu1 %v1630_v17, %s11969_s6 }
 0x128   :  { %v6981_v27 = vpop.permute.xlu0 %995 }
 0x12a   :  { %1666 = vrot.lane.b32.xlu2 %v1662_v10, %s11967_s23  ;;  %v7027_v10 = vstv %s5701_s29  ;;  %s5689_s29 = sld [smem:[#allocation15 + $0x12]] }
 0x12b   :  { %1246 = vrot.lane.b32.xlu0 %v1243_v36, %s11967_s23  ;;  %1682 = vrot.lane.b32.xlu1 %v1678_v41, %s11967_s23  ;;  %v7025_v41 = vld [vmem:[#allocation3 + $0x80] sm:$0x1] }
 0x130   :  { %v6989_v58 = vpop.permute.xlu0 %1033 }
 0x132   :  { %1714 = vrot.lane.b32.xlu2 %v1710_v33, %s11967_s23 }
 0x133   :  { %1405 = vrot.lane.b32.xlu0 %v1398_v39, %s11967_s23  ;;  %2180 = vrot.lane.b32.xlu1 %v2176_v14, %s11969_s6  ;;  %v7033_v14 = vstv %s5718_s30  ;;  %s7250_s30 = sld [smem:[#allocation18 + $0x40]] }
 0x13b   :  { %1602 = vrot.lane.b32.xlu0 %v1598_v52, %s11969_s6  ;;  %v961_v52 = vrot.slane %v957_v42, 2 }
 0x143   :  { %1650 = vrot.lane.b32.xlu0 %v1646_v63, %s11969_s6 }
 0x14b   :  { %1698 = vrot.lane.b32.xlu0 %v1694_v13, %s11967_s23 }
 0x15c   :  { %v667_v4 = vpop.permute.xlu2 %666 }
 0x16c   :  { %v649_v50 = vpop.permute.xlu0 %648 }
 0x16d   :  { %v651_v49 = vpop.permute.xlu1 %650 }
 0x16e   :  { %v6996_v21 = vsel %vm652_vm3, %v649_v50, %v651_v49  ;;  %v1387_v49 = vmul.f32 %v6886_v9, %v7025_v41 }
 0x16f   :  { %655 = vst [vmem:[#allocation3 + $0x20] sm:$0xff] %v6996_v21  ;;  %v847_v37 = vmul.f32 %v846_v45, %v6996_v21 }
 0x170   :  { %v1395_v53 = vrot.slane %v1387_v49, 2 }
 0x171   :  { %v851_v44 = vrot.slane %v847_v37, 1  ;;  %v7043_v37 = vstv %s5719_s16  ;;  %s7252_s16 = sld [smem:[#allocation15 + $0x15]] }
 0x173   :  { %853 = vrot.lane.b32.xlu0 %v851_v44, %s11967_s23  ;;  %v916_v44 = vmul.f32 %v7027_v10, %v7002_v26 }
 0x175   :  { %v669_v17 = vpop.permute.xlu0 %668 }
 0x176   :  { %v7007_v19 = vsel %vm652_vm3, %v667_v4, %v669_v17  ;;  %v7009_v45 = vld [vmem:[#allocation3 + $0x20] sm:$0x7f] }
 0x177   :  { %v7011_v36 = vld [vmem:[#allocation3 + $0x20] sm:$0xfe]  ;;  %672 = vst [vmem:[#allocation3 + $0x40] sm:$0xff] %v7007_v19  ;;  %v716_v6 = vmul.f32 %v714_v20, %v7009_v45  ;;  %v700_v59 = vmul.f32 %v698_v22, %v7009_v45  ;;  %v7031_v20 = vld [vmem:[#allocation3 + $0x80] sm:$0x1]  ;;  %v892_v22 = vmul.f32 %v7021_v38, %v7002_v26 }
 0x178   :  { %v956_v39 = vmul.f32 %v955_v40, %v7011_v36  ;;  %v7029_v13 = vld [vmem:[#allocation3 + $0x20] sm:$0xfe]  ;;  %v7055_v4 = vmul.f32 %v7027_v10, %v7011_v36  ;;  %v7059_v17 = vmul.f32 %v7021_v38, %v7011_v36 }
 0x179   :  { %721 = vrot.lane.b32.xlu1 %v716_v6, %s11969_s6  ;;  %705 = vrot.lane.b32.xlu2 %v700_v59, %s11969_s6  ;;  %v731_v33 = vld [vmem:[#allocation3 + $0x20] sm:$0x7f]  ;;  %v7049_v40 = vmul.f32 %v6722_v56, %v7029_v13  ;;  %v1264_v6 = vmul.f32 %v7033_v14, %v7031_v20 }
 0x17a   :  { %v960_v63 = vrot.slane %v956_v39, 2  ;;  %v737_v59 = vmul.f32 %v6668_v24, %v731_v33  ;;  %v765_v39 = vmul.f32 %v6677_v28, %v731_v33  ;;  %v11944_v23 = vrot.slane %v7055_v4, 2 }
 0x17b   :  { %v11943_v24 = vrot.slane %v7059_v17, 2  ;;  %v925_v28 = vrot.slane %v916_v44, 2  ;;  %v1273_v25 = vrot.slane %v1264_v6, 2 }
 0x17c   :  { %963 = vrot.lane.b32.xlu0 %v960_v63, %s11969_s6  ;;  %v7039_v50 = vsel %vm468_vm0, %v960_v63, %v961_v52  ;;  %v901_v52 = vrot.slane %v892_v22, 2  ;;  %v1288_v63 = vmul.f32 %v7043_v37, %v7031_v20  ;;  %v11945_v22 = vrot.slane %v7049_v40, 2 }
 0x17e   :  { %v7051_v42 = vld [vmem:[#allocation3 + $0x40] sm:$0xfe]  ;;  %v7083_v49 = vsel %vm468_vm0, %v11943_v24, %v901_v52  ;;  %v1297_v44 = vrot.slane %v1288_v63, 2  ;;  %v7102_v52 = vsel %vm468_vm0, %v11944_v23, %v925_v28  ;;  %v1219_v63 = vmul.f32 %v1218_v47, %v7007_v19 }
 0x17f   :  { %v1385_v30 = vmul.f32 %v6886_v9, %v7051_v42  ;;  %v7069_v48 = vld [vmem:[#allocation3 + $0x40] sm:$0xfe]  ;;  %v1192_v23 = vstv %s5714_s28  ;;  %s677_s28 = sld [smem:[#allocation15]] }
 0x180   :  { %v7078_v9 = vmul.f32 %v7033_v14, %v7069_v48  ;;  %v1223_v47 = vrot.slane %v1219_v63, 1 }
 0x181   :  { %747 = vrot.lane.b32.xlu1 %v737_v59, %s11967_s23  ;;  %775 = vrot.lane.b32.xlu2 %v765_v39, %s11967_s23  ;;  %v1393_v33 = vrot.slane %v1385_v30, 2  ;;  %v7087_v59 = vmul.f32 %v7043_v37, %v7069_v48  ;;  %v7089_v39 = vld [vmem:[#allocation3 + $0x40] sm:$0x7f] }
 0x182   :  { %v11941_v6 = vrot.slane %v7078_v9, 2  ;;  %v1088_v57 = vmul.f32 %v1086_v8, %v7089_v39  ;;  %v1103_v8 = vld [vmem:[#allocation3 + $0x40] sm:$0x7f] }
 0x183   :  { %v7095_v30 = vsel %vm468_vm0, %v1393_v33, %v1395_v53  ;;  %v11942_v34 = vrot.slane %v7087_v59, 2  ;;  %v1072_v53 = vmul.f32 %v1070_v16, %v7089_v39  ;;  %v1109_v16 = vmul.f32 %v6874_v32, %v1103_v8 }
 0x184   :  { %1027 = vrot.lane.b32.xlu0 %v11945_v22, %s11967_s23  ;;  %v7116_v0 = vsel %vm468_vm0, %v11941_v6, %v1273_v25  ;;  %v1137_v60 = vmul.f32 %v6859_v12, %v1103_v8  ;;  %v820_v25 = vstv %s5696_s3  ;;  %v832_v6 = vstv %s5697_s2  ;;  %s7258_s3 = sld [smem:[#allocation18 + $0x41]] }
 0x185   :  { %12385 = vst [vmem:[#allocation36_spill] sm:$0xff] %v7116_v0  ;;  %v7121_v28 = vsel %vm468_vm0, %v11942_v34, %v1297_v44  ;;  %v1308_v44 = vstv %s5720_s4  ;;  %v821_v63 = vmul.f32 %v820_v25, %v6996_v21  ;;  %v7139_v34 = vpop.permute.xlu2 %1115  ;;  %v1351_v25 = vmul.f32 %v6879_v5, %v7051_v42  ;;  %s7262_s2 = sld [smem:[#allocation18 + $0x1d]] }
 0x186   :  { %12386 = vst [vmem:[#allocation37_spill] sm:$0xff] %v7121_v28  ;;  %v1309_v32 = vmul.f32 %v1308_v44, %v7069_v48  ;;  %v1310_v12 = vmul.f32 %v1308_v44, %v7031_v20  ;;  %v866_v44 = vmul.f32 %v865_v43, %v6996_v21  ;;  %v1193_v43 = vmul.f32 %v1192_v23, %v7007_v19  ;;  %s7267_s4 = sld [smem:[#allocation18 + $0x2f]] }
 0x188   :  { %v1314_v24 = vrot.slane %v1310_v12, 2  ;;  %v870_v12 = vrot.slane %v866_v44, 1 }
 0x189   :  { %1093 = vrot.lane.b32.xlu1 %v1088_v57, %s11969_s6  ;;  %1077 = vrot.lane.b32.xlu2 %v1072_v53, %s11969_s6  ;;  %v7132_v57 = vpop.permute.xlu0 %1091  ;;  %v833_v53 = vmul.f32 %v832_v6, %v6996_v21  ;;  %v1353_v6 = vmul.f32 %v6879_v5, %v7025_v41 }
 0x18b   :  { %v835_v8 = vrot.slane %v833_v53, 1 }
 0x18c   :  { %1225 = vrot.lane.b32.xlu0 %v1223_v47, %s11967_s23  ;;  %v823_v47 = vrot.slane %v821_v63, 1 }
 0x18d   :  { %v7158_v5 = vpop.permute.xlu2 %1121 }
 0x18e   :  { %12387 = vst [vmem:[#allocation38_spill] sm:$0xff] %v7158_v5 }
 0x191   :  { %1119 = vrot.lane.b32.xlu1 %v1109_v16, %s11967_s23  ;;  %1147 = vrot.lane.b32.xlu2 %v1137_v60, %s11967_s23  ;;  %v1313_v16 = vrot.slane %v1309_v32, 2  ;;  %v936_v60 = vstv %s7128_s8  ;;  %v7153_v53 = vpop.permute.xlu0 %1117  ;;  %s7269_s8 = sld [smem:[#allocation21 + $0x25]] }
 0x193   :  { %v1315_v63 = vsel %vm468_vm0, %v1313_v16, %v1314_v24  ;;  %v1195_v24 = vrot.slane %v1193_v43, 1 }
 0x194   :  { %1399 = vrot.lane.b32.xlu0 %v1393_v33, %s11967_s23  ;;  %v937_v33 = vmul.f32 %v936_v60, %v7011_v36  ;;  %v979_v36 = vmul.f32 %v6719_v54, %v7029_v13 }
 0x195   :  { %v7174_v13 = vpop.permute.xlu2 %1367 }
 0x196   :  { %v941_v32 = vrot.slane %v937_v33, 2  ;;  %v1204_v33 = vstv %s5715_s1  ;;  %12388 = vst [vmem:[#allocation39_spill] sm:$0xff] %v7174_v13  ;;  %s7272_s1 = sld [smem:[#allocation15 + $0x3]] }
 0x197   :  { %v1205_v23 = vmul.f32 %v1204_v33, %v7007_v19  ;;  %12403 = sst [smem:[#allocation53_spill]] %s7269_s8 }
 0x199   :  { %824 = vrot.lane.b32.xlu1 %v823_v47, %s11969_s6  ;;  %836 = vrot.lane.b32.xlu2 %v835_v8, %s11969_s6  ;;  %v1359_v47 = vrot.slane %v1351_v25, 2  ;;  %v1361_v8 = vrot.slane %v1353_v6, 2  ;;  %v7165_v42 = vpop.permute.xlu0 %1143  ;;  %v987_v6 = vrot.slane %v979_v36, 2  ;;  %v7167_v25 = vpop.permute.xlu1 %1145  ;;  %v1207_v44 = vrot.slane %v1205_v23, 1  ;;  %v975_v23 = vld [vmem:[#allocation3 + $0x50] sm:$0x1] }
 0x19b   :  { %v1362_v41 = vsel %vm468_vm0, %v1359_v47, %v1361_v8 }
 0x19c   :  { %1318 = vrot.lane.b32.xlu0 %v1315_v63, %s11969_s6 }
 0x19d   :  { %v7184_v36 = vpop.permute.xlu2 %1618 }
 0x19e   :  { %12389 = vst [vmem:[#allocation40_spill] sm:$0xff] %v7184_v36  ;;  %v981_v36 = vmul.f32 %v6719_v54, %v975_v23 }
 0x1a1   :  { %944 = vrot.lane.b32.xlu1 %v941_v32, %s11969_s6  ;;  %872 = vrot.lane.b32.xlu2 %v870_v12, %s11967_s23  ;;  %v7176_v63 = vpop.permute.xlu0 %1149  ;;  %v1327_v12 = vstv %s7169_s18  ;;  %v7181_v8 = vpop.permute.xlu1 %1227  ;;  %s7291_s18 = sld [smem:[#allocation21 + $0x49]] }
 0x1a2   :  { %v1328_v43 = vmul.f32 %v1327_v12, %v7069_v48  ;;  %v938_v48 = vmul.f32 %v936_v60, %v7002_v26 }
 0x1a4   :  { %1369 = vrot.lane.b32.xlu0 %v1362_v41, %s11967_s23  ;;  %v1332_v41 = vrot.slane %v1328_v43, 2  ;;  %v989_v43 = vrot.slane %v981_v36, 2 }
 0x1a5   :  { %v7195_v22 = vpop.permute.xlu2 %1666 }
 0x1a6   :  { %12391 = vst [vmem:[#allocation42_spill] sm:$0xff] %v7195_v22  ;;  %v1015_v22 = vmul.f32 %v6722_v56, %v975_v23  ;;  %v1329_v23 = vmul.f32 %v1327_v12, %v7031_v20 }
 0x1a7   :  { %12404 = sst [smem:[#allocation54_spill]] %s7291_s18 }
 0x1a8   :  { %v1023_v26 = vrot.slane %v1015_v22, 2 }
 0x1a9   :  { %1196 = vrot.lane.b32.xlu1 %v1195_v24, %s11969_s6  ;;  %993 = vrot.lane.b32.xlu2 %v987_v6, %s11967_s23  ;;  %v7188_v24 = vpop.permute.xlu0 %1246  ;;  %v7190_v33 = vpop.permute.xlu1 %1371 }
 0x1aa   :  { %12390 = vst [vmem:[#allocation41_spill] sm:$0xff] %v7190_v33  ;;  %v942_v33 = vrot.slane %v938_v48, 2 }
 0x1ad   :  { %v7211_v54 = vpop.permute.xlu2 %1714 }
 0x1ae   :  { %12394 = vst [vmem:[#allocation45_spill] sm:$0xff] %v7211_v54 }
 0x1b1   :  { %1365 = vrot.lane.b32.xlu1 %v1359_v47, %s11967_s23  ;;  %1208 = vrot.lane.b32.xlu2 %v1207_v44, %s11969_s6  ;;  %v1238_v47 = vmul.f32 %v1237_v55, %v7007_v19  ;;  %v7204_v0 = vpop.permute.xlu1 %1401  ;;  %v990_v55 = vsel %vm468_vm0, %v987_v6, %v989_v43  ;;  %v11951_v6 = vstv %s7213_s5 }
 0x1b2   :  { %12393 = vst [vmem:[#allocation44_spill] sm:$0xff] %v7204_v0  ;;  %v2208_v22 = vmul.f32 %v11951_v6, %v6970_v7 }
 0x1b3   :  { %v1242_v44 = vrot.slane %v1238_v47, 1  ;;  %v943_v47 = vsel %vm468_vm0, %v941_v32, %v942_v33  ;;  %v12397_v32 = vrot.slane %v7049_v40, 2  ;;  %v11949_v33 = vstv %s7219_s25 }
 0x1b5   :  { %v1024_v56 = vsel %vm468_vm0, %v12397_v32, %v1023_v26 }
 0x1b9   :  { %1335 = vrot.lane.b32.xlu1 %v1332_v41, %s11969_s6  ;;  %1316 = vrot.lane.b32.xlu2 %v1313_v16, %s11969_s6  ;;  %v7202_v16 = vpop.permute.xlu0 %1405  ;;  %v7217_v60 = vpop.permute.xlu1 %1634 }
 0x1ba   :  { %12392 = vst [vmem:[#allocation43_spill] sm:$0xff] %v7202_v16  ;;  %v11966_v16 = vstv %s7272_s1 }
 0x1bb   :  { %12396 = vst [vmem:[#allocation47_spill] sm:$0xff] %v7217_v60 }
 0x1c1   :  { %965 = vrot.lane.b32.xlu1 %v7039_v50, %s11969_s6  ;;  %1244 = vrot.lane.b32.xlu2 %v1242_v44, %s11967_s23  ;;  %v7215_v50 = vpop.permute.xlu0 %1602  ;;  %v2192_v44 = vmul.f32 %v11949_v33, %v6970_v7  ;;  %v7240_v48 = vpop.permute.xlu1 %1682  ;;  %v11961_v33 = vstv %s7262_s2 }
 0x1c2   :  { %12395 = vst [vmem:[#allocation46_spill] sm:$0xff] %v7215_v50  ;;  %v7317_v50 = vld [vmem:[#allocation5 + $0x8] sm:$0x80] }
 0x1c3   :  { %12399 = vst [vmem:[#allocation49_spill] sm:$0xff] %v7240_v48  ;;  %2196 = vrot.lane.b32.xlu0 %v2192_v44, %s11969_s6  ;;  %v11952_v44 = vstv %s7252_s16 }
 0x1c9   :  { %997 = vrot.lane.b32.xlu1 %v990_v55, %s11967_s23  ;;  %946 = vrot.lane.b32.xlu2 %v943_v47, %s11969_s6  ;;  %v7235_v40 = vpop.permute.xlu0 %1650  ;;  %v1333_v55 = vrot.slane %v1329_v23, 2  ;;  %v11948_v47 = vstv %s7231_s26  ;;  %v7256_v12 = vpop.permute.xlu1 %2180  ;;  %v7277_v23 = vstv %s5689_s29  ;;  %s7302_s29 = sld [smem:[#allocation21 + $0x1]] }
 0x1ca   :  { %12398 = vst [vmem:[#allocation48_spill] sm:$0xff] %v7235_v40  ;;  %v2240_v26 = vmul.f32 %v11948_v47, %v6970_v7  ;;  %v6189_v40 = vld [vmem:[#allocation3 + $0x88] sm:$0x80] }
 0x1cb   :  { %v1334_v20 = vsel %vm468_vm0, %v1332_v41, %v1333_v55  ;;  %12400 = vst [vmem:[#allocation50_spill] sm:$0xff] %v7256_v12  ;;  %v11950_v41 = vstv %s7250_s30  ;;  %v11954_v55 = vstv %s7258_s3 }
 0x1cc   :  { %2244 = vrot.lane.b32.xlu0 %v2240_v26, %s11967_s23  ;;  %v808_v26 = vmul.f32 %v11952_v44, %v6996_v21  ;;  %v11965_v44 = vstv %s7267_s4 }
 0x1cd   :  { %v2272_v48 = vmul.f32 %v11965_v44, %v6970_v7 }
 0x1ce   :  { %v812_v60 = vrot.slane %v808_v26, 1 }
 0x1cf   :  { %12405 = sst [smem:[#allocation55_spill]] %s7302_s29 }
 0x1d1   :  { %1031 = vrot.lane.b32.xlu2 %v1024_v56, %s11967_s23  ;;  %v7260_v32 = vpop.permute.xlu0 %1698 }
 0x1d2   :  { %12401 = vst [vmem:[#allocation51_spill] sm:$0xff] %v7260_v32  ;;  %v11964_v32 = vstv %s7269_s8  ;;  %s12413_s8 = smov 126  }
 0x1d3   :  { %v7226_v36 = vpop.permute.xlu2 %705 }
 0x1d9   :  { %2212 = vrot.lane.b32.xlu2 %v2208_v22, %s11969_s6  ;;  %v2224_v22 = vmul.f32 %v11950_v41, %v6970_v7 }
 0x1db   :  { %v7244_v43 = vpop.permute.xlu2 %775  ;;  %2228 = vrot.lane.b32.xlu1 %v2224_v22, %s11969_s6 }
 0x1dc   :  { %v780_v22 = vsel %vm321_vm1, %v7244_v43, %v6953_v2 }
 0x1e1   :  { %1337 = vrot.lane.b32.xlu2 %v1334_v20, %s11969_s6  ;;  %v692_v20 = vmul.f32 %v7277_v23, %v7009_v45 }
 0x1e3   :  { %v7265_v56 = vpop.permute.xlu2 %1077  ;;  %2276 = vrot.lane.b32.xlu1 %v2272_v48, %s11967_s23 }
 0x1e4   :  { %12402 = vst [vmem:[#allocation52_spill] sm:$0xff] %v7265_v56 }
 0x1e5   :  { %v7288_v47 = vpop.permute.xlu0 %853 }
 0x1e9   :  { %1403 = vrot.lane.b32.xlu2 %v7095_v30, %s11967_s23  ;;  %v2288_v30 = vmul.f32 %v11954_v55, %v6970_v7  ;;  %v2256_v55 = vmul.f32 %v11961_v33, %v6970_v7  ;;  %v2878_v33 = vmul.f32 %v11964_v32, %v7317_v50  ;;  %v7331_v7 = vmul.f32 %v11966_v16, %v6996_v21 }
 0x1ea   :  { %v11976_v32 = vstv %s7302_s29  ;;  %v779_v21 = vsel %vm321_vm1, %v6932_v46, %v6958_v31  ;;  %s7387_s29 = sld [smem:[#allocation21 + $0x4a]] }
 0x1eb   :  { %v7297_v41 = vpop.permute.xlu1 %721  ;;  %v7299_v6 = vpop.permute.xlu2 %1147  ;;  %2292 = vrot.lane.b32.xlu0 %v2288_v30, %s11967_s23  ;;  %v7319_v30 = vstv %s677_s28  ;;  %s7336_s28 = sld [smem:[#allocation21 + $0x26]]  ;;  %v11978_v48 = vrot.slane %v7331_v7, 1  ;;  %v2862_v31 = vmul.f32 %v11976_v32, %v7317_v50 }
 0x1ec   :  { %v728_v12 = vadd.f32 %v7297_v41, %v692_v20  ;;  %v690_v20 = vmul.f32 %v6189_v40, %v7277_v23  ;;  %v682_v26 = vmul.f32 %v7319_v30, %v7009_v45 }
 0x1ed   :  { %2866 = vrot.lane.b32.xlu1 %v2862_v31, %s12410_s13 }
 0x1ee   :  { %v788_v54 = vadd.f32 %v780_v22, %v728_v12  ;;  %v11977_v12 = vstv %s7291_s18  ;;  %v712_v22 = vadd.f32 %v7226_v36, %v682_v26  ;;  %v7354_v26 = vpop.permute.xlu0 %963  ;;  %s7958_s18 = sld [smem:[#allocation21 + $0xa]] }
 0x1ef   :  { %v2894_v16 = vmul.f32 %v11977_v12, %v7317_v50  ;;  %v12414_v12 = vrot.slane %v7055_v4, 2 }
 0x1f0   :  { %v818_v2 = vadd.f32 %v812_v60, %v788_v54  ;;  %v726_v54 = vadd.f32 %v6910_v51, %v690_v20  ;;  %12412 = sst [smem:[#allocation61_spill]] %s7387_s29 }
 0x1f1   :  { %2260 = vrot.lane.b32.xlu2 %v2256_v55, %s11967_s23  ;;  %12407 = sst [smem:[#allocation57_spill]] %s7336_s28 }
 0x1f2   :  { %s7359_s23 = sld [smem:[#allocation21 + $0x6d]]  ;;  %v786_v13 = vadd.f32 %v779_v21, %v726_v54 }
 0x1f3   :  { %v7341_v45 = vpop.permute.xlu1 %747  ;;  %v7343_v55 = vpop.permute.xlu2 %836  ;;  %2882 = vrot.lane.b32.xlu0 %v2878_v33, %s11969_s6  ;;  %s5707_s6 = sld [smem:[#allocation15 + $0x1b]] }
 0x1f4   :  { %v752_v44 = vsel %vm321_vm1, %v7341_v45, %v6987_v35  ;;  %v816_v33 = vadd.f32 %v812_v60, %v786_v13 }
 0x1f5   :  { %v760_v20 = vadd.f32 %v752_v44, %v712_v22  ;;  %v11975_v44 = vstv %s7333_s27  ;;  %v11979_v22 = vstv %s7336_s28  ;;  %s7962_s28 = sld [smem:[#allocation21 + $0x2e]] }
 0x1f6   :  { %v2926_v54 = vmul.f32 %v11975_v44, %v7317_v50  ;;  %v840_v21 = vadd.f32 %v7343_v55, %v816_v33  ;;  %v7402_v28 = vpop.permute.xlu0 %1027  ;;  %s8000_s27 = sld [smem:[#allocation21 + $0x1d]] }
 0x1f7   :  { %v7366_v35 = vadd.f32 %v11978_v48, %v760_v20  ;;  %v842_v20 = vadd.f32 %v7343_v55, %v818_v2  ;;  %v2942_v2 = vmul.f32 %v11979_v22, %v7317_v50  ;;  %v7412_v22 = vld [vmem:[#allocation3 + $0x70] sm:$0x80] }
 0x1f8   :  { %12408 = sst [smem:[#allocation58_spill]] %s7359_s23  ;;  %v11980_v33 = vstv %s7359_s23 }
 0x1f9   :  { %2898 = vrot.lane.b32.xlu2 %v2894_v16, %s12410_s13  ;;  %v2910_v32 = vmul.f32 %v11980_v33, %v7317_v50  ;;  %s7992_s23 = sld [smem:[#allocation21 + $0x1c]] }
 0x1fb   :  { %v7383_v13 = vpop.permute.xlu1 %1093  ;;  %v7385_v60 = vpop.permute.xlu2 %872  ;;  %2930 = vrot.lane.b32.xlu0 %v2926_v54, %s12413_s8  ;;  %v680_v54 = vmul.f32 %v6189_v40, %v7319_v30  ;;  %v1035_v40 = vsel %vm321_vm1, %v7402_v28, %v6985_v18  ;;  %2914 = vrot.lane.b32.xlu1 %v2910_v32, %s12410_s13  ;;  %v751_v18 = vsel %vm321_vm1, %v6983_v15, %v6917_v61 }
 0x1fc   :  { %v876_v16 = vsel %vm321_vm1, %v7385_v60, %v6966_v29 }
 0x1fd   :  { %v880_v31 = vadd.f32 %v876_v16, %v840_v21  ;;  %v882_v44 = vadd.f32 %v876_v16, %v842_v20  ;;  %v7408_v21 = vstv %s5707_s6  ;;  %v11981_v20 = vstv %s7368_s15  ;;  %s7427_s6 = sld [smem:[#allocation21 + $0x13]] }
 0x1fe   :  { %v1062_v33 = vmul.f32 %v7412_v22, %v7408_v21  ;;  %v2974_v4 = vmul.f32 %v11981_v20, %v7317_v50  ;;  %v11987_v20 = vstv %s7387_s29  ;;  %v710_v56 = vadd.f32 %v6939_v62, %v680_v54  ;;  %s7454_s15 = sld [smem:[#allocation21 + $0xb]] }
 0x1ff   :  { %v932_v48 = vadd.f32 %v12414_v12, %v880_v31  ;;  %v7405_v29 = vadd.f32 %v7102_v52, %v882_v44  ;;  %v7424_v12 = vld [vmem:[#allocation5 + $0x38] sm:$0x80]  ;;  %s7475_s29 = sld [smem:[#allocation21 + $0x14]] }
 0x200   :  { %v673_v52 = vld [vmem:[#allocation3 + $0x48] sm:$0x80]  ;;  %v758_v61 = vadd.f32 %v751_v18, %v710_v56  ;;  %v7472_v18 = vld [vmem:[#allocation5 + $0x68] sm:$0x80] }
 0x201   :  { %v970_v16 = vadd.f32 %v7354_v26, %v932_v48  ;;  %2946 = vrot.lane.b32.xlu2 %v2942_v2, %s12413_s8  ;;  %v12417_v48 = vstv %s7370_s14  ;;  %v689_v54 = vmul.f32 %v7277_v23, %v673_v52 }
 0x202   :  { %v7443_v0 = vmul.f32 %v12417_v48, %v7007_v19 }
 0x203   :  { %12415 = sst [smem:[#allocation62_spill]] %s7427_s6  ;;  %v1042_v44 = vadd.f32 %v1035_v40, %v970_v16  ;;  %v7430_v31 = vpop.permute.xlu1 %1119  ;;  %v7432_v2 = vpop.permute.xlu2 %993  ;;  %2978 = vrot.lane.b32.xlu0 %v2974_v4, %s12413_s8  ;;  %v12419_v16 = vstv %s7375_s11  ;;  %v679_v4 = vmul.f32 %v7319_v30, %v673_v52  ;;  %v12421_v52 = vstv %s7252_s16 }
 0x204   :  { %12416 = vst [vmem:[#allocation63_spill] sm:$0xff] %v7430_v31  ;;  %v3520_v40 = vmul.f32 %v12419_v16, %v7424_v12  ;;  %v2958_v31 = vmul.f32 %v11987_v20, %v7317_v50  ;;  %12420 = sst [smem:[#allocation65_spill]] %s7454_s15  ;;  %v11988_v50 = vrot.slane %v7443_v0, 1  ;;  %v12422_v16 = vrot.slane %v7331_v7, 1 }
 0x205   :  { %12418 = vst [vmem:[#allocation64_spill] sm:$0xff] %v7443_v0  ;;  %v1066_v32 = vadd.f32 %v1062_v33, %v1042_v44  ;;  %v1151_v33 = vsel %vm321_vm1, %v7165_v42, %v7167_v25  ;;  %s7459_s11 = sld [smem:[#allocation15 + $0xc]]  ;;  %v7463_v44 = vld [vmem:[#allocation2] sm:$0xff]  ;;  %v11990_v25 = vstv %s7427_s6  ;;  %v12426_v0 = vrot.slane %v7059_v17, 2 }
 0x206   :  { %v802_v56 = vadd.f32 %v12422_v16, %v758_v61  ;;  %12423 = sst [smem:[#allocation66_spill]] %s7475_s29  ;;  %2962 = vrot.lane.b32.xlu1 %v2958_v31, %s12413_s8  ;;  %v4018_v31 = vmul.f32 %v11990_v25, %v7472_v18  ;;  %v883_v25 = vld [vmem:[#allocation3 + $0x60] sm:$0xfe]  ;;  %206 = vst.msk [vmem:[#allocation4 + $0x18] sm:$0xff] %vm205_vm4, %v7463_v44 }
 0x207   :  { %v1098_v5 = vadd.f32 %v7132_v57, %v1066_v32  ;;  %v7468_v32 = vmul.f32 %v7463_v44, %v12421_v52  ;;  %s5706_s16 = sld [smem:[#allocation15 + $0x9]]  ;;  %213 = vst.msk [vmem:[#allocation4 + $0x48] sm:$0xff] %vm205_vm4, %v7463_v44 }
 0x208   :  { %s7517_s6 = sld [smem:[#allocation21 + $0x77]]  ;;  %219 = vst.msk [vmem:[#allocation5 + $0x18] sm:$0xff] %vm205_vm4, %v7463_v44 }
 0x209   :  { %v1158_v48 = vadd.f32 %v1151_v33, %v1098_v5  ;;  %3524 = vrot.lane.b32.xlu2 %v3520_v40, %s12413_s8  ;;  %v725_v5 = vadd.f32 %v6910_v51, %v689_v54  ;;  %v709_v40 = vadd.f32 %v6939_v62, %v679_v4  ;;  %v12424_v33 = vstv %s7272_s1  ;;  %s7494_s1 = sld [smem:[#allocation21 + $0x52]]  ;;  %226 = vst.msk [vmem:[#allocation5 + $0x48] sm:$0xff] %vm205_vm4, %v7463_v44 }
 0x20a   :  { %v7483_v20 = vmul.f32 %v7463_v44, %v12424_v33  ;;  %v857_v62 = vsel %vm321_vm1, %v7288_v47, %v6968_v3  ;;  %v11994_v54 = vrot.slane %v7468_v32, 1  ;;  %233 = vst.msk [vmem:[#allocation5 + $0x78] sm:$0xff] %vm205_vm4, %v7463_v44 }
 0x20b   :  { %v7485_v52 = vpop.permute.xlu1 %824  ;;  %v7487_v7 = vpop.permute.xlu2 %1208  ;;  %v1188_v61 = vadd.f32 %v11988_v50, %v1158_v48  ;;  %v11992_v50 = vstv %s7454_s15  ;;  %240 = vst.msk [vmem:[#allocation5 + $0xa8] sm:$0xff] %vm205_vm4, %v7463_v44  ;;  %s5750_s15 = sld [smem:[#allocation18 + $0x2a]] }
 0x20c   :  { %v828_v16 = vadd.f32 %v7485_v52, %v802_v56  ;;  %v830_v51 = vadd.f32 %v7485_v52, %v7366_v35  ;;  %v785_v56 = vadd.f32 %v6932_v46, %v725_v5  ;;  %v11993_v33 = vrot.slane %v7483_v20, 1 }
 0x20d   :  { %v757_v35 = vadd.f32 %v6983_v15, %v709_v40  ;;  %v11998_v15 = vstv %s7459_s11  ;;  %v7524_v17 = vstv %s5706_s16  ;;  %v7530_v40 = vmul.f32 %v7027_v10, %v883_v25  ;;  %s7545_s16 = sld [smem:[#allocation21 + $0x76]] }
 0x20e   :  { %v861_v4 = vadd.f32 %v857_v62, %v828_v16  ;;  %v863_v48 = vadd.f32 %v857_v62, %v830_v51  ;;  %v3504_v16 = vmul.f32 %v11992_v50, %v7424_v12  ;;  %v11995_v51 = vstv %s7475_s29  ;;  %12427 = sst [smem:[#allocation68_spill]] %s7517_s6 }
 0x20f   :  { %12425 = sst [smem:[#allocation67_spill]] %s7494_s1  ;;  %v815_v46 = vadd.f32 %v11994_v54, %v785_v56  ;;  %v1052_v62 = vmul.f32 %v7412_v22, %v7524_v17 }
 0x210   :  { %v908_v1 = vadd.f32 %v12426_v0, %v861_v4  ;;  %v7510_v3 = vadd.f32 %v7083_v49, %v863_v48  ;;  %v801_v0 = vadd.f32 %v11993_v33, %v757_v35  ;;  %3508 = vrot.lane.b32.xlu1 %v3504_v16, %s12413_s8  ;;  %v11997_v4 = vstv %s7494_s1  ;;  %s7563_s1 = sld [smem:[#allocation21 + $0x5b]] }
 0x211   :  { %4022 = vrot.lane.b32.xlu2 %v4018_v31, %s12410_s13  ;;  %v1001_v48 = vsel %vm321_vm1, %v7432_v2, %v6981_v27  ;;  %v7540_v35 = vmul.f32 %v7021_v38, %v883_v25  ;;  %v4082_v16 = vmul.f32 %v11995_v51, %v7472_v18  ;;  %v839_v50 = vadd.f32 %v7343_v55, %v815_v46  ;;  %s7635_s29 = sld [smem:[#allocation21 + $0x5c]] }
 0x212   :  { %v827_v56 = vadd.f32 %v7485_v52, %v801_v0  ;;  %v7554_v27 = vmul.f32 %v11998_v15, %v7007_v19  ;;  %v11999_v25 = vrot.slane %v7530_v40, 2  ;;  %v1123_v19 = vsel %vm321_vm1, %v7139_v34, %v7153_v53  ;;  %v675_v53 = vld [vmem:[#allocation3 + $0x60] sm:$0x7f] }
 0x213   :  { %v945_v49 = vpop.permute.xlu1 %944  ;;  %v7526_v5 = vpop.permute.xlu2 %1316  ;;  %12429 = sst [smem:[#allocation70_spill]] %s7545_s16  ;;  %v879_v0 = vadd.f32 %v7385_v60, %v839_v50  ;;  %v897_v54 = vrot.slane %v7540_v35, 2  ;;  %v1212_v50 = vadd.f32 %v7487_v7, %v1188_v61  ;;  %v12004_v15 = vstv %s7545_s16 }
 0x214   :  { %12428 = vst [vmem:[#allocation69_spill] sm:$0xff] %v7526_v5  ;;  %v951_v31 = vadd.f32 %v945_v49, %v908_v1  ;;  %v3472_v1 = vmul.f32 %v11997_v4, %v7424_v12  ;;  %v860_v51 = vadd.f32 %v7288_v47, %v827_v56  ;;  %s7614_s16 = sld [smem:[#allocation21 + $0x7f]] }
 0x216   :  { %v1008_v22 = vadd.f32 %v1001_v48, %v951_v31  ;;  %v12001_v31 = vstv %s7517_s6  ;;  %12430 = sst [smem:[#allocation71_spill]] %s7563_s1  ;;  %v907_v61 = vadd.f32 %v897_v54, %v860_v51  ;;  %v3488_v51 = vmul.f32 %v12004_v15, %v7424_v12 }
 0x217   :  { %s7609_s6 = sld [smem:[#allocation21 + $0x37]] }
 0x218   :  { %v1056_v33 = vadd.f32 %v1052_v62, %v1008_v22  ;;  %3476 = vrot.lane.b32.xlu1 %v3472_v1, %s12410_s13  ;;  %v3552_v1 = vmul.f32 %v12001_v31, %v7424_v12  ;;  %12435 = sst [smem:[#allocation74_spill]] %s7635_s29 }
 0x219   :  { %4086 = vrot.lane.b32.xlu2 %v4082_v16, %s12413_s8  ;;  %v1170_v16 = vrot.slane %v7554_v27, 1 }
 0x21a   :  { %v1082_v46 = vadd.f32 %v6991_v11, %v1056_v33  ;;  %v931_v33 = vadd.f32 %v11999_v25, %v879_v0  ;;  %v691_v0 = vmul.f32 %v7277_v23, %v675_v53  ;;  %v12431_v25 = vrot.slane %v7087_v59, 2  ;;  %12433 = sst [smem:[#allocation73_spill]] %s7614_s16 }
 0x21b   :  { %v7569_v62 = vpop.permute.xlu1 %1196  ;;  %v7571_v48 = vpop.permute.xlu2 %1244 }
 0x21c   :  { %v1130_v56 = vadd.f32 %v1123_v19, %v1082_v46  ;;  %v7580_v22 = vsel %vm321_vm1, %v7571_v48, %v7188_v24  ;;  %v7590_v46 = vpop.permute.xlu0 %1225  ;;  %v950_v24 = vadd.f32 %v945_v49, %v907_v61  ;;  %v969_v31 = vadd.f32 %v7354_v26, %v931_v33  ;;  %v1045_v49 = vld [vmem:[#allocation3 + $0x38] sm:$0x80] }
 0x21d   :  { %v1252_v4 = vadd.f32 %v7580_v22, %v1212_v50  ;;  %v7606_v23 = vsel %vm321_vm1, %v7590_v46, %v7181_v8  ;;  %12432 = sst [smem:[#allocation72_spill]] %s7609_s6  ;;  %v727_v59 = vadd.f32 %v7297_v41, %v691_v0  ;;  %v1051_v26 = vmul.f32 %v7524_v17, %v1045_v49 }
 0x21e   :  { %v1174_v19 = vadd.f32 %v1170_v16, %v1130_v56  ;;  %v12032_v56 = vstv %s7563_s1  ;;  %v1007_v33 = vadd.f32 %v7432_v2, %v950_v24  ;;  %v681_v41 = vmul.f32 %v7319_v30, %v675_v53  ;;  %s7644_s1 = sld [smem:[#allocation21 + $0x40]] }
 0x21f   :  { %v7596_v5 = vadd.f32 %v12431_v25, %v1252_v4  ;;  %v885_v25 = vld [vmem:[#allocation3] sm:$0x1]  ;;  %v4050_v2 = vmul.f32 %v12032_v56, %v7472_v18 }
 0x220   :  { %v1200_v50 = vadd.f32 %v7569_v62, %v1174_v19  ;;  %3492 = vrot.lane.b32.xlu1 %v3488_v51, %s12410_s13  ;;  %v1061_v19 = vmul.f32 %v7408_v21, %v1045_v49  ;;  %v915_v24 = vmul.f32 %v7027_v10, %v885_v25  ;;  %v787_v51 = vadd.f32 %v7244_v43, %v727_v59 }
 0x221   :  { %3556 = vrot.lane.b32.xlu2 %v3552_v1, %s12413_s8  ;;  %v12434_v1 = vrot.slane %v7078_v9, 2  ;;  %v1055_v15 = vadd.f32 %v1051_v26, %v1007_v33  ;;  %v711_v9 = vadd.f32 %v7226_v36, %v681_v41  ;;  %v12030_v10 = vstv %s7614_s16  ;;  %s8091_s16 = sld [smem:[#allocation18 + $0x19]] }
 0x222   :  { %v1233_v4 = vadd.f32 %v7606_v23, %v1200_v50  ;;  %v1041_v50 = vadd.f32 %v7402_v28, %v969_v31  ;;  %v923_v53 = vrot.slane %v915_v24, 2  ;;  %v12028_v28 = vstv %s7609_s6  ;;  %s5741_s6 = sld [smem:[#allocation18 + $0x16]] }
 0x223   :  { %v7618_v8 = vpop.permute.xlu1 %1365  ;;  %v7620_v61 = vpop.permute.xlu2 %946  ;;  %v12436_v31 = vrot.slane %v7468_v32, 1  ;;  %v4034_v43 = vmul.f32 %v12028_v28, %v7472_v18  ;;  %v1081_v36 = vadd.f32 %v6991_v11, %v1055_v15  ;;  %v12438_v59 = vstv %s7459_s11  ;;  %s7669_s11 = sld [smem:[#allocation21 + $0x41]] }
 0x224   :  { %v7626_v0 = vadd.f32 %v12434_v1, %v1233_v4  ;;  %v1065_v30 = vadd.f32 %v1061_v19, %v1041_v50  ;;  %v759_v4 = vadd.f32 %v7341_v45, %v711_v9  ;;  %12437 = sst [smem:[#allocation75_spill]] %s7644_s1  ;;  %v7653_v26 = vmul.f32 %v7463_v44, %v12438_v59 }
 0x225   :  { %v817_v49 = vadd.f32 %v12436_v31, %v787_v51  ;;  %v891_v33 = vmul.f32 %v7021_v38, %v885_v25  ;;  %v12439_v19 = vstv %s7370_s14  ;;  %v4066_v15 = vmul.f32 %v12030_v10, %v7472_v18  ;;  %s7690_s14 = sld [smem:[#allocation21 + $0x65]] }
 0x226   :  { %v1097_v1 = vadd.f32 %v7132_v57, %v1065_v30  ;;  %v7664_v11 = vmul.f32 %v7463_v44, %v12439_v19  ;;  %v12441_v38 = vrot.slane %v7483_v20, 1  ;;  %v1129_v57 = vadd.f32 %v7139_v34, %v1081_v36  ;;  %v7687_v34 = vld [vmem:[#allocation5 + $0x98] sm:$0x80] }
 0x227   :  { %v841_v45 = vadd.f32 %v7343_v55, %v817_v49  ;;  %v12442_v55 = vrot.slane %v7530_v40, 2  ;;  %v1169_v24 = vrot.slane %v7653_v26, 1  ;;  %v899_v51 = vrot.slane %v891_v33, 2  ;;  %v1255_v40 = vld [vmem:[#allocation3 + $0x78] sm:$0xfe] }
 0x228   :  { %4038 = vrot.lane.b32.xlu1 %v4034_v43, %s12410_s13  ;;  %v803_v25 = vadd.f32 %v12441_v38, %v759_v4  ;;  %v12025_v9 = vstv %s7635_s29  ;;  %v1157_v20 = vadd.f32 %v7165_v42, %v1097_v1  ;;  %v1183_v49 = vrot.slane %v7664_v11, 1  ;;  %s7730_s29 = sld [smem:[#allocation16]]  ;;  %v12452_v11 = vld [vmem:[#allocation52_spill] sm:$0xff] }
 0x229   :  { %4054 = vrot.lane.b32.xlu2 %v4050_v2, %s12410_s13  ;;  %12440 = sst [smem:[#allocation76_spill]] %s7669_s11  ;;  %v881_v50 = vadd.f32 %v7385_v60, %v841_v45  ;;  %v924_v2 = vsel %vm468_vm0, %v12442_v55, %v923_v53  ;;  %v4114_v31 = vmul.f32 %v12025_v9, %v7472_v18  ;;  %v1047_v60 = vld [vmem:[#allocation3 + $0x78] sm:$0x7f]  ;;  %v12027_v4 = vstv %s7644_s1  ;;  %v1257_v55 = vld [vmem:[#allocation3 + $0x68] sm:$0x1] }
 0x22a   :  { %v829_v30 = vadd.f32 %v7485_v52, %v803_v25  ;;  %v1173_v52 = vadd.f32 %v1169_v24, %v1129_v57  ;;  %v7695_v43 = vmul.f32 %v7033_v14, %v1255_v40  ;;  %v900_v42 = vsel %vm468_vm0, %v897_v54, %v899_v51  ;;  %v7714_v25 = vpop.permute.xlu0 %1399  ;;  %s7745_s1 = sld [smem:[#allocation16 + $0x1]] }
 0x22b   :  { %v7656_v41 = vpop.permute.xlu1 %1335  ;;  %v1032_v32 = vpop.permute.xlu2 %1031  ;;  %v933_v53 = vadd.f32 %v924_v2, %v881_v50  ;;  %12443 = sst [smem:[#allocation77_spill]] %s7690_s14  ;;  %v1063_v45 = vmul.f32 %v7408_v21, %v1047_v60  ;;  %v4612_v54 = vmul.f32 %v12027_v4, %v7687_v34  ;;  %v12022_v38 = vstv %s7669_s11 }
 0x22c   :  { %v862_v33 = vadd.f32 %v7288_v47, %v829_v30  ;;  %v1036_v35 = vsel %vm321_vm1, %v1032_v32, %v6989_v58  ;;  %v1152_v2 = vsel %vm321_vm1, %v7299_v6, %v7176_v63  ;;  %v1199_v57 = vadd.f32 %v7569_v62, %v1173_v52  ;;  %s7739_s11 = sld [smem:[#allocation21 + $0x88]] }
 0x22d   :  { %v1285_v58 = vmul.f32 %v7043_v37, %v1255_v40  ;;  %v1054_v51 = vmul.f32 %v7524_v17, %v7089_v39  ;;  %v1053_v63 = vmul.f32 %v7524_v17, %v1047_v60  ;;  %v1287_v40 = vmul.f32 %v7043_v37, %v1257_v55 }
 0x22e   :  { %v909_v30 = vadd.f32 %v900_v42, %v862_v33 }
 0x22f   :  { %v1293_v17 = vrot.slane %v1285_v58, 2 }
 0x230   :  { %4118 = vrot.lane.b32.xlu1 %v4114_v31, %s12413_s8 }
 0x231   :  { %4070 = vrot.lane.b32.xlu2 %v4066_v15, %s12410_s13  ;;  %v1187_v15 = vadd.f32 %v1183_v49, %v1157_v20  ;;  %v4676_v20 = vmul.f32 %v12022_v38, %v7687_v34 }
 0x232   :  { %12445 = sst [smem:[#allocation79_spill]] %s7739_s11 }
 0x233   :  { %v966_v36 = vpop.permute.xlu1 %965  ;;  %v7700_v59 = vpop.permute.xlu2 %2212 }
 0x234   :  { %12444 = vst [vmem:[#allocation78_spill] sm:$0xff] %v7700_v59  ;;  %v971_v1 = vadd.f32 %v966_v36, %v933_v53  ;;  %v972_v19 = vadd.f32 %v966_v36, %v7405_v29  ;;  %v1064_v29 = vmul.f32 %v7408_v21, %v7089_v39  ;;  %v1211_v21 = vadd.f32 %v7487_v7, %v1187_v15 }
 0x235   :  { %v1269_v53 = vrot.slane %v7695_v43, 2  ;;  %v952_v39 = vadd.f32 %v7620_v61, %v909_v30  ;;  %v12024_v36 = vstv %s7690_s14  ;;  %v12449_v30 = vld [vmem:[#allocation64_spill] sm:$0xff]  ;;  %s7776_s14 = sld [smem:[#allocation21 + $0x89]] }
 0x236   :  { %v1043_v47 = vadd.f32 %v1032_v32, %v971_v1  ;;  %v1044_v50 = vadd.f32 %v1036_v35, %v972_v19  ;;  %v1251_v33 = vadd.f32 %v7571_v48, %v1211_v21  ;;  %v953_v1 = vadd.f32 %v7620_v61, %v7510_v3  ;;  %v12447_v61 = vld [vmem:[#allocation38_spill] sm:$0xff] }
 0x237   :  { %v4692_v3 = vmul.f32 %v12024_v36, %v7687_v34 }
 0x238   :  { %v1067_v31 = vadd.f32 %v1063_v45, %v1043_v47  ;;  %v1068_v32 = vadd.f32 %v1064_v29, %v1044_v50  ;;  %v1232_v45 = vadd.f32 %v7590_v46, %v1199_v57  ;;  %4680 = vrot.lane.b32.xlu1 %v4676_v20, %s12413_s8  ;;  %v1342_v47 = vadd.f32 %v7656_v41, %v7596_v5  ;;  %v12448_v57 = vld [vmem:[#allocation63_spill] sm:$0xff]  ;;  %v12451_v20 = vld [vmem:[#allocation44_spill] sm:$0xff] }
 0x239   :  { %4616 = vrot.lane.b32.xlu2 %v4612_v54, %s12410_s13  ;;  %v1295_v29 = vrot.slane %v1287_v40, 2  ;;  %v1124_v58 = vsel %vm321_vm1, %v12448_v57, %v12447_v61  ;;  %v1407_v5 = vsel %vm321_vm1, %v7714_v25, %v12451_v20  ;;  %v1303_v21 = vadd.f32 %v1293_v17, %v1251_v33 }
 0x23a   :  { %v1099_v52 = vadd.f32 %v7383_v13, %v1067_v31  ;;  %v1100_v42 = vadd.f32 %v7383_v13, %v1068_v32  ;;  %v12446_v13 = vld [vmem:[#allocation35_spill] sm:$0xff]  ;;  %v12450_v31 = vrot.slane %v12449_v30, 1 }
 0x23b   :  { %v998_v37 = vpop.permute.xlu1 %997  ;;  %v1338_v60 = vpop.permute.xlu2 %1337  ;;  %v1296_v33 = vsel %vm468_vm0, %v1293_v17, %v1295_v29  ;;  %12453 = sst [smem:[#allocation80_spill]] %s7776_s14  ;;  %v12455_v29 = vld [vmem:[#allocation37_spill] sm:$0xff]  ;;  %v12456_v30 = vld [vmem:[#allocation39_spill] sm:$0xff] }
 0x23c   :  { %v1159_v19 = vadd.f32 %v7299_v6, %v1099_v52  ;;  %v1160_v15 = vadd.f32 %v1152_v2, %v1100_v42  ;;  %v1002_v35 = vsel %vm321_vm1, %v998_v37, %v12446_v13  ;;  %v1009_v54 = vadd.f32 %v998_v37, %v952_v39  ;;  %v1319_v52 = vpop.permute.xlu0 %1318 }
 0x23d   :  { %v1010_v50 = vadd.f32 %v1002_v35, %v953_v1  ;;  %v1263_v39 = vmul.f32 %v7033_v14, %v1257_v55  ;;  %v1341_v37 = vadd.f32 %v7656_v41, %v1303_v21  ;;  %v1428_v13 = vstv %s7745_s1  ;;  %s8021_s1 = sld [smem:[#allocation21 + $0x64]] }
 0x23e   :  { %v1057_v6 = vadd.f32 %v1053_v63, %v1009_v54  ;;  %v1189_v2 = vadd.f32 %v1183_v49, %v1159_v19  ;;  %v1190_v32 = vadd.f32 %v12450_v31, %v1160_v15  ;;  %v1279_v63 = vadd.f32 %v1269_v53, %v1232_v45  ;;  %v12454_v54 = vld [vmem:[#allocation69_spill] sm:$0xff] }
 0x23f   :  { %v1058_v40 = vadd.f32 %v1054_v51, %v1010_v50  ;;  %v1414_v19 = vadd.f32 %v1407_v5, %v1342_v47  ;;  %v12021_v15 = vstv %s7739_s11  ;;  %v1271_v35 = vrot.slane %v1263_v39, 2  ;;  %s8081_s11 = sld [smem:[#allocation18 + $0x3a]] }
 0x240   :  { %v1083_v49 = vadd.f32 %v12452_v11, %v1057_v6  ;;  %v1213_v42 = vadd.f32 %v7487_v7, %v1189_v2  ;;  %v1214_v1 = vadd.f32 %v7487_v7, %v1190_v32  ;;  %v1418_v7 = vstv %s7730_s29  ;;  %v12457_v32 = vld [vmem:[#allocation43_spill] sm:$0xff]  ;;  %s12462_s29 = smov 1  }
 0x241   :  { %v1084_v51 = vadd.f32 %v12452_v11, %v1058_v40  ;;  %4696 = vrot.lane.b32.xlu2 %v4692_v3, %s12413_s8  ;;  %v1322_v47 = vadd.f32 %v12454_v54, %v1279_v63  ;;  %v1430_v6 = vadd.f32 %v1428_v13, %v1414_v19  ;;  %v1373_v31 = vsel %vm321_vm1, %v7618_v8, %v12456_v30 }
 0x242   :  { %v1131_v14 = vadd.f32 %v12448_v57, %v1083_v49  ;;  %v1253_v55 = vadd.f32 %v7571_v48, %v1213_v42  ;;  %v1254_v45 = vadd.f32 %v7580_v22, %v1214_v1  ;;  %v1323_v57 = vadd.f32 %v12454_v54, %v7626_v0 }
 0x243   :  { %v1132_v41 = vadd.f32 %v1124_v58, %v1084_v51  ;;  %v1404_v61 = vpop.permute.xlu2 %1403  ;;  %v1413_v48 = vadd.f32 %v7714_v25, %v1341_v37  ;;  %v4644_v58 = vmul.f32 %v12021_v15, %v7687_v34  ;;  %v1272_v27 = vsel %vm468_vm0, %v1269_v53, %v1271_v35  ;;  %v12458_v53 = vld [vmem:[#allocation36_spill] sm:$0xff]  ;;  %v12459_v51 = vld [vmem:[#allocation41_spill] sm:$0xff] }
 0x244   :  { %v1175_v17 = vadd.f32 %v1169_v24, %v1131_v14  ;;  %v1305_v50 = vadd.f32 %v1296_v33, %v1253_v55  ;;  %v1306_v3 = vadd.f32 %v12455_v29, %v1254_v45  ;;  %v1408_v25 = vsel %vm321_vm1, %v1404_v61, %v12457_v32  ;;  %v1370_v63 = vpop.permute.xlu0 %1369 }
 0x245   :  { %v1176_v22 = vadd.f32 %v1170_v16, %v1132_v41  ;;  %v1379_v16 = vadd.f32 %v7618_v8, %v1322_v47  ;;  %v1429_v40 = vadd.f32 %v1428_v13, %v1413_v48  ;;  %v1434_v11 = vmax.f32 %v1430_v6, 0.0 }
 0x246   :  { %v1201_v26 = vadd.f32 %v7569_v62, %v1175_v17  ;;  %v1343_v24 = vadd.f32 %v1338_v60, %v1305_v50  ;;  %v1344_v2 = vadd.f32 %v1338_v60, %v1306_v3  ;;  %v1380_v60 = vadd.f32 %v1373_v31, %v1323_v57 }
 0x247   :  { %v1202_v0 = vadd.f32 %v7569_v62, %v1176_v22  ;;  %v12020_v62 = vstv %s7776_s14  ;;  %v1419_v8 = vadd.f32 %v1418_v7, %v1379_v16  ;;  %v1374_v33 = vsel %vm321_vm1, %v1370_v63, %v12459_v51  ;;  %v1468_v51 = vld [vmem:[%s11925_s9 + $0x58] sm:$0xff]  ;;  %s8008_s14 = sld [smem:[#allocation21 + $0x80]] }
 0x248   :  { %v1234_v20 = vadd.f32 %v7590_v46, %v1201_v26  ;;  %v1415_v5 = vadd.f32 %v1404_v61, %v1343_v24  ;;  %v1416_v21 = vadd.f32 %v1408_v25, %v1344_v2  ;;  %v1420_v14 = vadd.f32 %v1418_v7, %v1380_v60 }
 0x249   :  { %v1235_v39 = vadd.f32 %v7606_v23, %v1202_v0  ;;  %4648 = vrot.lane.b32.xlu2 %v4644_v58, %s12410_s13  ;;  %v4708_v23 = vmul.f32 %v12020_v62, %v7687_v34  ;;  %v1433_v45 = vmax.f32 %v1429_v40, 0.0  ;;  %v1454_v41 = vrot.slane %v1434_v11, 7  ;;  %v1472_v11 = vld [vmem:[%s11925_s9 + $0x78] sm:$0xff] }
 0x24a   :  { %v1431_v49 = vadd.f32 %v1428_v13, %v1415_v5  ;;  %v1432_v43 = vadd.f32 %v1428_v13, %v1416_v21  ;;  %v1281_v42 = vadd.f32 %v1272_v27, %v1234_v20  ;;  %v1423_v17 = vmax.f32 %v1419_v8, 0.0  ;;  %1485 = vmatpush.msra.mxu0 %v1472_v11  ;;  %v1470_v8 = vld [vmem:[%s11925_s9 + $0x68] sm:$0xff]  ;;  %v1508_v11 = vld [vmem:[%s11926_s10] sm:$0xff] }
 0x24b   :  { %v1282_v1 = vadd.f32 %v12458_v53, %v1235_v39  ;;  %v7817_v54 = vpop.permute.xlu2 %2260  ;;  %v1424_v61 = vmax.f32 %v1420_v14, 0.0  ;;  %v1451_v48 = vrot.slane %v1433_v45, 7  ;;  %v1467_v14 = vld [vmem:[%s11925_s9 + $0x50] sm:$0xff]  ;;  %v1466_v45 = vld [vmem:[%s11925_s9 + $0x48] sm:$0xff] }
 0x24c   :  { %v1435_v37 = vmax.f32 %v1431_v49, 0.0  ;;  %v1436_v46 = vmax.f32 %v1432_v43, 0.0  ;;  %v1324_v19 = vadd.f32 %v1319_v52, %v1281_v42  ;;  %12460 = vst [vmem:[#allocation35_spill] sm:$0xff] %v7817_v54  ;;  %v1523_v49 = vld [vmem:[%s11926_s10 + $0x78] sm:$0xff]  ;;  %v1471_v43 = vld [vmem:[%s11925_s9 + $0x70] sm:$0xff] }
 0x24d   :  { %v1325_v55 = vadd.f32 %v1319_v52, %v1282_v1  ;;  %v1441_v52 = vrot.slane %v1423_v17, 7  ;;  %v1444_v24 = vrot.slane %v1424_v61, 7  ;;  %1524 = vmatpush.msra.mxu1 %v1523_v49  ;;  %v1522_v42 = vld [vmem:[%s11926_s10 + $0x70] sm:$0xff]  ;;  %1486 = vmatpush.msra.mxu0 %v1471_v43  ;;  %v1464_v17 = vld [vmem:[%s11925_s9 + $0x38] sm:$0xff]  ;;  %v1462_v61 = vld [vmem:[%s11925_s9 + $0x28] sm:$0xff] }
 0x24e   :  { %v1455_v35 = vrot.slane %v1436_v46, 7  ;;  %v1381_v13 = vadd.f32 %v1370_v63, %v1324_v19  ;;  %v1452_v50 = vrot.slane %v1435_v37, 7  ;;  %v1521_v37 = vld [vmem:[%s11926_s10 + $0x68] sm:$0xff]  ;;  %v1469_v46 = vld [vmem:[%s11925_s9 + $0x60] sm:$0xff] }
 0x24f   :  { %v1382_v47 = vadd.f32 %v1374_v33, %v1325_v55  ;;  %1525 = vmatpush.msra.mxu1 %v1522_v42  ;;  %1487 = vmatpush.msra.mxu0 %v1470_v8  ;;  %v1520_v19 = vld [vmem:[%s11926_s10 + $0x60] sm:$0xff]  ;;  %v1519_v33 = vld [vmem:[%s11926_s10 + $0x58] sm:$0xff]  ;;  %v12036_v42 = vstv %s7958_s18 }
 0x250   :  { %v1456_v29 = vsel %vm641_vm2, %v1454_v41, %v1455_v35  ;;  %v1421_v3 = vadd.f32 %v1418_v7, %v1381_v13  ;;  %v1453_v6 = vsel %vm641_vm2, %v1451_v48, %v1452_v50  ;;  %v1517_v41 = vld [vmem:[%s11926_s10 + $0x48] sm:$0xff]  ;;  %v1465_v35 = vld [vmem:[%s11925_s9 + $0x40] sm:$0xff]  ;;  %v1515_v50 = vld [vmem:[%s11926_s10 + $0x38] sm:$0xff]  ;;  %v3440_v8 = vmul.f32 %v12036_v42, %v7424_v12 }
 0x251   :  { %4712 = vrot.lane.b32.xlu2 %v4708_v23, %s12413_s8  ;;  %v1422_v57 = vadd.f32 %v1418_v7, %v1382_v47  ;;  %v6183_v31 = vpack.i.bf16 %v1456_v29, %v1453_v6  ;;  %v7828_v7 = vpop.permute.xlu1 %2228  ;;  %1526 = vmatpush.msra.mxu1 %v1521_v37  ;;  %v1518_v23 = vld [vmem:[%s11926_s10 + $0x50] sm:$0xff]  ;;  %v1516_v13 = vld [vmem:[%s11926_s10 + $0x40] sm:$0xff]  ;;  %v1511_v6 = vld [vmem:[%s11926_s10 + $0x18] sm:$0xff] }
 0x252   :  { %v1425_v22 = vmax.f32 %v1421_v3, 0.0  ;;  %12463 = vst [vmem:[#allocation63_spill] sm:$0xff] %v7828_v7  ;;  %1488 = vmatpush.msra.mxu0 %v1469_v46  ;;  %v1463_v29 = vld [vmem:[%s11925_s9 + $0x30] sm:$0xff]  ;;  %3444 = vrot.lane.b32.xlu0 %v3440_v8, %s12410_s13  ;;  %v12035_v46 = vstv %s7962_s28 }
 0x253   :  { %v1426_v58 = vmax.f32 %v1422_v57, 0.0  ;;  %v7824_v32 = vpop.permute.xlu2 %2898  ;;  %1527 = vmatpush.msra.mxu1 %v1520_v19  ;;  %v1514_v3 = vld [vmem:[%s11926_s10 + $0x30] sm:$0xff]  ;;  %v1513_v57 = vld [vmem:[%s11926_s10 + $0x28] sm:$0xff]  ;;  %v3456_v19 = vmul.f32 %v12035_v46, %v7424_v12 }
 0x254   :  { %v1442_v26 = vrot.slane %v1425_v22, 7  ;;  %12461 = vst [vmem:[#allocation38_spill] sm:$0xff] %v7824_v32  ;;  %1489 = vmatpush.msra.mxu0 %v1468_v51  ;;  %v1461_v22 = vld [vmem:[%s11925_s9 + $0x20] sm:$0xff] }
 0x255   :  { %v1445_v2 = vrot.slane %v1426_v58, 7  ;;  %1528 = vmatpush.msra.mxu1 %v1519_v33  ;;  %v1512_v58 = vld [vmem:[%s11926_s10 + $0x20] sm:$0xff] }
 0x256   :  { %v1443_v30 = vsel %vm641_vm2, %v1441_v52, %v1442_v26  ;;  %1490 = vmatpush.msra.mxu0 %v1467_v14  ;;  %v1460_v52 = vld [vmem:[%s11925_s9 + $0x18] sm:$0xff] }
 0x257   :  { %v1446_v0 = vsel %vm641_vm2, %v1444_v24, %v1445_v2  ;;  %1529 = vmatpush.msra.mxu1 %v1518_v23  ;;  %v1459_v24 = vld [vmem:[%s11925_s9 + $0x10] sm:$0xff] }
 0x258   :  { %v6178_v25 = vpack.i.bf16 %v1446_v0, %v1443_v30  ;;  %1491 = vmatpush.msra.mxu0 %v1466_v45  ;;  %v1510_v2 = vld [vmem:[%s11926_s10 + $0x10] sm:$0xff]  ;;  %v1458_v30 = vld [vmem:[%s11925_s9 + $0x8] sm:$0xff]  ;;  %v1457_v0 = vld [vmem:[%s11925_s9] sm:$0xff]  ;;  %s7974_s9 = sld [smem:[#allocation21 + $0x53]] }
 0x259   :  { %6184 = vrot.lane.b32.xlu2 %v6183_v31, %s12462_s29  ;;  %v7832_v16 = vpop.permute.xlu1 %2276  ;;  %1530 = vmatpush.msra.mxu1 %v1517_v41  ;;  %v1509_v31 = vld [vmem:[%s11926_s10 + $0x8] sm:$0xff]  ;;  %s7983_s10 = sld [smem:[#allocation21 + $0x38]] }
 0x25a   :  { %6179 = vrot.lane.b32.xlu1 %v6178_v25, %s12462_s29  ;;  %12465 = vst [vmem:[#allocation44_spill] sm:$0xff] %v7832_v16  ;;  %1492 = vmatpush.msra.mxu0 %v1465_v35 }
 0x25b   :  { %v7830_v27 = vpop.permute.xlu2 %2946  ;;  %1531 = vmatpush.msra.mxu1 %v1516_v13  ;;  %3460 = vrot.lane.b32.xlu0 %v3456_v19, %s12410_s13 }
 0x25c   :  { %12464 = vst [vmem:[#allocation64_spill] sm:$0xff] %v7830_v27  ;;  %1493 = vmatpush.msra.mxu0 %v1464_v17 }
 0x25d   :  { %1532 = vmatpush.msra.mxu1 %v1515_v50 }
 0x25e   :  { %1494 = vmatpush.msra.mxu0 %v1463_v29  ;;  %v12034_v33 = vstv %s7974_s9 }
 0x25f   :  { %1533 = vmatpush.msra.mxu1 %v1514_v3  ;;  %v3536_v23 = vmul.f32 %v12034_v33, %v7424_v12  ;;  %v12033_v41 = vstv %s7983_s10 }
 0x260   :  { %1495 = vmatpush.msra.mxu0 %v1462_v61  ;;  %v4098_v50 = vmul.f32 %v12033_v41, %v7472_v18  ;;  %v12031_v61 = vstv %s7992_s23 }
 0x261   :  { %v7836_v5 = vpop.permute.xlu1 %2866  ;;  %1534 = vmatpush.msra.mxu1 %v1513_v57 }
 0x262   :  { %12467 = vst [vmem:[#allocation69_spill] sm:$0xff] %v7836_v5  ;;  %1496 = vmatpush.msra.mxu0 %v1461_v22  ;;  %v4596_v22 = vmul.f32 %v12031_v61, %v7687_v34 }
 0x263   :  { %v7834_v20 = vpop.permute.xlu2 %3524  ;;  %1535 = vmatpush.msra.mxu1 %v1512_v58  ;;  %3540 = vrot.lane.b32.xlu0 %v3536_v23, %s12413_s8  ;;  %v12029_v58 = vstv %s8000_s27 }
 0x264   :  { %12466 = vst [vmem:[#allocation52_spill] sm:$0xff] %v7834_v20  ;;  %1497 = vmatpush.msra.mxu0 %v1460_v52  ;;  %v4660_v52 = vmul.f32 %v12029_v58, %v7687_v34 }
 0x265   :  { %1536 = vmatpush.msra.mxu1 %v1511_v6  ;;  %v12026_v6 = vstv %s8008_s14 }
 0x266   :  { %1498 = vmatpush.msra.mxu0 %v1459_v24  ;;  %v4130_v24 = vmul.f32 %v12026_v6, %v7472_v18  ;;  %v12023_v18 = vstv %s8021_s1 }
 0x267   :  { %1537 = vmatpush.msra.mxu1 %v1510_v2  ;;  %v4628_v2 = vmul.f32 %v12023_v18, %v7687_v34  ;;  %v12039_v18 = vstv %s8091_s16 }
 0x268   :  { %1499 = vmatpush.msra.mxu0 %v1458_v30  ;;  %v8032_v30 = vpop.permute.xlu0 %2196 }
 0x269   :  { %1538 = vmatpush.msra.mxu1 %v1509_v31  ;;  %12485 = vst [vmem:[#allocation93_spill] sm:$0xff] %v8032_v30 }
 0x26a   :  { %1500 = vmatpush.msra.mxu0 %v1457_v0 }
 0x26b   :  { %v7838_v21 = vpop.permute.xlu2 %4022  ;;  %1539 = vmatpush.msra.mxu1 %v1508_v11  ;;  %4102 = vrot.lane.b32.xlu0 %v4098_v50, %s12413_s8 }
 0x26c   :  { %12468 = vst [vmem:[#allocation37_spill] sm:$0xff] %v7838_v21 }
 0x26d   :  { %v7840_v60 = vpop.permute.xlu1 %2914 }
 0x26e   :  { %12469 = vst [vmem:[#allocation39_spill] sm:$0xff] %v7840_v60 }
 0x270   :  { %v8034_v31 = vpop.permute.xlu0 %2244 }
 0x271   :  { %12486 = vst [vmem:[#allocation94_spill] sm:$0xff] %v8034_v31 }
 0x273   :  { %v7842_v40 = vpop.permute.xlu2 %4086  ;;  %4600 = vrot.lane.b32.xlu0 %v4596_v22, %s12410_s13 }
 0x274   :  { %12470 = vst [vmem:[#allocation43_spill] sm:$0xff] %v7842_v40 }
 0x278   :  { %v7844_v39 = vpop.permute.xlu1 %2962  ;;  %v8037_v23 = vpop.permute.xlu0 %2292 }
 0x279   :  { %12471 = vst [vmem:[#allocation36_spill] sm:$0xff] %v7844_v39 }
 0x27a   :  { %12487 = vst [vmem:[#allocation95_spill] sm:$0xff] %v8037_v23 }
 0x27b   :  { %v7846_v63 = vpop.permute.xlu2 %3556  ;;  %4664 = vrot.lane.b32.xlu0 %v4660_v52, %s12413_s8  ;;  %v12493_v52 = vstv %s6929_s12  ;;  %s8073_s12 = sld [smem:[#allocation18 + $0x17]] }
 0x27c   :  { %12472 = vst [vmem:[#allocation41_spill] sm:$0xff] %v7846_v63 }
 0x282   :  { %v7860_v53 = vpop.permute.xlu1 %3508 }
 0x283   :  { %12473 = vst [vmem:[#allocation81_spill] sm:$0xff] %v7860_v53  ;;  %v7862_v1 = vpop.permute.xlu2 %4054  ;;  %4134 = vrot.lane.b32.xlu0 %v4130_v24, %s12413_s8  ;;  %v12520_v53 = vstv %s8091_s16  ;;  %s5776_s16 = sld [smem:[#allocation18 + $0xd]] }
 0x284   :  { %12474 = vst [vmem:[#allocation82_spill] sm:$0xff] %v7862_v1 }
 0x28a   :  { %v7888_v55 = vpop.permute.xlu1 %3476 }
 0x28b   :  { %12475 = vst [vmem:[#allocation83_spill] sm:$0xff] %v7888_v55  ;;  %v7902_v47 = vpop.permute.xlu2 %4070  ;;  %4632 = vrot.lane.b32.xlu0 %v4628_v2, %s12410_s13 }
 0x28c   :  { %12476 = vst [vmem:[#allocation84_spill] sm:$0xff] %v7902_v47 }
 0x292   :  { %v7922_v48 = vpop.permute.xlu1 %3492 }
 0x293   :  { %12477 = vst [vmem:[#allocation85_spill] sm:$0xff] %v7922_v48  ;;  %v7936_v26 = vpop.permute.xlu2 %4616 }
 0x294   :  { %12478 = vst [vmem:[#allocation86_spill] sm:$0xff] %v7936_v26 }
 0x29a   :  { %v7953_v25 = vpop.permute.xlu1 %4038 }
 0x29b   :  { %12479 = vst [vmem:[#allocation87_spill] sm:$0xff] %v7953_v25  ;;  %v7960_v49 = vpop.permute.xlu2 %4696 }
 0x29c   :  { %12480 = vst [vmem:[#allocation88_spill] sm:$0xff] %v7960_v49 }
 0x2a2   :  { %v7964_v43 = vpop.permute.xlu1 %4118 }
 0x2a3   :  { %12481 = vst [vmem:[#allocation89_spill] sm:$0xff] %v7964_v43  ;;  %v7971_v37 = vpop.permute.xlu2 %4648 }
 0x2a4   :  { %12482 = vst [vmem:[#allocation90_spill] sm:$0xff] %v7971_v37 }
 0x2aa   :  { %v7979_v51 = vpop.permute.xlu1 %4680 }
 0x2ab   :  { %12483 = vst [vmem:[#allocation91_spill] sm:$0xff] %v7979_v51  ;;  %v7985_v14 = vpop.permute.xlu2 %4712 }
 0x2ac   :  { %12484 = vst [vmem:[#allocation92_spill] sm:$0xff] %v7985_v14 }
 0x2b3   :  { %v6185_v29 = vpop.permute.xlu2 %6184 }
 0x2b4   :  { %v6187_v3 = vunpack.i.h.bf16 %v6185_v29  ;;  %v6186_v12 = vunpack.i.l.bf16 %v6185_v29  ;;  %v12490_v29 = vstv %s6914_s19  ;;  %s5742_s19 = sld [smem:[#allocation18 + $0x28]] }
 0x2b6   :  { %v1482_v57 = vsel %vm652_vm3, %v6186_v12, %v6187_v3  ;;  %v8054_v12 = vpop.permute.xlu0 %2882 }
 0x2b7   :  { %12491 = vst [vmem:[#allocation96_spill] sm:$0xff] %v8054_v12 }
 0x2cc   :  { %v6180_v45 = vpop.permute.xlu1 %6179 }
 0x2cd   :  { %v6182_v35 = vunpack.i.h.bf16 %v6180_v45  ;;  %v6181_v13 = vunpack.i.l.bf16 %v6180_v45 }
 0x2cf   :  { %v1481_v17 = vsel %vm652_vm3, %v6181_v13, %v6182_v35  ;;  %v12488_v35 = vstv %s6891_s17  ;;  %s5744_s17 = sld [smem:[#allocation18 + $0x5]] }
 0x2d0   :  { %1501 = vmatmul.f32.vlgmr.msra.gmra.mxu0 %v1481_v17  ;;  %1540 = vmatmul.f32.vlgmr.msra.gmra.mxu1 %v1481_v17  ;;  %v12489_v17 = vstv %s6922_s7  ;;  %s5740_s7 = sld [smem:[#allocation18 + $0x4]] }
 0x2d8   :  { %1504 = vmatmul.f32.gmra.mxu0 %v1482_v57  ;;  %1543 = vmatmul.f32.gmra.mxu1 %v1482_v57  ;;  %v12492_v57 = vstv %s6925_s21  ;;  %s8071_s21 = sld [smem:[#allocation18 + $0x3b]] }
 0x34d   :  { %v1502_v0 = vpop.f32.mrf.mxu0  ;;  %v1541_v11 = vpop.f32.mrf.mxu1 }
 0x34e   :  { %v1547_v8 = vmax.f32 %v1502_v0, %v1541_v11  ;;  %v12494_v0 = vstv %s6919_s20  ;;  %s5748_s20 = sld [smem:[#allocation18 + $0x6]] }
 0x350   :  { %1550 = vst.msk [vmem:[#allocation4 + $0x18] sm:$0xff] %vm1549_vm5, %v1547_v8  ;;  %v1795_v8 = vstv %s5741_s6  ;;  %s8095_s6 = sld [smem:[#allocation18 + $0x7]] }
 0x355   :  { %v1505_v44 = vpop.f32.mrf.mxu0  ;;  %v1544_v19 = vpop.f32.mrf.mxu1 }
 0x356   :  { %v1548_v34 = vmax.f32 %v1505_v44, %v1544_v19  ;;  %v12038_v9 = vstv %s8095_s6  ;;  %v12521_v39 = vstv %s8095_s6  ;;  %s8401_s6 = sld [smem:[#allocation18 + $0x32]] }
 0x357   :  { %v8039_v45 = vld [vmem:[#allocation4 + $0x18] sm:$0x7f] }
 0x358   :  { %1551 = vst.msk [vmem:[#allocation4 + $0x48] sm:$0xff] %vm1549_vm5, %v1548_v34  ;;  %v1631_v13 = vmul.f32 %v12488_v35, %v8039_v45  ;;  %v1615_v50 = vmul.f32 %v12489_v17, %v8039_v45  ;;  %v1599_v3 = vmul.f32 %v12490_v29, %v8039_v45  ;;  %v1679_v22 = vmul.f32 %v12492_v57, %v8039_v45  ;;  %v8062_v2 = vld [vmem:[#allocation4 + $0x18] sm:$0xff] }
 0x359   :  { %v1663_v24 = vmul.f32 %v12493_v52, %v8039_v45  ;;  %v1647_v11 = vmul.f32 %v12494_v0, %v8039_v45  ;;  %v1796_v44 = vmul.f32 %v1795_v8, %v8062_v2  ;;  %v12495_v34 = vstv %s6963_s24  ;;  %s5751_s24 = sld [smem:[#allocation18 + $0x3c]]  ;;  %v8093_v0 = vld [vmem:[#allocation4 + $0x18] sm:$0xfe] }
 0x35a   :  { %1636 = vrot.lane.b32.xlu2 %v1631_v13, %s12410_s13  ;;  %1620 = vrot.lane.b32.xlu0 %v1615_v50, %s12410_s13  ;;  %v1711_v35 = vmul.f32 %v12495_v34, %v8039_v45  ;;  %v12496_v13 = vstv %s6937_s22  ;;  %v1831_v50 = vstv %s5744_s17  ;;  %s5749_s22 = sld [smem:[#allocation18 + $0x18]]  ;;  %v8181_v10 = vmul.f32 %v12038_v9, %v8093_v0 }
 0x35b   :  { %1604 = vrot.lane.b32.xlu1 %v1599_v3, %s12410_s13  ;;  %v1798_v19 = vrot.slane %v1796_v44, 1  ;;  %v1695_v17 = vmul.f32 %v12496_v13, %v8039_v45  ;;  %v1807_v29 = vstv %s5742_s19  ;;  %v8083_v3 = vpop.permute.xlu0 %2930  ;;  %v1783_v57 = vstv %s5740_s7  ;;  %s8101_s17 = sld [smem:[#allocation18 + $0x29]] }
 0x35c   :  { %12497 = vst [vmem:[#allocation97_spill] sm:$0xff] %v8083_v3  ;;  %v1808_v52 = vmul.f32 %v1807_v29, %v8062_v2  ;;  %v8097_v44 = vstv %s5748_s20  ;;  %v1867_v34 = vstv %s8071_s21  ;;  %v1819_v13 = vstv %s8081_s11  ;;  %s8109_s19 = sld [smem:[#allocation18 + $0x8]] }
 0x35d   :  { %12498 = vst [vmem:[#allocation98_spill] sm:$0xff] %v8097_v44  ;;  %s8121_s7 = sld [smem:[#allocation18 + $0x3d]]  ;;  %v12049_v42 = vrot.slane %v8181_v10, 2 }
 0x35e   :  { %v1810_v8 = vrot.slane %v1808_v52, 1  ;;  %s8128_s21 = sld [smem:[#allocation18 + $0x2b]] }
 0x35f   :  { %v8115_v29 = vstv %s5751_s24  ;;  %s8147_s20 = sld [smem:[#allocation18 + $0x33]]  ;;  %v8186_v33 = vld [vmem:[#allocation4 + $0x48] sm:$0xfe] }
 0x360   :  { %12499 = vst [vmem:[#allocation99_spill] sm:$0xff] %v8115_v29  ;;  %s8150_s11 = sld [smem:[#allocation18 + $0x21]] }
 0x361   :  { %v1855_v6 = vstv %s8101_s17  ;;  %s8218_s24 = sld [smem:[#allocation18 + $0x3e]] }
 0x362   :  { %1684 = vrot.lane.b32.xlu2 %v1679_v22, %s12413_s8  ;;  %1668 = vrot.lane.b32.xlu0 %v1663_v24, %s12413_s8  ;;  %v1832_v22 = vmul.f32 %v1831_v50, %v8062_v2  ;;  %v1784_v24 = vmul.f32 %v1783_v57, %v8062_v2  ;;  %v8113_v50 = vmul.f32 %v8097_v44, %v8093_v0  ;;  %v12043_v46 = vstv %s8109_s19  ;;  %s8248_s17 = sld [smem:[#allocation18 + $0x1a]] }
 0x363   :  { %1652 = vrot.lane.b32.xlu1 %v1647_v11, %s12410_s13  ;;  %v8117_v57 = vpop.permute.xlu0 %2978  ;;  %v12523_v60 = vstv %s8109_s19  ;;  %s8407_s19 = sld [smem:[#allocation18 + $0x20]] }
 0x364   :  { %v1834_v11 = vrot.slane %v1832_v22, 1  ;;  %12500 = vst [vmem:[#allocation100_spill] sm:$0xff] %v8117_v57  ;;  %v1868_v22 = vmul.f32 %v1867_v34, %v8062_v2  ;;  %v8134_v34 = vmul.f32 %v8115_v29, %v8093_v0 }
 0x366   :  { %v1870_v15 = vrot.slane %v1868_v22, 1  ;;  %v12042_v28 = vrot.slane %v8134_v34, 2 }
 0x367   :  { %v2112_v21 = vstv %s8218_s24  ;;  %s8453_s24 = sld [smem:[#allocation18 + $0x39]] }
 0x36a   :  { %1799 = vrot.lane.b32.xlu2 %v1798_v19, %s12410_s13  ;;  %1716 = vrot.lane.b32.xlu0 %v1711_v35, %s12413_s8  ;;  %v1786_v19 = vrot.slane %v1784_v24, 1  ;;  %v1843_v35 = vstv %s8073_s12  ;;  %v8123_v24 = vstv %s5750_s15  ;;  %s8136_s12 = sld [smem:[#allocation18 + $0xf]] }
 0x36b   :  { %1700 = vrot.lane.b32.xlu1 %v1695_v17, %s12413_s8  ;;  %v8106_v17 = vld [vmem:[#allocation4 + $0x28] sm:$0x1]  ;;  %v1844_v52 = vmul.f32 %v1843_v35, %v8062_v2  ;;  %12501 = vst [vmem:[#allocation101_spill] sm:$0xff] %v8123_v24  ;;  %v12037_v35 = vrot.slane %v8113_v50, 2  ;;  %v8141_v62 = vmul.f32 %v8123_v24, %v8093_v0  ;;  %s8154_s15 = sld [smem:[#allocation18 + $0x45]]  ;;  %v8184_v61 = vpop.permute.xlu0 %3444 }
 0x36c   :  { %v1935_v58 = vmul.f32 %v8123_v24, %v8106_v17  ;;  %12503 = vst [vmem:[#allocation103_spill] sm:$0xff] %v8184_v61  ;;  %v2000_v61 = vmul.f32 %v12520_v53, %v8106_v17  ;;  %v1981_v57 = vmul.f32 %v12521_v39, %v8106_v17  ;;  %v2057_v32 = vmul.f32 %v12523_v60, %v8106_v17 }
 0x36d   :  { %v1846_v38 = vrot.slane %v1844_v52, 1  ;;  %v12524_v39 = vrot.slane %v8181_v10, 2 }
 0x372   :  { %1835 = vrot.lane.b32.xlu2 %v1834_v11, %s12413_s8  ;;  %1811 = vrot.lane.b32.xlu0 %v1810_v8, %s12410_s13  ;;  %v8125_v11 = vstv %s5749_s22  ;;  %v1820_v8 = vmul.f32 %v1819_v13, %v8062_v2  ;;  %s8224_s22 = sld [smem:[#allocation18 + $0x2c]] }
 0x373   :  { %1787 = vrot.lane.b32.xlu1 %v1786_v19, %s12410_s13  ;;  %12502 = vst [vmem:[#allocation102_spill] sm:$0xff] %v8125_v11  ;;  %v1887_v19 = vmul.f32 %v8097_v44, %v8106_v17  ;;  %v8145_v13 = vmul.f32 %v8125_v11, %v8093_v0  ;;  %v1911_v52 = vmul.f32 %v8125_v11, %v8106_v17  ;;  %v8279_v55 = vpop.permute.xlu0 %3460 }
 0x374   :  { %v1822_v36 = vrot.slane %v1820_v8, 1  ;;  %v1959_v8 = vmul.f32 %v8115_v29, %v8106_v17  ;;  %12515 = vst [vmem:[#allocation113_spill] sm:$0xff] %v8279_v55 }
 0x375   :  { %v1896_v4 = vrot.slane %v1887_v19, 2  ;;  %v12040_v22 = vrot.slane %v8145_v13, 2  ;;  %v8168_v19 = vmul.f32 %v12039_v18, %v8093_v0  ;;  %v1920_v56 = vrot.slane %v1911_v52, 2 }
 0x376   :  { %v1968_v41 = vrot.slane %v1959_v8, 2  ;;  %v8210_v18 = vstv %s8136_s12  ;;  %s8419_s12 = sld [smem:[#allocation18 + $0x34]] }
 0x377   :  { %v8195_v9 = vsel %vm468_vm0, %v12040_v22, %v1920_v56  ;;  %v12048_v52 = vrot.slane %v8168_v19, 2  ;;  %12504 = vst [vmem:[#allocation104_spill] sm:$0xff] %v8210_v18  ;;  %v8216_v22 = vmul.f32 %v12043_v46, %v8093_v0  ;;  %v12509_v46 = vstv %s8121_s7 }
 0x378   :  { %v8246_v14 = vmul.f32 %v12509_v46, %v8093_v0 }
 0x37a   :  { %1871 = vrot.lane.b32.xlu2 %v1870_v15, %s12413_s8  ;;  %1847 = vrot.lane.b32.xlu0 %v1846_v38, %s12413_s8  ;;  %v12041_v38 = vrot.slane %v8141_v62, 2  ;;  %v8174_v15 = vsel %vm468_vm0, %v12037_v35, %v1896_v4  ;;  %v1944_v4 = vrot.slane %v1935_v58, 2  ;;  %v8190_v35 = vld [vmem:[#allocation4 + $0x58] sm:$0x1]  ;;  %v2017_v58 = vstv %s8128_s21  ;;  %s8417_s21 = sld [smem:[#allocation18 + $0x22]] }
 0x37b   :  { %1823 = vrot.lane.b32.xlu1 %v1822_v36, %s12410_s13  ;;  %v1856_v36 = vmul.f32 %v1855_v6, %v8062_v2  ;;  %v8200_v6 = vsel %vm468_vm0, %v12042_v28, %v1968_v41  ;;  %v8222_v41 = vmul.f32 %v8210_v18, %v8186_v33  ;;  %v8232_v28 = vstv %s8150_s11  ;;  %s8439_s11 = sld [smem:[#allocation18 + $0x24]] }
 0x37c   :  { %v8207_v8 = vsel %vm468_vm0, %v12041_v38, %v1944_v4  ;;  %v2465_v4 = vmul.f32 %v8210_v18, %v8190_v35  ;;  %v8229_v38 = vstv %s8147_s20  ;;  %12507 = vst [vmem:[#allocation107_spill] sm:$0xff] %v8232_v28  ;;  %v2489_v46 = vmul.f32 %v8232_v28, %v8190_v35  ;;  %s8429_s20 = sld [smem:[#allocation18 + $0x10]] }
 0x37d   :  { %v1858_v56 = vrot.slane %v1856_v36, 1  ;;  %12505 = vst [vmem:[#allocation105_spill] sm:$0xff] %v8222_v41  ;;  %v8235_v36 = vstv %s8154_s15  ;;  %v8253_v49 = vmul.f32 %v8229_v38, %v8186_v33  ;;  %v2513_v51 = vmul.f32 %v8229_v38, %v8190_v35  ;;  %s8447_s15 = sld [smem:[#allocation18 + $0x36]] }
 0x37e   :  { %12506 = vst [vmem:[#allocation106_spill] sm:$0xff] %v8229_v38  ;;  %v8266_v37 = vmul.f32 %v8235_v36, %v8186_v33  ;;  %v2018_v26 = vmul.f32 %v2017_v58, %v8093_v0  ;;  %v2498_v48 = vrot.slane %v2489_v46, 2 }
 0x37f   :  { %12508 = vst [vmem:[#allocation108_spill] sm:$0xff] %v8235_v36  ;;  %v12064_v47 = vrot.slane %v8253_v49, 2  ;;  %v2522_v43 = vrot.slane %v2513_v51, 2 }
 0x380   :  { %12510 = vst [vmem:[#allocation109_spill] sm:$0xff] %v8253_v49  ;;  %v12063_v25 = vrot.slane %v8266_v37, 2  ;;  %v2022_v55 = vrot.slane %v2018_v26, 2  ;;  %v8307_v26 = vpop.permute.xlu0 %3540 }
 0x381   :  { %12512 = vst [vmem:[#allocation111_spill] sm:$0xff] %v8266_v37  ;;  %v8284_v51 = vsel %vm468_vm0, %v12064_v47, %v2522_v43  ;;  %v2093_v43 = vstv %s8224_s22  ;;  %v2019_v47 = vmul.f32 %v2017_v58, %v8106_v17  ;;  %v12522_v58 = vrot.slane %v8168_v19, 2  ;;  %s8458_s22 = sld [smem:[#allocation18 + $0x27]] }
 0x382   :  { %2006 = vrot.lane.b32.xlu2 %v12048_v52, %s12410_s13  ;;  %1987 = vrot.lane.b32.xlu0 %v12049_v42, %s12410_s13  ;;  %v2474_v52 = vrot.slane %v2465_v4, 2  ;;  %v8260_v42 = vmul.f32 %v8232_v28, %v8186_v33  ;;  %v12513_v4 = vrot.slane %v8222_v41, 2  ;;  %12516 = vst [vmem:[#allocation114_spill] sm:$0xff] %v8284_v51  ;;  %v12553_v51 = vld [vmem:[#allocation46_spill] sm:$0xff] }
 0x383   :  { %1859 = vrot.lane.b32.xlu1 %v1858_v56, %s12413_s8  ;;  %v2537_v56 = vmul.f32 %v8235_v36, %v8190_v35  ;;  %12519 = vst [vmem:[#allocation117_spill] sm:$0xff] %v8307_v26  ;;  %v8511_v5 = vstv %s8447_s15  ;;  %s12670_s15 = sld [smem:[#allocation54_spill]] }
 0x384   :  { %12511 = vst [vmem:[#allocation110_spill] sm:$0xff] %v8260_v42  ;;  %v8275_v1 = vsel %vm468_vm0, %v12513_v4, %v2474_v52  ;;  %v12062_v63 = vrot.slane %v8260_v42, 2  ;;  %v2060_v52 = vrot.slane %v8216_v22, 2  ;;  %v2041_v4 = vrot.slane %v8246_v14, 2 }
 0x385   :  { %12514 = vst [vmem:[#allocation112_spill] sm:$0xff] %v8275_v1  ;;  %v2546_v20 = vrot.slane %v2537_v56, 2  ;;  %v2113_v22 = vmul.f32 %v2112_v21, %v8093_v0  ;;  %v2094_v14 = vmul.f32 %v2093_v43, %v8093_v0 }
 0x386   :  { %v8289_v40 = vsel %vm468_vm0, %v12062_v63, %v2498_v48  ;;  %v2074_v48 = vstv %s8248_s17  ;;  %s8464_s17 = sld [smem:[#allocation18 + $0x11]] }
 0x387   :  { %12517 = vst [vmem:[#allocation115_spill] sm:$0xff] %v8289_v40  ;;  %v8296_v46 = vsel %vm468_vm0, %v12063_v25, %v2546_v20  ;;  %v2075_v56 = vmul.f32 %v2074_v48, %v8093_v0  ;;  %v2117_v20 = vrot.slane %v2113_v22, 2  ;;  %v2098_v63 = vrot.slane %v2094_v14, 2 }
 0x388   :  { %12518 = vst [vmem:[#allocation116_spill] sm:$0xff] %v8296_v46  ;;  %v2023_v0 = vrot.slane %v2019_v47, 2  ;;  %v2004_v22 = vrot.slane %v2000_v61, 2  ;;  %v1985_v14 = vrot.slane %v1981_v57, 2  ;;  %v2076_v53 = vmul.f32 %v2074_v48, %v8106_v17  ;;  %v8335_v57 = vpop.permute.xlu0 %4102 }
 0x389   :  { %v2079_v25 = vrot.slane %v2075_v56, 2  ;;  %v12525_v61 = vstv %s8121_s7  ;;  %12526 = vst [vmem:[#allocation118_spill] sm:$0xff] %v8335_v57  ;;  %v2061_v48 = vrot.slane %v2057_v32, 2  ;;  %s8415_s7 = sld [smem:[#allocation18 + $0x3]] }
 0x38a   :  { %2063 = vrot.lane.b32.xlu2 %v2060_v52, %s12413_s8  ;;  %2044 = vrot.lane.b32.xlu0 %v2041_v4, %s12410_s13  ;;  %v2024_v56 = vsel %vm468_vm0, %v2022_v55, %v2023_v0  ;;  %v2005_v26 = vsel %vm468_vm0, %v12522_v58, %v2004_v22  ;;  %v1986_v47 = vsel %vm468_vm0, %v12524_v39, %v1985_v14  ;;  %v2080_v19 = vrot.slane %v2076_v53, 2 }
 0x38b   :  { %2025 = vrot.lane.b32.xlu1 %v2022_v55, %s12410_s13  ;;  %v2038_v55 = vmul.f32 %v12525_v61, %v8106_v17  ;;  %v2062_v22 = vsel %vm468_vm0, %v2060_v52, %v2061_v48  ;;  %v2095_v14 = vmul.f32 %v2093_v43, %v8106_v17  ;;  %v12530_v43 = vstv %s7213_s5  ;;  %s5780_s5 = sld [smem:[#allocation18 + $0xe]] }
 0x38c   :  { %v2081_v60 = vsel %vm468_vm0, %v2079_v25, %v2080_v19  ;;  %v12534_v19 = vstv %s7262_s2  ;;  %s5725_s2 = sld [smem:[#allocation18 + $0x12]] }
 0x38d   :  { %v2042_v0 = vrot.slane %v2038_v55, 2 }
 0x38f   :  { %v2043_v10 = vsel %vm468_vm0, %v2041_v4, %v2042_v0  ;;  %v12535_v0 = vstv %s7267_s4  ;;  %s8396_s4 = sld [smem:[#allocation18 + $0x44]]  ;;  %v12543_v57 = vstv %s8415_s7 }
 0x390   :  { %v8346_v32 = vpop.permute.xlu0 %4600  ;;  %v8475_v3 = vmul.f32 %v12543_v57, %v8062_v2 }
 0x391   :  { %12527 = vst [vmem:[#allocation119_spill] sm:$0xff] %v8346_v32  ;;  %v12081_v32 = vstv %s8417_s21 }
 0x392   :  { %2120 = vrot.lane.b32.xlu2 %v2117_v20, %s12413_s8  ;;  %2101 = vrot.lane.b32.xlu0 %v2098_v63, %s12413_s8 }
 0x393   :  { %2082 = vrot.lane.b32.xlu1 %v2079_v25, %s12413_s8  ;;  %v8348_v25 = vld [vmem:[#allocation4 + $0x48] sm:$0x7f] }
 0x394   :  { %v2209_v39 = vmul.f32 %v12530_v43, %v8348_v25  ;;  %v2257_v48 = vmul.f32 %v12534_v19, %v8348_v25 }
 0x398   :  { %v8358_v4 = vpop.permute.xlu0 %4664 }
 0x399   :  { %12529 = vst [vmem:[#allocation120_spill] sm:$0xff] %v8358_v4 }
 0x39a   :  { %2027 = vrot.lane.b32.xlu2 %v2024_v56, %s12410_s13  ;;  %2008 = vrot.lane.b32.xlu0 %v2005_v26, %s12410_s13  ;;  %v2114_v26 = vmul.f32 %v2112_v21, %v8106_v17  ;;  %v2099_v56 = vrot.slane %v2095_v14, 2  ;;  %v12528_v21 = vstv %s6956_s0  ;;  %s5777_s0 = sld [smem:[#allocation18 + $0x1f]] }
 0x39b   :  { %1989 = vrot.lane.b32.xlu1 %v1986_v47, %s12410_s13  ;;  %v2177_v58 = vmul.f32 %v12528_v21, %v8348_v25  ;;  %v12531_v47 = vstv %s7250_s30  ;;  %s5778_s30 = sld [smem:[#allocation18 + $0x31]] }
 0x39c   :  { %v2118_v52 = vrot.slane %v2114_v26, 2  ;;  %v2100_v17 = vsel %vm468_vm0, %v2098_v63, %v2099_v56  ;;  %v2225_v61 = vmul.f32 %v12531_v47, %v8348_v25  ;;  %v8382_v26 = vld [vmem:[#allocation4 + $0x48] sm:$0xff]  ;;  %v2361_v56 = vstv %s5776_s16  ;;  %s8482_s16 = sld [smem:[#allocation18 + $0x35]] }
 0x39e   :  { %v2119_v53 = vsel %vm468_vm0, %v2117_v20, %v2118_v52  ;;  %v12532_v20 = vstv %s7219_s25  ;;  %s5779_s25 = sld [smem:[#allocation18 + $0x43]] }
 0x39f   :  { %v2193_v55 = vmul.f32 %v12532_v20, %v8348_v25 }
 0x3a0   :  { %v2373_v52 = vstv %s5777_s0  ;;  %s8477_s0 = sld [smem:[#allocation18 + $0x23]] }
 0x3a1   :  { %v2385_v19 = vstv %s5778_s30  ;;  %s5760_s30 = sld [smem:[#allocation18 + $0x9]] }
 0x3a2   :  { %2084 = vrot.lane.b32.xlu2 %v2081_v60, %s12413_s8  ;;  %2065 = vrot.lane.b32.xlu0 %v2062_v22, %s12413_s8  ;;  %v2273_v60 = vmul.f32 %v12535_v0, %v8348_v25  ;;  %v8380_v22 = vpop.permute.xlu0 %4134 }
 0x3a3   :  { %2046 = vrot.lane.b32.xlu1 %v2043_v10, %s12410_s13  ;;  %12536 = vst [vmem:[#allocation122_spill] sm:$0xff] %v8380_v22  ;;  %v12537_v10 = vstv %s7231_s26  ;;  %s8394_s26 = sld [smem:[#allocation18 + $0x15]] }
 0x3a4   :  { %v2241_v14 = vmul.f32 %v12537_v10, %v8348_v25  ;;  %v2397_v20 = vstv %s5779_s25  ;;  %v2386_v10 = vmul.f32 %v2385_v19, %v8382_v26  ;;  %s8584_s25 = sld [smem:[#allocation18 + $0x47]] }
 0x3aa   :  { %2122 = vrot.lane.b32.xlu0 %v2119_v53, %s12413_s8  ;;  %2182 = vrot.lane.b32.xlu2 %v2177_v58, %s12410_s13  ;;  %v2374_v58 = vmul.f32 %v2373_v52, %v8382_v26  ;;  %v2362_v53 = vmul.f32 %v2361_v56, %v8382_v26  ;;  %v8421_v56 = vstv %s5725_s2  ;;  %s8683_s2 = sld [smem:[#allocation18 + $0xc]] }
 0x3ab   :  { %2103 = vrot.lane.b32.xlu1 %v2100_v17, %s12413_s8 }
 0x3ac   :  { %v2376_v17 = vrot.slane %v2374_v58, 1  ;;  %v2364_v43 = vrot.slane %v2362_v53, 1  ;;  %v2388_v58 = vrot.slane %v2386_v10, 1  ;;  %v2445_v53 = vstv %s8396_s4  ;;  %s5763_s4 = sld [smem:[#allocation18 + $0x3f]] }
 0x3b2   :  { %2214 = vrot.lane.b32.xlu0 %v2209_v39, %s12410_s13  ;;  %2230 = vrot.lane.b32.xlu2 %v2225_v61, %s12410_s13  ;;  %v12539_v39 = vstv %s7258_s3  ;;  %v2409_v61 = vstv %s5780_s5  ;;  %s1556_s3 = sld [smem:[#allocation18]] }
 0x3b3   :  { %2198 = vrot.lane.b32.xlu1 %v2193_v55, %s12410_s13  ;;  %v2289_v47 = vmul.f32 %v12539_v39, %v8348_v25  ;;  %v8405_v55 = vpop.permute.xlu0 %4632  ;;  %v2410_v0 = vmul.f32 %v2409_v61, %v8382_v26  ;;  %v2421_v39 = vstv %s8407_s19  ;;  %v1571_v61 = vmul.f32 %v8421_v56, %v8039_v45  ;;  %s8527_s5 = sld [smem:[#allocation18 + $0x46]] }
 0x3b4   :  { %v8372_v63 = vpop.permute.xlu2 %1636  ;;  %12540 = vst [vmem:[#allocation124_spill] sm:$0xff] %v8405_v55  ;;  %s8736_s19 = sld [smem:[#allocation18 + $0x42]] }
 0x3b5   :  { %12533 = vst [vmem:[#allocation121_spill] sm:$0xff] %v8372_v63 }
 0x3b9   :  { %v12559_v44 = vstv %s8527_s5 }
 0x3ba   :  { %2262 = vrot.lane.b32.xlu0 %v2257_v48, %s12413_s8  ;;  %2278 = vrot.lane.b32.xlu2 %v2273_v60, %s12413_s8  ;;  %v2398_v60 = vmul.f32 %v2397_v20, %v8382_v26 }
 0x3bb   :  { %2246 = vrot.lane.b32.xlu1 %v2241_v14, %s12413_s8  ;;  %v2412_v14 = vrot.slane %v2410_v0, 1  ;;  %v2446_v0 = vmul.f32 %v2445_v53, %v8382_v26 }
 0x3bc   :  { %v8390_v21 = vpop.permute.xlu2 %1684  ;;  %v2400_v52 = vrot.slane %v2398_v60, 1 }
 0x3bd   :  { %12538 = vst [vmem:[#allocation123_spill] sm:$0xff] %v8390_v21  ;;  %v2448_v55 = vrot.slane %v2446_v0, 1  ;;  %v2557_v0 = vstv %s8429_s20  ;;  %s9171_s20 = sld [smem:[#allocation19 + $0x1]] }
 0x3be   :  { %v2559_v24 = vmul.f32 %v2557_v0, %v8190_v35 }
 0x3c2   :  { %2377 = vrot.lane.b32.xlu0 %v2376_v17, %s12410_s13  ;;  %2365 = vrot.lane.b32.xlu2 %v2364_v43, %s12410_s13  ;;  %v2433_v17 = vstv %s8401_s6  ;;  %v12072_v43 = vstv %s8394_s26  ;;  %s5762_s6 = sld [smem:[#allocation18 + $0x2d]] }
 0x3c3   :  { %2294 = vrot.lane.b32.xlu1 %v2289_v47, %s12413_s8  ;;  %v8434_v47 = vmul.f32 %v12072_v43, %v8062_v2  ;;  %v2434_v60 = vmul.f32 %v2433_v17, %v8382_v26 }
 0x3c4   :  { %v8410_v48 = vpop.permute.xlu2 %1799 }
 0x3c5   :  { %v12079_v53 = vrot.slane %v8434_v47, 1  ;;  %v2436_v4 = vrot.slane %v2434_v60, 1 }
 0x3ca   :  { %2413 = vrot.lane.b32.xlu0 %v2412_v14, %s12413_s8  ;;  %2401 = vrot.lane.b32.xlu2 %v2400_v52, %s12410_s13  ;;  %v2422_v52 = vmul.f32 %v2421_v39, %v8382_v26 }
 0x3cb   :  { %2389 = vrot.lane.b32.xlu1 %v2388_v58, %s12410_s13  ;;  %v8455_v58 = vstv %s1556_s3  ;;  %s5761_s3 = sld [smem:[#allocation18 + $0x1b]] }
 0x3cc   :  { %v8441_v20 = vpop.permute.xlu2 %1835  ;;  %v8443_v19 = vpop.permute.xlu0 %1620  ;;  %v1561_v39 = vmul.f32 %v8455_v58, %v8039_v45  ;;  %v2424_v22 = vrot.slane %v2422_v52, 1  ;;  %v8493_v52 = vmul.f32 %v12081_v32, %v8186_v33  ;;  %v12093_v32 = vstv %s8453_s24 }
 0x3cd   :  { %12541 = vst [vmem:[#allocation125_spill] sm:$0xff] %v8443_v19  ;;  %v8449_v10 = vpop.permute.xlu1 %1604  ;;  %v1627_v14 = vadd.f32 %v8443_v19, %v1571_v61  ;;  %v12083_v61 = vstv %s8419_s12  ;;  %v8524_v38 = vmul.f32 %v12093_v32, %v8062_v2 }
 0x3ce   :  { %12542 = vst [vmem:[#allocation126_spill] sm:$0xff] %v8449_v10  ;;  %v1611_v60 = vadd.f32 %v8449_v10, %v1561_v39  ;;  %v8505_v39 = vmul.f32 %v2557_v0, %v8186_v33  ;;  %v12095_v12 = vrot.slane %v8493_v52, 2  ;;  %v12561_v10 = vld [vmem:[#allocation45_spill] sm:$0xff] }
 0x3cf   :  { %v1691_v17 = vadd.f32 %v8390_v21, %v1627_v14 }
 0x3d1   :  { %v8470_v43 = vadd.f32 %v12079_v53, %v1691_v17  ;;  %v1733_v17 = vrot.slane %v8475_v3, 1  ;;  %v8508_v53 = vstv %s8439_s11  ;;  %v1591_v3 = vmul.f32 %v8511_v5, %v8039_v45  ;;  %s9202_s11 = sld [smem:[#allocation19 + $0x3]] }
 0x3d2   :  { %2449 = vrot.lane.b32.xlu0 %v2448_v55, %s12413_s8  ;;  %2437 = vrot.lane.b32.xlu2 %v2436_v4, %s12413_s8  ;;  %v8498_v4 = vmul.f32 %v12083_v61, %v8186_v33  ;;  %v1581_v28 = vmul.f32 %v8508_v53, %v8039_v45 }
 0x3d3   :  { %2425 = vrot.lane.b32.xlu1 %v2424_v22, %s12413_s8 }
 0x3d4   :  { %v8486_v57 = vpop.permute.xlu2 %1871  ;;  %v8488_v14 = vpop.permute.xlu0 %1668  ;;  %v12097_v36 = vrot.slane %v8498_v4, 2  ;;  %v1643_v40 = vadd.f32 %v8372_v63, %v1581_v28  ;;  %v12552_v28 = vstv %s8482_s16 }
 0x3d5   :  { %12544 = vst [vmem:[#allocation127_spill] sm:$0xff] %v8488_v14  ;;  %v8500_v55 = vpop.permute.xlu1 %1652  ;;  %v1675_v22 = vadd.f32 %v8488_v14, %v1611_v60  ;;  %v2562_v60 = vrot.slane %v8505_v39, 2  ;;  %v12546_v39 = vstv %s8458_s22  ;;  %v8568_v49 = vmul.f32 %v12552_v28, %v8186_v33 }
 0x3d6   :  { %12545 = vst [vmem:[#allocation128_spill] sm:$0xff] %v8500_v55  ;;  %v8541_v32 = vmul.f32 %v12546_v39, %v8062_v2  ;;  %v1659_v46 = vadd.f32 %v8500_v55, %v1591_v3  ;;  %v1775_v3 = vrot.slane %v8524_v38, 1 }
 0x3d7   :  { %v1739_v27 = vadd.f32 %v1733_v17, %v1675_v22  ;;  %v6192_v22 = vld [vmem:[#allocation4 + $0x8] sm:$0x80]  ;;  %v12557_v0 = vrot.slane %v8568_v49, 2 }
 0x3d8   :  { %v1559_v61 = vmul.f32 %v6192_v22, %v8455_v58  ;;  %v1589_v29 = vmul.f32 %v6192_v22, %v8511_v5 }
 0x3da   :  { %2584 = vrot.lane.b32.xlu0 %v12095_v12, %s12410_s13  ;;  %2603 = vrot.lane.b32.xlu2 %v12097_v36, %s12410_s13  ;;  %v12549_v12 = vstv %s8464_s17  ;;  %v12550_v36 = vstv %s8477_s0  ;;  %v1609_v41 = vadd.f32 %v12553_v51, %v1559_v61 }
 0x3db   :  { %2565 = vrot.lane.b32.xlu1 %v2562_v60, %s12410_s13  ;;  %v8554_v37 = vmul.f32 %v12549_v12, %v8186_v33  ;;  %v8559_v2 = vmul.f32 %v12550_v36, %v8186_v33  ;;  %v12107_v12 = vrot.slane %v8541_v32, 1  ;;  %v1569_v36 = vmul.f32 %v6192_v22, %v8421_v56 }
 0x3dc   :  { %v8547_v45 = vpop.permute.xlu2 %2006  ;;  %v8549_v42 = vpop.permute.xlu0 %1716 }
 0x3dd   :  { %12547 = vst [vmem:[#allocation129_spill] sm:$0xff] %v8547_v45  ;;  %v8561_v39 = vpop.permute.xlu1 %1700  ;;  %v1723_v18 = vadd.f32 %v8549_v42, %v1659_v46  ;;  %v12111_v46 = vrot.slane %v8554_v37, 2  ;;  %v12114_v28 = vrot.slane %v8559_v2, 2 }
 0x3de   :  { %12548 = vst [vmem:[#allocation130_spill] sm:$0xff] %v8549_v42  ;;  %v1707_v1 = vadd.f32 %v8561_v39, %v1643_v40  ;;  %v12554_v40 = vld [vmem:[#allocation42_spill] sm:$0xff]  ;;  %v12558_v42 = vld [vmem:[#allocation48_spill] sm:$0xff] }
 0x3df   :  { %12551 = vst [vmem:[#allocation131_spill] sm:$0xff] %v8561_v39  ;;  %v1781_v11 = vadd.f32 %v1775_v3, %v1723_v18  ;;  %v1673_v18 = vadd.f32 %v12554_v40, %v1609_v41  ;;  %v12556_v39 = vld [vmem:[#allocation40_spill] sm:$0xff]  ;;  %v1657_v55 = vadd.f32 %v12558_v42, %v1589_v29 }
 0x3e0   :  { %v8577_v38 = vadd.f32 %v12107_v12, %v1707_v1  ;;  %v12555_v1 = vstv %s8417_s21  ;;  %v1625_v61 = vadd.f32 %v12556_v39, %v1569_v36  ;;  %v2563_v36 = vrot.slane %v2559_v24, 2  ;;  %s8755_s21 = sld [smem:[#allocation18 + $0x30]] }
 0x3e1   :  { %v2578_v12 = vmul.f32 %v12555_v1, %v8190_v35  ;;  %v1737_v41 = vadd.f32 %v1733_v17, %v1673_v18  ;;  %v1579_v17 = vmul.f32 %v6192_v22, %v8508_v53  ;;  %v12560_v18 = vld [vmem:[#allocation49_spill] sm:$0xff]  ;;  %v1721_v42 = vadd.f32 %v12561_v10, %v1657_v55 }
 0x3e2   :  { %2641 = vrot.lane.b32.xlu0 %v12111_v46, %s12413_s8  ;;  %2660 = vrot.lane.b32.xlu2 %v12114_v28, %s12413_s8  ;;  %v8608_v28 = vmul.f32 %v12559_v44, %v8186_v33  ;;  %v1689_v14 = vadd.f32 %v12560_v18, %v1625_v61  ;;  %v12562_v24 = vrot.slane %v8434_v47, 1  ;;  %v12564_v55 = vrot.slane %v8493_v52, 2 }
 0x3e3   :  { %2679 = vrot.lane.b32.xlu1 %v12557_v0, %s12413_s8  ;;  %v2582_v29 = vrot.slane %v2578_v12, 2  ;;  %v12563_v12 = vstv %s8419_s12  ;;  %v12565_v47 = vstv %s8464_s17  ;;  %v1805_v52 = vadd.f32 %v8410_v48, %v8470_v43  ;;  %s8758_s12 = sld [smem:[#allocation18 + $0x1e]] }
 0x3e4   :  { %v8601_v63 = vpop.permute.xlu2 %2063  ;;  %v8603_v46 = vpop.permute.xlu0 %1811  ;;  %v12120_v19 = vrot.slane %v8608_v28, 2  ;;  %v1751_v40 = vadd.f32 %v12562_v24, %v1689_v14  ;;  %v2597_v22 = vmul.f32 %v12563_v12, %v8190_v35  ;;  %v2635_v14 = vmul.f32 %v12565_v47, %v8190_v35  ;;  %s12673_s17 = sld [smem:[#allocation57_spill]] }
 0x3e5   :  { %v8610_v1 = vpop.permute.xlu1 %1787 }
 0x3e6   :  { %v1791_v21 = vadd.f32 %v8610_v1, %v1737_v41  ;;  %v1793_v0 = vadd.f32 %v8610_v1, %v1739_v27  ;;  %v2564_v41 = vsel %vm468_vm0, %v2562_v60, %v2563_v36  ;;  %v12119_v27 = vstv %s8584_s25  ;;  %v12567_v36 = vld [vmem:[#allocation47_spill] sm:$0xff] }
 0x3e7   :  { %v12566_v60 = vrot.slane %v8113_v50, 2  ;;  %v1803_v24 = vadd.f32 %v8410_v48, %v1751_v40  ;;  %v8654_v50 = vmul.f32 %v12119_v27, %v8186_v33  ;;  %v2639_v43 = vrot.slane %v2635_v14, 2 }
 0x3e8   :  { %v1839_v44 = vadd.f32 %v8441_v20, %v1791_v21  ;;  %v1841_v39 = vadd.f32 %v8441_v20, %v1793_v0  ;;  %v2583_v21 = vsel %vm468_vm0, %v12564_v55, %v2582_v29  ;;  %v1641_v0 = vadd.f32 %v12567_v36, %v1579_v17 }
 0x3e9   :  { %v1779_v29 = vadd.f32 %v1775_v3, %v1721_v42  ;;  %v12568_v3 = vld [vmem:[#allocation51_spill] sm:$0xff]  ;;  %v12569_v33 = vrot.slane %v8145_v13, 2  ;;  %v12571_v14 = vrot.slane %v8541_v32, 1  ;;  %v12573_v13 = vstv %s8482_s16  ;;  %s12676_s16 = sld [smem:[#allocation58_spill]] }
 0x3ea   :  { %2622 = vrot.lane.b32.xlu0 %v12120_v19, %s12410_s13  ;;  %2567 = vrot.lane.b32.xlu2 %v2564_v41, %s12410_s13  ;;  %v1903_v61 = vadd.f32 %v12566_v60, %v1839_v44  ;;  %v8643_v12 = vadd.f32 %v8174_v15, %v1841_v39  ;;  %v2601_v39 = vrot.slane %v2597_v22, 2  ;;  %v1705_v44 = vadd.f32 %v12568_v3, %v1641_v0 }
 0x3eb   :  { %2586 = vrot.lane.b32.xlu1 %v2583_v21, %s12410_s13  ;;  %v12570_v22 = vstv %s8477_s0  ;;  %v12572_v0 = vrot.slane %v8498_v4, 2  ;;  %v12575_v32 = vstv %s8527_s5  ;;  %v12576_v4 = vrot.slane %v8134_v34, 2  ;;  %s12674_s0 = sld [smem:[#allocation56_spill]] }
 0x3ec   :  { %v8647_v41 = vpop.permute.xlu2 %2120  ;;  %v8649_v55 = vpop.permute.xlu0 %1847  ;;  %v1765_v27 = vadd.f32 %v12571_v14, %v1705_v44  ;;  %v12579_v19 = vrot.slane %v8559_v2, 2  ;;  %s12679_s5 = sld [smem:[#allocation60_spill]] }
 0x3ed   :  { %v8656_v40 = vpop.permute.xlu1 %1823  ;;  %v1851_v15 = vadd.f32 %v8649_v55, %v1803_v24  ;;  %v1853_v17 = vadd.f32 %v8649_v55, %v1805_v52  ;;  %v2695_v24 = vrot.slane %v8654_v50, 2  ;;  %v2654_v52 = vmul.f32 %v12570_v22, %v8190_v35 }
 0x3ee   :  { %v1827_v42 = vadd.f32 %v8656_v40, %v1779_v29  ;;  %v1829_v21 = vadd.f32 %v8656_v40, %v1781_v11  ;;  %v2602_v11 = vsel %vm468_vm0, %v12572_v0, %v2601_v39  ;;  %v1815_v44 = vadd.f32 %v8603_v46, %v1765_v27 }
 0x3ef   :  { %v8665_v47 = vadd.f32 %v12569_v33, %v1851_v15  ;;  %v8668_v60 = vadd.f32 %v8195_v9, %v1853_v17  ;;  %v2673_v15 = vmul.f32 %v12573_v13, %v8190_v35  ;;  %v12574_v9 = vrot.slane %v8554_v37, 2 }
 0x3f0   :  { %v1875_v29 = vadd.f32 %v8486_v57, %v1827_v42  ;;  %v2616_v17 = vmul.f32 %v12575_v32, %v8190_v35  ;;  %v1877_v39 = vadd.f32 %v8486_v57, %v1829_v21  ;;  %v1817_v33 = vadd.f32 %v8603_v46, %v8577_v38 }
 0x3f1   :  { %v2640_v50 = vsel %vm468_vm0, %v12574_v9, %v2639_v43  ;;  %v8702_v43 = vstv %s5760_s30  ;;  %v2658_v14 = vrot.slane %v2654_v52, 2  ;;  %v2677_v27 = vrot.slane %v2673_v15, 2  ;;  %s12682_s30 = sld [smem:[#allocation62_spill]] }
 0x3f2   :  { %2698 = vrot.lane.b32.xlu0 %v2695_v24, %s12413_s8  ;;  %2605 = vrot.lane.b32.xlu2 %v2602_v11, %s12410_s13  ;;  %v1975_v42 = vadd.f32 %v12576_v4, %v1875_v29  ;;  %v6193_v29 = vld [vmem:[#allocation4 + $0x38] sm:$0x80]  ;;  %v8711_v38 = vadd.f32 %v8200_v6, %v1877_v39  ;;  %v2620_v13 = vrot.slane %v2616_v17, 2  ;;  %v12580_v15 = vrot.slane %v8568_v49, 2  ;;  %v12583_v49 = vld [vmem:[#allocation50_spill] sm:$0xff] }
 0x3f3   :  { %2643 = vrot.lane.b32.xlu1 %v2640_v50, %s12413_s8  ;;  %v2137_v0 = vmul.f32 %v6193_v29, %v8702_v43  ;;  %v12578_v50 = vrot.slane %v8141_v62, 2  ;;  %v12121_v39 = vstv %s8683_s2  ;;  %v12581_v17 = vrot.slane %v8608_v28, 2 }
 0x3f4   :  { %v8700_v37 = vpop.permute.xlu2 %2027  ;;  %v8704_v22 = vpop.permute.xlu0 %1987  ;;  %v2678_v6 = vsel %vm468_vm0, %v12580_v15, %v2677_v27  ;;  %v12582_v62 = vstv %s8584_s25  ;;  %v8742_v28 = vstv %s5763_s4  ;;  %v12124_v15 = vstv %s8736_s19  ;;  %s12680_s25 = sld [smem:[#allocation61_spill]] }
 0x3f5   :  { %12577 = vst [vmem:[#allocation46_spill] sm:$0xff] %v8700_v37  ;;  %v8706_v34 = vpop.permute.xlu1 %1859  ;;  %v1994_v21 = vadd.f32 %v8704_v22, %v1903_v61  ;;  %v2659_v61 = vsel %vm468_vm0, %v12579_v19, %v2658_v14  ;;  %v2692_v2 = vmul.f32 %v12582_v62, %v8190_v35  ;;  %v8749_v35 = vmul.f32 %v12121_v39, %v8382_v26  ;;  %s12686_s4 = sld [smem:[#allocation66_spill]] }
 0x3f6   :  { %v1865_v11 = vadd.f32 %v8706_v34, %v1817_v33  ;;  %v1863_v9 = vadd.f32 %v8706_v34, %v1815_v44  ;;  %v2621_v44 = vsel %vm468_vm0, %v12581_v17, %v2620_v13  ;;  %v8772_v17 = vstv %s5761_s3  ;;  %s12693_s3 = sld [smem:[#allocation67_spill]] }
 0x3f7   :  { %v2070_v52 = vadd.f32 %v8601_v63, %v1994_v21  ;;  %v2167_v21 = vmul.f32 %v6193_v29, %v8742_v28  ;;  %v2147_v62 = vmul.f32 %v6193_v29, %v8772_v17 }
 0x3f8   :  { %v1951_v32 = vadd.f32 %v12578_v50, %v1863_v9  ;;  %v8734_v19 = vadd.f32 %v8207_v8, %v1865_v11  ;;  %v2696_v11 = vrot.slane %v2692_v2, 2  ;;  %v12122_v9 = vrot.slane %v8749_v35, 1 }
 0x3f9   :  { %v2141_v4 = vadd.f32 %v2137_v0, %v2070_v52 }
 0x3fa   :  { %2662 = vrot.lane.b32.xlu0 %v2659_v61, %s12413_s8  ;;  %2681 = vrot.lane.b32.xlu2 %v2678_v6, %s12413_s8  ;;  %v8763_v61 = vstv %s5762_s6  ;;  %s12688_s6 = sld [smem:[#allocation59_spill]] }
 0x3fb   :  { %2624 = vrot.lane.b32.xlu1 %v2621_v44, %s12410_s13  ;;  %v2187_v33 = vadd.f32 %v12583_v49, %v2141_v4  ;;  %v2697_v4 = vsel %vm468_vm0, %v2695_v24, %v2696_v11  ;;  %v2157_v44 = vmul.f32 %v6193_v29, %v8763_v61  ;;  %v2013_v24 = vadd.f32 %v8547_v45, %v8665_v47  ;;  %v1878_v45 = vld [vmem:[#allocation4 + $0x10] sm:$0xfe] }
 0x3fc   :  { %v8740_v14 = vpop.permute.xlu2 %2084  ;;  %v8744_v0 = vpop.permute.xlu0 %2044  ;;  %v8789_v11 = vmul.f32 %v12124_v15, %v8382_v26  ;;  %v12126_v47 = vstv %s8755_s21 }
 0x3fd   :  { %12584 = vst [vmem:[#allocation49_spill] sm:$0xff] %v8740_v14  ;;  %v8751_v8 = vpop.permute.xlu1 %2025  ;;  %v2051_v27 = vadd.f32 %v8744_v0, %v1975_v42  ;;  %v2251_v52 = vadd.f32 %v8034_v31, %v2187_v33 }
 0x3fe   :  { %v2032_v6 = vadd.f32 %v8751_v8, %v1951_v32 }
 0x3ff   :  { %v2127_v13 = vadd.f32 %v8647_v41, %v2051_v27  ;;  %v8767_v42 = vadd.f32 %v12122_v9, %v2251_v52  ;;  %v12125_v52 = vstv %s8758_s12  ;;  %v12127_v9 = vrot.slane %v8789_v11, 1 }
 0x400   :  { %v8804_v15 = vmul.f32 %v12125_v52, %v8382_v26 }
 0x401   :  { %v2171_v50 = vadd.f32 %v2167_v21, %v2127_v13 }
 0x403   :  { %2700 = vrot.lane.b32.xlu1 %v2697_v4, %s12413_s8  ;;  %v2235_v21 = vadd.f32 %v7828_v7, %v2171_v50  ;;  %v12596_v7 = vstv %s8415_s7  ;;  %s9149_s7 = sld [smem:[#allocation19]] }
 0x404   :  { %v8778_v2 = vpop.permute.xlu2 %2182  ;;  %v8780_v33 = vpop.permute.xlu0 %2101 }
 0x405   :  { %12585 = vst [vmem:[#allocation45_spill] sm:$0xff] %v8780_v33  ;;  %v8783_v32 = vpop.permute.xlu1 %2082  ;;  %v2108_v27 = vadd.f32 %v8780_v33, %v2032_v6  ;;  %v2299_v50 = vadd.f32 %v8037_v23, %v2235_v21  ;;  %v2335_v6 = vmul.f32 %v12126_v47, %v8382_v26  ;;  %v12130_v26 = vrot.slane %v8804_v15, 1 }
 0x406   :  { %12586 = vst [vmem:[#allocation47_spill] sm:$0xff] %v8783_v32  ;;  %v2089_v29 = vadd.f32 %v8783_v32, %v2013_v24 }
 0x407   :  { %v2161_v13 = vadd.f32 %v2157_v44, %v2108_v27  ;;  %v8808_v44 = vadd.f32 %v12127_v9, %v2299_v50  ;;  %v2149_v50 = vmul.f32 %v8772_v17, %v8348_v25 }
 0x408   :  { %v2151_v4 = vadd.f32 %v2147_v62, %v2089_v29 }
 0x409   :  { %v2219_v39 = vadd.f32 %v7700_v59, %v2161_v13  ;;  %12587 = vst [vmem:[#allocation51_spill] sm:$0xff] %v8808_v44 }
 0x40a   :  { %v2203_v31 = vadd.f32 %v8032_v30, %v2151_v4  ;;  %v2339_v4 = vrot.slane %v2335_v6, 1 }
 0x40b   :  { %v2283_v24 = vadd.f32 %v7832_v16, %v2219_v39  ;;  %v2169_v16 = vmul.f32 %v8742_v28, %v8348_v25 }
 0x40c   :  { %v2267_v62 = vadd.f32 %v7817_v54, %v2203_v31  ;;  %v8812_v27 = vpop.permute.xlu2 %2230  ;;  %v8814_v21 = vpop.permute.xlu0 %2008 }
 0x40d   :  { %12588 = vst [vmem:[#allocation132_spill] sm:$0xff] %v8814_v21  ;;  %v8816_v29 = vpop.permute.xlu1 %1989  ;;  %v2015_v13 = vadd.f32 %v8814_v21, %v8668_v60  ;;  %v8828_v39 = vadd.f32 %v2339_v4, %v2283_v24 }
 0x40e   :  { %12589 = vst [vmem:[#allocation133_spill] sm:$0xff] %v8816_v29  ;;  %v8826_v31 = vadd.f32 %v12130_v26, %v2267_v62  ;;  %v1996_v9 = vadd.f32 %v8816_v29, %v8643_v12  ;;  %v12601_v29 = vstv %s8453_s24  ;;  %s12671_s24 = sld [smem:[#allocation53_spill]] }
 0x40f   :  { %v2091_v52 = vadd.f32 %v8740_v14, %v2015_v13  ;;  %v2139_v13 = vmul.f32 %v8702_v43, %v8348_v25  ;;  %v8860_v14 = vld [vmem:[#allocation2] sm:$0xff] }
 0x410   :  { %12590 = vst [vmem:[#allocation134_spill] sm:$0xff] %v8826_v31  ;;  %v1728_v59 = vmul.f32 %v8860_v14, %v12596_v7  ;;  %v8882_v32 = vmul.f32 %v8860_v14, %v12601_v29  ;;  %v12603_v31 = vld [vmem:[#allocation125_spill] sm:$0xff] }
 0x411   :  { %v2153_v47 = vadd.f32 %v2149_v50, %v2091_v52  ;;  %v2034_v52 = vadd.f32 %v8700_v37, %v8734_v19  ;;  %v12602_v37 = vld [vmem:[#allocation40_spill] sm:$0xff] }
 0x412   :  { %v1774_v29 = vrot.slane %v8882_v32, 1  ;;  %v12610_v32 = vld [vmem:[#allocation123_spill] sm:$0xff] }
 0x414   :  { %v8832_v54 = vpop.permute.xlu2 %2278  ;;  %v8834_v60 = vpop.permute.xlu0 %2065 }
 0x415   :  { %12591 = vst [vmem:[#allocation135_spill] sm:$0xff] %v8832_v54  ;;  %v8836_v6 = vpop.permute.xlu1 %2046  ;;  %v2072_v23 = vadd.f32 %v8834_v60, %v1996_v9  ;;  %v1552_v9 = vld [vmem:[#allocation4] sm:$0x80] }
 0x416   :  { %12592 = vst [vmem:[#allocation136_spill] sm:$0xff] %v8834_v60  ;;  %v2053_v24 = vadd.f32 %v8836_v6, %v8711_v38  ;;  %v2159_v38 = vmul.f32 %v8763_v61, %v8348_v25  ;;  %v1588_v21 = vmul.f32 %v8511_v5, %v1552_v9 }
 0x417   :  { %12593 = vst [vmem:[#allocation137_spill] sm:$0xff] %v8836_v6  ;;  %v2143_v62 = vadd.f32 %v2139_v13, %v2072_v23  ;;  %v1558_v13 = vmul.f32 %v8455_v58, %v1552_v9 }
 0x419   :  { %v1608_v60 = vadd.f32 %v12553_v51, %v1558_v13  ;;  %v12600_v51 = vld [vmem:[#allocation42_spill] sm:$0xff] }
 0x41b   :  { %v1672_v13 = vadd.f32 %v12600_v51, %v1608_v60  ;;  %v12606_v51 = vld [vmem:[#allocation126_spill] sm:$0xff] }
 0x41c   :  { %v8845_v12 = vpop.permute.xlu2 %2365  ;;  %v8847_v50 = vpop.permute.xlu0 %2122 }
 0x41d   :  { %12594 = vst [vmem:[#allocation138_spill] sm:$0xff] %v8847_v50  ;;  %v8849_v26 = vpop.permute.xlu1 %2103  ;;  %v2129_v30 = vadd.f32 %v8847_v50, %v2053_v24  ;;  %v1568_v24 = vmul.f32 %v8421_v56, %v1552_v9  ;;  %v1554_v50 = vld [vmem:[#allocation4 + $0x10] sm:$0x7f] }
 0x41e   :  { %12595 = vst [vmem:[#allocation139_spill] sm:$0xff] %v8849_v26  ;;  %v2110_v23 = vadd.f32 %v8849_v26, %v2034_v52  ;;  %v1560_v7 = vmul.f32 %v8455_v58, %v1554_v50  ;;  %v1578_v26 = vmul.f32 %v8508_v53, %v1552_v9  ;;  %v12605_v58 = vstv %s8394_s26  ;;  %s9084_s26 = sld [smem:[#allocation19 + $0x2]] }
 0x41f   :  { %v8858_v19 = vadd.f32 %v2169_v16, %v2129_v30  ;;  %v1570_v16 = vmul.f32 %v8421_v56, %v1554_v50  ;;  %v1624_v49 = vadd.f32 %v12602_v37, %v1568_v24  ;;  %v1742_v60 = vmul.f32 %v8860_v14, %v12605_v58  ;;  %v12608_v24 = vld [vmem:[#allocation127_spill] sm:$0xff]  ;;  %v12612_v58 = vld [vmem:[#allocation98_spill] sm:$0xff] }
 0x420   :  { %v2163_v6 = vadd.f32 %v2159_v38, %v2110_v23  ;;  %v1732_v38 = vrot.slane %v1728_v59, 1  ;;  %v1610_v44 = vadd.f32 %v12606_v51, %v1560_v7  ;;  %v1640_v33 = vadd.f32 %v12567_v36, %v1578_v26 }
 0x421   :  { %v1688_v37 = vadd.f32 %v12560_v18, %v1624_v49  ;;  %v1580_v36 = vmul.f32 %v8508_v53, %v1554_v50  ;;  %v1884_v51 = vmul.f32 %v12612_v58, %v1878_v45 }
 0x422   :  { %v1736_v9 = vadd.f32 %v1732_v38, %v1672_v13 }
 0x424   :  { %v8867_v52 = vpop.permute.xlu2 %2401  ;;  %v8869_v25 = vpop.permute.xlu0 %2214 }
 0x425   :  { %12597 = vst [vmem:[#allocation140_spill] sm:$0xff] %v8867_v52  ;;  %v8872_v30 = vpop.permute.xlu1 %2198  ;;  %v2221_v23 = vadd.f32 %v8869_v25, %v2163_v6  ;;  %v1626_v6 = vadd.f32 %v12603_v31, %v1570_v16  ;;  %v12607_v31 = vstv %s8458_s22  ;;  %v2189_v16 = vadd.f32 %v8778_v2, %v2143_v62  ;;  %s12672_s22 = sld [smem:[#allocation55_spill]] }
 0x426   :  { %12598 = vst [vmem:[#allocation141_spill] sm:$0xff] %v8869_v25  ;;  %v12604_v25 = vld [vmem:[#allocation48_spill] sm:$0xff] }
 0x427   :  { %12599 = vst [vmem:[#allocation142_spill] sm:$0xff] %v8872_v30  ;;  %v2285_v56 = vadd.f32 %v8832_v54, %v2221_v23  ;;  %v1656_v52 = vadd.f32 %v12604_v25, %v1588_v21  ;;  %v2205_v23 = vadd.f32 %v8872_v30, %v2153_v47  ;;  %v1674_v21 = vadd.f32 %v12608_v24, %v1610_v44  ;;  %v8902_v25 = vld [vmem:[#allocation4 + $0x20] sm:$0x1] }
 0x428   :  { %v1690_v26 = vadd.f32 %v12610_v32, %v1626_v6  ;;  %v1590_v47 = vmul.f32 %v8511_v5, %v1554_v50  ;;  %v1886_v53 = vmul.f32 %v12612_v58, %v8902_v25  ;;  %v12613_v6 = vrot.slane %v8804_v15, 1 }
 0x429   :  { %v8887_v59 = vadd.f32 %v2339_v4, %v2285_v56  ;;  %v1756_v4 = vmul.f32 %v8860_v14, %v12607_v31  ;;  %v1720_v44 = vadd.f32 %v12561_v10, %v1656_v52  ;;  %v1746_v56 = vrot.slane %v1742_v60, 1  ;;  %v12615_v60 = vld [vmem:[#allocation121_spill] sm:$0xff] }
 0x42a   :  { %v1790_v31 = vadd.f32 %v8610_v1, %v1736_v9  ;;  %v1704_v50 = vadd.f32 %v12568_v3, %v1640_v33  ;;  %v12614_v10 = vrot.slane %v8749_v35, 1  ;;  %v1642_v32 = vadd.f32 %v12615_v60, %v1580_v36  ;;  %v12617_v9 = vld [vmem:[#allocation101_spill] sm:$0xff]  ;;  %v12619_v33 = vld [vmem:[#allocation130_spill] sm:$0xff] }
 0x42b   :  { %v1760_v5 = vrot.slane %v1756_v4, 1  ;;  %v1932_v30 = vmul.f32 %v12617_v9, %v1878_v45  ;;  %v1778_v54 = vadd.f32 %v1774_v29, %v1720_v44  ;;  %v1750_v58 = vadd.f32 %v1746_v56, %v1688_v37  ;;  %v12618_v4 = vld [vmem:[#allocation131_spill] sm:$0xff] }
 0x42c   :  { %v8905_v7 = vpop.permute.xlu2 %2437  ;;  %v8907_v13 = vpop.permute.xlu0 %2262  ;;  %v1706_v3 = vadd.f32 %v12618_v4, %v1642_v32  ;;  %v1838_v35 = vadd.f32 %v8441_v20, %v1790_v31  ;;  %v2237_v37 = vadd.f32 %v8812_v27, %v8858_v19  ;;  %v1934_v19 = vmul.f32 %v12617_v9, %v8902_v25 }
 0x42d   :  { %12609 = vst [vmem:[#allocation42_spill] sm:$0xff] %v8907_v13  ;;  %v8912_v18 = vpop.permute.xlu1 %2246  ;;  %v2269_v49 = vadd.f32 %v8907_v13, %v2205_v23  ;;  %v1738_v23 = vadd.f32 %v1732_v38, %v1674_v21  ;;  %v1752_v13 = vadd.f32 %v1746_v56, %v1690_v26  ;;  %v1894_v21 = vrot.slane %v1886_v53, 2 }
 0x42e   :  { %12611 = vst [vmem:[#allocation40_spill] sm:$0xff] %v8912_v18  ;;  %v2253_v62 = vadd.f32 %v8912_v18, %v2189_v16  ;;  %v12616_v16 = vld [vmem:[#allocation128_spill] sm:$0xff]  ;;  %v1764_v36 = vadd.f32 %v1760_v5, %v1704_v50  ;;  %v1826_v26 = vadd.f32 %v8656_v40, %v1778_v54  ;;  %v1802_v56 = vadd.f32 %v8410_v48, %v1750_v58  ;;  %v12621_v54 = vld [vmem:[#allocation102_spill] sm:$0xff] }
 0x42f   :  { %v8923_v24 = vadd.f32 %v12613_v6, %v2269_v49  ;;  %v1658_v18 = vadd.f32 %v12616_v16, %v1590_v47  ;;  %v1792_v15 = vadd.f32 %v8610_v1, %v1738_v23  ;;  %v1892_v49 = vrot.slane %v1884_v51, 2  ;;  %v8932_v6 = vld [vmem:[#allocation4 + $0x30] sm:$0x80] }
 0x430   :  { %v2317_v52 = vadd.f32 %v12614_v10, %v2253_v62  ;;  %v12620_v47 = vld [vmem:[#allocation99_spill] sm:$0xff]  ;;  %v1940_v51 = vrot.slane %v1932_v30, 2  ;;  %v1804_v31 = vadd.f32 %v8410_v48, %v1752_v13  ;;  %v1908_v50 = vmul.f32 %v12621_v54, %v1878_v45 }
 0x431   :  { %v1722_v38 = vadd.f32 %v12619_v33, %v1658_v18  ;;  %v8939_v62 = vmul.f32 %v12620_v47, %v1878_v45  ;;  %v2136_v18 = vmul.f32 %v8702_v43, %v8932_v6  ;;  %v1840_v23 = vadd.f32 %v8441_v20, %v1792_v15 }
 0x432   :  { %v1766_v60 = vadd.f32 %v1760_v5, %v1706_v3  ;;  %v1902_v16 = vadd.f32 %v1892_v49, %v1838_v35  ;;  %v1895_v58 = vsel %vm468_vm0, %v1892_v49, %v1894_v21  ;;  %v1874_v30 = vadd.f32 %v8486_v57, %v1826_v26 }
 0x433   :  { %v1780_v32 = vadd.f32 %v1774_v29, %v1722_v38  ;;  %v1964_v48 = vrot.slane %v8939_v62, 2  ;;  %v1910_v13 = vmul.f32 %v12621_v54, %v8902_v25  ;;  %v12622_v45 = vrot.slane %v8789_v11, 1 }
 0x434   :  { %v8943_v1 = vpop.permute.xlu2 %2603  ;;  %v8945_v44 = vpop.permute.xlu0 %2377  ;;  %v1814_v9 = vadd.f32 %v8603_v46, %v1764_v36  ;;  %v1993_v15 = vadd.f32 %v8704_v22, %v1902_v16  ;;  %v2166_v29 = vmul.f32 %v8742_v28, %v8932_v6  ;;  %v8973_v5 = vmul.f32 %v8772_v17, %v8932_v6 }
 0x435   :  { %v8951_v53 = vpop.permute.xlu1 %2294  ;;  %v1816_v49 = vadd.f32 %v8603_v46, %v1766_v60  ;;  %v1916_v4 = vrot.slane %v1908_v50, 2  ;;  %v1904_v3 = vadd.f32 %v1895_v58, %v1840_v23  ;;  %v1942_v33 = vrot.slane %v1934_v19, 2  ;;  %v12624_v60 = vld [vmem:[#allocation105_spill] sm:$0xff] }
 0x436   :  { %v2301_v10 = vadd.f32 %v8951_v53, %v2237_v37  ;;  %v1850_v11 = vadd.f32 %v8649_v55, %v1802_v56  ;;  %v1862_v38 = vadd.f32 %v8706_v34, %v1814_v9  ;;  %v2371_v35 = vadd.f32 %v8845_v12, %v2317_v52 }
 0x437   :  { %v2369_v22 = vadd.f32 %v8845_v12, %v8767_v42  ;;  %v1828_v21 = vadd.f32 %v8656_v40, %v1780_v32  ;;  %v1974_v36 = vadd.f32 %v1964_v48, %v1874_v30  ;;  %v1918_v26 = vrot.slane %v1910_v13, 2 }
 0x438   :  { %v8965_v20 = vadd.f32 %v12622_v45, %v2301_v10  ;;  %v1958_v62 = vmul.f32 %v12620_v47, %v8902_v25  ;;  %v1864_v56 = vadd.f32 %v8706_v34, %v1816_v49  ;;  %v2069_v54 = vadd.f32 %v8601_v63, %v1993_v15  ;;  %v12623_v10 = vld [vmem:[#allocation112_spill] sm:$0xff]  ;;  %v12626_v49 = vld [vmem:[#allocation114_spill] sm:$0xff] }
 0x439   :  { %v2050_v40 = vadd.f32 %v8744_v0, %v1974_v36  ;;  %v1943_v23 = vsel %vm468_vm0, %v1940_v51, %v1942_v33  ;;  %v1950_v19 = vadd.f32 %v1940_v51, %v1862_v38  ;;  %v1926_v34 = vadd.f32 %v1916_v4, %v1850_v11  ;;  %v12629_v38 = vld [vmem:[#allocation129_spill] sm:$0xff]  ;;  %v12632_v36 = vld [vmem:[#allocation140_spill] sm:$0xff] }
 0x43a   :  { %v12625_v32 = vrot.slane %v12624_v60, 2  ;;  %v1852_v58 = vadd.f32 %v8649_v55, %v1804_v31  ;;  %v1966_v0 = vrot.slane %v1958_v62, 2  ;;  %v1952_v51 = vadd.f32 %v1943_v23, %v1864_v56  ;;  %v12627_v55 = vld [vmem:[#allocation109_spill] sm:$0xff] }
 0x43b   :  { %v2031_v45 = vadd.f32 %v8751_v8, %v1950_v19  ;;  %v2126_v9 = vadd.f32 %v8647_v41, %v2050_v40  ;;  %v2156_v15 = vmul.f32 %v8763_v61, %v8932_v6  ;;  %v12628_v31 = vrot.slane %v12627_v55, 2  ;;  %v12633_v6 = vld [vmem:[#allocation134_spill] sm:$0xff] }
 0x43c   :  { %v8984_v46 = vpop.permute.xlu2 %2660  ;;  %v8986_v37 = vpop.permute.xlu0 %2413  ;;  %v1967_v62 = vsel %vm468_vm0, %v1964_v48, %v1966_v0  ;;  %v2381_v56 = vadd.f32 %v8945_v44, %v12633_v6  ;;  %v12634_v40 = vld [vmem:[#allocation50_spill] sm:$0xff]  ;;  %v12638_v0 = vld [vmem:[#allocation133_spill] sm:$0xff] }
 0x43d   :  { %v8990_v50 = vpop.permute.xlu1 %2389  ;;  %v2419_v52 = vadd.f32 %v8986_v37, %v2371_v35  ;;  %v2417_v42 = vadd.f32 %v8986_v37, %v2369_v22  ;;  %v12630_v35 = vld [vmem:[#allocation45_spill] sm:$0xff]  ;;  %v12631_v22 = vld [vmem:[#allocation51_spill] sm:$0xff]  ;;  %v12642_v55 = vld [vmem:[#allocation110_spill] sm:$0xff] }
 0x43e   :  { %v2393_v25 = vadd.f32 %v8990_v50, %v8828_v39  ;;  %v2395_v47 = vadd.f32 %v8990_v50, %v8887_v59  ;;  %v2140_v39 = vadd.f32 %v2136_v18, %v2069_v54  ;;  %v1919_v59 = vsel %vm468_vm0, %v1916_v4, %v1918_v26 }
 0x43f   :  { %v9001_v63 = vadd.f32 %v12623_v10, %v2419_v52  ;;  %v9005_v16 = vadd.f32 %v12625_v32, %v2417_v42  ;;  %v2012_v18 = vadd.f32 %v12629_v38, %v1926_v34  ;;  %v2107_v8 = vadd.f32 %v12630_v35, %v2031_v45  ;;  %v12637_v10 = vld [vmem:[#allocation47_spill] sm:$0xff] }
 0x440   :  { %v2443_v30 = vadd.f32 %v8905_v7, %v2395_v47  ;;  %v2441_v13 = vadd.f32 %v8905_v7, %v2393_v25  ;;  %v1876_v4 = vadd.f32 %v8486_v57, %v1828_v21  ;;  %v2405_v41 = vadd.f32 %v12632_v36, %v12631_v22  ;;  %v12635_v25 = vld [vmem:[#allocation46_spill] sm:$0xff]  ;;  %v12639_v45 = vld [vmem:[#allocation111_spill] sm:$0xff] }
 0x441   :  { %v1928_v26 = vadd.f32 %v1919_v59, %v1852_v58  ;;  %v2383_v54 = vadd.f32 %v8945_v44, %v8923_v24  ;;  %v2186_v23 = vadd.f32 %v12634_v40, %v2140_v39  ;;  %v2033_v57 = vadd.f32 %v12635_v25, %v1952_v51 }
 0x442   :  { %v9016_v33 = vadd.f32 %v12626_v49, %v2443_v30  ;;  %v9020_v11 = vadd.f32 %v12628_v31, %v2441_v13  ;;  %v12636_v21 = vstv %s8683_s2  ;;  %v2170_v34 = vadd.f32 %v2166_v29, %v2126_v9  ;;  %v2132_v13 = vld [vmem:[#allocation4 + $0x40] sm:$0x7f]  ;;  %v12641_v49 = vld [vmem:[#allocation139_spill] sm:$0xff]  ;;  %s12684_s2 = sld [smem:[#allocation65_spill]] }
 0x443   :  { %v9041_v47 = vmul.f32 %v8860_v14, %v12636_v21  ;;  %v2088_v60 = vadd.f32 %v12637_v10, %v2012_v18  ;;  %v2160_v58 = vadd.f32 %v2156_v15, %v2107_v8  ;;  %v1995_v30 = vadd.f32 %v12638_v0, %v1904_v3  ;;  %v12644_v15 = vld [vmem:[#allocation115_spill] sm:$0xff]  ;;  %v12645_v3 = vld [vmem:[#allocation132_spill] sm:$0xff] }
 0x444   :  { %v9032_v52 = vpop.permute.xlu2 %2567  ;;  %v9034_v42 = vpop.permute.xlu0 %2449  ;;  %v2407_v39 = vadd.f32 %v12632_v36, %v8965_v20  ;;  %v12640_v59 = vrot.slane %v12639_v45, 2  ;;  %v2109_v29 = vadd.f32 %v12641_v49, %v2033_v57  ;;  %v2158_v9 = vmul.f32 %v8763_v61, %v2132_v13  ;;  %v12646_v20 = vld [vmem:[#allocation136_spill] sm:$0xff] }
 0x445   :  { %v9043_v19 = vpop.permute.xlu1 %2425  ;;  %v2453_v48 = vadd.f32 %v9034_v42, %v2405_v41  ;;  %v12643_v31 = vrot.slane %v12642_v55, 2  ;;  %v2014_v35 = vadd.f32 %v12645_v3, %v1928_v26  ;;  %v2138_v8 = vmul.f32 %v8702_v43, %v2132_v13  ;;  %v12649_v57 = vld [vmem:[#allocation116_spill] sm:$0xff]  ;;  %v12650_v26 = vld [vmem:[#allocation63_spill] sm:$0xff] }
 0x446   :  { %v2429_v24 = vadd.f32 %v9043_v19, %v2381_v56  ;;  %v2431_v32 = vadd.f32 %v9043_v19, %v2383_v54  ;;  %v2071_v22 = vadd.f32 %v12646_v20, %v1995_v30  ;;  %v2455_v41 = vadd.f32 %v9034_v42, %v2407_v39  ;;  %v12647_v56 = vld [vmem:[#allocation78_spill] sm:$0xff]  ;;  %v12659_v20 = vld [vmem:[#allocation95_spill] sm:$0xff] }
 0x447   :  { %v9054_v51 = vadd.f32 %v12640_v59, %v2453_v48  ;;  %v2150_v6 = vadd.f32 %v8973_v5, %v2088_v60  ;;  %v2218_v61 = vadd.f32 %v12647_v56, %v2160_v58  ;;  %v1976_v54 = vadd.f32 %v1967_v62, %v1876_v4  ;;  %v12652_v4 = vld [vmem:[#allocation49_spill] sm:$0xff] }
 0x448   :  { %v9060_v38 = vadd.f32 %v12643_v31, %v2429_v24  ;;  %v9063_v18 = vadd.f32 %v12644_v15, %v2431_v32  ;;  %v12648_v40 = vstv %s8755_s21  ;;  %v9075_v21 = vadd.f32 %v12649_v57, %v2455_v41  ;;  %v12651_v24 = vld [vmem:[#allocation94_spill] sm:$0xff]  ;;  %v12658_v31 = vld [vmem:[#allocation137_spill] sm:$0xff]  ;;  %v12661_v57 = vld [vmem:[#allocation35_spill] sm:$0xff]  ;;  %s9306_s21 = sld [smem:[#allocation21 + $0x7]] }
 0x449   :  { %v2334_v25 = vmul.f32 %v8860_v14, %v12648_v40  ;;  %v2234_v48 = vadd.f32 %v12650_v26, %v2170_v34  ;;  %v2162_v43 = vadd.f32 %v2158_v9, %v2109_v29  ;;  %v2310_v10 = vrot.slane %v9041_v47, 1  ;;  %v12654_v47 = vld [vmem:[#allocation93_spill] sm:$0xff]  ;;  %v12657_v9 = vld [vmem:[#allocation44_spill] sm:$0xff]  ;;  %v12660_v41 = vld [vmem:[#allocation138_spill] sm:$0xff] }
 0x44a   :  { %v2250_v32 = vadd.f32 %v12651_v24, %v2186_v23  ;;  %v2090_v62 = vadd.f32 %v12652_v4, %v2014_v35  ;;  %v2142_v60 = vadd.f32 %v2138_v8, %v2071_v22  ;;  %v2148_v58 = vmul.f32 %v8772_v17, %v2132_v13  ;;  %v12655_v23 = vld [vmem:[#allocation141_spill] sm:$0xff]  ;;  %v12662_v26 = vld [vmem:[#allocation135_spill] sm:$0xff]  ;;  %v12664_v24 = vld [vmem:[#allocation142_spill] sm:$0xff] }
 0x44b   :  { %v12653_v30 = vstv %s8736_s19  ;;  %v2202_v45 = vadd.f32 %v12654_v47, %v2150_v6  ;;  %v2220_v59 = vadd.f32 %v12655_v23, %v2162_v43  ;;  %v12656_v49 = vstv %s8758_s12  ;;  %v9102_v35 = vld [vmem:[#allocation4 + $0x40] sm:$0xfe]  ;;  %v9111_v43 = vld [vmem:[#allocation4 + $0x50] sm:$0x1]  ;;  %s12691_s19 = sld [smem:[#allocation68_spill]] }
 0x44c   :  { %v9080_v0 = vpop.permute.xlu2 %2605  ;;  %v9082_v5 = vpop.permute.xlu0 %2584  ;;  %v9091_v39 = vmul.f32 %v8860_v14, %v12653_v30  ;;  %v2320_v29 = vmul.f32 %v8860_v14, %v12656_v49  ;;  %v2282_v55 = vadd.f32 %v12657_v9, %v2218_v61  ;;  %v2052_v15 = vadd.f32 %v12658_v31, %v1976_v54  ;;  %s9309_s12 = sld [smem:[#allocation21 + $0x8]] }
 0x44d   :  { %v9093_v34 = vpop.permute.xlu1 %2565  ;;  %v2338_v3 = vrot.slane %v2334_v25, 1  ;;  %v2168_v17 = vmul.f32 %v8742_v28, %v2132_v13  ;;  %v2314_v8 = vadd.f32 %v2310_v10, %v2250_v32  ;;  %v2298_v22 = vadd.f32 %v12659_v20, %v2234_v48  ;;  %v12663_v28 = vld [vmem:[#allocation104_spill] sm:$0xff] }
 0x44e   :  { %v2128_v6 = vadd.f32 %v12660_v41, %v2052_v15  ;;  %v2152_v56 = vadd.f32 %v2148_v58, %v2090_v62  ;;  %v2188_v40 = vadd.f32 %v8778_v2, %v2142_v60  ;;  %v2352_v14 = vrot.slane %v9091_v39, 1  ;;  %v12665_v32 = vld [vmem:[#allocation40_spill] sm:$0xff]  ;;  %v12666_v62 = vld [vmem:[#allocation106_spill] sm:$0xff] }
 0x44f   :  { %v2266_v61 = vadd.f32 %v12661_v57, %v2202_v45  ;;  %v2284_v54 = vadd.f32 %v12662_v26, %v2220_v59  ;;  %v2324_v25 = vrot.slane %v2320_v29, 1  ;;  %v2462_v13 = vmul.f32 %v12663_v28, %v9102_v35  ;;  %v12667_v15 = vld [vmem:[#allocation42_spill] sm:$0xff] }
 0x450   :  { %v2204_v48 = vadd.f32 %v12664_v24, %v2152_v56  ;;  %v2252_v4 = vadd.f32 %v12665_v32, %v2188_v40  ;;  %v2342_v30 = vadd.f32 %v2338_v3, %v2282_v55  ;;  %v2612_v2 = vadd.f32 %v9080_v0, %v9016_v33 }
 0x451   :  { %v2510_v60 = vmul.f32 %v12666_v62, %v9102_v35  ;;  %v2512_v58 = vmul.f32 %v12666_v62, %v9111_v43  ;;  %v9124_v47 = vstv %s9084_s26  ;;  %v2610_v45 = vadd.f32 %v8943_v1, %v9020_v11  ;;  %s9315_s26 = sld [smem:[#allocation21 + $0x10]] }
 0x452   :  { %v2172_v49 = vadd.f32 %v2168_v17, %v2128_v6  ;;  %v2464_v29 = vmul.f32 %v12663_v28, %v9111_v43  ;;  %v2368_v33 = vadd.f32 %v8845_v12, %v2314_v8  ;;  %v2344_v31 = vadd.f32 %v2338_v3, %v2284_v54  ;;  %v12668_v17 = vld [vmem:[#allocation107_spill] sm:$0xff] }
 0x453   :  { %v2268_v20 = vadd.f32 %v12667_v15, %v2204_v48  ;;  %v2470_v41 = vrot.slane %v2462_v13, 2  ;;  %v2316_v11 = vadd.f32 %v2310_v10, %v2252_v4  ;;  %v2392_v40 = vadd.f32 %v8990_v50, %v2342_v30 }
 0x454   :  { %v9128_v23 = vpop.permute.xlu2 %2681  ;;  %v2642_v59 = vpop.permute.xlu0 %2641  ;;  %v9141_v6 = vmul.f32 %v12668_v17, %v9102_v35  ;;  %v2416_v8 = vadd.f32 %v8986_v37, %v2368_v33  ;;  %v2518_v26 = vrot.slane %v2510_v60, 2  ;;  %v2520_v28 = vrot.slane %v2512_v58, 2 }
 0x455   :  { %v9133_v9 = vpop.permute.xlu1 %2679  ;;  %v2688_v55 = vadd.f32 %v9128_v23, %v2612_v2  ;;  %v2328_v54 = vadd.f32 %v2324_v25, %v2266_v61  ;;  %v2356_v13 = vadd.f32 %v2352_v14, %v2298_v22  ;;  %v2394_v10 = vadd.f32 %v8990_v50, %v2344_v31 }
 0x456   :  { %v2686_v56 = vadd.f32 %v9133_v9, %v2610_v45  ;;  %v2330_v48 = vadd.f32 %v2324_v25, %v2268_v20  ;;  %v2236_v32 = vadd.f32 %v8812_v27, %v2172_v49  ;;  %v2472_v4 = vrot.slane %v2464_v29, 2  ;;  %v12669_v20 = vld [vmem:[#allocation108_spill] sm:$0xff] }
 0x457   :  { %v2733_v57 = vadd.f32 %v9124_v47, %v2688_v55  ;;  %v2380_v2 = vadd.f32 %v8945_v44, %v2328_v54  ;;  %v2494_v62 = vrot.slane %v9141_v6, 2  ;;  %v2440_v60 = vadd.f32 %v8905_v7, %v2392_v40 }
 0x458   :  { %v2731_v3 = vadd.f32 %v9124_v47, %v2686_v56  ;;  %v2370_v58 = vadd.f32 %v8845_v12, %v2316_v11  ;;  %v2480_v22 = vadd.f32 %v2470_v41, %v2416_v8  ;;  %v2521_v50 = vsel %vm468_vm0, %v2518_v26, %v2520_v28 }
 0x459   :  { %v2737_v24 = vmax.f32 %v2733_v57, 0.0  ;;  %v2300_v25 = vadd.f32 %v8951_v53, %v2236_v32  ;;  %v2442_v27 = vadd.f32 %v8905_v7, %v2394_v10  ;;  %v2428_v49 = vadd.f32 %v9043_v19, %v2380_v2 }
 0x45a   :  { %v2735_v30 = vmax.f32 %v2731_v3, 0.0  ;;  %v2488_v29 = vmul.f32 %v12668_v17, %v9111_v43  ;;  %v2418_v31 = vadd.f32 %v8986_v37, %v2370_v58  ;;  %v2571_v12 = vadd.f32 %v9093_v34, %v2480_v22 }
 0x45b   :  { %v2790_v61 = vrot.slane %v2737_v24, 7  ;;  %v2572_v15 = vadd.f32 %v9093_v34, %v9005_v16  ;;  %v2534_v56 = vmul.f32 %v12669_v20, %v9102_v35  ;;  %v2473_v53 = vsel %vm468_vm0, %v2470_v41, %v2472_v4 }
 0x45c   :  { %v2789_v45 = vrot.slane %v2735_v30, 7  ;;  %v9157_v33 = vpop.permute.xlu0 %2622  ;;  %v2528_v7 = vadd.f32 %v2518_v26, %v2440_v60  ;;  %v2382_v40 = vadd.f32 %v8945_v44, %v2330_v48  ;;  %v2647_v17 = vadd.f32 %v2642_v59, %v2571_v12 }
 0x45d   :  { %v2587_v55 = vpop.permute.xlu1 %2586  ;;  %v2648_v37 = vadd.f32 %v2642_v59, %v2572_v15  ;;  %v2404_v6 = vadd.f32 %v12632_v36, %v2356_v13  ;;  %v2358_v16 = vadd.f32 %v2352_v14, %v2300_v25  ;;  %v2530_v34 = vadd.f32 %v2521_v50, %v2442_v27 }
 0x45e   :  { %v9174_v11 = vsel %vm641_vm2, %v2789_v45, %v2790_v61  ;;  %v2504_v57 = vadd.f32 %v2494_v62, %v2428_v49  ;;  %v2709_v35 = vstv %s9149_s7  ;;  %v2482_v8 = vadd.f32 %v2473_v53, %v2418_v31  ;;  %s9317_s7 = sld [smem:[#allocation21 + $0x50]] }
 0x45f   :  { %v2496_v41 = vrot.slane %v2488_v29, 2  ;;  %v2542_v28 = vrot.slane %v2534_v56, 2  ;;  %v2536_v26 = vmul.f32 %v12669_v20, %v9111_v43  ;;  %v2611_v3 = vadd.f32 %v9080_v0, %v2530_v34 }
 0x460   :  { %v2590_v44 = vadd.f32 %v9082_v5, %v2504_v57  ;;  %v2591_v59 = vadd.f32 %v9082_v5, %v9060_v38  ;;  %v2609_v54 = vadd.f32 %v8943_v1, %v2528_v7  ;;  %v2573_v39 = vadd.f32 %v9032_v52, %v2482_v8 }
 0x461   :  { %v2574_v14 = vadd.f32 %v9032_v52, %v9001_v63  ;;  %v2710_v13 = vadd.f32 %v2709_v35, %v2647_v17  ;;  %v2711_v10 = vadd.f32 %v2709_v35, %v2648_v37  ;;  %v2687_v0 = vadd.f32 %v9128_v23, %v2611_v3 }
 0x462   :  { %v2685_v43 = vadd.f32 %v9133_v9, %v2609_v54  ;;  %v2430_v48 = vadd.f32 %v9043_v19, %v2382_v40  ;;  %v2452_v32 = vadd.f32 %v9034_v42, %v2404_v6  ;;  %v2497_v1 = vsel %vm468_vm0, %v2494_v62, %v2496_v41 }
 0x463   :  { %v2544_v30 = vrot.slane %v2536_v26, 2  ;;  %v2406_v2 = vadd.f32 %v12632_v36, %v2358_v16  ;;  %v2719_v63 = vstv %s9171_s20  ;;  %v2666_v52 = vadd.f32 %v8984_v46, %v2590_v44  ;;  %s9328_s20 = sld [smem:[#allocation21 + $0x73]] }
 0x464   :  { %v2699_v24 = vpop.permute.xlu0 %2698  ;;  %v2667_v60 = vadd.f32 %v8984_v46, %v2591_v59  ;;  %v2714_v9 = vmax.f32 %v2710_v13, 0.0  ;;  %v2715_v61 = vmax.f32 %v2711_v10, 0.0  ;;  %v2730_v19 = vadd.f32 %v9124_v47, %v2685_v43 }
 0x465   :  { %v2644_v38 = vpop.permute.xlu1 %2643  ;;  %v2732_v22 = vadd.f32 %v9124_v47, %v2687_v0  ;;  %v2506_v50 = vadd.f32 %v2497_v1, %v2430_v48  ;;  %v2552_v62 = vadd.f32 %v2542_v28, %v2452_v32  ;;  %v2545_v36 = vsel %vm468_vm0, %v2542_v28, %v2544_v30 }
 0x466   :  { %v2649_v5 = vadd.f32 %v2644_v38, %v2573_v39  ;;  %v2650_v4 = vadd.f32 %v2644_v38, %v2574_v14  ;;  %v2454_v27 = vadd.f32 %v9034_v42, %v2406_v2  ;;  %v2720_v49 = vadd.f32 %v2719_v63, %v2666_v52 }
 0x467   :  { %v2721_v46 = vadd.f32 %v2719_v63, %v2667_v60  ;;  %v2592_v29 = vadd.f32 %v2587_v55, %v2506_v50  ;;  %v2593_v31 = vadd.f32 %v2587_v55, %v9063_v18  ;;  %v2752_v12 = vrot.slane %v2714_v9, 7 }
 0x468   :  { %v2712_v23 = vadd.f32 %v2709_v35, %v2649_v5  ;;  %v2713_v58 = vadd.f32 %v2709_v35, %v2650_v4  ;;  %v2755_v15 = vrot.slane %v2715_v61, 7  ;;  %v2734_v53 = vmax.f32 %v2730_v19, 0.0 }
 0x469   :  { %v2736_v7 = vmax.f32 %v2732_v22, 0.0  ;;  %v2628_v6 = vadd.f32 %v9157_v33, %v2552_v62  ;;  %v2629_v42 = vadd.f32 %v9157_v33, %v9054_v51  ;;  %v2724_v55 = vmax.f32 %v2720_v49, 0.0 }
 0x46a   :  { %v2716_v45 = vmax.f32 %v2712_v23, 0.0  ;;  %v2717_v25 = vmax.f32 %v2713_v58, 0.0  ;;  %v2725_v34 = vmax.f32 %v2721_v46, 0.0  ;;  %v2739_v28 = vstv %s9202_s11  ;;  %s9332_s11 = sld [smem:[#allocation21 + $0x4f]] }
 0x46b   :  { %v2704_v8 = vadd.f32 %v2699_v24, %v2628_v6  ;;  %v2705_v41 = vadd.f32 %v2699_v24, %v2629_v42  ;;  %v2786_v44 = vrot.slane %v2734_v53, 7  ;;  %v2787_v59 = vrot.slane %v2736_v7, 7 }
 0x46c   :  { %v2753_v20 = vrot.slane %v2716_v45, 7  ;;  %v2756_v56 = vrot.slane %v2717_v25, 7  ;;  %v2663_v47 = vpop.permute.xlu0 %2662  ;;  %v2554_v51 = vadd.f32 %v2545_v36, %v2454_v27  ;;  %v2772_v39 = vrot.slane %v2725_v34, 7 }
 0x46d   :  { %v2625_v40 = vpop.permute.xlu1 %2624  ;;  %v2668_v17 = vadd.f32 %v2663_v47, %v2592_v29  ;;  %v2669_v37 = vadd.f32 %v2663_v47, %v2593_v31  ;;  %v2769_v14 = vrot.slane %v2724_v55, 7  ;;  %v2740_v13 = vadd.f32 %v2739_v28, %v2704_v8 }
 0x46e   :  { %v2757_v16 = vsel %vm641_vm2, %v2755_v15, %v2756_v56  ;;  %v2754_v18 = vsel %vm641_vm2, %v2752_v12, %v2753_v20  ;;  %v2741_v10 = vadd.f32 %v2739_v28, %v2705_v41  ;;  %v2630_v43 = vadd.f32 %v2625_v40, %v2554_v51 }
 0x46f   :  { %v2722_v57 = vadd.f32 %v2719_v63, %v2668_v17  ;;  %v2723_v35 = vadd.f32 %v2719_v63, %v2669_v37  ;;  %2760 = vrot.lane.b32.xlu0 %v2757_v16, %s12462_s29  ;;  %2758 = vrot.lane.b32.xlu2 %v2754_v18, %s12462_s29  ;;  %v2631_v0 = vadd.f32 %v2625_v40, %v9075_v21  ;;  %v2744_v4 = vmax.f32 %v2740_v13, 0.0 }
 0x470   :  { %v2788_v5 = vsel %vm641_vm2, %v2786_v44, %v2787_v59  ;;  %v2745_v30 = vmax.f32 %v2741_v10, 0.0  ;;  %v12677_v29 = vstv %s12671_s24  ;;  %v12678_v12 = vstv %s12672_s22  ;;  %s12708_s24 = sld [smem:[#allocation72_spill]] }
 0x471   :  { %v2726_v26 = vmax.f32 %v2722_v57, 0.0  ;;  %v2727_v3 = vmax.f32 %v2723_v35, 0.0  ;;  %v2803_v60 = vrot.slane %v2744_v4, 7  ;;  %v12681_v40 = vstv %s12673_s17  ;;  %s9371_s22 = sld [smem:[#allocation21 + $0x35]] }
 0x472   :  { %v2806_v9 = vrot.slane %v2745_v30, 7  ;;  %v12683_v37 = vstv %s12674_s0  ;;  %v12685_v42 = vstv %s12676_s16  ;;  %v12687_v55 = vstv %s12679_s5  ;;  %s12712_s17 = sld [smem:[#allocation75_spill]] }
 0x473   :  { %v2770_v33 = vrot.slane %v2726_v26, 7  ;;  %v2773_v54 = vrot.slane %v2727_v3, 7  ;;  %v12689_v57 = vstv %s7958_s18  ;;  %v12690_v8 = vstv %s12680_s25  ;;  %s12699_s18 = sld [smem:[#allocation71_spill]] }
 0x474   :  { %v12692_v26 = vstv %s7962_s28  ;;  %v12694_v44 = vstv %s12682_s30  ;;  %v12695_v51 = vstv %s12684_s2  ;;  %v12698_v10 = vstv %s12688_s6  ;;  %s9300_s28 = sld [smem:[#allocation21 + $0x2c]] }
 0x475   :  { %v2701_v48 = vpop.permute.xlu1 %2700  ;;  %v2774_v32 = vsel %vm641_vm2, %v2772_v39, %v2773_v54  ;;  %v2771_v24 = vsel %vm641_vm2, %v2769_v14, %v2770_v33  ;;  %v12696_v54 = vstv %s7974_s9  ;;  %v12697_v14 = vstv %s12686_s4  ;;  %s12703_s9 = sld [smem:[#allocation70_spill]] }
 0x476   :  { %v2706_v38 = vadd.f32 %v2701_v48, %v2630_v43  ;;  %v2707_v1 = vadd.f32 %v2701_v48, %v2631_v0  ;;  %2775 = vrot.lane.b32.xlu1 %v2771_v24, %s12462_s29  ;;  %v12700_v0 = vstv %s7983_s10  ;;  %s9311_s10 = sld [smem:[#allocation21 + $0x2b]] }
 0x477   :  { %2792 = vrot.lane.b32.xlu0 %v2788_v5, %s12462_s29  ;;  %2777 = vrot.lane.b32.xlu2 %v2774_v32, %s12462_s29  ;;  %v12701_v32 = vstv %s12691_s19  ;;  %s9424_s0 = sld [smem:[#allocation21 + $0x5]] }
 0x478   :  { %v2742_v2 = vadd.f32 %v2739_v28, %v2706_v38  ;;  %v2743_v63 = vadd.f32 %v2739_v28, %v2707_v1  ;;  %v12702_v38 = vstv %s12693_s3  ;;  %s12717_s16 = sld [smem:[#allocation77_spill]] }
 0x479   :  { %v12704_v30 = vstv %s12699_s18  ;;  %s12718_s5 = sld [smem:[#allocation76_spill]] }
 0x47a   :  { %v2746_v21 = vmax.f32 %v2742_v2, 0.0  ;;  %v2747_v52 = vmax.f32 %v2743_v63, 0.0  ;;  %v12705_v63 = vstv %s7992_s23  ;;  %s9340_s23 = sld [smem:[#allocation21 + $0x11]] }
 0x47b   :  { %s12721_s25 = sld [smem:[#allocation79_spill]] }
 0x47c   :  { %v2804_v61 = vrot.slane %v2746_v21, 7  ;;  %v2807_v23 = vrot.slane %v2747_v52, 7  ;;  %v3338_v52 = vstv %s9300_s28  ;;  %s5850_s30 = sld [smem:[#allocation21 + $0xd]] }
 0x47d   :  { %s5819_s2 = sld [smem:[#allocation21 + $0x29]] }
 0x47e   :  { %v2808_v58 = vsel %vm641_vm2, %v2806_v9, %v2807_v23  ;;  %v2805_v19 = vsel %vm641_vm2, %v2803_v60, %v2804_v61  ;;  %2794 = vrot.lane.b32.xlu1 %v9174_v11, %s12462_s29  ;;  %v12675_v11 = vstv %s12670_s15  ;;  %v12706_v60 = vstv %s12703_s9  ;;  %s12707_s15 = sld [smem:[#allocation73_spill]] }
 0x47f   :  { %2811 = vrot.lane.b32.xlu0 %v2808_v58, %s12462_s29  ;;  %2809 = vrot.lane.b32.xlu2 %v2805_v19, %s12462_s29  ;;  %v3243_v23 = vstv %s9306_s21  ;;  %v3319_v58 = vstv %s9309_s12  ;;  %s2820_s4 = sld [smem:[#allocation21]] }
 0x480   :  { %v3262_v19 = vstv %s9311_s10  ;;  %s9504_s6 = sld [smem:[#allocation21 + $0x4c]] }
 0x481   :  { %s9506_s19 = sld [smem:[#allocation21 + $0x70]] }
 0x482   :  { %s5825_s3 = sld [smem:[#allocation21 + $0x72]] }
 0x483   :  { %s5801_s18 = sld [smem:[#allocation21 + $0x6c]] }
 0x484   :  { %s5822_s28 = sld [smem:[#allocation21 + $0x6]] }
 0x485   :  { %s5823_s9 = sld [smem:[#allocation21 + $0x2a]] }
 0x486   :  { %s5824_s21 = sld [smem:[#allocation21 + $0x4e]] }
 0x487   :  { %s9530_s12 = sld [smem:[#allocation21 + $0x4d]] }
 0x488   :  { %s9538_s10 = sld [smem:[#allocation21 + $0xe]] }
 0x4c9   :  { %v2759_v22 = vpop.permute.xlu2 %2758 }
 0x4d1   :  { %v2778_v45 = vpop.permute.xlu2 %2777 }
 0x4d9   :  { %v2810_v56 = vpop.permute.xlu2 %2809 }
 0x4e1   :  { %v2761_v50 = vpop.permute.xlu0 %2760 }
 0x4e2   :  { %v2762_v62 = vsel %vm652_vm3, %v2759_v22, %v2761_v50  ;;  %v3821_v50 = vstv %s9315_s26  ;;  %s9560_s26 = sld [smem:[#allocation21 + $0x48]] }
 0x4e3   :  { %2764 = vst.msk [vmem:[#allocation5 + $0x18] sm:$0xff] %vm1549_vm5, %v2762_v62  ;;  %v3357_v62 = vstv %s9317_s7  ;;  %s9568_s7 = sld [smem:[#allocation21 + $0x4b]] }
 0x4e8   :  { %v2776_v25 = vpop.permute.xlu1 %2775 }
 0x4e9   :  { %v2779_v36 = vsel %vm652_vm3, %v2776_v25, %v2778_v45  ;;  %v2793_v27 = vpop.permute.xlu0 %2792  ;;  %v9349_v45 = vld [vmem:[#allocation5 + $0x28] sm:$0x1] }
 0x4ea   :  { %v9231_v49 = vld [vmem:[#allocation5 + $0x18] sm:$0x7f]  ;;  %2781 = vst.msk [vmem:[#allocation5 + $0x48] sm:$0xff] %vm1549_vm5, %v2779_v36 }
 0x4eb   :  { %v2895_v46 = vmul.f32 %v12675_v11, %v9231_v49  ;;  %v2879_v31 = vmul.f32 %v12677_v29, %v9231_v49  ;;  %v2863_v15 = vmul.f32 %v12678_v12, %v9231_v49  ;;  %v2943_v17 = vmul.f32 %v12681_v40, %v9231_v49  ;;  %v9319_v4 = vld [vmem:[#allocation5 + $0x18] sm:$0xfe] }
 0x4ec   :  { %v2927_v6 = vmul.f32 %v12683_v37, %v9231_v49  ;;  %v2911_v16 = vmul.f32 %v12685_v42, %v9231_v49  ;;  %v2959_v41 = vmul.f32 %v12690_v8, %v9231_v49  ;;  %v2975_v43 = vmul.f32 %v12698_v10, %v9231_v49 }
 0x4ed   :  { %2900 = vrot.lane.b32.xlu0 %v2895_v46, %s12410_s13  ;;  %2884 = vrot.lane.b32.xlu1 %v2879_v31, %s12410_s13  ;;  %v9338_v61 = vmul.f32 %v3338_v52, %v9319_v4  ;;  %v9352_v25 = vmul.f32 %v3243_v23, %v9319_v4  ;;  %v9359_v11 = vmul.f32 %v3262_v19, %v9319_v4  ;;  %v12709_v46 = vstv %s12707_s15  ;;  %s9604_s15 = sld [smem:[#allocation21 + $0x3]] }
 0x4ee   :  { %2868 = vrot.lane.b32.xlu2 %v2863_v15, %s12410_s13  ;;  %v12710_v31 = vstv %s8000_s27  ;;  %v3340_v40 = vmul.f32 %v3338_v52, %v9349_v45  ;;  %v3897_v37 = vstv %s9340_s23  ;;  %s12715_s27 = sld [smem:[#allocation74_spill]]  ;;  %v3321_v10 = vmul.f32 %v3319_v58, %v9349_v45 }
 0x4ef   :  { %v3343_v36 = vrot.slane %v9338_v61, 2  ;;  %s9607_s23 = sld [smem:[#allocation21 + $0x27]] }
 0x4f0   :  { %v2795_v20 = vpop.permute.xlu1 %2794  ;;  %v3344_v42 = vrot.slane %v3340_v40, 2 }
 0x4f1   :  { %v2796_v47 = vsel %vm652_vm3, %v2793_v27, %v2795_v20  ;;  %v2812_v53 = vpop.permute.xlu0 %2811  ;;  %v3397_v18 = vld [vmem:[#allocation5 + $0x48] sm:$0x7f]  ;;  %v9356_v27 = vmul.f32 %v3319_v58, %v9319_v4  ;;  %v3300_v20 = vstv %s9328_s20  ;;  %s9578_s20 = sld [smem:[#allocation21 + $0x31]] }
 0x4f2   :  { %2798 = vst.msk [vmem:[#allocation5 + $0x78] sm:$0xff] %vm1549_vm5, %v2796_v47  ;;  %v2813_v7 = vsel %vm652_vm3, %v2810_v56, %v2812_v53  ;;  %v3521_v34 = vmul.f32 %v12687_v55, %v3397_v18  ;;  %v3441_v35 = vmul.f32 %v12689_v57, %v3397_v18  ;;  %v3457_v3 = vmul.f32 %v12692_v26, %v3397_v18  ;;  %v9345_v22 = vld [vmem:[#allocation5 + $0x48] sm:$0xfe] }
 0x4f3   :  { %2815 = vst.msk [vmem:[#allocation5 + $0xa8] sm:$0xff] %vm1549_vm5, %v2813_v7  ;;  %v3505_v33 = vmul.f32 %v12695_v51, %v3397_v18  ;;  %v3537_v39 = vmul.f32 %v12696_v54, %v3397_v18  ;;  %v3553_v24 = vmul.f32 %v12701_v32, %v3397_v18  ;;  %v3473_v1 = vmul.f32 %v12702_v38, %v3397_v18 }
 0x4f4   :  { %v3489_v9 = vmul.f32 %v12706_v60, %v3397_v18  ;;  %v9368_v15 = vmul.f32 %v3821_v50, %v9345_v22  ;;  %v12711_v56 = vstv %s12708_s24  ;;  %v9377_v53 = vmul.f32 %v3357_v62, %v9319_v4  ;;  %s9620_s24 = sld [smem:[#allocation21 + $0x6f]] }
 0x4f5   :  { %2948 = vrot.lane.b32.xlu0 %v2943_v17, %s12413_s8  ;;  %2932 = vrot.lane.b32.xlu1 %v2927_v6, %s12413_s8  ;;  %v3281_v7 = vstv %s9332_s11  ;;  %v3248_v17 = vrot.slane %v9352_v25, 2  ;;  %v9387_v6 = vmul.f32 %v3300_v20, %v9319_v4  ;;  %v3324_v18 = vrot.slane %v9356_v27, 2  ;;  %s9580_s11 = sld [smem:[#allocation21 + $0x24]] }
 0x4f6   :  { %2916 = vrot.lane.b32.xlu2 %v2911_v16, %s12410_s13  ;;  %v3723_v16 = vld [vmem:[#allocation5 + $0x58] sm:$0x1]  ;;  %v3267_v55 = vrot.slane %v9359_v11, 2  ;;  %v9393_v57 = vmul.f32 %v3281_v7, %v9319_v4  ;;  %v3245_v54 = vmul.f32 %v3243_v23, %v9349_v45 }
 0x4f7   :  { %v3823_v51 = vmul.f32 %v3821_v50, %v3723_v16  ;;  %v3899_v50 = vmul.f32 %v3897_v37, %v3723_v16 }
 0x4f8   :  { %v3249_v32 = vrot.slane %v3245_v54, 2  ;;  %v3286_v58 = vrot.slane %v9393_v57, 2 }
 0x4f9   :  { %v9272_v28 = vld [vmem:[#allocation5 + $0x78] sm:$0x7f] }
 0x4fa   :  { %v4019_v59 = vmul.f32 %v12694_v44, %v9272_v28  ;;  %v4083_v13 = vmul.f32 %v12697_v14, %v9272_v28  ;;  %v4099_v48 = vmul.f32 %v12700_v0, %v9272_v28  ;;  %v9313_v5 = vld [vmem:[#allocation5 + $0xa8] sm:$0x7f]  ;;  %v4051_v2 = vmul.f32 %v12704_v30, %v9272_v28 }
 0x4fb   :  { %v4597_v21 = vmul.f32 %v12705_v63, %v9313_v5  ;;  %v4067_v29 = vmul.f32 %v12709_v46, %v9272_v28  ;;  %v4661_v12 = vmul.f32 %v12710_v31, %v9313_v5  ;;  %v4035_v47 = vmul.f32 %v12711_v56, %v9272_v28 }
 0x4fc   :  { %v9405_v44 = vsel %vm468_vm0, %v3343_v36, %v3344_v42  ;;  %v3302_v14 = vmul.f32 %v3300_v20, %v9349_v45  ;;  %v3827_v0 = vrot.slane %v3823_v51, 2  ;;  %v3903_v46 = vrot.slane %v3899_v50, 2 }
 0x4fd   :  { %3526 = vrot.lane.b32.xlu0 %v3521_v34, %s12413_s8  ;;  %3446 = vrot.lane.b32.xlu1 %v3441_v35, %s12410_s13  ;;  %v3826_v34 = vrot.slane %v9368_v15, 2  ;;  %v12713_v35 = vstv %s12712_s17  ;;  %v12719_v20 = vstv %s12717_s16  ;;  %s9675_s17 = sld [smem:[#allocation21 + $0x32]] }
 0x4fe   :  { %2964 = vrot.lane.b32.xlu2 %v2959_v41, %s12413_s8  ;;  %v4613_v8 = vmul.f32 %v12713_v35, %v9313_v5  ;;  %v12714_v41 = vstv %s8008_s14  ;;  %s9420_s14 = sld [smem:[#allocation21 + $0x4]]  ;;  %v4693_v56 = vmul.f32 %v12719_v20, %v9313_v5  ;;  %v3071_v50 = vstv %s9504_s6 }
 0x4ff   :  { %v4131_v26 = vmul.f32 %v12714_v41, %v9272_v28  ;;  %v9429_v63 = vsel %vm468_vm0, %v3826_v34, %v3827_v0  ;;  %s5853_s16 = sld [smem:[#allocation21 + $0x79]] }
 0x500   :  { %s9801_s6 = sld [smem:[#allocation21 + $0x59]] }
 0x505   :  { %3462 = vrot.lane.b32.xlu1 %v3457_v3, %s12410_s13  ;;  %4024 = vrot.lane.b32.xlu0 %v4019_v59, %s12410_s13  ;;  %v3362_v3 = vrot.slane %v9377_v53, 2  ;;  %v9408_v59 = vmul.f32 %v3897_v37, %v9345_v22  ;;  %v9480_v37 = vld [vmem:[#allocation5 + $0x18] sm:$0xff] }
 0x506   :  { %3510 = vrot.lane.b32.xlu2 %v3505_v33, %s12413_s8  ;;  %v3264_v33 = vmul.f32 %v3262_v19, %v9349_v45  ;;  %v3072_v20 = vmul.f32 %v3071_v50, %v9480_v37 }
 0x507   :  { %v12158_v19 = vrot.slane %v9408_v59, 2 }
 0x509   :  { %v9473_v42 = vsel %vm468_vm0, %v12158_v19, %v3903_v46  ;;  %v3083_v46 = vstv %s9506_s19  ;;  %s5857_s19 = sld [smem:[#allocation21 + $0x7a]] }
 0x50a   :  { %12722 = vst [vmem:[#allocation125_spill] sm:$0xff] %v9473_v42 }
 0x50d   :  { %3542 = vrot.lane.b32.xlu1 %v3537_v39, %s12413_s8  ;;  %4088 = vrot.lane.b32.xlu0 %v4083_v13, %s12413_s8  ;;  %v3305_v39 = vrot.slane %v9387_v6, 2  ;;  %v3359_v13 = vmul.f32 %v3357_v62, %v9349_v45  ;;  %v3283_v62 = vmul.f32 %v3281_v7, %v9349_v45 }
 0x50e   :  { %2980 = vrot.lane.b32.xlu2 %v2975_v43, %s12413_s8  ;;  %v3916_v43 = vstv %s9371_s22  ;;  %s9630_s22 = sld [smem:[#allocation21 + $0x71]] }
 0x50f   :  { %v3363_v30 = vrot.slane %v3359_v13, 2  ;;  %v9443_v52 = vmul.f32 %v3916_v43, %v9345_v22 }
 0x511   :  { %v12157_v31 = vrot.slane %v9443_v52, 2 }
 0x515   :  { %4104 = vrot.lane.b32.xlu1 %v4099_v48, %s12413_s8  ;;  %3558 = vrot.lane.b32.xlu0 %v3553_v24, %s12413_s8  ;;  %v3268_v48 = vrot.slane %v3264_v33, 2  ;;  %v12716_v24 = vstv %s12715_s27  ;;  %s9683_s27 = sld [smem:[#allocation21 + $0x74]] }
 0x516   :  { %3478 = vrot.lane.b32.xlu2 %v3473_v1, %s12410_s13  ;;  %v4115_v38 = vmul.f32 %v12716_v24, %v9272_v28  ;;  %v3306_v1 = vrot.slane %v3302_v14, 2  ;;  %v12726_v14 = vstv %s12721_s25  ;;  %v3625_v24 = vstv %s5850_s30  ;;  %s5886_s25 = sld [smem:[#allocation21 + $0x16]] }
 0x517   :  { %v9434_v28 = vsel %vm468_vm0, %v3267_v55, %v3268_v48  ;;  %v4645_v13 = vmul.f32 %v12726_v14, %v9313_v5  ;;  %s9773_s30 = sld [smem:[#allocation21 + $0x17]] }
 0x518   :  { %v9448_v60 = vsel %vm468_vm0, %v3305_v39, %v3306_v1  ;;  %v9516_v1 = vstv %s2820_s4  ;;  %s5887_s4 = sld [smem:[#allocation21 + $0x3a]] }
 0x51d   :  { %4056 = vrot.lane.b32.xlu0 %v4051_v2, %s12410_s13  ;;  %4602 = vrot.lane.b32.xlu1 %v4597_v21, %s12410_s13  ;;  %v3325_v2 = vrot.slane %v3321_v10, 2  ;;  %v9439_v21 = vsel %vm468_vm0, %v3248_v17, %v3249_v32  ;;  %v9508_v32 = vld [vmem:[#allocation5 + $0x48] sm:$0xff] }
 0x51e   :  { %3494 = vrot.lane.b32.xlu2 %v3489_v9, %s12410_s13  ;;  %v9453_v9 = vsel %vm468_vm0, %v3362_v3, %v3363_v30  ;;  %v2825_v30 = vmul.f32 %v9516_v1, %v9231_v49 }
 0x51f   :  { %v9458_v23 = vsel %vm468_vm0, %v3324_v18, %v3325_v2  ;;  %v3626_v2 = vmul.f32 %v3625_v24, %v9508_v32 }
 0x525   :  { %4072 = vrot.lane.b32.xlu0 %v4067_v29, %s12410_s13  ;;  %4666 = vrot.lane.b32.xlu1 %v4661_v12, %s12413_s8  ;;  %v3287_v29 = vrot.slane %v3283_v62, 2  ;;  %v3918_v12 = vmul.f32 %v3916_v43, %v3723_v16  ;;  %v12724_v16 = vstv %s12718_s5  ;;  %s9747_s5 = sld [smem:[#allocation21 + $0x56]] }
 0x526   :  { %4040 = vrot.lane.b32.xlu2 %v4035_v47, %s12410_s13  ;;  %v12720_v47 = vstv %s8021_s1  ;;  %v4677_v35 = vmul.f32 %v12724_v16, %v9313_v5  ;;  %s5815_s1 = sld [smem:[#allocation21 + $0x28]]  ;;  %v9555_v16 = vstv %s5823_s9 }
 0x527   :  { %v4629_v40 = vmul.f32 %v12720_v47, %v9313_v5  ;;  %v9478_v7 = vsel %vm468_vm0, %v3286_v58, %v3287_v29  ;;  %v3922_v41 = vrot.slane %v3918_v12, 2  ;;  %v9532_v29 = vstv %s5825_s3  ;;  %12729 = vst [vmem:[#allocation98_spill] sm:$0xff] %v9555_v16  ;;  %s9808_s3 = sld [smem:[#allocation21 + $0x7c]] }
 0x528   :  { %12723 = vst [vmem:[#allocation48_spill] sm:$0xff] %v9478_v7  ;;  %v9540_v12 = vstv %s5801_s18  ;;  %v3084_v47 = vmul.f32 %v3083_v46, %v9480_v37  ;;  %v9551_v27 = vmul.f32 %v9532_v29, %v9319_v4  ;;  %s9827_s18 = sld [smem:[#allocation21 + $0x1a]] }
 0x529   :  { %v9493_v51 = vsel %vm468_vm0, %v12157_v31, %v3922_v41  ;;  %12727 = vst [vmem:[#allocation127_spill] sm:$0xff] %v9532_v29  ;;  %s9835_s9 = sld [smem:[#allocation21 + $0x7d]] }
 0x52a   :  { %12725 = vst [vmem:[#allocation126_spill] sm:$0xff] %v9493_v51  ;;  %v12152_v14 = vrot.slane %v9551_v27, 2 }
 0x52c   :  { %v3059_v0 = vstv %s5815_s1  ;;  %s9754_s1 = sld [smem:[#allocation21 + $0x19]] }
 0x52d   :  { %4618 = vrot.lane.b32.xlu0 %v4613_v8, %s12410_s13  ;;  %4136 = vrot.lane.b32.xlu1 %v4131_v26, %s12413_s8  ;;  %v3047_v8 = vstv %s9420_s14  ;;  %v3095_v26 = vstv %s9424_s0  ;;  %v3060_v48 = vmul.f32 %v3059_v0, %v9480_v37  ;;  %s9723_s14 = sld [smem:[#allocation21 + $0x34]] }
 0x52e   :  { %4120 = vrot.lane.b32.xlu2 %v4115_v38, %s12413_s8  ;;  %v3048_v33 = vmul.f32 %v3047_v8, %v9480_v37  ;;  %v3096_v54 = vmul.f32 %v3095_v26, %v9480_v37  ;;  %v3107_v38 = vstv %s5819_s2  ;;  %v3074_v8 = vrot.slane %v3072_v20, 1  ;;  %s5852_s0 = sld [smem:[#allocation21 + $0x55]] }
 0x52f   :  { %v3062_v5 = vrot.slane %v3060_v48, 1  ;;  %v9566_v26 = vstv %s5824_s21  ;;  %s9778_s2 = sld [smem:[#allocation21 + $0x58]] }
 0x530   :  { %v3050_v10 = vrot.slane %v3048_v33, 1  ;;  %v3098_v43 = vrot.slane %v3096_v54, 1  ;;  %12730 = vst [vmem:[#allocation121_spill] sm:$0xff] %v9566_v26  ;;  %v3086_v33 = vrot.slane %v3084_v47, 1  ;;  %v9572_v54 = vmul.f32 %v9555_v16, %v9319_v4  ;;  %v2818_v47 = vld [vmem:[#allocation5 + $0x10] sm:$0x7f] }
 0x531   :  { %v9587_v0 = vmul.f32 %v9566_v26, %v9319_v4  ;;  %v3199_v46 = vmul.f32 %v9566_v26, %v9349_v45  ;;  %s9856_s21 = sld [smem:[#allocation21 + $0x3e]] }
 0x533   :  { %v12153_v50 = vrot.slane %v9587_v0, 2 }
 0x535   :  { %4698 = vrot.lane.b32.xlu0 %v4693_v56, %s12413_s8  ;;  %4634 = vrot.lane.b32.xlu1 %v4629_v40, %s12410_s13  ;;  %v2855_v56 = vmul.f32 %v9540_v12, %v9231_v49  ;;  %v9547_v40 = vstv %s5822_s28  ;;  %s5891_s28 = sld [smem:[#allocation21 + $0x3b]] }
 0x536   :  { %4682 = vrot.lane.b32.xlu2 %v4677_v35, %s12413_s8  ;;  %12728 = vst [vmem:[#allocation123_spill] sm:$0xff] %v9547_v40  ;;  %v9564_v41 = vmul.f32 %v9547_v40, %v9319_v4  ;;  %v3151_v24 = vmul.f32 %v9547_v40, %v9349_v45 }
 0x53d   :  { %4650 = vrot.lane.b32.xlu0 %v4645_v13, %s12410_s13  ;;  %3051 = vrot.lane.b32.xlu1 %v3050_v10, %s12410_s13  ;;  %v3223_v13 = vmul.f32 %v9532_v29, %v9349_v45  ;;  %v3119_v10 = vstv %s9530_s12  ;;  %s9860_s12 = sld [smem:[#allocation21 + $0x3d]] }
 0x53e   :  { %3099 = vrot.lane.b32.xlu2 %v3098_v43, %s12413_s8  ;;  %v3673_v43 = vstv %s9538_s10  ;;  %s9871_s10 = sld [smem:[#allocation21 + $0x5e]] }
 0x53f   :  { %v3232_v48 = vrot.slane %v3223_v13, 2  ;;  %v3208_v13 = vrot.slane %v3199_v46, 2 }
 0x545   :  { %3251 = vrot.lane.b32.xlu0 %v3248_v17, %s12410_s13  ;;  %3346 = vrot.lane.b32.xlu1 %v3343_v36, %s12413_s8  ;;  %v3108_v17 = vmul.f32 %v3107_v38, %v9480_v37  ;;  %v3628_v36 = vrot.slane %v3626_v2, 1  ;;  %v3120_v38 = vmul.f32 %v3119_v10, %v9480_v37  ;;  %v9600_v2 = vsel %vm468_vm0, %v12152_v14, %v3232_v48 }
 0x546   :  { %3063 = vrot.lane.b32.xlu2 %v3062_v5, %s12410_s13  ;;  %v12155_v5 = vrot.slane %v9564_v41, 2  ;;  %12731 = vst [vmem:[#allocation128_spill] sm:$0xff] %v9600_v2  ;;  %v12154_v10 = vstv %s9568_s7  ;;  %v3637_v48 = vstv %s9578_s20  ;;  %s9909_s20 = sld [smem:[#allocation21 + $0x5f]] }
 0x547   :  { %v3110_v62 = vrot.slane %v3108_v17, 1  ;;  %v3175_v17 = vmul.f32 %v9555_v16, %v9349_v45 }
 0x548   :  { %v9522_v25 = vpop.permute.xlu2 %2868 }
 0x549   :  { %v9526_v61 = vadd.f32 %v9522_v25, %v2825_v30  ;;  %v12156_v30 = vrot.slane %v9572_v54, 2 }
 0x54d   :  { %3327 = vrot.lane.b32.xlu0 %v3324_v18, %s12413_s8  ;;  %3629 = vrot.lane.b32.xlu1 %v3628_v36, %s12410_s13  ;;  %v3160_v36 = vrot.slane %v3151_v24, 2  ;;  %v9633_v24 = vstv %s9580_s11  ;;  %s9917_s11 = sld [smem:[#allocation21 + $0x1f]] }
 0x54e   :  { %3111 = vrot.lane.b32.xlu2 %v3110_v62, %s12413_s8  ;;  %v3184_v62 = vrot.slane %v3175_v17, 2  ;;  %v9647_v17 = vsel %vm468_vm0, %v12153_v50, %v3208_v13 }
 0x54f   :  { %v9615_v20 = vsel %vm468_vm0, %v12155_v5, %v3160_v36  ;;  %12734 = vst [vmem:[#allocation130_spill] sm:$0xff] %v9647_v17  ;;  %v2834_v5 = vmul.f32 %v9633_v24, %v2818_v47 }
 0x550   :  { %v9553_v18 = vpop.permute.xlu2 %2916  ;;  %12732 = vst [vmem:[#allocation101_spill] sm:$0xff] %v9615_v20 }
 0x551   :  { %v9558_v35 = vadd.f32 %v9553_v18, %v2855_v56  ;;  %v9618_v56 = vstv %s9560_s26  ;;  %s9904_s26 = sld [smem:[#allocation21 + $0x82]] }
 0x552   :  { %v2845_v36 = vmul.f32 %v9618_v56, %v9231_v49 }
 0x555   :  { %3075 = vrot.lane.b32.xlu0 %v3074_v8, %s12410_s13  ;;  %3087 = vrot.lane.b32.xlu1 %v3086_v33, %s12410_s13  ;;  %v3122_v8 = vrot.slane %v3120_v38, 1  ;;  %v9625_v33 = vsel %vm468_vm0, %v12156_v30, %v3184_v62  ;;  %v9642_v38 = vmul.f32 %v12154_v10, %v9480_v37  ;;  %v3638_v62 = vmul.f32 %v3637_v48, %v9508_v32 }
 0x556   :  { %3270 = vrot.lane.b32.xlu2 %v3267_v55, %s12410_s13  ;;  %v3674_v55 = vmul.f32 %v3673_v43, %v9508_v32  ;;  %12733 = vst [vmem:[#allocation131_spill] sm:$0xff] %v9625_v33  ;;  %v2844_v43 = vmul.f32 %v9618_v56, %v2818_v47  ;;  %v12169_v10 = vstv %s9607_s23  ;;  %v2854_v48 = vmul.f32 %v9540_v12, %v2818_v47 }
 0x557   :  { %v12159_v50 = vrot.slane %v9642_v38, 1 }
 0x558   :  { %v2965_v11 = vpop.permute.xlu2 %2964  ;;  %v3676_v45 = vrot.slane %v3674_v55, 1  ;;  %v2835_v55 = vmul.f32 %v9633_v24, %v9231_v49  ;;  %v2824_v49 = vmul.f32 %v9516_v1, %v2818_v47 }
 0x55d   :  { %3123 = vrot.lane.b32.xlu0 %v3122_v8, %s12413_s8  ;;  %3829 = vrot.lane.b32.xlu1 %v3826_v34, %s12410_s13 }
 0x55e   :  { %3677 = vrot.lane.b32.xlu2 %v3676_v45, %s12413_s8  ;;  %v12166_v45 = vstv %s9604_s15 }
 0x55f   :  { %v2885_v15 = vpop.permute.xlu1 %2884  ;;  %v2901_v34 = vpop.permute.xlu0 %2900 }
 0x560   :  { %v2891_v46 = vadd.f32 %v2885_v15, %v2835_v55  ;;  %v9655_v8 = vpop.permute.xlu2 %3510  ;;  %v2906_v13 = vadd.f32 %v2901_v34, %v2844_v43  ;;  %v2907_v14 = vadd.f32 %v2901_v34, %v2845_v36  ;;  %v3640_v55 = vrot.slane %v3638_v62, 1 }
 0x561   :  { %12735 = vst [vmem:[#allocation99_spill] sm:$0xff] %v9655_v8  ;;  %v9668_v43 = vmul.f32 %v12166_v45, %v9480_v37  ;;  %v9673_v36 = vmul.f32 %v12169_v10, %v9480_v37  ;;  %v12160_v34 = vstv %s9620_s24  ;;  %v2890_v47 = vadd.f32 %v2885_v15, %v2834_v5 }
 0x562   :  { %v9662_v30 = vadd.f32 %v2965_v11, %v2906_v13  ;;  %v2971_v31 = vadd.f32 %v2965_v11, %v2907_v14  ;;  %v3131_v13 = vstv %s9630_s22  ;;  %v9692_v14 = vmul.f32 %v12160_v34, %v9480_v37  ;;  %s9956_s22 = sld [smem:[#allocation21 + $0x22]] }
 0x563   :  { %v2874_v11 = vadd.f32 %v9522_v25, %v2824_v49  ;;  %v12165_v62 = vrot.slane %v9668_v43, 1  ;;  %v12168_v57 = vrot.slane %v9673_v36, 1  ;;  %v4251_v10 = vstv %s9773_s30  ;;  %s10053_s30 = sld [smem:[#allocation21 + $0x23]] }
 0x564   :  { %v9680_v19 = vadd.f32 %v12159_v50, %v2971_v31  ;;  %v2922_v31 = vadd.f32 %v9553_v18, %v2854_v48 }
 0x565   :  { %3289 = vrot.lane.b32.xlu0 %v3286_v58, %s12410_s13  ;;  %3641 = vrot.lane.b32.xlu1 %v3640_v55, %s12410_s13  ;;  %v3132_v55 = vmul.f32 %v3131_v13, %v9480_v37  ;;  %v12162_v13 = vstv %s9683_s27 }
 0x566   :  { %3365 = vrot.lane.b32.xlu2 %v3362_v3, %s12413_s8  ;;  %v12163_v3 = vrot.slane %v9692_v14, 1 }
 0x567   :  { %v2933_v50 = vpop.permute.xlu1 %2932  ;;  %v2949_v58 = vpop.permute.xlu0 %2948 }
 0x568   :  { %v9702_v34 = vadd.f32 %v2933_v50, %v2874_v11  ;;  %v2939_v25 = vadd.f32 %v2933_v50, %v9526_v61  ;;  %v2981_v5 = vpop.permute.xlu2 %2980  ;;  %v9705_v15 = vadd.f32 %v2949_v58, %v2890_v47  ;;  %v2955_v53 = vadd.f32 %v2949_v58, %v2891_v46 }
 0x569   :  { %v9708_v18 = vadd.f32 %v2981_v5, %v2922_v31  ;;  %v2987_v49 = vadd.f32 %v2981_v5, %v9558_v35  ;;  %v3134_v50 = vrot.slane %v3132_v55, 1  ;;  %v3685_v46 = vstv %s9675_s17  ;;  %s9961_s17 = sld [smem:[#allocation21 + $0x20]] }
 0x56a   :  { %v9713_v48 = vadd.f32 %v12165_v62, %v2939_v25  ;;  %v9717_v37 = vadd.f32 %v12168_v57, %v2955_v53  ;;  %v12736_v35 = vrot.slane %v9408_v59, 2  ;;  %v3686_v31 = vmul.f32 %v3685_v46, %v9508_v32 }
 0x56b   :  { %v9721_v61 = vadd.f32 %v12163_v3, %v2987_v49  ;;  %v9742_v58 = vmul.f32 %v12162_v13, %v9319_v4  ;;  %v12164_v59 = vstv %s9723_s14  ;;  %v3649_v25 = vstv %s5852_s0  ;;  %s10000_s0 = sld [smem:[#allocation21 + $0x43]] }
 0x56c   :  { %v3688_v6 = vrot.slane %v3686_v31, 1  ;;  %v3661_v5 = vstv %s5853_s16  ;;  %v12740_v4 = vrot.slane %v9443_v52, 2  ;;  %v3650_v46 = vmul.f32 %v3649_v25, %v9508_v32  ;;  %v9775_v52 = vld [vmem:[#allocation5 + $0x78] sm:$0xff]  ;;  %s10007_s16 = sld [smem:[#allocation21 + $0x62]] }
 0x56d   :  { %3135 = vrot.lane.b32.xlu0 %v3134_v50, %s12413_s8  ;;  %3308 = vrot.lane.b32.xlu1 %v3305_v39, %s12410_s13  ;;  %v12161_v39 = vrot.slane %v9742_v58, 2  ;;  %v9766_v50 = vmul.f32 %v12164_v59, %v9345_v22  ;;  %v3662_v31 = vmul.f32 %v3661_v5, %v9508_v32  ;;  %v3697_v13 = vstv %s9747_s5  ;;  %v9780_v59 = vld [vmem:[#allocation5 + $0x78] sm:$0xfe]  ;;  %s10042_s5 = sld [smem:[#allocation21 + $0x9]] }
 0x56e   :  { %3905 = vrot.lane.b32.xlu2 %v12736_v35, %s12413_s8  ;;  %v4203_v3 = vstv %s5886_s25  ;;  %v12171_v25 = vstv %s9754_s1  ;;  %s10046_s25 = sld [smem:[#allocation21 + $0x85]] }
 0x56f   :  { %v9734_v11 = vpop.permute.xlu1 %3446  ;;  %v9736_v47 = vpop.permute.xlu0 %3526  ;;  %v4204_v62 = vmul.f32 %v4203_v3, %v9775_v52  ;;  %v4215_v3 = vstv %s5887_s4  ;;  %s10059_s4 = sld [smem:[#allocation21 + $0x44]] }
 0x570   :  { %12737 = vst [vmem:[#allocation102_spill] sm:$0xff] %v9734_v11  ;;  %v9744_v55 = vpop.permute.xlu2 %3478  ;;  %v9893_v11 = vld [vmem:[#allocation5] sm:$0x80] }
 0x571   :  { %12738 = vst [vmem:[#allocation112_spill] sm:$0xff] %v9736_v47  ;;  %v4206_v57 = vrot.slane %v4204_v62, 1 }
 0x572   :  { %12739 = vst [vmem:[#allocation105_spill] sm:$0xff] %v9744_v55  ;;  %v12758_v55 = vstv %s9827_s18 }
 0x575   :  { %3689 = vrot.lane.b32.xlu0 %v3688_v6, %s12413_s8  ;;  %3384 = vrot.lane.b32.xlu1 %v12161_v39, %s12413_s8  ;;  %v12167_v6 = vrot.slane %v9766_v50, 2  ;;  %v3652_v39 = vrot.slane %v3650_v46, 1 }
 0x576   :  { %3924 = vrot.lane.b32.xlu2 %v12740_v4, %s12413_s8  ;;  %v3664_v4 = vrot.slane %v3662_v31, 1  ;;  %v3698_v31 = vmul.f32 %v3697_v13, %v9508_v32 }
 0x577   :  { %v9759_v53 = vpop.permute.xlu1 %3462  ;;  %v9761_v49 = vpop.permute.xlu0 %4024 }
 0x578   :  { %12741 = vst [vmem:[#allocation114_spill] sm:$0xff] %v9759_v53  ;;  %v9769_v35 = vpop.permute.xlu2 %3494 }
 0x579   :  { %12742 = vst [vmem:[#allocation109_spill] sm:$0xff] %v9761_v49  ;;  %v12177_v49 = vstv %s9778_s2 }
 0x57a   :  { %12743 = vst [vmem:[#allocation129_spill] sm:$0xff] %v9769_v35  ;;  %v9896_v35 = vld [vmem:[#allocation2] sm:$0xff] }
 0x57d   :  { %3848 = vrot.lane.b32.xlu0 %v12167_v6, %s12410_s13  ;;  %3653 = vrot.lane.b32.xlu1 %v3652_v39, %s12410_s13  ;;  %v9799_v6 = vmul.f32 %v12171_v25, %v9780_v59  ;;  %v3700_v39 = vrot.slane %v3698_v31, 1  ;;  %v4252_v31 = vmul.f32 %v4251_v10, %v9775_v52  ;;  %v9821_v25 = vmul.f32 %v12177_v49, %v9345_v22 }
 0x57e   :  { %3665 = vrot.lane.b32.xlu2 %v3664_v4, %s12410_s13  ;;  %v12183_v10 = vstv %s9808_s3 }
 0x57f   :  { %v9788_v5 = vpop.permute.xlu1 %3542  ;;  %v9790_v46 = vpop.permute.xlu0 %4088  ;;  %12747 = vst [vmem:[#allocation134_spill] sm:$0xff] %v9799_v6  ;;  %v12174_v4 = vrot.slane %v9799_v6, 2 }
 0x580   :  { %12744 = vst [vmem:[#allocation45_spill] sm:$0xff] %v9788_v5  ;;  %v9794_v45 = vpop.permute.xlu2 %4040  ;;  %v3709_v5 = vstv %s5857_s19  ;;  %s10079_s19 = sld [smem:[#allocation21 + $0xc]] }
 0x581   :  { %12745 = vst [vmem:[#allocation51_spill] sm:$0xff] %v9790_v46  ;;  %v4254_v46 = vrot.slane %v4252_v31, 1 }
 0x582   :  { %12746 = vst [vmem:[#allocation140_spill] sm:$0xff] %v9794_v45  ;;  %v12178_v45 = vrot.slane %v9821_v25, 2 }
 0x585   :  { %3701 = vrot.lane.b32.xlu0 %v3700_v39, %s12413_s8  ;;  %4207 = vrot.lane.b32.xlu1 %v4206_v57, %s12410_s13  ;;  %v4216_v57 = vmul.f32 %v4215_v3, %v9775_v52 }
 0x586   :  { %4407 = vrot.lane.b32.xlu2 %v12174_v4, %s12410_s13 }
 0x587   :  { %v9813_v62 = vpop.permute.xlu1 %4104  ;;  %v9815_v13 = vpop.permute.xlu0 %3558  ;;  %v4218_v4 = vrot.slane %v4216_v57, 1 }
 0x588   :  { %12748 = vst [vmem:[#allocation50_spill] sm:$0xff] %v9813_v62  ;;  %v9823_v39 = vpop.permute.xlu2 %4120  ;;  %v12182_v62 = vstv %s9801_s6 }
 0x589   :  { %12749 = vst [vmem:[#allocation46_spill] sm:$0xff] %v9815_v13  ;;  %v9845_v57 = vmul.f32 %v12182_v62, %v9345_v22  ;;  %v4263_v62 = vstv %s5891_s28  ;;  %v9883_v13 = vmul.f32 %v12758_v55, %v9780_v59  ;;  %v2832_v55 = vmul.f32 %v9633_v24, %v9893_v11  ;;  %s10085_s28 = sld [smem:[#allocation21 + $0x67]] }
 0x58a   :  { %12750 = vst [vmem:[#allocation47_spill] sm:$0xff] %v9823_v39 }
 0x58b   :  { %12753 = vst [vmem:[#allocation139_spill] sm:$0xff] %v9845_v57  ;;  %v12187_v39 = vrot.slane %v9845_v57, 2 }
 0x58c   :  { %12759 = vst [vmem:[#allocation78_spill] sm:$0xff] %v9883_v13 }
 0x58d   :  { %4255 = vrot.lane.b32.xlu0 %v4254_v46, %s12413_s8  ;;  %3867 = vrot.lane.b32.xlu1 %v12178_v45, %s12410_s13  ;;  %v3710_v46 = vmul.f32 %v3709_v5, %v9508_v32  ;;  %v9853_v45 = vmul.f32 %v12183_v10, %v9345_v22  ;;  %v9862_v5 = vld [vmem:[#allocation5 + $0x8] sm:$0x80] }
 0x58e   :  { %4219 = vrot.lane.b32.xlu2 %v4218_v4, %s12410_s13  ;;  %v2833_v10 = vmul.f32 %v9862_v5, %v9633_v24  ;;  %v4227_v24 = vstv %s9871_s10  ;;  %s10087_s10 = sld [smem:[#allocation21 + $0x46]] }
 0x58f   :  { %v9838_v3 = vpop.permute.xlu1 %4602  ;;  %v9840_v31 = vpop.permute.xlu0 %4056  ;;  %12755 = vst [vmem:[#allocation115_spill] sm:$0xff] %v9853_v45  ;;  %v3712_v4 = vrot.slane %v3710_v46, 1  ;;  %v12196_v46 = vstv %s9835_s9 }
 0x590   :  { %12751 = vst [vmem:[#allocation133_spill] sm:$0xff] %v9838_v3  ;;  %v9848_v49 = vpop.permute.xlu2 %4682  ;;  %v12190_v3 = vrot.slane %v9853_v45, 2  ;;  %v9891_v8 = vmul.f32 %v12196_v46, %v9345_v22  ;;  %v12201_v46 = vstv %s9856_s21 }
 0x591   :  { %12752 = vst [vmem:[#allocation111_spill] sm:$0xff] %v9840_v31 }
 0x592   :  { %12754 = vst [vmem:[#allocation110_spill] sm:$0xff] %v9848_v49  ;;  %v12199_v22 = vrot.slane %v9891_v8, 2 }
 0x593   :  { %12761 = vst [vmem:[#allocation63_spill] sm:$0xff] %v9891_v8 }
 0x594   :  { %v12237_v42 = vstv %s10087_s10 }
 0x595   :  { %3943 = vrot.lane.b32.xlu0 %v12187_v39, %s12413_s8  ;;  %3713 = vrot.lane.b32.xlu1 %v3712_v4, %s12413_s8  ;;  %v4264_v39 = vmul.f32 %v4263_v62, %v9775_v52  ;;  %v12198_v62 = vrot.slane %v9883_v13, 2  ;;  %v12774_v13 = vstv %s9604_s15  ;;  %s9994_s15 = sld [smem:[#allocation21 + $0x83]] }
 0x596   :  { %3886 = vrot.lane.b32.xlu2 %v12190_v3, %s12410_s13  ;;  %v12762_v3 = vld [vmem:[#allocation96_spill] sm:$0xff]  ;;  %v2992_v20 = vmul.f32 %v9896_v35, %v12774_v13 }
 0x597   :  { %v9876_v31 = vpop.permute.xlu1 %4666  ;;  %v9878_v49 = vpop.permute.xlu0 %4072  ;;  %v4266_v53 = vrot.slane %v4264_v39, 1 }
 0x598   :  { %12756 = vst [vmem:[#allocation132_spill] sm:$0xff] %v9876_v31  ;;  %v9886_v4 = vpop.permute.xlu2 %3099  ;;  %v2889_v31 = vadd.f32 %v12762_v3, %v2833_v10  ;;  %v12764_v10 = vld [vmem:[#allocation64_spill] sm:$0xff] }
 0x599   :  { %12757 = vst [vmem:[#allocation136_spill] sm:$0xff] %v9878_v49  ;;  %v12763_v49 = vstv %s9607_s23  ;;  %s9950_s23 = sld [smem:[#allocation21 + $0x61]] }
 0x59a   :  { %12760 = vst [vmem:[#allocation116_spill] sm:$0xff] %v9886_v4  ;;  %v3006_v47 = vmul.f32 %v9896_v35, %v12763_v49  ;;  %v2953_v2 = vadd.f32 %v12764_v10, %v2889_v31  ;;  %v2888_v49 = vadd.f32 %v12762_v3, %v2832_v55  ;;  %v12765_v31 = vrot.slane %v9673_v36, 1 }
 0x59b   :  { %v12769_v3 = vstv %s9860_s12 }
 0x59c   :  { %v3010_v45 = vrot.slane %v3006_v47, 1  ;;  %v3015_v47 = vadd.f32 %v12765_v31, %v2953_v2  ;;  %v9938_v55 = vmul.f32 %v12769_v3, %v9780_v59  ;;  %v2822_v31 = vmul.f32 %v9516_v1, %v9893_v11 }
 0x59d   :  { %4483 = vrot.lane.b32.xlu0 %v12198_v62, %s12413_s8  ;;  %4267 = vrot.lane.b32.xlu1 %v4266_v53, %s12413_s8  ;;  %v9933_v53 = vmul.f32 %v12201_v46, %v9780_v59  ;;  %v2823_v46 = vmul.f32 %v9862_v5, %v9516_v1  ;;  %v2952_v3 = vadd.f32 %v12764_v10, %v2888_v49  ;;  %v4781_v1 = vstv %s9917_s11  ;;  %v12773_v10 = vld [vmem:[#allocation69_spill] sm:$0xff]  ;;  %s10216_s11 = sld [smem:[#allocation21 + $0x12]] }
 0x59e   :  { %3962 = vrot.lane.b32.xlu2 %v12199_v22, %s12413_s8  ;;  %v3016_v39 = vadd.f32 %v3010_v45, %v9705_v15  ;;  %12770 = vst [vmem:[#allocation141_spill] sm:$0xff] %v9938_v55  ;;  %v4228_v15 = vmul.f32 %v4227_v24, %v9775_v52  ;;  %v2872_v49 = vadd.f32 %v12773_v10, %v2822_v31 }
 0x59f   :  { %v9926_v17 = vpop.permute.xlu1 %4136  ;;  %v9928_v62 = vpop.permute.xlu0 %4618  ;;  %12768 = vst [vmem:[#allocation93_spill] sm:$0xff] %v9933_v53  ;;  %v12205_v24 = vrot.slane %v9933_v53, 2  ;;  %v3014_v51 = vadd.f32 %v3010_v45, %v2952_v3  ;;  %v2996_v3 = vrot.slane %v2992_v20, 1 }
 0x5a0   :  { %12766 = vst [vmem:[#allocation94_spill] sm:$0xff] %v9926_v17  ;;  %v3064_v22 = vpop.permute.xlu2 %3063  ;;  %v4275_v17 = vstv %s9909_s20  ;;  %s10164_s20 = sld [smem:[#allocation21 + $0x68]] }
 0x5a1   :  { %12767 = vst [vmem:[#allocation49_spill] sm:$0xff] %v9928_v62  ;;  %v3067_v8 = vadd.f32 %v3064_v22, %v3015_v47  ;;  %v9941_v36 = vadd.f32 %v3064_v22, %v3016_v39  ;;  %v9944_v2 = vadd.f32 %v3064_v22, %v9717_v37  ;;  %v12207_v39 = vrot.slane %v9938_v55, 2  ;;  %v9959_v62 = vld [vmem:[#allocation5 + $0x10] sm:$0xfe] }
 0x5a2   :  { %v4239_v47 = vstv %s9904_s26  ;;  %v4230_v37 = vrot.slane %v4228_v15, 1  ;;  %v2873_v15 = vadd.f32 %v12773_v10, %v2823_v46  ;;  %v4276_v53 = vmul.f32 %v4275_v17, %v9775_v52  ;;  %s10099_s26 = sld [smem:[#allocation21 + $0x86]] }
 0x5a3   :  { %12771 = vst [vmem:[#allocation44_spill] sm:$0xff] %v9941_v36  ;;  %v9963_v36 = vld [vmem:[#allocation5 + $0xa8] sm:$0xff]  ;;  %v4240_v33 = vmul.f32 %v4239_v47, %v9775_v52  ;;  %v3066_v46 = vadd.f32 %v3064_v22, %v3014_v51  ;;  %v12779_v47 = vld [vmem:[#allocation97_spill] sm:$0xff]  ;;  %v12213_v22 = vstv %s9956_s22 }
 0x5a4   :  { %12772 = vst [vmem:[#allocation137_spill] sm:$0xff] %v9944_v2  ;;  %v4782_v13 = vmul.f32 %v4781_v1, %v9963_v36  ;;  %v2937_v10 = vadd.f32 %v12779_v47, %v2873_v15  ;;  %v12780_v1 = vrot.slane %v9572_v54, 2  ;;  %v10002_v51 = vld [vmem:[#allocation5 + $0xa8] sm:$0xfe]  ;;  %v3002_v54 = vadd.f32 %v2996_v3, %v9702_v34 }
 0x5a5   :  { %4502 = vrot.lane.b32.xlu0 %v12205_v24, %s12413_s8  ;;  %4426 = vrot.lane.b32.xlu1 %v12207_v39, %s12410_s13  ;;  %v9986_v39 = vmul.f32 %v9555_v16, %v9959_v62  ;;  %v4242_v17 = vrot.slane %v4240_v33, 1  ;;  %v4829_v33 = vstv %s9961_s17  ;;  %v10031_v34 = vmul.f32 %v12213_v22, %v10002_v51  ;;  %s10223_s17 = sld [smem:[#allocation21 + $0x15]] }
 0x5a6   :  { %4231 = vrot.lane.b32.xlu2 %v4230_v37, %s12410_s13  ;;  %v2936_v37 = vadd.f32 %v12779_v47, %v2872_v49  ;;  %v4784_v20 = vrot.slane %v4782_v13, 1  ;;  %v12781_v49 = vrot.slane %v9668_v43, 1  ;;  %v10017_v13 = vmul.f32 %v9547_v40, %v9959_v62 }
 0x5a7   :  { %v9979_v2 = vpop.permute.xlu1 %4634  ;;  %v9981_v24 = vpop.permute.xlu0 %4698  ;;  %12777 = vst [vmem:[#allocation35_spill] sm:$0xff] %v9986_v39  ;;  %v12212_v16 = vrot.slane %v9986_v39, 2  ;;  %v4830_v43 = vmul.f32 %v4829_v33, %v9963_v36  ;;  %v12214_v33 = vrot.slane %v10031_v34, 2  ;;  %v12797_v39 = vstv %s10053_s30 }
 0x5a8   :  { %12775 = vst [vmem:[#allocation95_spill] sm:$0xff] %v9979_v2  ;;  %v9988_v31 = vpop.permute.xlu2 %3111  ;;  %v3001_v15 = vadd.f32 %v12781_v49, %v2937_v10  ;;  %v12215_v22 = vrot.slane %v10017_v13, 2  ;;  %v10132_v40 = vmul.f32 %v12797_v39, %v10002_v51  ;;  %v4805_v39 = vstv %s10085_s28  ;;  %s10327_s28 = sld [smem:[#allocation21 + $0x33]] }
 0x5a9   :  { %12776 = vst [vmem:[#allocation138_spill] sm:$0xff] %v9981_v24  ;;  %v3115_v45 = vadd.f32 %v9988_v31, %v3067_v8  ;;  %v4278_v24 = vrot.slane %v4276_v53, 1  ;;  %v3114_v2 = vadd.f32 %v9988_v31, %v3066_v46  ;;  %v12217_v8 = vstv %s9950_s23 }
 0x5aa   :  { %12778 = vst [vmem:[#allocation135_spill] sm:$0xff] %v9988_v31  ;;  %v3000_v53 = vadd.f32 %v2996_v3, %v2936_v37 }
 0x5ab   :  { %v3191_v57 = vadd.f32 %v12780_v1, %v3115_v45  ;;  %12782 = vst [vmem:[#allocation104_spill] sm:$0xff] %v10017_v13  ;;  %v3190_v46 = vadd.f32 %v12212_v16, %v3114_v2 }
 0x5ac   :  { %12785 = vst [vmem:[#allocation106_spill] sm:$0xff] %v10031_v34 }
 0x5ad   :  { %4243 = vrot.lane.b32.xlu0 %v4242_v17, %s12410_s13  ;;  %4279 = vrot.lane.b32.xlu1 %v4278_v24, %s12413_s8  ;;  %v10026_v24 = vmul.f32 %v12217_v8, %v9780_v59 }
 0x5ae   :  { %4785 = vrot.lane.b32.xlu2 %v4784_v20, %s12410_s13 }
 0x5af   :  { %v3052_v45 = vpop.permute.xlu1 %3051  ;;  %v10021_v47 = vpop.permute.xlu0 %4650  ;;  %12784 = vst [vmem:[#allocation40_spill] sm:$0xff] %v10026_v24 }
 0x5b0   :  { %12783 = vst [vmem:[#allocation142_spill] sm:$0xff] %v10021_v47  ;;  %v3271_v3 = vpop.permute.xlu2 %3270  ;;  %v3054_v37 = vadd.f32 %v3052_v45, %v3000_v53  ;;  %v3055_v10 = vadd.f32 %v3052_v45, %v3001_v15  ;;  %v10034_v2 = vadd.f32 %v3052_v45, %v3002_v54  ;;  %v10037_v17 = vadd.f32 %v3052_v45, %v9713_v48  ;;  %v12793_v47 = vld [vmem:[#allocation39_spill] sm:$0xff] }
 0x5b1   :  { %v3276_v1 = vadd.f32 %v3271_v3, %v3190_v46  ;;  %v3277_v20 = vadd.f32 %v3271_v3, %v3191_v57  ;;  %v4832_v53 = vrot.slane %v4830_v43, 1  ;;  %v4287_v15 = vstv %s9994_s15  ;;  %s10243_s15 = sld [smem:[#allocation21 + $0x2d]] }
 0x5b2   :  { %12786 = vst [vmem:[#allocation42_spill] sm:$0xff] %v10034_v2  ;;  %v3102_v49 = vadd.f32 %v9886_v4, %v3054_v37  ;;  %v3103_v16 = vadd.f32 %v9886_v4, %v3055_v10  ;;  %v12216_v48 = vrot.slane %v10026_v24, 2  ;;  %v12788_v54 = vrot.slane %v9564_v41, 2  ;;  %v10103_v2 = vld [vmem:[#allocation5 + $0x30] sm:$0x80]  ;;  %v12798_v24 = vld [vmem:[#allocation100_spill] sm:$0xff] }
 0x5b3   :  { %12787 = vst [vmem:[#allocation107_spill] sm:$0xff] %v10037_v17  ;;  %v4793_v46 = vstv %s10000_s0  ;;  %v12218_v45 = vstv %s10007_s16  ;;  %v4288_v3 = vmul.f32 %v4287_v15, %v9775_v52  ;;  %v2843_v15 = vmul.f32 %v9862_v5, %v9618_v56  ;;  %s10279_s0 = sld [smem:[#allocation21 + $0x30]] }
 0x5b4   :  { %v3167_v57 = vadd.f32 %v12788_v54, %v3103_v16  ;;  %v3166_v41 = vadd.f32 %v12215_v22, %v3102_v49  ;;  %v4794_v37 = vmul.f32 %v4793_v46, %v9963_v36  ;;  %v10071_v10 = vmul.f32 %v12218_v45, %v9780_v59 }
 0x5b5   :  { %4985 = vrot.lane.b32.xlu0 %v12214_v33, %s12410_s13  ;;  %4833 = vrot.lane.b32.xlu1 %v4832_v53, %s12413_s8  ;;  %v2853_v46 = vmul.f32 %v9862_v5, %v9540_v12  ;;  %v12792_v5 = vld [vmem:[#allocation38_spill] sm:$0xff]  ;;  %v12799_v17 = vstv %s9568_s7  ;;  %s10159_s7 = sld [smem:[#allocation21 + $0x47]] }
 0x5b6   :  { %4445 = vrot.lane.b32.xlu2 %v12216_v48, %s12410_s13  ;;  %12789 = vst [vmem:[#allocation108_spill] sm:$0xff] %v10071_v10  ;;  %v12230_v48 = vstv %s10046_s25  ;;  %v2905_v45 = vadd.f32 %v12792_v5, %v2843_v15  ;;  %v10116_v15 = vld [vmem:[#allocation5 + $0x38] sm:$0x80] }
 0x5b7   :  { %v3347_v16 = vpop.permute.xlu1 %3346  ;;  %v3252_v43 = vpop.permute.xlu0 %3251  ;;  %v2921_v13 = vadd.f32 %v12793_v47, %v2853_v46 }
 0x5b8   :  { %v10073_v53 = vpop.permute.xlu2 %3677  ;;  %v10075_v54 = vadd.f32 %v3347_v16, %v3276_v1  ;;  %v10077_v33 = vadd.f32 %v3347_v16, %v3277_v20  ;;  %v3257_v49 = vadd.f32 %v3252_v43, %v3166_v41  ;;  %v3258_v22 = vadd.f32 %v3252_v43, %v3167_v57 }
 0x5b9   :  { %12790 = vst [vmem:[#allocation96_spill] sm:$0xff] %v10073_v53  ;;  %v2842_v1 = vmul.f32 %v9618_v56, %v9893_v11  ;;  %v12791_v20 = vstv %s9620_s24  ;;  %v4796_v41 = vrot.slane %v4794_v37, 1  ;;  %v12221_v16 = vrot.slane %v10071_v10, 2  ;;  %s10134_s24 = sld [smem:[#allocation21 + $0xf]]  ;;  %v12800_v10 = vld [vmem:[#allocation36_spill] sm:$0xff] }
 0x5ba   :  { %v10094_v57 = vmul.f32 %v9896_v35, %v12791_v20  ;;  %v4290_v43 = vrot.slane %v4288_v3, 1  ;;  %v10110_v56 = vstv %s10042_s5  ;;  %v4841_v3 = vstv %s10059_s4  ;;  %s10312_s5 = sld [smem:[#allocation21 + $0x51]] }
 0x5bb   :  { %12794 = vst [vmem:[#allocation64_spill] sm:$0xff] %v10110_v56  ;;  %v3400_v37 = vmul.f32 %v10110_v56, %v10103_v2  ;;  %v3401_v46 = vmul.f32 %v10116_v15, %v10110_v56  ;;  %v2904_v20 = vadd.f32 %v12792_v5, %v2842_v1  ;;  %v4842_v5 = vmul.f32 %v4841_v3, %v9963_v36  ;;  %s10318_s4 = sld [smem:[#allocation21 + $0x75]] }
 0x5bc   :  { %v2985_v4 = vadd.f32 %v12798_v24, %v2921_v13  ;;  %v2969_v31 = vadd.f32 %v12800_v10, %v2905_v45  ;;  %v12802_v13 = vrot.slane %v9692_v14, 1  ;;  %v12804_v45 = vld [vmem:[#allocation103_spill] sm:$0xff] }
 0x5bd   :  { %4797 = vrot.lane.b32.xlu0 %v4796_v41, %s12410_s13  ;;  %4521 = vrot.lane.b32.xlu1 %v12221_v16, %s12413_s8  ;;  %v3569_v41 = vstv %s10079_s19  ;;  %s10324_s19 = sld [smem:[#allocation21 + $0x54]] }
 0x5be   :  { %4291 = vrot.lane.b32.xlu2 %v4290_v43, %s12413_s8  ;;  %v10127_v43 = vmul.f32 %v12230_v48, %v9780_v59  ;;  %v10144_v48 = vmul.f32 %v9896_v35, %v12799_v17  ;;  %v10150_v55 = vmul.f32 %v9896_v35, %v3569_v41  ;;  %v10157_v17 = vmul.f32 %v3569_v41, %v9508_v32 }
 0x5bf   :  { %v10122_v16 = vpop.permute.xlu1 %3629  ;;  %v3328_v8 = vpop.permute.xlu0 %3327  ;;  %v12805_v32 = vrot.slane %v9642_v38, 1 }
 0x5c0   :  { %12795 = vst [vmem:[#allocation69_spill] sm:$0xff] %v10122_v16  ;;  %v10136_v56 = vpop.permute.xlu2 %3365  ;;  %v3333_v34 = vadd.f32 %v3328_v8, %v3257_v49  ;;  %v3334_v1 = vadd.f32 %v3328_v8, %v3258_v22  ;;  %v12236_v8 = vrot.slane %v10127_v43, 2  ;;  %v12239_v22 = vrot.slane %v10132_v40, 2 }
 0x5c1   :  { %12796 = vst [vmem:[#allocation97_spill] sm:$0xff] %v10127_v43  ;;  %v3043_v49 = vadd.f32 %v12802_v13, %v2985_v4  ;;  %v3029_v14 = vadd.f32 %v12805_v32, %v2969_v31  ;;  %v10181_v4 = vld [vmem:[#allocation5 + $0x40] sm:$0xfe]  ;;  %v12243_v38 = vrot.slane %v10150_v55, 1  ;;  %v12246_v43 = vstv %s10159_s7 }
 0x5c2   :  { %v3404_v6 = vadd.f32 %v3400_v37, %v3333_v34  ;;  %v3405_v7 = vadd.f32 %v3401_v46, %v3334_v1  ;;  %12801 = vst [vmem:[#allocation38_spill] sm:$0xff] %v10150_v55  ;;  %v4844_v37 = vrot.slane %v4842_v5, 1  ;;  %v12238_v46 = vstv %s10099_s26  ;;  %v12807_v5 = vld [vmem:[#allocation81_spill] sm:$0xff] }
 0x5c3   :  { %12803 = vst [vmem:[#allocation39_spill] sm:$0xff] %v10157_v17  ;;  %v3024_v1 = vrot.slane %v10144_v48, 1  ;;  %v12806_v48 = vrot.slane %v10094_v57, 1  ;;  %v12836_v55 = vrot.slane %v9551_v27, 2 }
 0x5c4   :  { %v3450_v34 = vadd.f32 %v12804_v45, %v3404_v6  ;;  %v3451_v3 = vadd.f32 %v12804_v45, %v3405_v7  ;;  %v4806_v7 = vmul.f32 %v4805_v39, %v9963_v36  ;;  %v10179_v6 = vmul.f32 %v12237_v42, %v10002_v51 }
 0x5c5   :  { %4464 = vrot.lane.b32.xlu0 %v12236_v8, %s12410_s13  ;;  %5061 = vrot.lane.b32.xlu1 %v12239_v22, %s12413_s8  ;;  %v3044_v41 = vadd.f32 %v12806_v48, %v9708_v18  ;;  %v3030_v31 = vadd.f32 %v3024_v1, %v9662_v30  ;;  %v10196_v8 = vmul.f32 %v12238_v46, %v9780_v59  ;;  %v10200_v18 = vstv %s10134_s24  ;;  %v10226_v22 = vld [vmem:[#allocation5 + $0x48] sm:$0xfe]  ;;  %s10343_s24 = sld [smem:[#allocation21 + $0x36]] }
 0x5c6   :  { %v3514_v13 = vadd.f32 %v12807_v5, %v3450_v34  ;;  %v3515_v45 = vadd.f32 %v12807_v5, %v3451_v3  ;;  %4845 = vrot.lane.b32.xlu2 %v4844_v37, %s12413_s8  ;;  %12808 = vst [vmem:[#allocation100_spill] sm:$0xff] %v10200_v18  ;;  %v10214_v48 = vmul.f32 %v10200_v18, %v10181_v4 }
 0x5c7   :  { %v10191_v39 = vpop.permute.xlu1 %3087  ;;  %v3076_v32 = vpop.permute.xlu0 %3075 }
 0x5c8   :  { %v3906_v34 = vpop.permute.xlu2 %3905  ;;  %v10203_v3 = vadd.f32 %v10191_v39, %v3043_v49  ;;  %v10206_v37 = vadd.f32 %v10191_v39, %v3044_v41  ;;  %v10210_v30 = vadd.f32 %v10191_v39, %v9721_v61  ;;  %12811 = vst [vmem:[#allocation81_spill] sm:$0xff] %v10214_v48  ;;  %v3079_v5 = vadd.f32 %v3076_v32, %v3029_v14 }
 0x5c9   :  { %v10218_v46 = vadd.f32 %v3076_v32, %v3030_v31  ;;  %v10221_v49 = vadd.f32 %v3076_v32, %v9680_v19  ;;  %v2968_v41 = vadd.f32 %v12800_v10, %v2904_v20  ;;  %v10230_v61 = vmul.f32 %v10226_v22, %v10200_v18 }
 0x5ca   :  { %12809 = vst [vmem:[#allocation36_spill] sm:$0xff] %v10206_v37  ;;  %v3578_v42 = vadd.f32 %v12243_v38, %v3514_v13  ;;  %v12814_v14 = vrot.slane %v10157_v17, 1  ;;  %v12244_v19 = vrot.slane %v10179_v6, 2  ;;  %v12245_v37 = vrot.slane %v10196_v8, 2 }
 0x5cb   :  { %12810 = vst [vmem:[#allocation103_spill] sm:$0xff] %v10210_v30  ;;  %v12249_v10 = vrot.slane %v10214_v48, 2  ;;  %v4853_v30 = vstv %s10164_s20  ;;  %v10260_v38 = vmul.f32 %v12246_v43, %v10002_v51  ;;  %v10295_v17 = vstv %s10243_s15  ;;  %s10363_s20 = sld [smem:[#allocation21 + $0x57]] }
 0x5cc   :  { %12812 = vst [vmem:[#allocation143_spill] sm:$0xff] %v10218_v46  ;;  %v3579_v31 = vadd.f32 %v12814_v14, %v3515_v45  ;;  %v4808_v46 = vrot.slane %v4806_v7, 1  ;;  %v3632_v20 = vadd.f32 %v10122_v16, %v3578_v42  ;;  %v12250_v7 = vrot.slane %v10230_v61, 2  ;;  %s10885_s15 = sld [smem:[#allocation21 + $0x21]] }
 0x5cd   :  { %12813 = vst [vmem:[#allocation144_spill] sm:$0xff] %v10230_v61  ;;  %5004 = vrot.lane.b32.xlu0 %v12244_v19, %s12410_s13  ;;  %4540 = vrot.lane.b32.xlu1 %v12245_v37, %s12413_s8  ;;  %v3028_v45 = vadd.f32 %v3024_v1, %v2968_v41  ;;  %v4854_v19 = vmul.f32 %v4853_v30, %v9963_v36  ;;  %v10277_v36 = vstv %s10216_s11  ;;  %v12838_v61 = vstv %s9723_s14  ;;  %s10461_s14 = sld [smem:[#allocation21 + $0x39]] }
 0x5ce   :  { %v3633_v18 = vadd.f32 %v10122_v16, %v3579_v31  ;;  %4809 = vrot.lane.b32.xlu2 %v4808_v46, %s12410_s13  ;;  %v3680_v42 = vadd.f32 %v10073_v53, %v3632_v20  ;;  %12815 = vst [vmem:[#allocation145_spill] sm:$0xff] %v10260_v38  ;;  %v10265_v46 = vmul.f32 %v9566_v26, %v9959_v62  ;;  %v10406_v26 = vstv %s10343_s24  ;;  %s10857_s11 = sld [smem:[#allocation21 + $0x60]] }
 0x5cf   :  { %v3830_v14 = vpop.permute.xlu1 %3829  ;;  %v10255_v31 = vpop.permute.xlu0 %3123  ;;  %v2852_v20 = vmul.f32 %v9540_v12, %v9893_v11  ;;  %v3078_v43 = vadd.f32 %v3076_v32, %v3028_v45  ;;  %12817 = vst [vmem:[#allocation147_spill] sm:$0xff] %v10277_v36  ;;  %v4856_v32 = vrot.slane %v4854_v19, 1  ;;  %s11172_s24 = sld [smem:[#allocation21 + $0x66]] }
 0x5d0   :  { %v3681_v13 = vadd.f32 %v10073_v53, %v3633_v18  ;;  %12816 = vst [vmem:[#allocation146_spill] sm:$0xff] %v10265_v46  ;;  %v10269_v37 = vpop.permute.xlu2 %3924  ;;  %v3744_v1 = vadd.f32 %v12249_v10, %v3680_v42  ;;  %v3127_v41 = vadd.f32 %v10255_v31, %v3079_v5  ;;  %v10282_v53 = vld [vmem:[#allocation5 + $0x68] sm:$0x80]  ;;  %v12818_v10 = vrot.slane %v9587_v0, 2 }
 0x5d1   :  { %v3979_v12 = vmul.f32 %v10282_v53, %v10277_v36  ;;  %v12257_v5 = vrot.slane %v10260_v38, 2  ;;  %v3126_v45 = vadd.f32 %v10255_v31, %v3078_v43  ;;  %v2920_v30 = vadd.f32 %v12793_v47, %v2852_v20  ;;  %12819 = vst [vmem:[#allocation148_spill] sm:$0xff] %v10295_v17 }
 0x5d2   :  { %v3745_v18 = vadd.f32 %v12250_v7, %v3681_v13  ;;  %v3835_v11 = vadd.f32 %v3830_v14, %v3744_v1  ;;  %v3215_v13 = vadd.f32 %v12818_v10, %v3127_v41  ;;  %v12256_v7 = vrot.slane %v10265_v46, 2 }
 0x5d3   :  { %v12820_v0 = vstv %s10223_s17  ;;  %v3410_v43 = vmul.f32 %v10295_v17, %v10103_v2  ;;  %v3411_v47 = vmul.f32 %v10116_v15, %v10295_v17  ;;  %v2984_v1 = vadd.f32 %v12798_v24, %v2920_v30  ;;  %v12826_v30 = vld [vmem:[#allocation43_spill] sm:$0xff] }
 0x5d4   :  { %v3836_v42 = vadd.f32 %v3830_v14, %v3745_v18  ;;  %v10292_v48 = vadd.f32 %v3906_v34, %v3835_v11  ;;  %v10304_v19 = vmul.f32 %v12820_v0, %v9775_v52  ;;  %v3214_v14 = vadd.f32 %v12256_v7, %v3126_v45  ;;  %v12823_v18 = vld [vmem:[#allocation37_spill] sm:$0xff] }
 0x5d5   :  { %5080 = vrot.lane.b32.xlu0 %v12257_v5, %s12413_s8  ;;  %4857 = vrot.lane.b32.xlu1 %v4856_v32, %s12413_s8  ;;  %v3414_v32 = vadd.f32 %v3410_v43, %v10075_v54  ;;  %v3415_v45 = vadd.f32 %v3411_v47, %v10077_v33  ;;  %v10334_v24 = vmul.f32 %v9532_v29, %v9959_v62  ;;  %v10347_v43 = vld [vmem:[#allocation5 + $0x48] sm:$0xff]  ;;  %v12833_v7 = vstv %s9778_s2  ;;  %s10517_s2 = sld [smem:[#allocation21 + $0x5a]] }
 0x5d6   :  { %v3912_v16 = vadd.f32 %v3906_v34, %v3836_v42  ;;  %12821 = vst [vmem:[#allocation149_spill] sm:$0xff] %v10304_v19  ;;  %3348 = vrot.lane.b32.xlu2 %v9405_v44, %s12413_s8  ;;  %v12255_v42 = vrot.slane %v10304_v19, 1 }
 0x5d7   :  { %v10314_v10 = vpop.permute.xlu1 %3641  ;;  %v3290_v20 = vpop.permute.xlu0 %3289  ;;  %12825 = vst [vmem:[#allocation151_spill] sm:$0xff] %v10334_v24 }
 0x5d8   :  { %v3983_v34 = vadd.f32 %v3979_v12, %v3912_v16  ;;  %12822 = vst [vmem:[#allocation150_spill] sm:$0xff] %v10314_v10  ;;  %v10322_v11 = vpop.permute.xlu2 %3665  ;;  %v3583_v16 = vstv %s10279_s0  ;;  %v3295_v44 = vadd.f32 %v3290_v20, %v3214_v14  ;;  %v3296_v12 = vadd.f32 %v3290_v20, %v3215_v13  ;;  %s10901_s0 = sld [smem:[#allocation21 + $0x8e]] }
 0x5d9   :  { %12824 = vst [vmem:[#allocation37_spill] sm:$0xff] %v10322_v11  ;;  %v12827_v14 = vrot.slane %v10094_v57, 1  ;;  %v10350_v62 = vmul.f32 %v10347_v43, %v3583_v16  ;;  %v10357_v47 = vmul.f32 %v9896_v35, %v3583_v16  ;;  %v12830_v57 = vld [vmem:[#allocation113_spill] sm:$0xff] }
 0x5da   :  { %v4029_v41 = vadd.f32 %v12823_v18, %v3983_v34  ;;  %v10338_v34 = vadd.f32 %v10136_v56, %v3295_v44  ;;  %v10341_v13 = vadd.f32 %v10136_v56, %v3296_v12  ;;  %v3466_v56 = vadd.f32 %v12830_v57, %v3414_v32  ;;  %v6201_v44 = vld [vmem:[#allocation5 + $0x28] sm:$0x1] }
 0x5db   :  { %v3042_v54 = vadd.f32 %v12827_v14, %v2984_v1  ;;  %12828 = vst [vmem:[#allocation43_spill] sm:$0xff] %v10350_v62  ;;  %v3467_v20 = vadd.f32 %v12830_v57, %v3415_v45  ;;  %v12832_v12 = vstv %s9683_s27  ;;  %v10385_v14 = vstv %s10318_s4  ;;  %v12834_v45 = vld [vmem:[#allocation52_spill] sm:$0xff]  ;;  %s10453_s27 = sld [smem:[#allocation21 + $0x78]] }
 0x5dc   :  { %v4093_v0 = vadd.f32 %v12826_v30, %v4029_v41  ;;  %12829 = vst [vmem:[#allocation152_spill] sm:$0xff] %v10357_v47  ;;  %v3378_v32 = vmul.f32 %v6201_v44, %v12832_v12  ;;  %v10392_v44 = vstv %s10327_s28  ;;  %v10394_v12 = vld [vmem:[#allocation5 + $0x58] sm:$0x1]  ;;  %s10991_s4 = sld [smem:[#allocation21 + $0x42]] }
 0x5dd   :  { %3272 = vrot.lane.b32.xlu0 %v9434_v28, %s12410_s13  ;;  %3253 = vrot.lane.b32.xlu1 %v9439_v21, %s12410_s13  ;;  %v3090_v1 = vadd.f32 %v10191_v39, %v3042_v54  ;;  %v10372_v28 = vstv %s10312_s5  ;;  %v10387_v54 = vld [vmem:[#allocation5 + $0x88] sm:$0x1]  ;;  %v3861_v5 = vmul.f32 %v10394_v12, %v12833_v7  ;;  %v3531_v41 = vadd.f32 %v12834_v45, %v3467_v20  ;;  %s12949_s5 = sld [smem:[#allocation80_spill]] }
 0x5de   :  { %v10354_v33 = vadd.f32 %v12255_v42, %v4093_v0  ;;  %3831 = vrot.lane.b32.xlu2 %v9429_v63, %s12410_s13  ;;  %12831 = vst [vmem:[#allocation113_spill] sm:$0xff] %v10372_v28  ;;  %v3597_v42 = vstv %s10324_s19  ;;  %v3382_v46 = vrot.slane %v3378_v32, 2  ;;  %v3842_v29 = vmul.f32 %v10394_v12, %v12838_v61  ;;  %s10999_s19 = sld [smem:[#allocation21 + $0x8f]] }
 0x5df   :  { %v3309_v21 = vpop.permute.xlu1 %3308  ;;  %v10374_v16 = vpop.permute.xlu0 %3135  ;;  %12837 = vst [vmem:[#allocation52_spill] sm:$0xff] %v10406_v26  ;;  %v12839_v7 = vstv %s9860_s12  ;;  %v10415_v20 = vmul.f32 %v10347_v43, %v3597_v42  ;;  %v10427_v27 = vmul.f32 %v10392_v44, %v10181_v4  ;;  %v12843_v61 = vstv %s9754_s1  ;;  %s10497_s1 = sld [smem:[#allocation21 + $0x7b]] }
 0x5e0   :  { %v10379_v0 = vpop.permute.xlu2 %4407  ;;  %v3138_v39 = vadd.f32 %v10374_v16, %v3090_v1  ;;  %v3139_v63 = vadd.f32 %v10374_v16, %v10203_v3  ;;  %v3530_v1 = vadd.f32 %v12834_v45, %v3466_v56  ;;  %v12835_v3 = vrot.slane %v10334_v24, 2  ;;  %s10716_s12 = sld [smem:[#allocation21 + $0x7e]] }
 0x5e1   :  { %v4420_v17 = vmul.f32 %v12839_v7, %v10387_v54  ;;  %12840 = vst [vmem:[#allocation153_spill] sm:$0xff] %v10415_v20  ;;  %v10419_v45 = vmul.f32 %v10226_v22, %v10392_v44  ;;  %v12845_v32 = vrot.slane %v10357_v47, 1  ;;  %v12848_v7 = vrot.slane %v9742_v58, 2  ;;  %s11012_s28 = sld [smem:[#allocation21 + $0x84]] }
 0x5e2   :  { %v3238_v19 = vadd.f32 %v12835_v3, %v3138_v39  ;;  %v3239_v57 = vadd.f32 %v12836_v55, %v3139_v63  ;;  %12842 = vst [vmem:[#allocation155_spill] sm:$0xff] %v10427_v27  ;;  %v3865_v55 = vrot.slane %v3861_v5, 2  ;;  %v12846_v63 = vrot.slane %v10350_v62, 1 }
 0x5e3   :  { %12841 = vst [vmem:[#allocation154_spill] sm:$0xff] %v10419_v45  ;;  %v3592_v39 = vadd.f32 %v12845_v32, %v3530_v1  ;;  %v3846_v1 = vrot.slane %v3842_v29, 2  ;;  %v4424_v32 = vrot.slane %v4420_v17, 2  ;;  %v12849_v47 = vstv %s9801_s6  ;;  %s10536_s6 = sld [smem:[#allocation21 + $0x18]] }
 0x5e4   :  { %v3314_v56 = vadd.f32 %v3309_v21, %v3238_v19  ;;  %v3315_v38 = vadd.f32 %v3309_v21, %v3239_v57  ;;  %v4401_v19 = vmul.f32 %v12843_v61, %v10387_v54  ;;  %v10433_v21 = vstv %s10363_s20  ;;  %s11454_s20 = sld [smem:[#allocation21 + $0x8d]] }
 0x5e5   :  { %3367 = vrot.lane.b32.xlu0 %v9453_v9, %s12413_s8  ;;  %3329 = vrot.lane.b32.xlu1 %v9458_v23, %s12413_s8  ;;  %12844 = vst [vmem:[#allocation156_spill] sm:$0xff] %v10433_v21  ;;  %v3593_v9 = vadd.f32 %v12846_v63, %v3531_v41  ;;  %v3420_v57 = vmul.f32 %v10372_v28, %v10103_v2  ;;  %v10455_v63 = vld [vmem:[#allocation5 + $0x60] sm:$0x80] }
 0x5e6   :  { %v3421_v23 = vmul.f32 %v10116_v15, %v10372_v28  ;;  %3310 = vrot.lane.b32.xlu2 %v9448_v60, %s12410_s13  ;;  %v3383_v61 = vsel %vm468_vm0, %v12848_v7, %v3382_v46  ;;  %v3937_v41 = vmul.f32 %v10394_v12, %v12849_v47  ;;  %v3644_v62 = vadd.f32 %v10314_v10, %v3592_v39 }
 0x5e7   :  { %v3385_v5 = vpop.permute.xlu1 %3384  ;;  %v10445_v3 = vpop.permute.xlu0 %3689  ;;  %v3645_v60 = vadd.f32 %v10314_v10, %v3593_v9  ;;  %v4405_v46 = vrot.slane %v4401_v19, 2  ;;  %v10467_v47 = vmul.f32 %v10226_v22, %v10433_v21  ;;  %v3424_v39 = vadd.f32 %v3420_v57, %v10338_v34  ;;  %v12854_v57 = vld [vmem:[#allocation141_spill] sm:$0xff] }
 0x5e8   :  { %12847 = vst [vmem:[#allocation157_spill] sm:$0xff] %v10445_v3  ;;  %v10459_v24 = vpop.permute.xlu2 %4219  ;;  %v3390_v28 = vadd.f32 %v3385_v5, %v3314_v56  ;;  %v3391_v58 = vadd.f32 %v3385_v5, %v3315_v38  ;;  %v3425_v9 = vadd.f32 %v3421_v23, %v10341_v13  ;;  %v3692_v7 = vadd.f32 %v10445_v3, %v3644_v62 }
 0x5e9   :  { %12850 = vst [vmem:[#allocation158_spill] sm:$0xff] %v10459_v24  ;;  %v3693_v38 = vadd.f32 %v10445_v3, %v3645_v60  ;;  %v3978_v56 = vmul.f32 %v10277_v36, %v10455_v63  ;;  %v12278_v5 = vrot.slane %v10419_v45, 2  ;;  %v3941_v29 = vrot.slane %v3937_v41, 2 }
 0x5ea   :  { %v12851_v19 = vstv %s10007_s16  ;;  %v12852_v10 = vrot.slane %v9821_v25, 2  ;;  %v12853_v13 = vrot.slane %v9766_v50, 2  ;;  %v12855_v23 = vrot.slane %v12854_v57, 2  ;;  %v12858_v25 = vld [vmem:[#allocation48_spill] sm:$0xff]  ;;  %v12863_v57 = vld [vmem:[#allocation83_spill] sm:$0xff]  ;;  %s10725_s16 = sld [smem:[#allocation21 + $0x81]] }
 0x5eb   :  { %v10479_v17 = vmul.f32 %v12851_v19, %v10387_v54  ;;  %v12856_v3 = vstv %s9808_s3  ;;  %v12857_v19 = vld [vmem:[#allocation125_spill] sm:$0xff]  ;;  %v10504_v50 = vmul.f32 %v9896_v35, %v3597_v42  ;;  %v12864_v42 = vrot.slane %v10427_v27, 2  ;;  %s10653_s3 = sld [smem:[#allocation21 + $0x1b]] }
 0x5ec   :  { %v3866_v34 = vsel %vm468_vm0, %v12852_v10, %v3865_v55  ;;  %v3847_v62 = vsel %vm468_vm0, %v12853_v13, %v3846_v1  ;;  %v10490_v60 = vsel %vm468_vm0, %v12855_v23, %v4424_v32  ;;  %v10495_v41 = vmul.f32 %v10394_v12, %v12856_v3  ;;  %v12860_v10 = vld [vmem:[#allocation134_spill] sm:$0xff]  ;;  %v12866_v3 = vld [vmem:[#allocation139_spill] sm:$0xff] }
 0x5ed   :  { %3907 = vrot.lane.b32.xlu0 %v12857_v19, %s12413_s8  ;;  %3291 = vrot.lane.b32.xlu1 %v12858_v25, %s12410_s13  ;;  %12859 = vst [vmem:[#allocation141_spill] sm:$0xff] %v10504_v50  ;;  %v12861_v55 = vrot.slane %v12860_v10, 2  ;;  %v12862_v32 = vstv %s9827_s18  ;;  %v3482_v23 = vadd.f32 %v12863_v57, %v3424_v39  ;;  %v3483_v19 = vadd.f32 %v12863_v57, %v3425_v9  ;;  %s10665_s18 = sld [smem:[#allocation21 + $0x6a]] }
 0x5ee   :  { %v10515_v13 = vmul.f32 %v12862_v32, %v10387_v54  ;;  %3386 = vrot.lane.b32.xlu2 %v3383_v61, %s12413_s8  ;;  %v3768_v25 = vadd.f32 %v12864_v42, %v3692_v7  ;;  %v3982_v10 = vadd.f32 %v3978_v56, %v10292_v48  ;;  %v12867_v36 = vrot.slane %v12866_v3, 2  ;;  %v12868_v42 = vld [vmem:[#allocation117_spill] sm:$0xff] }
 0x5ef   :  { %v10509_v1 = vsel %vm468_vm0, %v12861_v55, %v4405_v46  ;;  %v3769_v46 = vadd.f32 %v12278_v5, %v3693_v38  ;;  %v10527_v55 = vpop.permute.xlu1 %3653  ;;  %v3849_v32 = vpop.permute.xlu0 %3848  ;;  %v4519_v9 = vrot.slane %v10479_v17, 2  ;;  %v3611_v57 = vstv %s10453_s27  ;;  %s11551_s27 = sld [smem:[#allocation22]] }
 0x5f0   :  { %12865 = vst [vmem:[#allocation125_spill] sm:$0xff] %v10527_v55  ;;  %v10532_v39 = vsel %vm468_vm0, %v12867_v36, %v3941_v29  ;;  %v10538_v61 = vpop.permute.xlu2 %3886  ;;  %v3989_v7 = vmul.f32 %v10282_v53, %v10406_v26  ;;  %v3854_v48 = vadd.f32 %v3849_v32, %v3768_v25  ;;  %v12280_v56 = vstv %s10461_s14 }
 0x5f1   :  { %v3855_v38 = vadd.f32 %v3849_v32, %v3769_v46  ;;  %v3430_v36 = vmul.f32 %v10385_v14, %v10103_v2  ;;  %v3431_v29 = vmul.f32 %v10116_v15, %v10385_v14  ;;  %v3546_v5 = vadd.f32 %v12868_v42, %v3482_v23 }
 0x5f2   :  { %v3547_v27 = vadd.f32 %v12868_v42, %v3483_v19  ;;  %v10552_v25 = vadd.f32 %v10269_v37, %v3854_v48  ;;  %v4028_v32 = vadd.f32 %v12823_v18, %v3982_v10  ;;  %v10558_v15 = vmul.f32 %v10347_v43, %v3611_v57  ;;  %v12873_v42 = vld [vmem:[#allocation137_spill] sm:$0xff]  ;;  %v12875_v43 = vld [vmem:[#allocation126_spill] sm:$0xff] }
 0x5f3   :  { %v3931_v46 = vadd.f32 %v10269_v37, %v3855_v38  ;;  %v10563_v3 = vmul.f32 %v12280_v56, %v9775_v52  ;;  %v12871_v17 = vstv %s10223_s17  ;;  %v10571_v48 = vstv %s10497_s1  ;;  %v12874_v37 = vld [vmem:[#allocation135_spill] sm:$0xff]  ;;  %s10876_s17 = sld [smem:[#allocation21 + $0x3f]] }
 0x5f4   :  { %12869 = vst [vmem:[#allocation48_spill] sm:$0xff] %v10558_v15  ;;  %v10568_v19 = vmul.f32 %v9896_v35, %v12871_v17  ;;  %v3117_v38 = vadd.f32 %v12874_v37, %v12873_v42  ;;  %v3434_v18 = vadd.f32 %v3430_v36, %v3390_v28  ;;  %v3435_v10 = vadd.f32 %v3431_v29, %v3391_v58  ;;  %v12879_v28 = vld [vmem:[#allocation87_spill] sm:$0xff]  ;;  %v12896_v37 = vld [vmem:[#allocation41_spill] sm:$0xff]  ;;  %s11649_s1 = sld [smem:[#allocation22 + $0x1]] }
 0x5f5   :  { %12870 = vst [vmem:[#allocation134_spill] sm:$0xff] %v10563_v3  ;;  %v3993_v23 = vadd.f32 %v3989_v7, %v3931_v46  ;;  %3926 = vrot.lane.b32.xlu0 %v12875_v43, %s12413_s8  ;;  %3850 = vrot.lane.b32.xlu1 %v3847_v62, %s12410_s13  ;;  %v10580_v52 = vmul.f32 %v10433_v21, %v10181_v4  ;;  %v10583_v7 = vstv %s10517_s2  ;;  %v12877_v17 = vrot.slane %v10504_v50, 1  ;;  %v10591_v58 = vld [vmem:[#allocation5 + $0x70] sm:$0xfe]  ;;  %v12884_v50 = vld [vmem:[#allocation108_spill] sm:$0xff]  ;;  %s5944_s2 = sld [smem:[#allocation22 + $0x3]] }
 0x5f6   :  { %12872 = vst [vmem:[#allocation83_spill] sm:$0xff] %v10568_v19  ;;  %v12878_v56 = vrot.slane %v10415_v20, 1  ;;  %3869 = vrot.lane.b32.xlu2 %v3866_v34, %s12410_s13  ;;  %v12880_v29 = vld [vmem:[#allocation131_spill] sm:$0xff]  ;;  %v4092_v2 = vadd.f32 %v12826_v30, %v4028_v32  ;;  %v10621_v34 = vmul.f32 %v9896_v35, %v3611_v57  ;;  %v10638_v57 = vmul.f32 %v10226_v22, %v10571_v48  ;;  %v12895_v22 = vld [vmem:[#allocation116_spill] sm:$0xff] }
 0x5f7   :  { %12876 = vst [vmem:[#allocation139_spill] sm:$0xff] %v10580_v52  ;;  %v3606_v46 = vadd.f32 %v12877_v17, %v3546_v5  ;;  %v4045_v36 = vadd.f32 %v12879_v28, %v3993_v23  ;;  %v10594_v62 = vadd.f32 %v12880_v29, %v3117_v38  ;;  %v10596_v43 = vpop.permute.xlu1 %4207  ;;  %v10599_v45 = vpop.permute.xlu0 %3701  ;;  %v12885_v5 = vrot.slane %v12884_v50, 2  ;;  %v12886_v38 = vld [vmem:[#allocation118_spill] sm:$0xff]  ;;  %v10616_v50 = vld [vmem:[#allocation5 + $0xb8] sm:$0x1] }
 0x5f8   :  { %v3607_v42 = vadd.f32 %v12878_v56, %v3547_v27  ;;  %12882 = vst [vmem:[#allocation137_spill] sm:$0xff] %v10596_v43  ;;  %v10607_v27 = vstv %s10536_s6  ;;  %v10613_v20 = vpop.permute.xlu2 %3962 }
 0x5f9   :  { %12881 = vst [vmem:[#allocation117_spill] sm:$0xff] %v10594_v62  ;;  %v10604_v17 = vsel %vm468_vm0, %v12885_v5, %v4519_v9  ;;  %v3656_v56 = vadd.f32 %v10527_v55, %v3606_v46  ;;  %v4109_v29 = vadd.f32 %v12886_v38, %v4045_v36  ;;  %v12887_v9 = vld [vmem:[#allocation85_spill] sm:$0xff]  ;;  %v10625_v46 = vmul.f32 %v10607_v27, %v10591_v58 }
 0x5fa   :  { %12883 = vst [vmem:[#allocation126_spill] sm:$0xff] %v10599_v45  ;;  %v3657_v23 = vadd.f32 %v10527_v55, %v3607_v42  ;;  %v3498_v32 = vadd.f32 %v12887_v9, %v3434_v18  ;;  %v3499_v5 = vadd.f32 %v12887_v9, %v3435_v10  ;;  %v12890_v55 = vrot.slane %v10563_v3, 1 }
 0x5fb   :  { %12888 = vst [vmem:[#allocation87_spill] sm:$0xff] %v10621_v34  ;;  %v3704_v36 = vadd.f32 %v10599_v45, %v3656_v56  ;;  %v3988_v18 = vmul.f32 %v10406_v26, %v10455_v63  ;;  %v12891_v10 = vstv %s10053_s30  ;;  %v10645_v42 = vmul.f32 %v10607_v27, %v9780_v59  ;;  %s10836_s30 = sld [smem:[#allocation21 + $0x8b]] }
 0x5fc   :  { %12889 = vst [vmem:[#allocation131_spill] sm:$0xff] %v10625_v46  ;;  %v3705_v30 = vadd.f32 %v10599_v45, %v3657_v23  ;;  %v10632_v62 = vadd.f32 %v12890_v55, %v4109_v29  ;;  %v5055_v9 = vmul.f32 %v12891_v10, %v10616_v50  ;;  %v12892_v56 = vrot.slane %v10568_v19, 1  ;;  %v12894_v45 = vld [vmem:[#allocation107_spill] sm:$0xff] }
 0x5fd   :  { %v12893_v29 = vstv %s9835_s9  ;;  %v3105_v26 = vadd.f32 %v12895_v22, %v12894_v45  ;;  %v3562_v10 = vadd.f32 %v12896_v37, %v3498_v32  ;;  %v3563_v21 = vadd.f32 %v12896_v37, %v3499_v5  ;;  %4409 = vrot.lane.b32.xlu0 %v10509_v1, %s12410_s13  ;;  %3945 = vrot.lane.b32.xlu1 %v10532_v39, %s12413_s8  ;;  %s10683_s9 = sld [smem:[#allocation21 + $0x5d]] }
 0x5fe   :  { %v4156_v23 = vadd.f32 %v12892_v56, %v4092_v2  ;;  %v3956_v3 = vmul.f32 %v10394_v12, %v12893_v29  ;;  %v4211_v45 = vadd.f32 %v10596_v43, %v10354_v33  ;;  %4428 = vrot.lane.b32.xlu2 %v10490_v60, %s12410_s13  ;;  %v12897_v37 = vrot.slane %v10580_v52, 2  ;;  %v12901_v33 = vld [vmem:[#allocation101_spill] sm:$0xff]  ;;  %v12908_v52 = vld [vmem:[#allocation78_spill] sm:$0xff] }
 0x5ff   :  { %v12898_v32 = vrot.slane %v10467_v47, 2  ;;  %v3992_v5 = vadd.f32 %v3988_v18, %v10552_v25  ;;  %v3868_v29 = vpop.permute.xlu1 %3867  ;;  %v10677_v2 = vpop.permute.xlu0 %4255  ;;  %v12900_v55 = vstv %s9856_s21  ;;  %v10686_v60 = vadd.f32 %v12901_v33, %v3105_v26  ;;  %s10706_s21 = sld [smem:[#allocation21 + $0x3c]] }
 0x600   :  { %v4210_v56 = vadd.f32 %v10596_v43, %v4156_v23  ;;  %v3792_v1 = vadd.f32 %v12897_v37, %v3704_v36  ;;  %12899 = vst [vmem:[#allocation108_spill] sm:$0xff] %v10677_v2  ;;  %v4496_v23 = vmul.f32 %v12900_v55, %v10387_v54  ;;  %v10688_v43 = vpop.permute.xlu2 %4231  ;;  %v12904_v18 = vrot.slane %v10495_v41, 2 }
 0x601   :  { %v3793_v39 = vadd.f32 %v12898_v32, %v3705_v30  ;;  %12902 = vst [vmem:[#allocation118_spill] sm:$0xff] %v10686_v60  ;;  %v4259_v30 = vadd.f32 %v10677_v2, %v4211_v45  ;;  %v12905_v32 = vld [vmem:[#allocation115_spill] sm:$0xff]  ;;  %v12907_v19 = vrot.slane %v10515_v13, 2  ;;  %v12909_v26 = vrot.slane %v12908_v52, 2 }
 0x602   :  { %12903 = vst [vmem:[#allocation85_spill] sm:$0xff] %v10688_v43  ;;  %v3873_v36 = vadd.f32 %v3868_v29, %v3792_v1  ;;  %v4258_v25 = vadd.f32 %v10677_v2, %v4210_v56  ;;  %v12906_v55 = vrot.slane %v12905_v32, 2  ;;  %v10704_v1 = vmul.f32 %v10571_v48, %v10181_v4 }
 0x603   :  { %v3874_v37 = vadd.f32 %v3868_v29, %v3793_v39  ;;  %v4482_v33 = vsel %vm468_vm0, %v12909_v26, %v12907_v19  ;;  %v5059_v56 = vrot.slane %v5055_v9, 2  ;;  %v12911_v41 = vrot.slane %v10621_v34, 1  ;;  %v10801_v34 = vld [vmem:[#allocation5 + $0x90] sm:$0x80] }
 0x604   :  { %v3885_v59 = vsel %vm468_vm0, %v12906_v55, %v12904_v18  ;;  %12910 = vst [vmem:[#allocation107_spill] sm:$0xff] %v10704_v1  ;;  %v12912_v39 = vrot.slane %v10558_v15, 1  ;;  %v12913_v13 = vrot.slane %v10625_v46, 2  ;;  %v12914_v19 = vrot.slane %v10645_v42, 2 }
 0x605   :  { %v3620_v45 = vadd.f32 %v12911_v41, %v3562_v10  ;;  %v4044_v4 = vadd.f32 %v12879_v28, %v3992_v5  ;;  %v3960_v32 = vrot.slane %v3956_v3, 2  ;;  %v12915_v10 = vstv %s10461_s14  ;;  %3888 = vrot.lane.b32.xlu0 %v3885_v59, %s12410_s13  ;;  %4485 = vrot.lane.b32.xlu1 %v4482_v33, %s12413_s8  ;;  %s11644_s14 = sld [smem:[#allocation22 + $0x2]] }
 0x606   :  { %v3621_v29 = vadd.f32 %v12912_v39, %v3563_v21  ;;  %v4322_v52 = vadd.f32 %v12913_v13, %v4258_v25  ;;  %v4323_v18 = vadd.f32 %v12914_v19, %v4259_v30  ;;  %v10723_v55 = vmul.f32 %v9896_v35, %v12915_v10  ;;  %4523 = vrot.lane.b32.xlu2 %v10604_v17, %s12413_s8  ;;  %v12921_v19 = vld [vmem:[#allocation63_spill] sm:$0xff] }
 0x607   :  { %v4500_v21 = vrot.slane %v4496_v23, 2  ;;  %v10734_v26 = vstv %s10653_s3  ;;  %v12917_v3 = vrot.slane %v10132_v40, 2  ;;  %v12918_v28 = vstv %s10099_s26  ;;  %v10760_v13 = vpop.permute.xlu1 %3713  ;;  %s10845_s26 = sld [smem:[#allocation21 + $0x1e]] }
 0x608   :  { %12916 = vst [vmem:[#allocation116_spill] sm:$0xff] %v10723_v55  ;;  %v10728_v25 = vadd.f32 %v10379_v0, %v4322_v52  ;;  %v10731_v30 = vadd.f32 %v10379_v0, %v4323_v18  ;;  %v10744_v5 = vmul.f32 %v12918_v28, %v10387_v54  ;;  %v12919_v23 = vstv %s9950_s23  ;;  %v3944_v52 = vpop.permute.xlu0 %3943  ;;  %s10766_s23 = sld [smem:[#allocation21 + $0x6b]] }
 0x609   :  { %v5060_v35 = vsel %vm468_vm0, %v12917_v3, %v5059_v56  ;;  %v10749_v41 = vmul.f32 %v12919_v23, %v10387_v54  ;;  %v5015_v0 = vstv %s10665_s18  ;;  %v12301_v59 = vrot.slane %v10704_v1, 2  ;;  %12920 = vst [vmem:[#allocation41_spill] sm:$0xff] %v10760_v13  ;;  %v10769_v3 = vpop.permute.xlu2 %4785  ;;  %s13207_s18 = sld [smem:[#allocation183_spill]] }
 0x60a   :  { %v3668_v33 = vadd.f32 %v10322_v11, %v3620_v45  ;;  %v3669_v40 = vadd.f32 %v10322_v11, %v3621_v29  ;;  %v3999_v56 = vmul.f32 %v10282_v53, %v10583_v7  ;;  %v4108_v39 = vadd.f32 %v12886_v38, %v4044_v4  ;;  %12923 = vst [vmem:[#allocation101_spill] sm:$0xff] %v10769_v3 }
 0x60b   :  { %v12922_v18 = vrot.slane %v12921_v19, 2  ;;  %v4175_v45 = vstv %s10683_s9  ;;  %v3949_v4 = vadd.f32 %v3944_v52, %v3873_v36  ;;  %v3950_v28 = vadd.f32 %v3944_v52, %v3874_v37 }
 0x60c   :  { %v3716_v29 = vadd.f32 %v10760_v13, %v3668_v33  ;;  %v3717_v38 = vadd.f32 %v10760_v13, %v3669_v40  ;;  %v3998_v23 = vmul.f32 %v10583_v7, %v10455_v63  ;;  %v4538_v17 = vrot.slane %v10744_v5, 2  ;;  %v10848_v13 = vld [vmem:[#allocation2] sm:$0xff] }
 0x60d   :  { %v3961_v10 = vsel %vm468_vm0, %v12922_v18, %v3960_v32  ;;  %v12924_v32 = vld [vmem:[#allocation93_spill] sm:$0xff]  ;;  %v10780_v9 = vmul.f32 %v5015_v0, %v10002_v51  ;;  %v12926_v2 = vrot.slane %v10638_v57, 2  ;;  %v4003_v36 = vadd.f32 %v3999_v56, %v3950_v28  ;;  %v10808_v28 = vld [vmem:[#allocation5 + $0x78] sm:$0xfe]  ;;  %12938 = vst [vmem:[#allocation161_spill] sm:$0xff] %v10848_v13 }
 0x60e   :  { %v12925_v19 = vrot.slane %v12924_v32, 2  ;;  %v3816_v33 = vadd.f32 %v12301_v59, %v3716_v29  ;;  %v10787_v37 = vstv %s10706_s21  ;;  %v10790_v52 = vmul.f32 %v5015_v0, %v10616_v50  ;;  %v6203_v32 = vld [vmem:[#allocation5 + $0x78] sm:$0xff]  ;;  %v12930_v29 = vld [vmem:[#allocation82_spill] sm:$0xff]  ;;  %12931 = vst [vmem:[#allocation93_spill] sm:$0xff] %v10801_v34  ;;  %3964 = vrot.lane.b32.xlu0 %v3961_v10, %s12413_s8  ;;  %v12934_v10 = vld [vmem:[#allocation89_spill] sm:$0xff]  ;;  %5063 = vrot.lane.b32.xlu2 %v5060_v35, %s12413_s8 }
 0x60f   :  { %v3817_v40 = vadd.f32 %v12926_v2, %v3717_v38  ;;  %12927 = vst [vmem:[#allocation115_spill] sm:$0xff] %v10787_v37  ;;  %v10792_v46 = vmul.f32 %v6203_v32, %v4175_v45  ;;  %v12306_v5 = vstv %s10725_s16  ;;  %v4061_v59 = vadd.f32 %v12930_v29, %v4003_v36 }
 0x610   :  { %v4501_v18 = vsel %vm468_vm0, %v12925_v19, %v4500_v21  ;;  %v10795_v21 = vstv %s10716_s12  ;;  %v3892_v19 = vadd.f32 %v10538_v61, %v3816_v33  ;;  %v12932_v2 = vrot.slane %v10723_v55, 1  ;;  %v4484_v36 = vpop.permute.xlu0 %4483 }
 0x611   :  { %12928 = vst [vmem:[#allocation78_spill] sm:$0xff] %v10792_v46  ;;  %v3893_v1 = vadd.f32 %v10538_v61, %v3817_v40  ;;  %v4002_v0 = vadd.f32 %v3998_v23, %v3949_v4  ;;  %4504 = vrot.lane.b32.xlu1 %v4501_v18, %s12413_s8  ;;  %v4443_v38 = vrot.slane %v10749_v41, 2  ;;  %v10812_v61 = vmul.f32 %v10808_v28, %v10787_v37  ;;  %v10826_v18 = vpop.permute.xlu1 %4267 }
 0x612   :  { %12929 = vst [vmem:[#allocation63_spill] sm:$0xff] %v10795_v21  ;;  %v4170_v56 = vadd.f32 %v12932_v2, %v4108_v39  ;;  %v4009_v33 = vmul.f32 %v10282_v53, %v10795_v21  ;;  %v10817_v39 = vadd.f32 %v10613_v20, %v3892_v19  ;;  %v4125_v23 = vadd.f32 %v12934_v10, %v4061_v59 }
 0x613   :  { %12933 = vst [vmem:[#allocation82_spill] sm:$0xff] %v10812_v61  ;;  %v3969_v4 = vadd.f32 %v10613_v20, %v3893_v1  ;;  %v10824_v41 = vmul.f32 %v10787_v37, %v10591_v58  ;;  %v4556_v40 = vmul.f32 %v10734_v26, %v10801_v34  ;;  %v5091_v53 = vstv %s10766_s23  ;;  %v10838_v20 = vpop.permute.xlu2 %4445 }
 0x614   :  { %12936 = vst [vmem:[#allocation159_spill] sm:$0xff] %v10826_v18  ;;  %v10834_v2 = vmul.f32 %v6203_v32, %v12306_v5  ;;  %v4489_v1 = vadd.f32 %v4484_v36, %v10728_v25  ;;  %v4490_v35 = vadd.f32 %v4484_v36, %v10731_v30  ;;  %v4222_v59 = vadd.f32 %v10459_v24, %v4170_v56  ;;  %v10859_v30 = vld [vmem:[#allocation5 + $0x98] sm:$0x80] }
 0x615   :  { %12935 = vst [vmem:[#allocation89_spill] sm:$0xff] %v10824_v41  ;;  %v4223_v55 = vadd.f32 %v10459_v24, %v10632_v62  ;;  %v4060_v19 = vadd.f32 %v12930_v29, %v4002_v0  ;;  %v10851_v32 = vmul.f32 %v10848_v13, %v4175_v45  ;;  %v12940_v5 = vrot.slane %v10792_v46, 1  ;;  %v12944_v46 = vld [vmem:[#allocation40_spill] sm:$0xff] }
 0x616   :  { %12937 = vst [vmem:[#allocation160_spill] sm:$0xff] %v10834_v2  ;;  %v4013_v25 = vadd.f32 %v4009_v33, %v3969_v4  ;;  %v4557_v62 = vmul.f32 %v10859_v30, %v10734_v26  ;;  %v4270_v29 = vadd.f32 %v10826_v18, %v4222_v59  ;;  %v12942_v45 = vrot.slane %v10196_v8, 2  ;;  %v12943_v4 = vld [vmem:[#allocation84_spill] sm:$0xff] }
 0x617   :  { %12939 = vst [vmem:[#allocation162_spill] sm:$0xff] %v10851_v32  ;;  %v10855_v11 = vadd.f32 %v12940_v5, %v4125_v23  ;;  %v4271_v0 = vadd.f32 %v10826_v18, %v4223_v55  ;;  %v5020_v5 = vrot.slane %v10780_v9, 2  ;;  %v5092_v33 = vmul.f32 %v5091_v53, %v10002_v51 }
 0x618   :  { %12941 = vst [vmem:[#allocation163_spill] sm:$0xff] %v10859_v30  ;;  %v4539_v36 = vsel %vm468_vm0, %v12942_v45, %v4538_v17  ;;  %v4077_v23 = vadd.f32 %v12943_v4, %v4013_v25  ;;  %v12945_v24 = vrot.slane %v12944_v46, 2  ;;  %v12314_v56 = vrot.slane %v10812_v61, 2 }
 0x619   :  { %v12313_v55 = vrot.slane %v10834_v2, 1  ;;  %v5093_v8 = vmul.f32 %v5091_v53, %v10616_v50  ;;  %v4124_v17 = vadd.f32 %v12934_v10, %v4060_v19  ;;  %v4560_v9 = vadd.f32 %v4556_v40, %v4489_v1  ;;  %5023 = vrot.lane.b32.xlu1 %v5020_v5, %s12410_s13  ;;  %4542 = vrot.lane.b32.xlu2 %v4539_v36, %s12413_s8  ;;  %v4427_v19 = vpop.permute.xlu1 %4426  ;;  %v4503_v1 = vpop.permute.xlu0 %4502 }
 0x61a   :  { %v4444_v15 = vsel %vm468_vm0, %v12945_v24, %v4443_v38  ;;  %v12316_v51 = vrot.slane %v10851_v32, 1  ;;  %v12946_v24 = vld [vmem:[#allocation122_spill] sm:$0xff]  ;;  %v4561_v38 = vadd.f32 %v4557_v62, %v4490_v35  ;;  %v12947_v53 = vrot.slane %v10824_v41, 2 }
 0x61b   :  { %4447 = vrot.lane.b32.xlu0 %v4444_v15, %s12410_s13  ;;  %v4141_v46 = vadd.f32 %v12946_v24, %v4077_v23  ;;  %v4347_v40 = vadd.f32 %v12314_v56, %v4271_v0  ;;  %v5021_v15 = vrot.slane %v10790_v52, 2  ;;  %v5096_v59 = vrot.slane %v5092_v33, 2 }
 0x61c   :  { %v4346_v10 = vadd.f32 %v12947_v53, %v4270_v29  ;;  %v4817_v35 = vstv %s10836_s30  ;;  %v12948_v62 = vstv %s9956_s22  ;;  %v10903_v29 = vpop.permute.xlu2 %4291  ;;  %v5097_v52 = vrot.slane %v5093_v8, 2  ;;  %v12951_v53 = vld [vmem:[#allocation119_spill] sm:$0xff]  ;;  %s10912_s22 = sld [smem:[#allocation21 + $0x8c]] }
 0x61d   :  { %v10895_v25 = vadd.f32 %v12313_v55, %v4141_v46  ;;  %v4979_v45 = vmul.f32 %v12948_v62, %v10616_v50  ;;  %12950 = vst [vmem:[#allocation84_spill] sm:$0xff] %v10903_v29  ;;  %v4433_v36 = vadd.f32 %v4427_v19, %v4347_v40  ;;  %v4725_v23 = vstv %s10845_s26 }
 0x61e   :  { %v4432_v0 = vadd.f32 %v4427_v19, %v4346_v10  ;;  %v4606_v33 = vadd.f32 %v12951_v53, %v4560_v9  ;;  %v4184_v46 = vadd.f32 %v12316_v51, %v4124_v17  ;;  %v10910_v55 = vmul.f32 %v10848_v13, %v4725_v23  ;;  %v10926_v9 = vld [vmem:[#allocation5 + $0xa8] sm:$0x7f] }
 0x61f   :  { %v10915_v62 = vstv %s10857_s11  ;;  %v4607_v56 = vadd.f32 %v12951_v53, %v4561_v38  ;;  %v10920_v10 = vadd.f32 %v4503_v1, %v4433_v36  ;;  %v12955_v17 = vstv %s12949_s5  ;;  %v10933_v51 = vld [vmem:[#allocation5 + $0xa8] sm:$0xff] }
 0x620   :  { %12952 = vst [vmem:[#allocation40_spill] sm:$0xff] %v10910_v55  ;;  %v10918_v2 = vadd.f32 %v4503_v1, %v4432_v0  ;;  %v10924_v8 = vmul.f32 %v10915_v62, %v10591_v58  ;;  %v4709_v40 = vmul.f32 %v10926_v9, %v12955_v17  ;;  %v4008_v19 = vmul.f32 %v10795_v21, %v10455_v63  ;;  %v12959_v17 = vld [vmem:[#allocation120_spill] sm:$0xff] }
 0x621   :  { %12953 = vst [vmem:[#allocation122_spill] sm:$0xff] %v10915_v62  ;;  %v4818_v38 = vmul.f32 %v10933_v51, %v4817_v35  ;;  %v4983_v0 = vrot.slane %v4979_v45, 2  ;;  %v10937_v1 = vstv %s10876_s17  ;;  %v5022_v36 = vsel %vm468_vm0, %v5020_v5, %v5021_v15  ;;  %5099 = vrot.lane.b32.xlu1 %v5096_v59, %s12413_s8  ;;  %v10963_v18 = vpop.permute.xlu1 %4279 }
 0x622   :  { %12954 = vst [vmem:[#allocation119_spill] sm:$0xff] %v10924_v8  ;;  %v10941_v53 = vmul.f32 %v10933_v51, %v4725_v23  ;;  %v10945_v41 = vmul.f32 %v10808_v28, %v10915_v62  ;;  %v4670_v32 = vadd.f32 %v12959_v17, %v4606_v33  ;;  %v5098_v63 = vsel %vm468_vm0, %v5096_v59, %v5097_v52  ;;  %v10960_v33 = vld [vmem:[#allocation5 + $0xa0] sm:$0xfe]  ;;  %v10966_v52 = vpop.permute.xlu0 %4243 }
 0x623   :  { %12956 = vst [vmem:[#allocation164_spill] sm:$0xff] %v10937_v1  ;;  %4714 = vrot.lane.b32.xlu0 %v4709_v40, %s12413_s8  ;;  %v10953_v45 = vstv %s10885_s15  ;;  %v4671_v5 = vadd.f32 %v12959_v17, %v4607_v56  ;;  %5025 = vrot.lane.b32.xlu2 %v5022_v36, %s12410_s13  ;;  %v4234_v15 = vadd.f32 %v10688_v43, %v4184_v46  ;;  %v4820_v35 = vrot.slane %v4818_v38, 1  ;;  %v12964_v56 = vld [vmem:[#allocation106_spill] sm:$0xff] }
 0x624   :  { %12957 = vst [vmem:[#allocation165_spill] sm:$0xff] %v10941_v53  ;;  %v4235_v23 = vadd.f32 %v10688_v43, %v10855_v11  ;;  %v4012_v59 = vadd.f32 %v4008_v19, %v10817_v39  ;;  %v12965_v17 = vrot.slane %v12964_v56, 2  ;;  %v5034_v46 = vstv %s10901_s0  ;;  %v10972_v60 = vpop.permute.xlu2 %4845 }
 0x625   :  { %12958 = vst [vmem:[#allocation166_spill] sm:$0xff] %v10945_v41  ;;  %v4282_v11 = vadd.f32 %v10963_v18, %v4234_v15  ;;  %v12332_v43 = vrot.slane %v10941_v53, 1  ;;  %v12967_v19 = vrot.slane %v10910_v55, 1  ;;  %v10982_v56 = vmul.f32 %v10953_v45, %v10960_v33 }
 0x626   :  { %12960 = vst [vmem:[#allocation120_spill] sm:$0xff] %v10953_v45  ;;  %v4984_v36 = vsel %vm468_vm0, %v12965_v17, %v4983_v0  ;;  %v4283_v40 = vadd.f32 %v10963_v18, %v4235_v23  ;;  %v10984_v0 = vld [vmem:[#allocation5 + $0xa8] sm:$0xfe]  ;;  %v4865_v17 = vstv %s10912_s22  ;;  %v12971_v39 = vrot.slane %v10924_v8, 2 }
 0x627   :  { %12961 = vst [vmem:[#allocation167_spill] sm:$0xff] %v10960_v33  ;;  %v4734_v38 = vadd.f32 %v12967_v19, %v4670_v32  ;;  %v10988_v15 = vmul.f32 %v10984_v0, %v10953_v45  ;;  %v4735_v23 = vadd.f32 %v12332_v43, %v4671_v5  ;;  %v12972_v32 = vrot.slane %v10945_v41, 2  ;;  %v12985_v41 = vld [vmem:[#allocation97_spill] sm:$0xff] }
 0x628   :  { %12962 = vst [vmem:[#allocation168_spill] sm:$0xff] %v10963_v18  ;;  %v4370_v55 = vadd.f32 %v12971_v39, %v4282_v11  ;;  %v3129_v18 = vadd.f32 %v10255_v31, %v10221_v49  ;;  %v4076_v45 = vadd.f32 %v12943_v4, %v4012_v59  ;;  %v12973_v62 = vstv %s10725_s16  ;;  %v12976_v11 = vld [vmem:[#allocation103_spill] sm:$0xff] }
 0x629   :  { %12963 = vst [vmem:[#allocation169_spill] sm:$0xff] %v10966_v52  ;;  %v4371_v19 = vadd.f32 %v12972_v32, %v4283_v40  ;;  %v11007_v61 = vmul.f32 %v10848_v13, %v12973_v62  ;;  %v12975_v53 = vstv %s10046_s25  ;;  %v3141_v39 = vadd.f32 %v10374_v16, %v12976_v11  ;;  %4987 = vrot.lane.b32.xlu1 %v4984_v36, %s12410_s13  ;;  %s5931_s25 = sld [smem:[#allocation21 + $0x45]] }
 0x62a   :  { %12966 = vst [vmem:[#allocation106_spill] sm:$0xff] %v10972_v60  ;;  %v4458_v5 = vmul.f32 %v12975_v53, %v10387_v54  ;;  %v4566_v40 = vmul.f32 %v10937_v1, %v10801_v34  ;;  %v4567_v49 = vmul.f32 %v10859_v30, %v10937_v1  ;;  %v4451_v4 = vadd.f32 %v10838_v20, %v4370_v55  ;;  %v13029_v34 = vld [vmem:[#allocation127_spill] sm:$0xff] }
 0x62b   :  { %12968 = vst [vmem:[#allocation170_spill] sm:$0xff] %v10982_v56  ;;  %v4452_v59 = vadd.f32 %v10838_v20, %v4371_v19  ;;  %4821 = vrot.lane.b32.xlu0 %v4820_v35, %s12410_s13  ;;  %v11026_v53 = vmul.f32 %v10984_v0, %v5034_v46  ;;  %v5036_v32 = vmul.f32 %v5034_v46, %v10616_v50  ;;  %v12977_v20 = vld [vmem:[#allocation128_spill] sm:$0xff]  ;;  %v12978_v35 = vld [vmem:[#allocation130_spill] sm:$0xff]  ;;  %v11041_v46 = vpop.permute.xlu1 %4833 }
 0x62c   :  { %12969 = vst [vmem:[#allocation171_spill] sm:$0xff] %v10984_v0  ;;  %v4866_v11 = vmul.f32 %v10933_v51, %v4865_v17  ;;  %5101 = vrot.lane.b32.xlu2 %v5098_v63, %s12413_s8  ;;  %v4788_v43 = vadd.f32 %v10769_v3, %v4734_v38  ;;  %v4789_v55 = vadd.f32 %v10769_v3, %v4735_v23  ;;  %v4986_v38 = vpop.permute.xlu0 %4985  ;;  %v4462_v17 = vrot.slane %v4458_v5, 2 }
 0x62d   :  { %12970 = vst [vmem:[#allocation172_spill] sm:$0xff] %v10988_v15  ;;  %v11034_v19 = vadd.f32 %v12977_v20, %v3141_v39  ;;  %v11037_v36 = vadd.f32 %v12978_v35, %v3129_v18  ;;  %v4140_v62 = vadd.f32 %v12946_v24, %v4076_v45  ;;  %v4570_v23 = vadd.f32 %v4566_v40, %v10918_v2  ;;  %v11046_v20 = vpop.permute.xlu2 %4809 }
 0x62e   :  { %12974 = vst [vmem:[#allocation173_spill] sm:$0xff] %v11007_v61  ;;  %v4571_v39 = vadd.f32 %v4567_v49, %v10920_v10  ;;  %v4836_v18 = vadd.f32 %v11041_v46, %v4788_v43  ;;  %v4837_v24 = vadd.f32 %v11041_v46, %v4789_v55  ;;  %v5040_v35 = vrot.slane %v5036_v32, 2 }
 0x62f   :  { %12979 = vst [vmem:[#allocation103_spill] sm:$0xff] %v11041_v46  ;;  %v4868_v8 = vrot.slane %v4866_v11, 1  ;;  %v4739_v3 = vstv %s10991_s4  ;;  %v12981_v63 = vrot.slane %v10982_v56, 2  ;;  %v12982_v5 = vrot.slane %v10988_v15, 2 }
 0x630   :  { %12980 = vst [vmem:[#allocation128_spill] sm:$0xff] %v11046_v20  ;;  %v12983_v10 = vstv %s10087_s10  ;;  %v12984_v20 = vrot.slane %v11007_v61, 1  ;;  %v12986_v55 = vrot.slane %v12985_v41, 2  ;;  %v11066_v32 = vmul.f32 %v10848_v13, %v4739_v3  ;;  %s5908_s10 = sld [smem:[#allocation21 + $0x63]] }
 0x631   :  { %v4900_v30 = vadd.f32 %v12981_v63, %v4836_v18  ;;  %v4901_v2 = vadd.f32 %v12982_v5, %v4837_v24  ;;  %v4998_v49 = vmul.f32 %v12983_v10, %v10616_v50  ;;  %v11069_v11 = vstv %s11012_s28  ;;  %v12988_v63 = vld [vmem:[#allocation86_spill] sm:$0xff]  ;;  %s13208_s28 = sld [smem:[#allocation184_spill]] }
 0x632   :  { %v4198_v43 = vadd.f32 %v12984_v20, %v4140_v62  ;;  %v4463_v45 = vsel %vm468_vm0, %v12986_v55, %v4462_v17  ;;  %12987 = vst [vmem:[#allocation130_spill] sm:$0xff] %v11066_v32  ;;  %v4622_v18 = vadd.f32 %v12988_v63, %v4570_v23  ;;  %v4623_v24 = vadd.f32 %v12988_v63, %v4571_v39 }
 0x633   :  { %v4991_v5 = vadd.f32 %v4986_v38, %v4900_v30  ;;  %v4992_v40 = vadd.f32 %v4986_v38, %v4901_v2  ;;  %v12989_v62 = vrot.slane %v11026_v53, 2  ;;  %4869 = vrot.lane.b32.xlu0 %v4868_v8, %s12413_s8  ;;  %4466 = vrot.lane.b32.xlu1 %v4463_v45, %s12410_s13  ;;  %v11081_v17 = vmul.f32 %v11069_v11, %v10591_v58  ;;  %v4522_v38 = vpop.permute.xlu1 %4521 }
 0x634   :  { %v4246_v10 = vadd.f32 %v10966_v52, %v4198_v43  ;;  %v4247_v23 = vadd.f32 %v10966_v52, %v10895_v25  ;;  %v11087_v30 = vmul.f32 %v10933_v51, %v4739_v3  ;;  %v12339_v39 = vrot.slane %v11066_v32, 1  ;;  %v11090_v20 = vpop.permute.xlu0 %4797  ;;  %v12995_v25 = vld [vmem:[#allocation91_spill] sm:$0xff] }
 0x635   :  { %v5041_v41 = vsel %vm468_vm0, %v12989_v62, %v5040_v35  ;;  %12990 = vst [vmem:[#allocation97_spill] sm:$0xff] %v11081_v17  ;;  %v12993_v8 = vstv %s10999_s19  ;;  %v5002_v58 = vrot.slane %v4998_v49, 2  ;;  %v11099_v35 = vmul.f32 %v10808_v28, %v11069_v11 }
 0x636   :  { %5044 = vrot.lane.b32.xlu2 %v5041_v41, %s12410_s13  ;;  %12991 = vst [vmem:[#allocation86_spill] sm:$0xff] %v11087_v30  ;;  %v11095_v45 = vmul.f32 %v10984_v0, %v12993_v8  ;;  %v4686_v2 = vadd.f32 %v12995_v25, %v4622_v18  ;;  %v4687_v3 = vadd.f32 %v12995_v25, %v4623_v24  ;;  %v11109_v41 = vpop.permute.xlu2 %3348  ;;  %v12340_v49 = vrot.slane %v11087_v30, 1 }
 0x637   :  { %12992 = vst [vmem:[#allocation174_spill] sm:$0xff] %v11090_v20  ;;  %v11103_v43 = vadd.f32 %v4522_v38, %v4451_v4  ;;  %v11105_v55 = vadd.f32 %v4522_v38, %v4452_v59  ;;  %v4294_v63 = vadd.f32 %v10903_v29, %v4246_v10  ;;  %v4295_v8 = vadd.f32 %v10903_v29, %v4247_v23 }
 0x638   :  { %12994 = vst [vmem:[#allocation175_spill] sm:$0xff] %v11099_v35  ;;  %v12341_v28 = vrot.slane %v11095_v45, 2  ;;  %v12998_v18 = vrot.slane %v10179_v6, 2  ;;  %v12999_v4 = vstv %s10159_s7  ;;  %v4748_v10 = vadd.f32 %v12339_v39, %v4686_v2  ;;  %s5909_s7 = sld [smem:[#allocation21 + $0x87]] }
 0x639   :  { %12996 = vst [vmem:[#allocation91_spill] sm:$0xff] %v11103_v43  ;;  %v5074_v59 = vmul.f32 %v12999_v4, %v10616_v50  ;;  %v4749_v38 = vadd.f32 %v12340_v49, %v4687_v3  ;;  %v12342_v25 = vrot.slane %v11099_v35, 2  ;;  %v11125_v62 = vstv %s5931_s25 }
 0x63a   :  { %12997 = vst [vmem:[#allocation176_spill] sm:$0xff] %v11105_v55  ;;  %v5003_v24 = vsel %vm468_vm0, %v12998_v18, %v5002_v58  ;;  %v13001_v6 = vrot.slane %v11081_v17, 2  ;;  %v4800_v58 = vadd.f32 %v11090_v20, %v4748_v10  ;;  %v11139_v18 = vmul.f32 %v11125_v62, %v10960_v33  ;;  %v6211_v33 = vld [vmem:[#allocation5 + $0x78] sm:$0x7f]  ;;  %v13023_v55 = vld [vmem:[#allocation147_spill] sm:$0xff] }
 0x63b   :  { %13000 = vst [vmem:[#allocation177_spill] sm:$0xff] %v11125_v62  ;;  %5118 = vrot.lane.b32.xlu0 %v12341_v28, %s12413_s8  ;;  %5006 = vrot.lane.b32.xlu1 %v5003_v24, %s12410_s13  ;;  %v4801_v2 = vadd.f32 %v11090_v20, %v4749_v38  ;;  %v4395_v3 = vadd.f32 %v12342_v25, %v4295_v8  ;;  %v5062_v4 = vpop.permute.xlu1 %5061  ;;  %v5078_v49 = vrot.slane %v5074_v59, 2  ;;  %v13006_v59 = vld [vmem:[#allocation145_spill] sm:$0xff]  ;;  %v13021_v35 = vrot.slane %v11095_v45, 2 }
 0x63c   :  { %v4394_v23 = vadd.f32 %v13001_v6, %v4294_v63  ;;  %13002 = vst [vmem:[#allocation178_spill] sm:$0xff] %v11139_v18  ;;  %v4465_v39 = vpop.permute.xlu0 %4464  ;;  %v11143_v24 = vmul.f32 %v10984_v0, %v11125_v62  ;;  %v11145_v28 = vadd.f32 %v5062_v4, %v4991_v5  ;;  %v11147_v63 = vadd.f32 %v5062_v4, %v4992_v40 }
 0x63d   :  { %v4471_v38 = vadd.f32 %v4465_v39, %v4395_v3  ;;  %v4848_v6 = vadd.f32 %v10972_v60, %v4800_v58  ;;  %v4849_v8 = vadd.f32 %v10972_v60, %v4801_v2  ;;  %v12347_v25 = vrot.slane %v11139_v18, 2  ;;  %v11163_v2 = vld [vmem:[#allocation5 + $0x20] sm:$0x1]  ;;  %v13012_v18 = vld [vmem:[#allocation100_spill] sm:$0xff] }
 0x63e   :  { %13003 = vst [vmem:[#allocation179_spill] sm:$0xff] %v11143_v24  ;;  %v4470_v10 = vadd.f32 %v4465_v39, %v4394_v23  ;;  %v11152_v32 = vpop.permute.xlu2 %3831  ;;  %v13007_v17 = vrot.slane %v13006_v59, 2  ;;  %v12349_v5 = vrot.slane %v11143_v24, 2  ;;  %v13010_v59 = vstv %s10999_s19 }
 0x63f   :  { %13004 = vst [vmem:[#allocation180_spill] sm:$0xff] %v11145_v28  ;;  %v4924_v40 = vadd.f32 %v12347_v25, %v4848_v6  ;;  %v13011_v6 = vld [vmem:[#allocation98_spill] sm:$0xff]  ;;  %v4307_v61 = vmul.f32 %v10607_v27, %v10387_v54  ;;  %v13020_v28 = vld [vmem:[#allocation113_spill] sm:$0xff]  ;;  %v11219_v15 = vmul.f32 %v6211_v33, %v13023_v55  ;;  %v4331_v45 = vmul.f32 %v10787_v37, %v10387_v54 }
 0x640   :  { %13005 = vst [vmem:[#allocation181_spill] sm:$0xff] %v11147_v63  ;;  %v5079_v20 = vsel %vm468_vm0, %v13007_v17, %v5078_v49  ;;  %v4925_v39 = vadd.f32 %v12349_v5, %v4849_v8  ;;  %v3174_v25 = vmul.f32 %v13011_v6, %v11163_v2  ;;  %v3729_v8 = vmul.f32 %v10394_v12, %v13012_v18  ;;  %v13014_v6 = vld [vmem:[#allocation148_spill] sm:$0xff] }
 0x641   :  { %v13013_v5 = vrot.slane %v11026_v53, 2  ;;  %v13017_v63 = vld [vmem:[#allocation156_spill] sm:$0xff]  ;;  %v11242_v54 = vmul.f32 %v6211_v33, %v10583_v7  ;;  %v11264_v37 = vmul.f32 %v6211_v33, %v10795_v21 }
 0x642   :  { %v3777_v56 = vmul.f32 %v10394_v12, %v13017_v63 }
 0x643   :  { %5082 = vrot.lane.b32.xlu1 %v5079_v20, %s12413_s8  ;;  %v4541_v23 = vpop.permute.xlu1 %4540  ;;  %v5112_v20 = vmul.f32 %v13010_v59, %v10616_v50 }
 0x644   :  { %v5005_v58 = vpop.permute.xlu0 %5004  ;;  %v11165_v3 = vadd.f32 %v4541_v23, %v4470_v10  ;;  %v11167_v4 = vadd.f32 %v4541_v23, %v4471_v38  ;;  %v3753_v38 = vmul.f32 %v10394_v12, %v10392_v44  ;;  %v11187_v23 = vstv %s5909_s7 }
 0x645   :  { %v5010_v17 = vadd.f32 %v5005_v58, %v4924_v40  ;;  %v5011_v49 = vadd.f32 %v5005_v58, %v4925_v39  ;;  %v5116_v10 = vrot.slane %v5112_v20, 2  ;;  %v11183_v40 = vstv %s5908_s10  ;;  %v6210_v58 = vld [vmem:[#allocation5 + $0x48] sm:$0x7f] }
 0x646   :  { %13008 = vst [vmem:[#allocation145_spill] sm:$0xff] %v11165_v3  ;;  %v11185_v39 = vpop.permute.xlu2 %3310  ;;  %v11190_v59 = vmul.f32 %v6210_v58, %v10385_v14  ;;  %v13016_v20 = vld [vmem:[#allocation64_spill] sm:$0xff]  ;;  %v11211_v30 = vmul.f32 %v6210_v58, %v13020_v28  ;;  %v3762_v13 = vrot.slane %v3753_v38, 2  ;;  %v3786_v43 = vrot.slane %v3777_v56, 2 }
 0x647   :  { %13009 = vst [vmem:[#allocation182_spill] sm:$0xff] %v11167_v4  ;;  %v11193_v4 = vmul.f32 %v6210_v58, %v13014_v6  ;;  %v11198_v60 = vmul.f32 %v6210_v58, %v13016_v20  ;;  %v5117_v52 = vsel %vm468_vm0, %v13021_v35, %v5116_v10  ;;  %v3801_v58 = vmul.f32 %v10394_v12, %v10571_v48  ;;  %v13026_v35 = vld [vmem:[#allocation35_spill] sm:$0xff] }
 0x648   :  { %v13027_v10 = vrot.slane %v13026_v35, 2  ;;  %v4316_v38 = vrot.slane %v4307_v61, 2  ;;  %v11246_v35 = vmul.f32 %v10926_v9, %v10734_v26  ;;  %v13033_v61 = vld [vmem:[#allocation154_spill] sm:$0xff]  ;;  %v11329_v21 = vmul.f32 %v10926_v9, %v11183_v40 }
 0x64a   :  { %13032 = vst [vmem:[#allocation64_spill] sm:$0xff] %v11246_v35  ;;  %v4340_v35 = vrot.slane %v4331_v45, 2 }
 0x64b   :  { %5042 = vrot.lane.b32.xlu1 %v13013_v5, %s12410_s13  ;;  %v11195_v3 = vpop.permute.xlu1 %4857  ;;  %v3182_v5 = vrot.slane %v3174_v25, 2  ;;  %s11204_s13 = sld [smem:[#allocation21 + $0x69]]  ;;  %v3738_v25 = vrot.slane %v3729_v8, 2  ;;  %v12372_v8 = vstv %s11172_s24 }
 0x64c   :  { %13015 = vst [vmem:[#allocation98_spill] sm:$0xff] %v11195_v3  ;;  %v5081_v53 = vpop.permute.xlu0 %5080  ;;  %v13022_v3 = vld [vmem:[#allocation123_spill] sm:$0xff] }
 0x64d   :  { %v11206_v29 = vadd.f32 %v5081_v53, %v5010_v17  ;;  %v11208_v24 = vadd.f32 %v5081_v53, %v5011_v49  ;;  %v3150_v46 = vmul.f32 %v13022_v3, %v11163_v2  ;;  %v13024_v17 = vld [vmem:[#allocation44_spill] sm:$0xff]  ;;  %v3183_v3 = vsel %vm468_vm0, %v13027_v10, %v3182_v5  ;;  %13037 = vst [vmem:[#allocation123_spill] sm:$0xff] %v11264_v37 }
 0x64e   :  { %v13028_v53 = vld [vmem:[#allocation52_spill] sm:$0xff]  ;;  %v13034_v5 = vrot.slane %v13033_v61, 2  ;;  %v3387_v45 = vpop.permute.xlu2 %3386  ;;  %13053 = vst [vmem:[#allocation44_spill] sm:$0xff] %v11329_v21 }
 0x64f   :  { %13018 = vst [vmem:[#allocation100_spill] sm:$0xff] %v11206_v29  ;;  %v13025_v29 = vld [vmem:[#allocation135_spill] sm:$0xff]  ;;  %v3158_v56 = vrot.slane %v3150_v46, 2  ;;  %v13038_v46 = vld [vmem:[#allocation42_spill] sm:$0xff] }
 0x650   :  { %13019 = vst [vmem:[#allocation148_spill] sm:$0xff] %v11208_v24  ;;  %v3116_v49 = vadd.f32 %v13025_v29, %v13024_v17  ;;  %v11232_v24 = vmul.f32 %v6211_v33, %v13028_v53  ;;  %v3222_v29 = vmul.f32 %v13029_v34, %v11163_v2  ;;  %v13030_v17 = vld [vmem:[#allocation144_spill] sm:$0xff]  ;;  %v11252_v34 = vsel %vm468_vm0, %v13034_v5, %v3762_v13 }
 0x651   :  { %v13031_v62 = vrot.slane %v13030_v17, 2  ;;  %v3810_v17 = vrot.slane %v3801_v58, 2  ;;  %v3104_v13 = vadd.f32 %v12895_v22, %v13038_v46  ;;  %v11281_v58 = vstv %s11204_s13  ;;  %v13042_v46 = vld [vmem:[#allocation117_spill] sm:$0xff]  ;;  %s6420_s13 = smov [#allocation25]  }
 0x652   :  { %v3192_v10 = vadd.f32 %v3183_v3, %v3116_v49  ;;  %13041 = vst [vmem:[#allocation147_spill] sm:$0xff] %v11281_v58  ;;  %v3230_v33 = vrot.slane %v3222_v29, 2 }
 0x653   :  { %v11239_v12 = vsel %vm468_vm0, %v13031_v62, %v3738_v25  ;;  %5120 = vrot.lane.b32.xlu1 %v5117_v52, %s12413_s8  ;;  %v11256_v62 = vmul.f32 %v10926_v9, %v10937_v1  ;;  %v11261_v25 = vmul.f32 %v10933_v51, %v12372_v8  ;;  %v11266_v52 = vld [vmem:[#allocation5 + $0x40] sm:$0x7f]  ;;  %v3254_v61 = vpop.permute.xlu1 %3253  ;;  %v13039_v1 = vrot.slane %v10467_v47, 2  ;;  %s11294_s8 = sld [smem:[#allocation21 + $0x8a]] }
 0x654   :  { %v3273_v5 = vpop.permute.xlu0 %3272  ;;  %v13040_v8 = vrot.slane %v10645_v42, 2  ;;  %v3412_v3 = vmul.f32 %v13014_v6, %v11266_v52  ;;  %v3317_v47 = vadd.f32 %v11185_v39, %v11034_v19  ;;  %v13047_v19 = vld [vmem:[#allocation82_spill] sm:$0xff] }
 0x655   :  { %13035 = vst [vmem:[#allocation156_spill] sm:$0xff] %v11256_v62  ;;  %v11273_v62 = vsel %vm468_vm0, %v13039_v1, %v3786_v43  ;;  %v3278_v22 = vadd.f32 %v3273_v5, %v3192_v10  ;;  %v3279_v37 = vadd.f32 %v3273_v5, %v13042_v46  ;;  %v13043_v1 = vld [vmem:[#allocation104_spill] sm:$0xff]  ;;  %v13046_v10 = vrot.slane %v10638_v57, 2  ;;  %v13050_v57 = vld [vmem:[#allocation151_spill] sm:$0xff] }
 0x656   :  { %13036 = vst [vmem:[#allocation113_spill] sm:$0xff] %v11261_v25  ;;  %v11278_v49 = vsel %vm468_vm0, %v13040_v8, %v4316_v38  ;;  %v13044_v43 = vrot.slane %v13043_v1, 2  ;;  %v13045_v8 = vld [vmem:[#allocation121_spill] sm:$0xff]  ;;  %v13048_v46 = vrot.slane %v13047_v19, 2  ;;  %v13049_v1 = vld [vmem:[#allocation36_spill] sm:$0xff] }
 0x657   :  { %v3198_v38 = vmul.f32 %v13045_v8, %v11163_v2  ;;  %v3354_v29 = vadd.f32 %v11109_v41, %v3278_v22  ;;  %v3355_v6 = vadd.f32 %v11109_v41, %v3279_v37  ;;  %v11301_v5 = vsel %vm468_vm0, %v13046_v10, %v3810_v17  ;;  %v6212_v19 = vld [vmem:[#allocation5 + $0x88] sm:$0x1] }
 0x658   :  { %v3159_v42 = vsel %vm468_vm0, %v13044_v43, %v3158_v56  ;;  %v11306_v56 = vsel %vm468_vm0, %v13048_v46, %v4340_v35  ;;  %v3140_v2 = vadd.f32 %v10374_v16, %v13049_v1  ;;  %v3393_v43 = vadd.f32 %v3387_v45, %v3317_v47  ;;  %v13052_v46 = vld [vmem:[#allocation122_spill] sm:$0xff] }
 0x659   :  { %v11312_v8 = vmul.f32 %v10984_v0, %v11281_v58  ;;  %v11316_v37 = vmul.f32 %v11281_v58, %v10616_v50  ;;  %v13051_v41 = vrot.slane %v13050_v57, 2  ;;  %v3168_v22 = vadd.f32 %v3159_v42, %v3104_v13  ;;  %v13054_v57 = vld [vmem:[#allocation118_spill] sm:$0xff] }
 0x65a   :  { %v3416_v10 = vadd.f32 %v3412_v3, %v3354_v29  ;;  %v3417_v35 = vadd.f32 %v11193_v4, %v3355_v6  ;;  %v3402_v16 = vmul.f32 %v13016_v20, %v11266_v52  ;;  %v3206_v47 = vrot.slane %v3198_v38, 2 }
 0x65b   :  { %v3231_v17 = vsel %vm468_vm0, %v13051_v41, %v3230_v33  ;;  %v11325_v1 = vmul.f32 %v6212_v19, %v13052_v46  ;;  %v3259_v25 = vadd.f32 %v3254_v61, %v3168_v22  ;;  %v3260_v58 = vadd.f32 %v3254_v61, %v13054_v57  ;;  %v13055_v33 = vld [vmem:[#allocation114_spill] sm:$0xff]  ;;  %v3330_v42 = vpop.permute.xlu1 %3329  ;;  %v13056_v41 = vld [vmem:[#allocation112_spill] sm:$0xff] }
 0x65c   :  { %v3468_v13 = vadd.f32 %v13055_v33, %v3416_v10  ;;  %v3469_v4 = vadd.f32 %v13055_v33, %v3417_v35  ;;  %v3240_v3 = vadd.f32 %v3231_v17, %v3140_v2  ;;  %v3437_v20 = vadd.f32 %v11190_v59, %v3393_v43  ;;  %v3368_v38 = vpop.permute.xlu0 %3367  ;;  %v13057_v57 = vld [vmem:[#allocation146_spill] sm:$0xff]  ;;  %v13059_v35 = vld [vmem:[#allocation143_spill] sm:$0xff]  ;;  %v13060_v59 = vld [vmem:[#allocation120_spill] sm:$0xff] }
 0x65d   :  { %v4942_v6 = vrot.slane %v11316_v37, 2  ;;  %v3335_v21 = vadd.f32 %v3330_v42, %v3259_v25  ;;  %v3336_v61 = vadd.f32 %v3330_v42, %v3260_v58  ;;  %v13058_v46 = vrot.slane %v13057_v57, 2  ;;  %v11351_v25 = vld [vmem:[#allocation5 + $0x50] sm:$0x1] }
 0x65e   :  { %v3532_v0 = vadd.f32 %v13056_v41, %v3468_v13  ;;  %v3533_v22 = vadd.f32 %v13056_v41, %v3469_v4  ;;  %v3128_v2 = vadd.f32 %v10255_v31, %v13059_v35  ;;  %v11346_v43 = vmul.f32 %v13060_v59, %v10616_v50  ;;  %v13061_v58 = vld [vmem:[#allocation43_spill] sm:$0xff]  ;;  %v13064_v41 = vld [vmem:[#allocation152_spill] sm:$0xff] }
 0x65f   :  { %v3207_v10 = vsel %vm468_vm0, %v13058_v46, %v3206_v47  ;;  %v12379_v17 = vstv %s11294_s8  ;;  %v3316_v37 = vadd.f32 %v11185_v39, %v3240_v3  ;;  %v3406_v33 = vadd.f32 %v3402_v16, %v3335_v21  ;;  %v13063_v47 = vld [vmem:[#allocation129_spill] sm:$0xff]  ;;  %v13066_v3 = vld [vmem:[#allocation102_spill] sm:$0xff] }
 0x660   :  { %v3407_v13 = vadd.f32 %v11198_v60, %v3336_v61  ;;  %v13062_v4 = vrot.slane %v13061_v58, 1  ;;  %v3501_v46 = vadd.f32 %v13063_v47, %v3437_v20  ;;  %v3728_v31 = vmul.f32 %v13012_v18, %v11351_v25  ;;  %v13067_v16 = vld [vmem:[#allocation150_spill] sm:$0xff] }
 0x661   :  { %v3752_v50 = vmul.f32 %v10392_v44, %v11351_v25  ;;  %v13065_v57 = vrot.slane %v13064_v41, 1  ;;  %v3452_v21 = vadd.f32 %v13066_v3, %v3406_v33  ;;  %v3432_v20 = vmul.f32 %v10385_v14, %v11266_v52  ;;  %v13068_v44 = vld [vmem:[#allocation99_spill] sm:$0xff]  ;;  %v13070_v41 = vld [vmem:[#allocation46_spill] sm:$0xff] }
 0x662   :  { %v3595_v42 = vadd.f32 %v13062_v4, %v3533_v22  ;;  %v3453_v60 = vadd.f32 %v13066_v3, %v3407_v13  ;;  %v3392_v22 = vadd.f32 %v3387_v45, %v3316_v37  ;;  %v3216_v58 = vadd.f32 %v3207_v10, %v3128_v2  ;;  %v13069_v13 = vld [vmem:[#allocation157_spill] sm:$0xff]  ;;  %v11380_v2 = vpop.permute.xlu2 %3869 }
 0x663   :  { %v3594_v39 = vadd.f32 %v13065_v57, %v3532_v0  ;;  %v11371_v18 = vmul.f32 %v10933_v51, %v12379_v17  ;;  %v3516_v4 = vadd.f32 %v13068_v44, %v3452_v21  ;;  %v3422_v33 = vmul.f32 %v13020_v28, %v11266_v52  ;;  %v3292_v3 = vpop.permute.xlu1 %3291  ;;  %v13071_v51 = vld [vmem:[#allocation38_spill] sm:$0xff]  ;;  %v13073_v17 = vld [vmem:[#allocation39_spill] sm:$0xff] }
 0x664   :  { %v3647_v61 = vadd.f32 %v13067_v16, %v3595_v42  ;;  %v3517_v0 = vadd.f32 %v13068_v44, %v3453_v60  ;;  %v3565_v57 = vadd.f32 %v13070_v41, %v3501_v46  ;;  %v3736_v35 = vrot.slane %v3728_v31, 2  ;;  %v3908_v14 = vpop.permute.xlu0 %3907 }
 0x665   :  { %v3760_v45 = vrot.slane %v3752_v50, 2  ;;  %v3646_v10 = vadd.f32 %v13067_v16, %v3594_v39  ;;  %v13072_v37 = vrot.slane %v13071_v51, 1  ;;  %v13074_v60 = vrot.slane %v13073_v17, 1 }
 0x666   :  { %v3695_v42 = vadd.f32 %v13069_v13, %v3647_v61  ;;  %v3297_v29 = vadd.f32 %v3292_v3, %v3216_v58  ;;  %v3298_v28 = vadd.f32 %v3292_v3, %v11037_v36  ;;  %v3436_v52 = vadd.f32 %v3432_v20, %v3392_v22  ;;  %v13075_v61 = vld [vmem:[#allocation69_spill] sm:$0xff]  ;;  %v13076_v58 = vld [vmem:[#allocation81_spill] sm:$0xff] }
 0x667   :  { %v3580_v21 = vadd.f32 %v13072_v37, %v3516_v4  ;;  %v3581_v44 = vadd.f32 %v13074_v60, %v3517_v0  ;;  %v11389_v31 = vmul.f32 %v6212_v19, %v11069_v11  ;;  %v11393_v50 = vmul.f32 %v10926_v9, %v11187_v23  ;;  %v11397_v0 = vld [vmem:[#allocation5 + $0x70] sm:$0x7f]  ;;  %v13080_v9 = vld [vmem:[#allocation48_spill] sm:$0xff] }
 0x668   :  { %v3771_v46 = vadd.f32 %v11252_v34, %v3695_v42  ;;  %v3373_v39 = vadd.f32 %v3368_v38, %v3297_v29  ;;  %v3374_v16 = vadd.f32 %v3368_v38, %v3298_v28  ;;  %v13077_v36 = vrot.slane %v13076_v58, 2  ;;  %v13078_v34 = vld [vmem:[#allocation155_spill] sm:$0xff]  ;;  %v13082_v37 = vld [vmem:[#allocation96_spill] sm:$0xff]  ;;  %v13083_v28 = vld [vmem:[#allocation37_spill] sm:$0xff] }
 0x669   :  { %v3634_v4 = vadd.f32 %v13075_v61, %v3580_v21  ;;  %v3635_v17 = vadd.f32 %v13075_v61, %v3581_v44  ;;  %v13079_v22 = vrot.slane %v13078_v34, 2  ;;  %v3694_v42 = vadd.f32 %v13069_v13, %v3646_v10  ;;  %v13086_v58 = vld [vmem:[#allocation41_spill] sm:$0xff] }
 0x66a   :  { %v3737_v20 = vsel %vm468_vm0, %v13077_v36, %v3736_v35  ;;  %v13081_v3 = vrot.slane %v13080_v9, 1  ;;  %v3426_v38 = vadd.f32 %v3422_v33, %v3373_v39  ;;  %v3427_v51 = vadd.f32 %v11211_v30, %v3374_v16  ;;  %v13085_v33 = vld [vmem:[#allocation105_spill] sm:$0xff] }
 0x66b   :  { %v3761_v19 = vsel %vm468_vm0, %v13079_v22, %v3760_v45  ;;  %v3682_v21 = vadd.f32 %v13082_v37, %v3634_v4  ;;  %v3683_v60 = vadd.f32 %v13082_v37, %v3635_v17  ;;  %v3980_v44 = vmul.f32 %v13023_v55, %v11397_v0  ;;  %v3851_v55 = vpop.permute.xlu1 %3850  ;;  %v13087_v34 = vld [vmem:[#allocation45_spill] sm:$0xff] }
 0x66c   :  { %v3623_v29 = vadd.f32 %v13081_v3, %v3565_v57  ;;  %v3776_v35 = vmul.f32 %v13017_v63, %v11351_v25  ;;  %v13084_v13 = vrot.slane %v11312_v8, 2  ;;  %v3484_v57 = vadd.f32 %v13085_v33, %v3426_v38  ;;  %v3927_v17 = vpop.permute.xlu0 %3926  ;;  %v13090_v37 = vld [vmem:[#allocation153_spill] sm:$0xff] }
 0x66d   :  { %v3485_v30 = vadd.f32 %v13085_v33, %v3427_v51  ;;  %v3746_v39 = vadd.f32 %v3737_v20, %v3682_v21  ;;  %v3747_v16 = vadd.f32 %v11239_v12, %v3683_v60  ;;  %v3500_v61 = vadd.f32 %v13063_v47, %v3436_v52  ;;  %v11435_v52 = vpop.permute.xlu2 %4428 }
 0x66e   :  { %v3671_v45 = vadd.f32 %v13083_v28, %v3623_v29  ;;  %v11419_v10 = vsel %vm468_vm0, %v13084_v13, %v4942_v6  ;;  %v3770_v4 = vadd.f32 %v3761_v19, %v3694_v42  ;;  %v3990_v63 = vmul.f32 %v13028_v53, %v11397_v0  ;;  %v13088_v42 = vld [vmem:[#allocation141_spill] sm:$0xff] }
 0x66f   :  { %v3548_v6 = vadd.f32 %v13087_v34, %v3484_v57  ;;  %v3549_v22 = vadd.f32 %v13087_v34, %v3485_v30  ;;  %v3837_v9 = vadd.f32 %v11152_v32, %v3746_v39  ;;  %v3838_v20 = vadd.f32 %v11152_v32, %v3747_v16  ;;  %v13092_v57 = vld [vmem:[#allocation125_spill] sm:$0xff] }
 0x670   :  { %v3719_v36 = vadd.f32 %v13086_v58, %v3671_v45  ;;  %v3856_v3 = vadd.f32 %v3851_v55, %v3770_v4  ;;  %v3857_v12 = vadd.f32 %v3851_v55, %v3771_v46  ;;  %v3784_v29 = vrot.slane %v3776_v35, 2  ;;  %v11441_v45 = vld [vmem:[#allocation5 + $0x80] sm:$0x1]  ;;  %v13093_v55 = vld [vmem:[#allocation139_spill] sm:$0xff] }
 0x671   :  { %v3913_v53 = vadd.f32 %v3908_v14, %v3837_v9  ;;  %v3914_v19 = vadd.f32 %v3908_v14, %v3838_v20  ;;  %v13089_v38 = vrot.slane %v13088_v42, 1  ;;  %v13091_v21 = vrot.slane %v13090_v37, 1  ;;  %v13098_v20 = vld [vmem:[#allocation87_spill] sm:$0xff] }
 0x672   :  { %v11433_v47 = vadd.f32 %v11301_v5, %v3719_v36  ;;  %v3564_v32 = vadd.f32 %v13070_v41, %v3500_v61  ;;  %v3932_v13 = vadd.f32 %v3927_v17, %v3856_v3  ;;  %v3933_v46 = vadd.f32 %v3927_v17, %v3857_v12  ;;  %v13095_v61 = vld [vmem:[#allocation109_spill] sm:$0xff]  ;;  %v13096_v17 = vld [vmem:[#allocation126_spill] sm:$0xff]  ;;  %v13101_v42 = vld [vmem:[#allocation51_spill] sm:$0xff] }
 0x673   :  { %v3608_v51 = vadd.f32 %v13089_v38, %v3548_v6  ;;  %v3609_v60 = vadd.f32 %v13091_v21, %v3549_v22  ;;  %v4894_v35 = vrot.slane %v11346_v43, 2  ;;  %v3984_v5 = vadd.f32 %v3980_v44, %v3913_v53  ;;  %v13100_v53 = vld [vmem:[#allocation177_spill] sm:$0xff] }
 0x674   :  { %v3985_v33 = vadd.f32 %v11219_v15, %v3914_v19  ;;  %v3994_v39 = vadd.f32 %v3990_v63, %v3932_v13  ;;  %v3995_v16 = vadd.f32 %v11232_v24, %v3933_v46  ;;  %v13094_v4 = vrot.slane %v13093_v55, 2  ;;  %v13097_v63 = vld [vmem:[#allocation140_spill] sm:$0xff]  ;;  %v3946_v24 = vpop.permute.xlu1 %3945  ;;  %v4410_v9 = vpop.permute.xlu0 %4409  ;;  %v13102_v13 = vld [vmem:[#allocation50_spill] sm:$0xff] }
 0x675   :  { %v3658_v30 = vadd.f32 %v13092_v57, %v3608_v51  ;;  %v3659_v14 = vadd.f32 %v13092_v57, %v3609_v60  ;;  %v4306_v41 = vmul.f32 %v10607_v27, %v11441_v45  ;;  %v4030_v44 = vadd.f32 %v13095_v61, %v3984_v5 }
 0x676   :  { %v3785_v36 = vsel %vm468_vm0, %v13094_v4, %v3784_v29  ;;  %v4031_v15 = vadd.f32 %v13095_v61, %v3985_v33  ;;  %v4047_v22 = vadd.f32 %v13097_v63, %v3995_v16  ;;  %v13099_v3 = vrot.slane %v13098_v20, 1  ;;  %v11465_v29 = vld [vmem:[#allocation5 + $0xb8] sm:$0x1]  ;;  %v13103_v33 = vld [vmem:[#allocation83_spill] sm:$0xff]  ;;  %v13108_v4 = vld [vmem:[#allocation134_spill] sm:$0xff] }
 0x677   :  { %v3706_v34 = vadd.f32 %v13096_v17, %v3658_v30  ;;  %v3707_v6 = vadd.f32 %v13096_v17, %v3659_v14  ;;  %v3800_v27 = vmul.f32 %v10571_v48, %v11351_v25  ;;  %v11469_v19 = vmul.f32 %v11465_v29, %v13100_v53  ;;  %v13105_v14 = vld [vmem:[#allocation149_spill] sm:$0xff] }
 0x678   :  { %v3622_v12 = vadd.f32 %v13099_v3, %v3564_v32  ;;  %v4094_v38 = vadd.f32 %v13101_v42, %v4030_v44  ;;  %v4095_v51 = vadd.f32 %v13101_v42, %v4031_v15  ;;  %v4046_v60 = vadd.f32 %v13097_v63, %v3994_v39  ;;  %v11489_v44 = vpop.permute.xlu2 %4523  ;;  %v13113_v42 = vld [vmem:[#allocation158_spill] sm:$0xff] }
 0x679   :  { %v3794_v37 = vadd.f32 %v3785_v36, %v3706_v34  ;;  %v3795_v21 = vadd.f32 %v11273_v62, %v3707_v6  ;;  %v4111_v32 = vadd.f32 %v13102_v13, %v4047_v22  ;;  %v4000_v48 = vmul.f32 %v10583_v7, %v11397_v0  ;;  %v13107_v62 = vld [vmem:[#allocation93_spill] sm:$0xff]  ;;  %v13111_v22 = vld [vmem:[#allocation131_spill] sm:$0xff] }
 0x67a   :  { %v4314_v25 = vrot.slane %v4306_v41, 2  ;;  %v13104_v57 = vrot.slane %v13103_v33, 1  ;;  %v13106_v16 = vrot.slane %v13105_v14, 1  ;;  %v4576_v39 = vmul.f32 %v11183_v40, %v13107_v62  ;;  %v13119_v14 = vld [vmem:[#allocation111_spill] sm:$0xff] }
 0x67b   :  { %v3875_v46 = vadd.f32 %v11380_v2, %v3794_v37  ;;  %v3876_v5 = vadd.f32 %v11380_v2, %v3795_v21  ;;  %v13109_v36 = vrot.slane %v13108_v4, 1  ;;  %v3670_v7 = vadd.f32 %v13083_v28, %v3622_v12  ;;  %v13110_v2 = vld [vmem:[#allocation137_spill] sm:$0xff]  ;;  %v13120_v4 = vld [vmem:[#allocation116_spill] sm:$0xff] }
 0x67c   :  { %v4158_v30 = vadd.f32 %v13104_v57, %v4094_v38  ;;  %v4159_v55 = vadd.f32 %v13106_v16, %v4095_v51  ;;  %v3808_v41 = vrot.slane %v3800_v27, 2  ;;  %v4110_v63 = vadd.f32 %v13102_v13, %v4046_v60  ;;  %v13114_v27 = vld [vmem:[#allocation108_spill] sm:$0xff]  ;;  %v11504_v21 = vld [vmem:[#allocation5 + $0xa0] sm:$0x7f]  ;;  %v4486_v60 = vpop.permute.xlu1 %4485  ;;  %v3889_v57 = vpop.permute.xlu0 %3888 }
 0x67d   :  { %v4173_v61 = vadd.f32 %v13109_v36, %v4111_v32  ;;  %v3951_v15 = vadd.f32 %v3946_v24, %v3875_v46  ;;  %v3952_v17 = vadd.f32 %v3946_v24, %v3876_v5  ;;  %v13112_v20 = vrot.slane %v13111_v22, 2  ;;  %v13115_v32 = vld [vmem:[#allocation91_spill] sm:$0xff] }
 0x67e   :  { %v4212_v34 = vadd.f32 %v13110_v2, %v4158_v30  ;;  %v4213_v6 = vadd.f32 %v13110_v2, %v4159_v55  ;;  %v11499_v51 = vstv %s11454_s20  ;;  %v4580_v46 = vadd.f32 %v4576_v39, %v13115_v32  ;;  %v13116_v5 = vld [vmem:[#allocation107_spill] sm:$0xff]  ;;  %v13131_v32 = vld [vmem:[#allocation78_spill] sm:$0xff] }
 0x67f   :  { %v4315_v3 = vsel %vm468_vm0, %v13112_v20, %v4314_v25  ;;  %v4225_v38 = vadd.f32 %v13113_v42, %v4173_v61  ;;  %v4004_v28 = vadd.f32 %v4000_v48, %v3951_v15  ;;  %v4005_v12 = vadd.f32 %v11242_v54, %v3952_v17  ;;  %v13118_v30 = vld [vmem:[#allocation159_spill] sm:$0xff] }
 0x680   :  { %v4260_v37 = vadd.f32 %v13114_v27, %v4212_v34  ;;  %v4261_v24 = vadd.f32 %v13114_v27, %v4213_v6  ;;  %v3718_v13 = vadd.f32 %v13086_v58, %v3670_v7  ;;  %v13117_v25 = vrot.slane %v13116_v5, 2  ;;  %v13125_v2 = vld [vmem:[#allocation47_spill] sm:$0xff]  ;;  %v13129_v27 = vld [vmem:[#allocation162_spill] sm:$0xff] }
 0x681   :  { %v4273_v48 = vadd.f32 %v13118_v30, %v4225_v38  ;;  %v4062_v54 = vadd.f32 %v13119_v14, %v4004_v28  ;;  %v4063_v16 = vadd.f32 %v13119_v14, %v4005_v12  ;;  %v13121_v36 = vrot.slane %v13120_v4, 1  ;;  %v13137_v4 = vld [vmem:[#allocation85_spill] sm:$0xff] }
 0x682   :  { %v3809_v33 = vsel %vm468_vm0, %v13117_v25, %v3808_v41  ;;  %v4324_v55 = vadd.f32 %v4315_v3, %v4260_v37  ;;  %v4325_v62 = vadd.f32 %v11278_v49, %v4261_v24  ;;  %v4558_v58 = vmul.f32 %v10734_v26, %v11504_v21  ;;  %v13123_v41 = vld [vmem:[#allocation166_spill] sm:$0xff]  ;;  %v13127_v3 = vld [vmem:[#allocation124_spill] sm:$0xff] }
 0x683   :  { %v4172_v39 = vadd.f32 %v13121_v36, %v4110_v63  ;;  %v4349_v61 = vadd.f32 %v11306_v56, %v4273_v48  ;;  %v13122_v7 = vrot.slane %v11325_v1, 2  ;;  %v13124_v15 = vrot.slane %v13123_v41, 2  ;;  %v13126_v63 = vld [vmem:[#allocation163_spill] sm:$0xff]  ;;  %v13138_v41 = vld [vmem:[#allocation88_spill] sm:$0xff] }
 0x684   :  { %v4126_v34 = vadd.f32 %v13125_v2, %v4062_v54  ;;  %v4127_v6 = vadd.f32 %v13125_v2, %v4063_v16  ;;  %v4415_v49 = vadd.f32 %v4410_v9, %v4324_v55  ;;  %v4416_v22 = vadd.f32 %v4410_v9, %v4325_v62  ;;  %v13128_v56 = vld [vmem:[#allocation115_spill] sm:$0xff]  ;;  %v13134_v54 = vld [vmem:[#allocation161_spill] sm:$0xff]  ;;  %v13136_v55 = vld [vmem:[#allocation64_spill] sm:$0xff]  ;;  %v3965_v2 = vpop.permute.xlu0 %3964 }
 0x685   :  { %v4365_v17 = vsel %vm468_vm0, %v13124_v15, %v13122_v7  ;;  %v4577_v20 = vmul.f32 %v13126_v63, %v11183_v40  ;;  %v4638_v26 = vadd.f32 %v13127_v3, %v4580_v46  ;;  %v3818_v38 = vadd.f32 %v3809_v33, %v3718_v13  ;;  %v13135_v46 = vld [vmem:[#allocation122_spill] sm:$0xff]  ;;  %v11545_v33 = vpop.permute.xlu2 %5063  ;;  %v4505_v15 = vpop.permute.xlu1 %4504  ;;  %v13140_v63 = vld [vmem:[#allocation63_spill] sm:$0xff] }
 0x686   :  { %v4330_v1 = vmul.f32 %v13128_v56, %v11441_v45  ;;  %v4491_v28 = vadd.f32 %v4486_v60, %v4415_v49  ;;  %v4492_v12 = vadd.f32 %v4486_v60, %v4416_v22  ;;  %v13130_v37 = vrot.slane %v13129_v27, 1  ;;  %v13141_v27 = vld [vmem:[#allocation168_spill] sm:$0xff] }
 0x687   :  { %v13132_v5 = vrot.slane %v13131_v32, 1  ;;  %v4224_v48 = vadd.f32 %v13113_v42, %v4172_v39  ;;  %v4435_v9 = vadd.f32 %v11435_v52, %v4349_v61  ;;  %v13133_v14 = vstv %s11172_s24  ;;  %s13209_s24 = sld [smem:[#allocation185_spill]] }
 0x688   :  { %v4186_v24 = vadd.f32 %v13130_v37, %v4126_v34  ;;  %v11541_v16 = vmul.f32 %v13134_v54, %v13133_v14  ;;  %v4354_v13 = vmul.f32 %v13135_v46, %v11441_v45  ;;  %v4562_v60 = vadd.f32 %v4558_v58, %v4491_v28  ;;  %v13147_v54 = vld [vmem:[#allocation89_spill] sm:$0xff] }
 0x689   :  { %v4187_v25 = vadd.f32 %v13132_v5, %v4127_v6  ;;  %v4563_v62 = vadd.f32 %v13136_v55, %v4492_v12  ;;  %v4702_v42 = vadd.f32 %v13138_v41, %v4638_v26  ;;  %v3895_v39 = vadd.f32 %v3889_v57, %v11433_v47  ;;  %v13139_v6 = vld [vmem:[#allocation133_spill] sm:$0xff] }
 0x68a   :  { %v4236_v36 = vadd.f32 %v13137_v4, %v4186_v24  ;;  %v4338_v61 = vrot.slane %v4330_v1, 2  ;;  %v4362_v34 = vrot.slane %v4354_v13, 2  ;;  %v3894_v22 = vadd.f32 %v3889_v57, %v3818_v38  ;;  %v13142_v1 = vld [vmem:[#allocation132_spill] sm:$0xff]  ;;  %v13144_v38 = vld [vmem:[#allocation123_spill] sm:$0xff] }
 0x68b   :  { %v4237_v7 = vadd.f32 %v13137_v4, %v4187_v25  ;;  %v4609_v49 = vadd.f32 %v13139_v6, %v4563_v62  ;;  %v4511_v58 = vadd.f32 %v4505_v15, %v4435_v9  ;;  %v4010_v56 = vmul.f32 %v13140_v63, %v11397_v0  ;;  %v13143_v25 = vld [vmem:[#allocation156_spill] sm:$0xff]  ;;  %v13145_v0 = vld [vmem:[#allocation119_spill] sm:$0xff] }
 0x68c   :  { %v4272_v28 = vadd.f32 %v13118_v30, %v4224_v48  ;;  %v3971_v12 = vadd.f32 %v3965_v2, %v3895_v39  ;;  %v4758_v26 = vrot.slane %v11541_v16, 1  ;;  %v4608_v47 = vadd.f32 %v13139_v6, %v4562_v60  ;;  %v13149_v60 = vld [vmem:[#allocation172_spill] sm:$0xff] }
 0x68d   :  { %v4285_v37 = vadd.f32 %v13141_v27, %v4237_v7  ;;  %v4673_v24 = vadd.f32 %v13142_v1, %v4609_v49  ;;  %v3970_v32 = vadd.f32 %v3965_v2, %v3894_v22  ;;  %v4284_v5 = vadd.f32 %v13141_v27, %v4236_v36  ;;  %v13151_v7 = vld [vmem:[#allocation176_spill] sm:$0xff]  ;;  %v11593_v27 = vpop.permute.xlu1 %5023 }
 0x68e   :  { %v4573_v57 = vadd.f32 %v13143_v25, %v4511_v58  ;;  %v4015_v9 = vadd.f32 %v13144_v38, %v3971_v12  ;;  %v13146_v14 = vrot.slane %v13145_v0, 2  ;;  %v13148_v46 = vrot.slane %v13147_v54, 2  ;;  %v13152_v2 = vld [vmem:[#allocation136_spill] sm:$0xff]  ;;  %v11596_v38 = vpop.permute.xlu2 %4542  ;;  %v13162_v54 = vld [vmem:[#allocation103_spill] sm:$0xff] }
 0x68f   :  { %v4373_v48 = vadd.f32 %v4365_v17, %v4285_v37  ;;  %v13150_v55 = vrot.slane %v13149_v60, 2  ;;  %v4388_v4 = vrot.slane %v11389_v31, 2  ;;  %v4918_v36 = vrot.slane %v11469_v19, 2  ;;  %v4448_v37 = vpop.permute.xlu0 %4447 }
 0x690   :  { %v4363_v30 = vsel %vm468_vm0, %v13146_v14, %v4362_v34  ;;  %v4339_v13 = vsel %vm468_vm0, %v13148_v46, %v4338_v61  ;;  %v4581_v39 = vadd.f32 %v4577_v20, %v13151_v7  ;;  %v4079_v6 = vadd.f32 %v13152_v2, %v4015_v9  ;;  %v13153_v34 = vld [vmem:[#allocation165_spill] sm:$0xff]  ;;  %v13159_v9 = vld [vmem:[#allocation167_spill] sm:$0xff]  ;;  %v13161_v14 = vld [vmem:[#allocation128_spill] sm:$0xff] }
 0x691   :  { %v4895_v62 = vsel %vm468_vm0, %v13150_v55, %v4894_v35  ;;  %v4762_v17 = vadd.f32 %v4758_v26, %v4702_v42  ;;  %v13154_v49 = vrot.slane %v13153_v34, 1  ;;  %v4672_v43 = vadd.f32 %v13142_v1, %v4608_v47  ;;  %v13155_v35 = vld [vmem:[#allocation171_spill] sm:$0xff]  ;;  %v13156_v20 = vld [vmem:[#allocation49_spill] sm:$0xff]  ;;  %v13163_v7 = vld [vmem:[#allocation40_spill] sm:$0xff] }
 0x692   :  { %v4014_v22 = vadd.f32 %v4010_v56, %v3970_v32  ;;  %v4372_v58 = vadd.f32 %v4363_v30, %v4284_v5  ;;  %v11587_v63 = vmul.f32 %v13155_v35, %v11499_v51  ;;  %v11590_v31 = vstv %s11551_s27  ;;  %v13157_v42 = vld [vmem:[#allocation101_spill] sm:$0xff]  ;;  %v11599_v56 = vld [vmem:[#allocation5 + $0xb0] sm:$0x1]  ;;  %v13165_v34 = vld [vmem:[#allocation110_spill] sm:$0xff] }
 0x693   :  { %v4737_v61 = vadd.f32 %v13154_v49, %v4673_v24  ;;  %v4348_v19 = vadd.f32 %v4339_v13, %v4272_v28  ;;  %v4625_v12 = vadd.f32 %v13156_v20, %v4573_v57  ;;  %v13158_v24 = vld [vmem:[#allocation94_spill] sm:$0xff]  ;;  %v4578_v1 = vmul.f32 %v11183_v40, %v11504_v21  ;;  %v13160_v57 = vld [vmem:[#allocation147_spill] sm:$0xff] }
 0x694   :  { %v4143_v47 = vadd.f32 %v13158_v24, %v4079_v6  ;;  %v4453_v32 = vadd.f32 %v4448_v37, %v4372_v58  ;;  %v4454_v5 = vadd.f32 %v4448_v37, %v4373_v48  ;;  %v4639_v28 = vadd.f32 %v13127_v3, %v4581_v39  ;;  %v13167_v58 = vld [vmem:[#allocation160_spill] sm:$0xff] }
 0x695   :  { %v4791_v25 = vadd.f32 %v13157_v42, %v4737_v61  ;;  %v4930_v0 = vmul.f32 %v13160_v57, %v13159_v9  ;;  %v4812_v30 = vadd.f32 %v13161_v14, %v4762_v17  ;;  %v4078_v13 = vadd.f32 %v13152_v2, %v4014_v22  ;;  %v13166_v17 = vld [vmem:[#allocation164_spill] sm:$0xff]  ;;  %v13172_v9 = vld [vmem:[#allocation169_spill] sm:$0xff] }
 0x696   :  { %v4529_v60 = vadd.f32 %v11489_v44, %v4453_v32  ;;  %v4530_v55 = vadd.f32 %v11489_v44, %v4454_v5  ;;  %v13164_v6 = vrot.slane %v13163_v7, 1  ;;  %v4434_v48 = vadd.f32 %v11435_v52, %v4348_v19  ;;  %v13170_v19 = vld [vmem:[#allocation44_spill] sm:$0xff]  ;;  %v11629_v7 = vpop.permute.xlu1 %5099 }
 0x697   :  { %v4839_v46 = vadd.f32 %v13162_v54, %v4791_v25  ;;  %v4689_v3 = vadd.f32 %v13165_v34, %v4625_v12  ;;  %v4884_v39 = vmul.f32 %v13060_v59, %v11599_v56  ;;  %v4568_v61 = vmul.f32 %v13166_v17, %v11504_v21  ;;  %v13169_v25 = vld [vmem:[#allocation98_spill] sm:$0xff]  ;;  %v13171_v59 = vld [vmem:[#allocation95_spill] sm:$0xff] }
 0x698   :  { %v4736_v40 = vadd.f32 %v13164_v6, %v4672_v43  ;;  %v4932_v2 = vmul.f32 %v13160_v57, %v11599_v56  ;;  %v4582_v22 = vadd.f32 %v4578_v1, %v4529_v60  ;;  %v13168_v44 = vrot.slane %v13167_v58, 1  ;;  %v13173_v57 = vld [vmem:[#allocation175_spill] sm:$0xff]  ;;  %v13178_v6 = vld [vmem:[#allocation138_spill] sm:$0xff] }
 0x699   :  { %v4903_v49 = vadd.f32 %v4895_v62, %v4839_v46  ;;  %v4510_v37 = vadd.f32 %v4505_v15, %v4434_v48  ;;  %v4938_v43 = vrot.slane %v4930_v0, 2  ;;  %v4860_v52 = vadd.f32 %v13169_v25, %v4812_v30  ;;  %v13179_v48 = vld [vmem:[#allocation179_spill] sm:$0xff] }
 0x69a   :  { %v4201_v35 = vadd.f32 %v13168_v44, %v4143_v47  ;;  %v4583_v12 = vadd.f32 %v13170_v19, %v4530_v55  ;;  %v4142_v32 = vadd.f32 %v13158_v24, %v4078_v13  ;;  %v4640_v62 = vadd.f32 %v13171_v59, %v4582_v22  ;;  %v13175_v47 = vld [vmem:[#allocation86_spill] sm:$0xff]  ;;  %v13177_v13 = vld [vmem:[#allocation180_spill] sm:$0xff]  ;;  %v13182_v19 = vld [vmem:[#allocation173_spill] sm:$0xff] }
 0x69b   :  { %v4790_v5 = vadd.f32 %v13157_v42, %v4736_v40  ;;  %v4892_v1 = vrot.slane %v4884_v39, 2  ;;  %v13174_v60 = vrot.slane %v13173_v57, 2  ;;  %v13176_v0 = vrot.slane %v13175_v47, 1  ;;  %v13181_v22 = vld [vmem:[#allocation84_spill] sm:$0xff]  ;;  %v13187_v47 = vld [vmem:[#allocation181_spill] sm:$0xff] }
 0x69c   :  { %v4249_v46 = vadd.f32 %v13172_v9, %v4201_v35  ;;  %v11638_v55 = vmul.f32 %v11465_v29, %v11499_v51  ;;  %v4703_v24 = vadd.f32 %v13138_v41, %v4639_v28  ;;  %v5130_v42 = vadd.f32 %v11590_v31, %v13177_v13  ;;  %v11653_v41 = vpop.permute.xlu2 %5025 }
 0x69d   :  { %v4389_v15 = vsel %vm468_vm0, %v13174_v60, %v4388_v4  ;;  %v4751_v30 = vadd.f32 %v13176_v0, %v4689_v3  ;;  %v4704_v40 = vadd.f32 %v13178_v6, %v4640_v62  ;;  %v13180_v39 = vrot.slane %v13179_v48, 2 }
 0x69e   :  { %v4940_v3 = vrot.slane %v4932_v2, 2  ;;  %v4948_v17 = vadd.f32 %v4938_v43, %v4860_v52  ;;  %v4641_v29 = vadd.f32 %v13171_v59, %v4583_v12  ;;  %v4297_v58 = vadd.f32 %v13181_v22, %v4249_v46  ;;  %v13186_v59 = vld [vmem:[#allocation174_spill] sm:$0xff] }
 0x69f   :  { %v4919_v4 = vsel %vm468_vm0, %v13180_v39, %v4918_v36  ;;  %v4572_v28 = vadd.f32 %v4568_v61, %v4510_v37  ;;  %v4764_v44 = vadd.f32 %v4758_v26, %v4704_v40  ;;  %v4838_v35 = vadd.f32 %v13162_v54, %v4790_v5  ;;  %v13184_v36 = vld [vmem:[#allocation170_spill] sm:$0xff]  ;;  %v6214_v26 = vld [vmem:[#allocation5 + $0x90] sm:$0x80] }
 0x6a0   :  { %v13183_v62 = vrot.slane %v13182_v19, 1  ;;  %v13185_v60 = vrot.slane %v13184_v36, 2  ;;  %v4378_v52 = vmul.f32 %v11069_v11, %v11441_v45  ;;  %v4397_v12 = vadd.f32 %v4389_v15, %v4297_v58  ;;  %v13188_v11 = vld [vmem:[#allocation106_spill] sm:$0xff]  ;;  %v13189_v15 = vld [vmem:[#allocation113_spill] sm:$0xff]  ;;  %v6215_v19 = vld [vmem:[#allocation5 + $0x98] sm:$0x80] }
 0x6a1   :  { %v4803_v46 = vadd.f32 %v13186_v59, %v4751_v30  ;;  %v5131_v61 = vadd.f32 %v11590_v31, %v13187_v47  ;;  %v5134_v16 = vmax.f32 %v5130_v42, 0.0  ;;  %v4586_v54 = vmul.f32 %v6214_v26, %v11187_v23 }
 0x6a2   :  { %v4200_v57 = vadd.f32 %v13183_v62, %v4142_v32  ;;  %v4893_v2 = vsel %vm468_vm0, %v13185_v60, %v4892_v1  ;;  %v4814_v37 = vadd.f32 %v13161_v14, %v4764_v44  ;;  %v4941_v32 = vsel %vm468_vm0, %v4938_v43, %v4940_v3  ;;  %v4988_v43 = vpop.permute.xlu1 %4987 }
 0x6a3   :  { %v5029_v5 = vadd.f32 %v11593_v27, %v4948_v17  ;;  %v4705_v1 = vadd.f32 %v13178_v6, %v4641_v29  ;;  %v4851_v45 = vadd.f32 %v13188_v11, %v4803_v46  ;;  %v13190_v0 = vrot.slane %v13189_v15, 1 }
 0x6a4   :  { %v4862_v13 = vadd.f32 %v13169_v25, %v4814_v37  ;;  %v4902_v42 = vadd.f32 %v4893_v2, %v4838_v35  ;;  %v4248_v40 = vadd.f32 %v13172_v9, %v4200_v57  ;;  %v4624_v48 = vadd.f32 %v13156_v20, %v4572_v28  ;;  %v11691_v20 = vpop.permute.xlu0 %4714 }
 0x6a5   :  { %v4763_v30 = vadd.f32 %v13190_v0, %v4703_v24  ;;  %v5105_v39 = vadd.f32 %v11629_v7, %v5029_v5  ;;  %v4386_v3 = vrot.slane %v4378_v52, 2  ;;  %v11680_v17 = vadd.f32 %v4919_v4, %v4851_v45  ;;  %v13192_v52 = vld [vmem:[#allocation97_spill] sm:$0xff] }
 0x6a6   :  { %v5135_v6 = vmax.f32 %v5131_v61, 0.0  ;;  %v11683_v29 = vstv %s11644_s14  ;;  %v4993_v58 = vadd.f32 %v4988_v43, %v4902_v42  ;;  %v4994_v44 = vadd.f32 %v4988_v43, %v4903_v49  ;;  %v13196_v43 = vld [vmem:[#allocation130_spill] sm:$0xff]  ;;  %s13210_s14 = sld [smem:[#allocation186_spill]] }
 0x6a7   :  { %v4587_v24 = vmul.f32 %v6215_v19, %v11187_v23  ;;  %v11687_v62 = vstv %s11649_s1  ;;  %v13191_v9 = vmov %v13190_v0  ;;  %v4950_v28 = vadd.f32 %v4941_v32, %v4862_v13  ;;  %v11703_v32 = vpop.permute.xlu2 %5101  ;;  %v13195_v0 = vld [vmem:[#allocation182_spill] sm:$0xff] }
 0x6a8   :  { %v4765_v35 = vadd.f32 %v13191_v9, %v4705_v1  ;;  %v4813_v57 = vadd.f32 %v13161_v14, %v4763_v30  ;;  %v5069_v4 = vadd.f32 %v11545_v33, %v4993_v58  ;;  %v5070_v36 = vadd.f32 %v11545_v33, %v4994_v44  ;;  %v13194_v1 = vld [vmem:[#allocation145_spill] sm:$0xff] }
 0x6a9   :  { %v4296_v60 = vadd.f32 %v13181_v22, %v4248_v40  ;;  %v4688_v49 = vadd.f32 %v13165_v34, %v4624_v48  ;;  %v5150_v2 = vadd.f32 %v11683_v29, %v5105_v39  ;;  %v13193_v46 = vrot.slane %v13192_v52, 2 }
 0x6aa   :  { %v5031_v61 = vadd.f32 %v11653_v41, %v4950_v28  ;;  %v5172_v26 = vrot.slane %v5134_v16, 7  ;;  %v5175_v37 = vrot.slane %v5135_v6, 7  ;;  %v5132_v5 = vadd.f32 %v11590_v31, %v5069_v4  ;;  %v4467_v39 = vpop.permute.xlu1 %4466 }
 0x6ab   :  { %v4387_v47 = vsel %vm468_vm0, %v13193_v46, %v4386_v3  ;;  %v5133_v33 = vadd.f32 %v11590_v31, %v5070_v36  ;;  %v4590_v22 = vadd.f32 %v4586_v54, %v13194_v1  ;;  %v4861_v34 = vadd.f32 %v13169_v25, %v4813_v57  ;;  %v13199_v36 = vld [vmem:[#allocation90_spill] sm:$0xff] }
 0x6ac   :  { %v4815_v45 = vadd.f32 %v13161_v14, %v4765_v35  ;;  %v5107_v15 = vadd.f32 %v11703_v32, %v5031_v61  ;;  %v4591_v30 = vadd.f32 %v4587_v24, %v13195_v0  ;;  %v5136_v13 = vmax.f32 %v5132_v5, 0.0  ;;  %v13201_v5 = vld [vmem:[#allocation142_spill] sm:$0xff]  ;;  %s5655_s1 = sshll.u32 %s13210_s14, 4  ;;  %s5656_s1 = int_to_ptr.hbm [resolvable:$true] %s5655_s1 }
 0x6ad   :  { %v5137_v42 = vmax.f32 %v5133_v33, 0.0  ;;  %v4396_v16 = vadd.f32 %v4387_v47, %v4296_v60  ;;  %v5154_v40 = vmax.f32 %v5150_v2, 0.0  ;;  %v4588_v48 = vmul.f32 %v11187_v23, %v11504_v21  ;;  %v6216_v47 = vld [vmem:[#allocation2] sm:$0xff] }
 0x6ae   :  { %v13197_v31 = vrot.slane %v13196_v43, 1  ;;  %v5152_v54 = vadd.f32 %v11683_v29, %v5107_v15  ;;  %v5173_v6 = vrot.slane %v5136_v13, 7  ;;  %v4473_v44 = vadd.f32 %v4467_v39, %v4397_v12 }
 0x6af   :  { %v5176_v58 = vrot.slane %v5137_v42, 7  ;;  %v4472_v14 = vadd.f32 %v4467_v39, %v4396_v16  ;;  %v13198_v19 = vrot.slane %v11312_v8, 2  ;;  %v4863_v9 = vadd.f32 %v13169_v25, %v4815_v45 }
 0x6b0   :  { %v4750_v3 = vadd.f32 %v13197_v31, %v4688_v49  ;;  %v4908_v35 = vmul.f32 %v13100_v53, %v11599_v56  ;;  %v5156_v28 = vmax.f32 %v5152_v54, 0.0  ;;  %v4549_v21 = vadd.f32 %v11596_v38, %v4473_v44  ;;  %v4822_v49 = vpop.permute.xlu0 %4821  ;;  %v13206_v31 = vld [vmem:[#allocation148_spill] sm:$0xff] }
 0x6b1   :  { %v4949_v24 = vadd.f32 %v13198_v19, %v4861_v34  ;;  %v4548_v23 = vadd.f32 %v11596_v38, %v4472_v14  ;;  %v5177_v57 = vsel %vm641_vm2, %v5175_v37, %v5176_v58  ;;  %v5174_v4 = vsel %vm641_vm2, %v5172_v26, %v5173_v6  ;;  %v13202_v34 = vld [vmem:[#allocation92_spill] sm:$0xff] }
 0x6b2   :  { %v4654_v12 = vadd.f32 %v13199_v36, %v4590_v22  ;;  %v5192_v60 = vrot.slane %v5154_v40, 7  ;;  %5218 = vrot.lane.b32.xlu0 %v5177_v57, %s12462_s29  ;;  %5216 = vrot.lane.b32.xlu2 %v5174_v4, %s12462_s29  ;;  %v5193_v53 = vrot.slane %v5156_v28, 7  ;;  %v4655_v25 = vadd.f32 %v13199_v36, %v4591_v30  ;;  %v5007_v15 = vpop.permute.xlu1 %5006  ;;  %v13203_v30 = vld [vmem:[#allocation100_spill] sm:$0xff] }
 0x6b3   :  { %v5030_v8 = vadd.f32 %v11593_v27, %v4949_v24  ;;  %v4592_v2 = vadd.f32 %v4588_v48, %v4548_v23  ;;  %v4593_v38 = vadd.f32 %v11393_v50, %v4549_v21  ;;  %v4802_v52 = vadd.f32 %v13186_v59, %v4750_v3  ;;  %v13204_v48 = vld [vmem:[#allocation178_spill] sm:$0xff] }
 0x6b4   :  { %v13200_v61 = vstv %s11294_s8  ;;  %v4916_v27 = vrot.slane %v4908_v35, 2  ;;  %v5194_v37 = vsel %vm641_vm2, %v5192_v60, %v5193_v53  ;;  %v4951_v22 = vadd.f32 %v11419_v10, %v4863_v9  ;;  %s5653_s8 = sshll.u32 %s6420_s13, 4  ;;  %s5654_s8 = int_to_ptr.vmem [resolvable:$true] %s5653_s8 }
 0x6b5   :  { %v5106_v46 = vadd.f32 %v11629_v7, %v5030_v8  ;;  %v4768_v26 = vmul.f32 %v6216_v47, %v13200_v61  ;;  %v4656_v33 = vadd.f32 %v13201_v5, %v4592_v2  ;;  %v4657_v1 = vadd.f32 %v13201_v5, %v4593_v38 }
 0x6b6   :  { %v4718_v45 = vadd.f32 %v13202_v34, %v4654_v12  ;;  %v4773_v50 = vrot.slane %v11371_v18, 1  ;;  %v4963_v59 = vrot.slane %v11587_v63, 2  ;;  %v4966_v7 = vrot.slane %v11638_v55, 2 }
 0x6b7   :  { %v4719_v0 = vadd.f32 %v13202_v34, %v4655_v25  ;;  %v5140_v13 = vadd.f32 %v11687_v62, %v13203_v30  ;;  %v4721_v42 = vadd.f32 %v11691_v20, %v4657_v1  ;;  %v4850_v16 = vadd.f32 %v13188_v11, %v4802_v52 }
 0x6b8   :  { %v5151_v10 = vadd.f32 %v11683_v29, %v5106_v46  ;;  %v4772_v40 = vrot.slane %v4768_v26, 1  ;;  %v13205_v39 = vrot.slane %v13204_v48, 2  ;;  %v5032_v63 = vadd.f32 %v11653_v41, %v4951_v22  ;;  %v4870_v9 = vpop.permute.xlu0 %4869  ;;  %v6217_v41 = vld [vmem:[#allocation5 + $0xa0] sm:$0xfe]  ;;  %v5045_v48 = vpop.permute.xlu2 %5044 }
 0x6b9   :  { %v4720_v55 = vadd.f32 %v11691_v20, %v4656_v33  ;;  %v4779_v43 = vadd.f32 %v4773_v50, %v4721_v42  ;;  %v5141_v3 = vadd.f32 %v11687_v62, %v13206_v31  ;;  %v4967_v54 = vsel %vm468_vm0, %v4963_v59, %v4966_v7 }
 0x6ba   :  { %v4917_v18 = vsel %vm468_vm0, %v13205_v39, %v4916_v27  ;;  %5224 = vrot.lane.b32.xlu0 %v5194_v37, %s12462_s29  ;;  %v5108_v11 = vadd.f32 %v11703_v32, %v5032_v63  ;;  %v5144_v6 = vmax.f32 %v5140_v13, 0.0  ;;  %v4777_v58 = vadd.f32 %v4773_v50, %v4719_v0  ;;  %v5083_v32 = vpop.permute.xlu1 %5082 }
 0x6bb   :  { %v4827_v14 = vadd.f32 %v4822_v49, %v4779_v43  ;;  %v4926_v44 = vadd.f32 %v4917_v18, %v4850_v16  ;;  %v5155_v19 = vmax.f32 %v5151_v10, 0.0  ;;  %v4776_v24 = vadd.f32 %v4772_v40, %v4718_v45 }
 0x6bc   :  { %v4954_v20 = vmul.f32 %v6217_v41, %v11499_v51  ;;  %v5153_v35 = vadd.f32 %v11683_v29, %v5108_v11  ;;  %v4778_v28 = vadd.f32 %v4772_v40, %v4720_v55  ;;  %v5013_v57 = vadd.f32 %v5007_v15, %v11680_v17 }
 0x6bd   :  { %v4875_v23 = vadd.f32 %v4870_v9, %v4827_v14  ;;  %v5012_v21 = vadd.f32 %v5007_v15, %v4926_v44  ;;  %v5145_v4 = vmax.f32 %v5141_v3, 0.0  ;;  %v4824_v36 = vadd.f32 %v4822_v49, %v4776_v24 }
 0x6be   :  { %v4956_v12 = vmul.f32 %v11499_v51, %v11599_v56  ;;  %v5157_v8 = vmax.f32 %v5153_v35, 0.0  ;;  %v4825_v60 = vadd.f32 %v4822_v49, %v4777_v58  ;;  %v5089_v25 = vadd.f32 %v5083_v32, %v5013_v57  ;;  %v5215_v35 = vld [vmem:[%s13207_s18 + $0x38] sm:$0xff]  ;;  %v5213_v57 = vld [vmem:[%s13207_s18 + $0x28] sm:$0xff] }
 0x6bf   :  { %v5088_v53 = vadd.f32 %v5083_v32, %v5012_v21  ;;  %v4975_v2 = vadd.f32 %v4967_v54, %v4875_v23  ;;  %v5195_v38 = vrot.slane %v5155_v19, 7  ;;  %v4962_v52 = vrot.slane %v4954_v20, 2  ;;  %v5214_v23 = vld [vmem:[%s13207_s18 + $0x30] sm:$0xff]  ;;  %5252 = vmatpush.msra.mxu2 %v5215_v35  ;;  %v5277_v32 = vld [vmem:[#allocation23 + $0x20] sm:$0xff] }
 0x6c0   :  { %v4872_v46 = vadd.f32 %v4870_v9, %v4824_v36  ;;  %v5196_v29 = vrot.slane %v5157_v8, 7  ;;  %v4826_v47 = vadd.f32 %v4822_v49, %v4778_v28  ;;  %v5143_v17 = vadd.f32 %v11687_v62, %v5089_v25  ;;  %v5119_v13 = vpop.permute.xlu0 %5118  ;;  %v5280_v28 = vld [vmem:[#allocation23 + $0x38] sm:$0xff]  ;;  %v5279_v21 = vld [vmem:[#allocation23 + $0x30] sm:$0xff]  ;;  %v5212_v36 = vld [vmem:[%s13207_s18 + $0x20] sm:$0xff] }
 0x6c1   :  { %v5142_v61 = vadd.f32 %v11687_v62, %v5088_v53  ;;  %v4873_v26 = vadd.f32 %v4870_v9, %v4825_v60  ;;  %v4964_v27 = vrot.slane %v4956_v12, 2  ;;  %v5182_v5 = vrot.slane %v5144_v6, 7  ;;  %5289 = vmatpush.msra.mxu3 %v5280_v28  ;;  %5253 = vmatpush.msra.mxu2 %v5214_v23  ;;  %v5211_v12 = vld [vmem:[%s13207_s18 + $0x18] sm:$0xff]  ;;  %v5210_v60 = vld [vmem:[%s13207_s18 + $0x10] sm:$0xff]  ;;  %v5209_v25 = vld [vmem:[%s13207_s18 + $0x8] sm:$0xff] }
 0x6c2   :  { %v5197_v37 = vsel %vm641_vm2, %v5195_v38, %v5196_v29  ;;  %v5147_v56 = vmax.f32 %v5143_v17, 0.0  ;;  %v5185_v33 = vrot.slane %v5145_v4, 7  ;;  %v4972_v1 = vadd.f32 %v4962_v52, %v4872_v46  ;;  %v5043_v15 = vpop.permute.xlu1 %5042  ;;  %v5278_v4 = vld [vmem:[#allocation23 + $0x28] sm:$0xff]  ;;  %v5276_v8 = vld [vmem:[#allocation23 + $0x18] sm:$0xff]  ;;  %v5275_v53 = vld [vmem:[#allocation23 + $0x10] sm:$0xff] }
 0x6c3   :  { %v5146_v51 = vmax.f32 %v5142_v61, 0.0  ;;  %v4874_v22 = vadd.f32 %v4870_v9, %v4826_v47  ;;  %v4973_v50 = vadd.f32 %v4963_v59, %v4873_v26  ;;  %v4965_v49 = vsel %vm468_vm0, %v4962_v52, %v4964_v27  ;;  %5290 = vmatpush.msra.mxu3 %v5279_v21  ;;  %5254 = vmatpush.msra.mxu2 %v5213_v57  ;;  %v5208_v38 = vld [vmem:[%s13207_s18] sm:$0xff] }
 0x6c4   :  { %v5186_v45 = vrot.slane %v5147_v56, 7  ;;  %v5048_v7 = vadd.f32 %v5043_v15, %v4972_v1  ;;  %v5159_v40 = vstv %s5944_s2  ;;  %v5051_v63 = vadd.f32 %v5045_v48, %v4975_v2  ;;  %v5274_v2 = vld [vmem:[#allocation23 + $0x8] sm:$0xff]  ;;  %v5273_v52 = vld [vmem:[#allocation23] sm:$0xff]  ;;  %v6144_v1 = vld [vmem:[%s13208_s28 + $0x78] sm:$0xff] }
 0x6c5   :  { %v5183_v34 = vrot.slane %v5146_v51, 7  ;;  %v5049_v0 = vadd.f32 %v5043_v15, %v4973_v50  ;;  %v4974_v10 = vadd.f32 %v4965_v49, %v4874_v22  ;;  %5291 = vmatpush.msra.mxu3 %v5278_v4  ;;  %5255 = vmatpush.msra.mxu2 %v5212_v36  ;;  %v6136_v22 = vld [vmem:[%s13208_s28 + $0x38] sm:$0xff]  ;;  %v6143_v50 = vld [vmem:[%s13208_s28 + $0x70] sm:$0xff] }
 0x6c6   :  { %v5187_v30 = vsel %vm641_vm2, %v5185_v33, %v5186_v45  ;;  %v5124_v42 = vadd.f32 %v5119_v13, %v5048_v7  ;;  %v6160_v45 = vld [vmem:[%s13208_s28 + $0xf8] sm:$0xff]  ;;  %v6135_v15 = vld [vmem:[%s13208_s28 + $0x30] sm:$0xff] }
 0x6c7   :  { %v5184_v62 = vsel %vm641_vm2, %v5182_v5, %v5183_v34  ;;  %5222 = vrot.lane.b32.xlu2 %v5187_v30, %s12462_s29  ;;  %v5125_v16 = vadd.f32 %v5119_v13, %v5049_v0  ;;  %v5050_v18 = vadd.f32 %v5045_v48, %v4974_v10  ;;  %5292 = vmatpush.msra.mxu3 %v5277_v32  ;;  %v6152_v34 = vld [vmem:[%s13208_s28 + $0xb8] sm:$0xff]  ;;  %v6151_v49 = vld [vmem:[%s13208_s28 + $0xb0] sm:$0xff]  ;;  %v6142_v0 = vld [vmem:[%s13208_s28 + $0x68] sm:$0xff] }
 0x6c8   :  { %5220 = vrot.lane.b32.xlu1 %v5184_v62, %s12462_s29  ;;  %v5160_v59 = vadd.f32 %v5159_v40, %v5124_v42  ;;  %5256 = vmatpush.msra.mxu2 %v5211_v12  ;;  %v6159_v7 = vld [vmem:[%s13208_s28 + $0xf0] sm:$0xff]  ;;  %v6134_v62 = vld [vmem:[%s13208_s28 + $0x28] sm:$0xff]  ;;  %v6133_v48 = vld [vmem:[%s13208_s28 + $0x20] sm:$0xff] }
 0x6c9   :  { %v5161_v39 = vadd.f32 %v5159_v40, %v5125_v16  ;;  %5293 = vmatpush.msra.mxu3 %v5276_v8  ;;  %5546 = vmatpush.bf16.msrb.mxu0 %v6152_v34  ;;  %v6150_v30 = vld [vmem:[%s13208_s28 + $0xa8] sm:$0xff] }
 0x6ca   :  { %v5121_v55 = vpop.permute.xlu1 %5120  ;;  %v5164_v3 = vmax.f32 %v5160_v59, 0.0  ;;  %5257 = vmatpush.msra.mxu2 %v5210_v60  ;;  %5628 = vmatpush.bf16.msrb.mxu1 %v6160_v45  ;;  %v6158_v13 = vld [vmem:[%s13208_s28 + $0xe8] sm:$0xff]  ;;  %v6149_v59 = vld [vmem:[%s13208_s28 + $0xa0] sm:$0xff] }
 0x6cb   :  { %v5126_v43 = vadd.f32 %v5121_v55, %v5050_v18  ;;  %v5127_v31 = vadd.f32 %v5121_v55, %v5051_v63  ;;  %v5165_v54 = vmax.f32 %v5161_v39, 0.0  ;;  %5294 = vmatpush.msra.mxu3 %v5275_v53  ;;  %v6157_v39 = vld [vmem:[%s13208_s28 + $0xe0] sm:$0xff]  ;;  %v6140_v18 = vld [vmem:[%s13208_s28 + $0x58] sm:$0xff] }
 0x6cc   :  { %v5202_v44 = vrot.slane %v5164_v3, 7  ;;  %5258 = vmatpush.msra.mxu2 %v5209_v25  ;;  %v6132_v63 = vld [vmem:[%s13208_s28 + $0x18] sm:$0xff]  ;;  %v6131_v3 = vld [vmem:[%s13208_s28 + $0x10] sm:$0xff] }
 0x6cd   :  { %v5162_v11 = vadd.f32 %v5159_v40, %v5126_v43  ;;  %v5163_v6 = vadd.f32 %v5159_v40, %v5127_v31  ;;  %v5205_v19 = vrot.slane %v5165_v54, 7  ;;  %5295 = vmatpush.msra.mxu3 %v5274_v2  ;;  %5547 = vmatpush.bf16.msrb.mxu0 %v6151_v49  ;;  %v6141_v40 = vld [vmem:[%s13208_s28 + $0x60] sm:$0xff]  ;;  %v6148_v55 = vld [vmem:[%s13208_s28 + $0x98] sm:$0xff]  ;;  %v6139_v31 = vld [vmem:[%s13208_s28 + $0x50] sm:$0xff] }
 0x6ce   :  { %5259 = vmatpush.msra.mxu2 %v5208_v38  ;;  %5629 = vmatpush.bf16.msrb.mxu1 %v6159_v7  ;;  %v6156_v43 = vld [vmem:[%s13208_s28 + $0xd8] sm:$0xff]  ;;  %v6147_v54 = vld [vmem:[%s13208_s28 + $0x90] sm:$0xff] }
 0x6cf   :  { %v5166_v58 = vmax.f32 %v5162_v11, 0.0  ;;  %v5167_v14 = vmax.f32 %v5163_v6, 0.0  ;;  %5296 = vmatpush.msra.mxu3 %v5273_v52  ;;  %v6155_v11 = vld [vmem:[%s13208_s28 + $0xd0] sm:$0xff]  ;;  %v6138_v6 = vld [vmem:[%s13208_s28 + $0x48] sm:$0xff] }
 0x6d0   :  { %5226 = vrot.lane.b32.xlu1 %v5197_v37, %s12462_s29  ;;  %5404 = vmatpush.bf16.msrb.mxu2 %v6144_v1 }
 0x6d1   :  { %v5203_v24 = vrot.slane %v5166_v58, 7  ;;  %v5206_v9 = vrot.slane %v5167_v14, 7  ;;  %5465 = vmatpush.bf16.msrb.mxu3 %v6136_v22  ;;  %5548 = vmatpush.bf16.msrb.mxu0 %v6150_v30  ;;  %v6130_v58 = vld [vmem:[%s13208_s28 + $0x8] sm:$0xff] }
 0x6d2   :  { %5630 = vmatpush.bf16.msrb.mxu1 %v6158_v13  ;;  %v6146_v14 = vld [vmem:[%s13208_s28 + $0x88] sm:$0xff] }
 0x6d3   :  { %v5207_v41 = vsel %vm641_vm2, %v5205_v19, %v5206_v9  ;;  %v5204_v20 = vsel %vm641_vm2, %v5202_v44, %v5203_v24  ;;  %v6154_v44 = vld [vmem:[%s13208_s28 + $0xc8] sm:$0xff]  ;;  %v6137_v19 = vld [vmem:[%s13208_s28 + $0x40] sm:$0xff] }
 0x6d4   :  { %5230 = vrot.lane.b32.xlu0 %v5207_v41, %s12462_s29  ;;  %5228 = vrot.lane.b32.xlu2 %v5204_v20, %s12462_s29  ;;  %v6129_v24 = vld [vmem:[%s13208_s28] sm:$0xff] }
 0x6d5   :  { %5405 = vmatpush.bf16.msrb.mxu2 %v6143_v50  ;;  %5466 = vmatpush.bf16.msrb.mxu3 %v6135_v15  ;;  %v6145_v9 = vld [vmem:[%s13208_s28 + $0x80] sm:$0xff] }
 0x6d6   :  { %5549 = vmatpush.bf16.msrb.mxu0 %v6149_v59  ;;  %5631 = vmatpush.bf16.msrb.mxu1 %v6157_v39  ;;  %v6153_v41 = vld [vmem:[%s13208_s28 + $0xc0] sm:$0xff] }
 0x6d9   :  { %5406 = vmatpush.bf16.msrb.mxu2 %v6142_v0  ;;  %5467 = vmatpush.bf16.msrb.mxu3 %v6134_v62 }
 0x6da   :  { %5550 = vmatpush.bf16.msrb.mxu0 %v6148_v55  ;;  %5632 = vmatpush.bf16.msrb.mxu1 %v6156_v43 }
 0x6dd   :  { %5407 = vmatpush.bf16.msrb.mxu2 %v6141_v40  ;;  %5468 = vmatpush.bf16.msrb.mxu3 %v6133_v48 }
 0x6de   :  { %5551 = vmatpush.bf16.msrb.mxu0 %v6147_v54  ;;  %5633 = vmatpush.bf16.msrb.mxu1 %v6155_v11 }
 0x6e1   :  { %5408 = vmatpush.bf16.msrb.mxu2 %v6140_v18  ;;  %5469 = vmatpush.bf16.msrb.mxu3 %v6132_v63 }
 0x6e2   :  { %5552 = vmatpush.bf16.msrb.mxu0 %v6146_v14  ;;  %5634 = vmatpush.bf16.msrb.mxu1 %v6154_v44 }
 0x6e5   :  { %5409 = vmatpush.bf16.msrb.mxu2 %v6139_v31  ;;  %5470 = vmatpush.bf16.msrb.mxu3 %v6131_v3 }
 0x6e6   :  { %5553 = vmatpush.bf16.msrb.mxu0 %v6145_v9  ;;  %5635 = vmatpush.bf16.msrb.mxu1 %v6153_v41 }
 0x6e9   :  { %5410 = vmatpush.bf16.msrb.mxu2 %v6138_v6  ;;  %5471 = vmatpush.bf16.msrb.mxu3 %v6130_v58 }
 0x6ed   :  { %5411 = vmatpush.bf16.msrb.mxu2 %v6137_v19  ;;  %5472 = vmatpush.bf16.msrb.mxu3 %v6129_v24 }
 0x70c   :  { %v5217_v46 = vpop.permute.xlu2 %5216 }
 0x721   :  { %v5223_v61 = vpop.permute.xlu2 %5222 }
 0x724   :  { %v5219_v29 = vpop.permute.xlu0 %5218 }
 0x725   :  { %v5232_v47 = vsel %vm652_vm3, %v5217_v46, %v5219_v29 }
 0x726   :  { %5945 = vmatmul.msk.f32.vlgmr.msra.gmra.mxu2 %vm1549_vm5, %v5232_v47  ;;  %5949 = vmatmul.msk.f32.vlgmr.msra.gmra.mxu3 %vm1549_vm5, %v5232_v47 }
 0x72c   :  { %v5225_v27 = vpop.permute.xlu0 %5224 }
 0x72e   :  { %v5229_v56 = vpop.permute.xlu2 %5228 }
 0x73a   :  { %v5221_v17 = vpop.permute.xlu1 %5220 }
 0x73b   :  { %v5233_v26 = vsel %vm652_vm3, %v5221_v17, %v5223_v61 }
 0x73c   :  { %5946 = vmatmul.msk.f32.gmra.mxu2 %vm1549_vm5, %v5233_v26  ;;  %5950 = vmatmul.msk.f32.gmra.mxu3 %vm1549_vm5, %v5233_v26 }
 0x742   :  { %v5227_v37 = vpop.permute.xlu1 %5226 }
 0x743   :  { %v5234_v51 = vsel %vm652_vm3, %v5225_v27, %v5227_v37 }
 0x744   :  { %5947 = vmatmul.msk.f32.gmra.mxu2 %vm1549_vm5, %v5234_v51  ;;  %5951 = vmatmul.msk.f32.gmra.mxu3 %vm1549_vm5, %v5234_v51  ;;  %v6188_v51 = vld [vmem:[%s13209_s24] ss:$0 sm:$0xff] }
 0x746   :  { %v5231_v5 = vpop.permute.xlu0 %5230 }
 0x747   :  { %v5235_v33 = vsel %vm652_vm3, %v5229_v56, %v5231_v5 }
 0x74c   :  { %5948 = vmatmul.msk.f32.gmra.mxu2 %vm1549_vm5, %v5235_v33  ;;  %5952 = vmatmul.msk.f32.gmra.mxu3 %vm1549_vm5, %v5235_v33 }
 0x7a9   :  { %v5261_v42 = vpop.f32.mrf.mxu2  ;;  %v5298_v16 = vpop.f32.mrf.mxu3 }
 0x7aa   :  { %v5310_v10 = vmax.f32 %v5261_v42, %v5298_v16 }
 0x7ac   :  { %5314 = vst [vmem:[#allocation6] sm:$0xff] %v5310_v10 }
 0x7bf   :  { %v5264_v20 = vpop.f32.mrf.mxu2  ;;  %v5301_v35 = vpop.f32.mrf.mxu3 }
 0x7c0   :  { %v5311_v28 = vmax.f32 %v5264_v20, %v5301_v35 }
 0x7c2   :  { %5315 = vst [vmem:[#allocation6 + $0x8] sm:$0xff] %v5311_v28 }
 0x7c7   :  { %v5267_v23 = vpop.f32.mrf.mxu2  ;;  %v5304_v21 = vpop.f32.mrf.mxu3 }
 0x7c8   :  { %v5312_v57 = vmax.f32 %v5267_v23, %v5304_v21 }
 0x7ca   :  { %5316 = vst [vmem:[#allocation6 + $0x10] sm:$0xff] %v5312_v57 }
 0x7cf   :  { %v5270_v4 = vpop.f32.mrf.mxu2  ;;  %v5307_v36 = vpop.f32.mrf.mxu3 }
 0x7d0   :  { %v5313_v32 = vmax.f32 %v5270_v4, %v5307_v36 }
 0x7d2   :  { %5317 = vst [vmem:[#allocation6 + $0x18] sm:$0xff] %v5313_v32 }
 0x7d9   :  { %v5337_v12 = vld [vmem:[#allocation6 + $0x1] ss:$4 sm:$0xff]  ;;  %v5318_v8 = vld [vmem:[#allocation6] ss:$4 sm:$0xff]  ;;  %v5479_v60 = vld [vmem:[#allocation6 + $0x2] ss:$4 sm:$0xff] }
 0x7da   :  { %v5338_v53 = vpack.c.bf16 %v5337_v12, %v5337_v12  ;;  %v5319_v25 = vpack.c.bf16 %v5318_v8, %v5318_v8  ;;  %v5480_v2 = vpack.c.bf16 %v5479_v60, %v5479_v60  ;;  %v5561_v38 = vld [vmem:[#allocation6 + $0x3] ss:$4 sm:$0xff] }
 0x7db   :  { %v5562_v52 = vpack.c.bf16 %v5561_v38, %v5561_v38 }
 0x7dc   :  { %5412 = vmatmul.bf16.vlgmr.msrb.gmra.mxu2 %v5338_v53  ;;  %5473 = vmatmul.bf16.vlgmr.msrb.gmra.mxu3 %v5319_v25 }
 0x7dd   :  { %5554 = vmatmul.bf16.vlgmr.msrb.gmra.mxu0 %v5480_v2  ;;  %5636 = vmatmul.bf16.vlgmr.msrb.gmra.mxu1 %v5562_v52 }
 0x85a   :  { %v5555_v46 = vpop.f32.mrf.mxu0  ;;  %v5637_v29 = vpop.f32.mrf.mxu1 }
 0x85f   :  { %v5413_v47 = vpop.f32.mrf.mxu2  ;;  %v5474_v61 = vpop.f32.mrf.mxu3 }
 0x860   :  { %v5475_v17 = vadd.f32 %v5474_v61, %v5413_v47 }
 0x862   :  { %v5559_v26 = vadd.f32 %v5555_v46, %v5475_v17  ;;  %v5557_v27 = vpop.f32.mrf.mxu0  ;;  %v5639_v37 = vpop.f32.mrf.mxu1 }
 0x864   :  { %v5641_v56 = vadd.f32 %v5637_v29, %v5559_v26 }
 0x866   :  { %v5646_v5 = vadd.f32 %v6188_v51, %v5641_v56 }
 0x867   :  { %v5415_v33 = vpop.f32.mrf.mxu2  ;;  %v5476_v1 = vpop.f32.mrf.mxu3 }
 0x868   :  { %5647 = vst [vmem:[#allocation25] sm:$0xff] %v5646_v5 }
 0x869   :  { %5658 = dma.vmem_to_hbm [thread:$0]  %s5654_s8, 128, %s5656_s1, [#allocation9]  }
 0x86a   :  { %6402 = dma.done.wait [#allocation9], 128  }
 0x86b   :  { %6403 = vsyncadd [#allocation9], 4294967168 }
 0x86c   :  { %5663 = vsyncpa [#allocation8], 1 }
 0x86d   :  { %5664 = vsyncpa [#allocation24], 1 }
 0x86e   :  { %5665 = vsyncpa [#allocation9], 1 }
 0x86f   :  { %5666 = vsyncpa [#allocation10], 1 }
 0x870   :  { %5667 = vsyncpa [#allocation14], 1 }
 0x871   :  { %5668 = vsyncpa [#allocation17], 1 }
 0x872   :  { %5669 = vsyncpa [#allocation11], 1 }
 0x873   :  { %5670 = vsyncpa [#allocation20], 1 }

</bundles_post_ra>
